<compile_context>
chip_gen: v6e
topology: v6e:2x2x1
jax: 0.10.0
libtpu: 0.0.40
codegen_flags: <defaults>
</compile_context>

<pallas_src>
import functools

import jax
import jax.numpy as jnp
from jax.experimental import pallas as pl
from jax.experimental.pallas import tpu as pltpu

BN_EPS = 1e-5
LEAKY_SLOPE = 0.01            # PyTorch nn.LeakyReLU() default
TILE_M = 256                  # row tile for the pipelined matmul grid
VMEM_LIMIT = 32 * 1024 * 1024  # explicit, portable across v5e/v6e/v7x


def _round_up(x, m):
    return (x + m - 1) // m * m


# ----------------------------------------------------------------------------
# Pallas kernel: y = leaky_relu?(x @ w + b)    (bf16 operands, f32 epilogue)
# ----------------------------------------------------------------------------
def _linear_kernel(x_ref, w_ref, b_ref, o_ref, *, leaky):
    y = jnp.dot(x_ref[...], w_ref[...], preferred_element_type=jnp.float32)
    y = y + b_ref[...]
    if leaky:
        y = jnp.where(y > 0, y, LEAKY_SLOPE * y)
    o_ref[...] = y.astype(o_ref.dtype)


def pallas_linear(xp, wp, bp, *, leaky, tile_m, out_dtype=jnp.float32):
    """xp:(Mp,Kp) bf16 @ wp:(Kp,N) bf16 + bp:(1,N) f32, M-tiled pipelined grid."""
    Mp, Kp = xp.shape
    Kw, N = wp.shape
    assert Kp == Kw and Mp % tile_m == 0
    grid = (Mp // tile_m,)
    kernel = functools.partial(_linear_kernel, leaky=bool(leaky))
    return pl.pallas_call(
        kernel,
        out_shape=jax.ShapeDtypeStruct((Mp, N), out_dtype),
        grid=grid,
        in_specs=[
            pl.BlockSpec((tile_m, Kp), lambda i: (i, 0)),   # streamed rows
            pl.BlockSpec((Kp, N), lambda i: (0, 0)),        # resident weight
            pl.BlockSpec((1, N), lambda i: (0, 0)),         # resident bias
        ],
        out_specs=pl.BlockSpec((tile_m, N), lambda i: (i, 0)),
        compiler_params=pltpu.CompilerParams(
            dimension_semantics=("parallel",),
            vmem_limit_bytes=VMEM_LIMIT),
    )(xp, wp, bp)


# ----------------------------------------------------------------------------
# Conv2d(3x3, stride=2, pad=1) + BN(eval, folded) + LeakyReLU via im2col
# ----------------------------------------------------------------------------
def _im2col_padded(x_nhwc, k_padded, tile_m, k=3, stride=2, pad=1):
    """Builds the (Mp, Kp) bf16 patch matrix directly in the kernel layout."""
    B, H, W, C = x_nhwc.shape
    xpad = jnp.pad(x_nhwc, ((0, 0), (pad, pad), (pad, pad), (0, 0)))
    Ho = (H + 2 * pad - k) // stride + 1
    Wo = (W + 2 * pad - k) // stride + 1
    patches = [
        xpad[:, i:i + stride * (Ho - 1) + 1:stride,
                j:j + stride * (Wo - 1) + 1:stride, :]
        for i in range(k) for j in range(k)
    ]
    # column layout: ((kh*3 + kw) * C_in + ci) — matches the stored weights
    cols = jnp.concatenate(patches, axis=-1)             # (B, Ho, Wo, 9*C)
    M, K = B * Ho * Wo, k * k * C
    cols = cols.reshape(M, K)
    Mp = _round_up(M, tile_m)
    cols = jnp.pad(cols, ((0, Mp - M), (0, k_padded - K)))
    return cols.astype(jnp.bfloat16), Ho, Wo, M


def _choose_tile_m(M):
    return min(TILE_M, _round_up(M, 16))


def conv_bn_lrelu(x_nhwc, wp, b):
    Kp, Cout = wp.shape
    B = x_nhwc.shape[0]
    tile_m = _choose_tile_m(B * ((x_nhwc.shape[1] + 1) // 2) ** 2)
    cols, Ho, Wo, M = _im2col_padded(x_nhwc, Kp, tile_m)
    out = pallas_linear(cols, wp, b, leaky=True, tile_m=tile_m,
                        out_dtype=jnp.bfloat16)
    return out[:M].reshape(B, Ho, Wo, Cout)


# ----------------------------------------------------------------------------
# Fused predictor rollout: one pallas_call for all T-1 steps x 3 MLP layers
# ----------------------------------------------------------------------------
def _rollout_kernel(state0_ref, act_ref, w0s_ref, w0a_ref, b0_ref,
                    w1_ref, b1_ref, w2_ref, b2_ref, out_ref, st_ref):
    @pl.when(pl.program_id(0) == 0)
    def _():
        st_ref[...] = state0_ref[...]

    xs = st_ref[...].astype(jnp.bfloat16)                 # (Bp, Dp)
    xa = act_ref[0].astype(jnp.bfloat16)                  # (Bp, 128)
    h = jnp.dot(xs, w0s_ref[...], preferred_element_type=jnp.float32)
    h = h + jnp.dot(xa, w0a_ref[...], preferred_element_type=jnp.float32)
    h = h + b0_ref[...]
    h = jnp.where(h > 0, h, LEAKY_SLOPE * h)
    h = jnp.dot(h.astype(jnp.bfloat16), w1_ref[...],
                preferred_element_type=jnp.float32) + b1_ref[...]
    h = jnp.where(h > 0, h, LEAKY_SLOPE * h)
    y = jnp.dot(h.astype(jnp.bfloat16), w2_ref[...],
                preferred_element_type=jnp.float32) + b2_ref[...]
    st_ref[...] = y                                       # carry to next t
    out_ref[0] = y


def predictor_rollout(params, state0_p, actions):
    """state0_p: (Bp, Dp) padded f32 latent; actions: (B, T_a, 2)."""
    B, T_a, A = actions.shape
    Bp, Dp = state0_p.shape
    acts = jnp.zeros((T_a, Bp, 128), jnp.float32)
    acts = acts.at[:, :B, :A].set(
        jnp.transpose(actions, (1, 0, 2)).astype(jnp.float32))

    full = lambda arr: pl.BlockSpec(arr.shape, lambda t: (0,) * arr.ndim)
    return pl.pallas_call(
        _rollout_kernel,
        out_shape=jax.ShapeDtypeStruct((T_a, Bp, Dp), jnp.float32),
        grid=(T_a,),
        in_specs=[
            pl.BlockSpec((Bp, Dp), lambda t: (0, 0)),          # state0
            pl.BlockSpec((1, Bp, 128), lambda t: (t, 0, 0)),   # action[t]
            full(params["pred0_ws"]), full(params["pred0_wa"]),
            full(params["pred0_b"]),
            full(params["pred1_w"]), full(params["pred1_b"]),
            full(params["pred2_w"]), full(params["pred2_b"]),
        ],
        out_specs=pl.BlockSpec((1, Bp, Dp), lambda t: (t, 0, 0)),
        scratch_shapes=[pltpu.VMEM((Bp, Dp), jnp.float32)],
        compiler_params=pltpu.CompilerParams(
            dimension_semantics=("arbitrary",),    # sequential carry over t
            vmem_limit_bytes=VMEM_LIMIT),
    )(state0_p, acts,
      params["pred0_ws"], params["pred0_wa"], params["pred0_b"],
      params["pred1_w"], params["pred1_b"],
      params["pred2_w"], params["pred2_b"])


# ----------------------------------------------------------------------------
# Parameters (xavier_uniform weights, zero biases), pre-padded / pre-folded
# ----------------------------------------------------------------------------
def _xavier_uniform(key, shape, fan_in, fan_out):
    bound = (6.0 / (fan_in + fan_out)) ** 0.5
    return jax.random.uniform(key, shape, jnp.float32, -bound, bound)


def init_params(key, latent_dim):
    keys = jax.random.split(key, 8)
    p = {}
    bn_scale = 1.0 / (1.0 + BN_EPS) ** 0.5   # eval-mode BN folded into weights
    conv_dims = [(2, 32), (32, 64), (64, 128), (128, 256)]
    for idx, (ci, co) in enumerate(conv_dims):
        k = 9 * ci
        kp = _round_up(k, 128)
        w = _xavier_uniform(keys[idx], (k, co), ci * 9, co * 9) * bn_scale
        p[f"conv{idx}_w"] = (jnp.zeros((kp, co), jnp.float32)
                             .at[:k].set(w).astype(jnp.bfloat16))
        p[f"conv{idx}_b"] = jnp.zeros((1, co), jnp.float32)  # 0 * bn_scale = 0

    dp = _round_up(latent_dim, 128)          # padded 128-lane latent layout
    fc_in = 256 * 5 * 5
    # fc rows are in NHWC flatten order (checkpoint load would need a permute)
    fcw = _xavier_uniform(keys[4], (fc_in, latent_dim), fc_in, latent_dim)
    p["fc_w"] = (jnp.zeros((fc_in, dp), jnp.float32)
                 .at[:, :latent_dim].set(fcw).astype(jnp.bfloat16))
    p["fc_b"] = jnp.zeros((1, dp), jnp.float32)

    w0 = _xavier_uniform(keys[5], (latent_dim + 2, 512), latent_dim + 2, 512)
    p["pred0_ws"] = (jnp.zeros((dp, 512), jnp.float32)
                     .at[:latent_dim].set(w0[:latent_dim]).astype(jnp.bfloat16))
    p["pred0_wa"] = (jnp.zeros((128, 512), jnp.float32)
                     .at[:2].set(w0[latent_dim:]).astype(jnp.bfloat16))
    p["pred0_b"] = jnp.zeros((1, 512), jnp.float32)
    p["pred1_w"] = _xavier_uniform(keys[6], (512, 512), 512, 512).astype(jnp.bfloat16)
    p["pred1_b"] = jnp.zeros((1, 512), jnp.float32)
    w2 = _xavier_uniform(keys[7], (512, latent_dim), 512, latent_dim)
    p["pred2_w"] = (jnp.zeros((512, dp), jnp.float32)
                    .at[:, :latent_dim].set(w2).astype(jnp.bfloat16))
    p["pred2_b"] = jnp.zeros((1, dp), jnp.float32)
    return p


# ----------------------------------------------------------------------------
# Model forward (matches JEPAModel.forward semantics, eval-mode BN/Dropout)
# ----------------------------------------------------------------------------
def encoder_forward(params, x_nchw):
    x = jnp.transpose(x_nchw, (0, 2, 3, 1)).astype(jnp.bfloat16)  # NHWC
    for idx in range(4):
        x = conv_bn_lrelu(x, params[f"conv{idx}_w"], params[f"conv{idx}_b"])
    # TODO(synk): Dropout(0.2) after conv block 3 and BatchNorm batch stats are
    # train-mode-only (stochastic / batch-dependent); eval-mode semantics used.
    B = x.shape[0]
    feat = x.reshape(B, -1)                  # NHWC flatten, matches fc_w rows
    Bp = _round_up(B, 16)
    featp = jnp.pad(feat, ((0, Bp - B), (0, 0)))
    return pallas_linear(featp, params["fc_w"], params["fc_b"],
                         leaky=False, tile_m=Bp)         # (Bp, Dp) f32, padded


def jepa_forward(params, states, actions, *, latent_dim):
    """states: (B, T, 2, H, W), actions: (B, T_a, 2) -> (B, T_a+1, latent)."""
    B = states.shape[0]
    s0 = encoder_forward(params, states[:, 0])           # padded latent
    preds = predictor_rollout(params, s0, actions)       # (T_a, Bp, Dp)
    all_p = jnp.concatenate([s0[None], preds], axis=0)   # (T_a+1, Bp, Dp)
    return jnp.transpose(all_p, (1, 0, 2))[:B, :, :latent_dim]


# ----------------------------------------------------------------------------
if __name__ == "__main__":
    key = jax.random.PRNGKey(0)
    latent_dim = 32                       # constructor arg (default 256)
    B, T, C, H, W = 2, 4, 2, 65, 65       # 65 -> 33 -> 17 -> 9 -> 5 matches fc(256*5*5)
    k_param, k_states, k_actions = jax.random.split(key, 3)

    params = init_params(k_param, latent_dim)
    states = jax.random.normal(k_states, (B, T, C, H, W), jnp.float32)
    actions = jax.random.normal(k_actions, (B, T - 1, 2), jnp.float32)

    fwd = jax.jit(functools.partial(jepa_forward, latent_dim=latent_dim))
    out = jax.block_until_ready(fwd(params, states, actions))
    assert out.shape == (B, T, latent_dim), out.shape
    assert bool(jnp.all(jnp.isfinite(out)))
    print("KERNEL_OK")
</pallas_src>

<mosaic_0001>
module attributes {stable_mosaic.version = 11 : i64} {
  func.func @_linear_kernel(%arg0: i32, %arg1: memref<256x128xbf16, #tpu.memory_space<vmem>>, %arg2: memref<128x32xbf16, #tpu.memory_space<vmem>>, %arg3: memref<1x32xf32, #tpu.memory_space<vmem>>, %arg4: memref<256x32xbf16, #tpu.memory_space<vmem>>) attributes {dimension_semantics = [#tpu.dimension_semantics<parallel>], iteration_bounds = array<i64: 9>, scalar_prefetch = 0 : i64, scratch_operands = 0 : i64, tpu.core_type = #tpu.core_type<tc>, window_params = [{transform_indices = @transform_0, window_bounds = array<i64: 256, 128>}, {pipeline_mode = #tpu.pipeline_mode<synchronous>, transform_indices = @transform_1, window_bounds = array<i64: 128, 32>}, {pipeline_mode = #tpu.pipeline_mode<synchronous>, transform_indices = @transform_2, window_bounds = array<i64: 1, 32>}, {transform_indices = @transform_3, window_bounds = array<i64: 256, 32>}]} {
    %c0 = arith.constant 0 : index
    %c0_0 = arith.constant 0 : index
    %0 = vector.load %arg1[%c0, %c0_0] : memref<256x128xbf16, #tpu.memory_space<vmem>>, vector<256x128xbf16>
    %c0_1 = arith.constant 0 : index
    %c0_2 = arith.constant 0 : index
    %1 = vector.load %arg2[%c0_1, %c0_2] : memref<128x32xbf16, #tpu.memory_space<vmem>>, vector<128x32xbf16>
    %cst = arith.constant dense<0.000000e+00> : vector<256x32xf32>
    %2 = tpu.matmul %0, %1, %cst {dimension_numbers = #tpu.dot_dimension_numbers<[1], [0], [0], [1], [0, 0, 1, 1], [], []>} : vector<256x128xbf16>, vector<128x32xbf16>, vector<256x32xf32> -> vector<256x32xf32>
    %c0_3 = arith.constant 0 : index
    %c0_4 = arith.constant 0 : index
    %3 = vector.load %arg3[%c0_3, %c0_4] : memref<1x32xf32, #tpu.memory_space<vmem>>, vector<1x32xf32>
    %4 = vector.broadcast %3 : vector<1x32xf32> to vector<256x32xf32>
    %5 = arith.addf %2, %4 : vector<256x32xf32>
    %cst_5 = arith.constant 0.000000e+00 : f32
    %6 = vector.broadcast %cst_5 : f32 to vector<256x32xf32>
    %7 = arith.cmpf ogt, %5, %6 : vector<256x32xf32>
    %cst_6 = arith.constant 0.00999999977 : f32
    %8 = vector.broadcast %cst_6 : f32 to vector<256x32xf32>
    %9 = arith.mulf %8, %5 : vector<256x32xf32>
    %10 = arith.select %7, %5, %9 : vector<256x32xi1>, vector<256x32xf32>
    %11 = arith.truncf %10 : vector<256x32xf32> to vector<256x32xbf16>
    %c0_7 = arith.constant 0 : index
    %c0_8 = arith.constant 0 : index
    %12 = vector.load %arg4[%c0_7, %c0_8] : memref<256x32xbf16, #tpu.memory_space<vmem>>, vector<256x32xbf16>
    tpu.vector_store %arg4[%c0_7, %c0_8], %11 {strides = array<i32>} : memref<256x32xbf16, #tpu.memory_space<vmem>>, vector<256x32xbf16>,
    return
  }
  func.func @transform_0(%arg0: i32) -> (i32, i32) {
    %c0_i32 = arith.constant 0 : i32
    %c0_i32_0 = arith.constant 0 : i32
    return %arg0, %c0_i32 : i32, i32
  }
  func.func @transform_1(%arg0: i32) -> (i32, i32) {
    %c0_i32 = arith.constant 0 : i32
    %c0_i32_0 = arith.constant 0 : i32
    %c0_i32_1 = arith.constant 0 : i32
    return %c0_i32, %c0_i32_0 : i32, i32
  }
  func.func @transform_2(%arg0: i32) -> (i32, i32) {
    %c0_i32 = arith.constant 0 : i32
    %c0_i32_0 = arith.constant 0 : i32
    %c0_i32_1 = arith.constant 0 : i32
    return %c0_i32, %c0_i32_0 : i32, i32
  }
  func.func @transform_3(%arg0: i32) -> (i32, i32) {
    %c0_i32 = arith.constant 0 : i32
    %c0_i32_0 = arith.constant 0 : i32
    return %arg0, %c0_i32 : i32, i32
  }
}

module attributes {stable_mosaic.version = 11 : i64} {
  func.func @_linear_kernel(%arg0: i32, %arg1: memref<256x384xbf16, #tpu.memory_space<vmem>>, %arg2: memref<384x64xbf16, #tpu.memory_space<vmem>>, %arg3: memref<1x64xf32, #tpu.memory_space<vmem>>, %arg4: memref<256x64xbf16, #tpu.memory_space<vmem>>) attributes {dimension_semantics = [#tpu.dimension_semantics<parallel>], iteration_bounds = array<i64: 3>, scalar_prefetch = 0 : i64, scratch_operands = 0 : i64, tpu.core_type = #tpu.core_type<tc>, window_params = [{transform_indices = @transform_0, window_bounds = array<i64: 256, 384>}, {pipeline_mode = #tpu.pipeline_mode<synchronous>, transform_indices = @transform_1, window_bounds = array<i64: 384, 64>}, {pipeline_mode = #tpu.pipeline_mode<synchronous>, transform_indices = @transform_2, window_bounds = array<i64: 1, 64>}, {transform_indices = @transform_3, window_bounds = array<i64: 256, 64>}]} {
    %c0 = arith.constant 0 : index
    %c0_0 = arith.constant 0 : index
    %0 = vector.load %arg1[%c0, %c0_0] : memref<256x384xbf16, #tpu.memory_space<vmem>>, vector<256x384xbf16>
    %c0_1 = arith.constant 0 : index
    %c0_2 = arith.constant 0 : index
    %1 = vector.load %arg2[%c0_1, %c0_2] : memref<384x64xbf16, #tpu.memory_space<vmem>>, vector<384x64xbf16>
    %cst = arith.constant dense<0.000000e+00> : vector<256x64xf32>
    %2 = tpu.matmul %0, %1, %cst {dimension_numbers = #tpu.dot_dimension_numbers<[1], [0], [0], [1], [0, 0, 1, 1], [], []>} : vector<256x384xbf16>, vector<384x64xbf16>, vector<256x64xf32> -> vector<256x64xf32>
    %c0_3 = arith.constant 0 : index
    %c0_4 = arith.constant 0 : index
    %3 = vector.load %arg3[%c0_3, %c0_4] : memref<1x64xf32, #tpu.memory_space<vmem>>, vector<1x64xf32>
    %4 = vector.broadcast %3 : vector<1x64xf32> to vector<256x64xf32>
    %5 = arith.addf %2, %4 : vector<256x64xf32>
    %cst_5 = arith.constant 0.000000e+00 : f32
    %6 = vector.broadcast %cst_5 : f32 to vector<256x64xf32>
    %7 = arith.cmpf ogt, %5, %6 : vector<256x64xf32>
    %cst_6 = arith.constant 0.00999999977 : f32
    %8 = vector.broadcast %cst_6 : f32 to vector<256x64xf32>
    %9 = arith.mulf %8, %5 : vector<256x64xf32>
    %10 = arith.select %7, %5, %9 : vector<256x64xi1>, vector<256x64xf32>
    %11 = arith.truncf %10 : vector<256x64xf32> to vector<256x64xbf16>
    %c0_7 = arith.constant 0 : index
    %c0_8 = arith.constant 0 : index
    %12 = vector.load %arg4[%c0_7, %c0_8] : memref<256x64xbf16, #tpu.memory_space<vmem>>, vector<256x64xbf16>
    tpu.vector_store %arg4[%c0_7, %c0_8], %11 {strides = array<i32>} : memref<256x64xbf16, #tpu.memory_space<vmem>>, vector<256x64xbf16>,
    return
  }
  func.func @transform_0(%arg0: i32) -> (i32, i32) {
    %c0_i32 = arith.constant 0 : i32
    %c0_i32_0 = arith.constant 0 : i32
    return %arg0, %c0_i32 : i32, i32
  }
  func.func @transform_1(%arg0: i32) -> (i32, i32) {
    %c0_i32 = arith.constant 0 : i32
    %c0_i32_0 = arith.constant 0 : i32
    %c0_i32_1 = arith.constant 0 : i32
    return %c0_i32, %c0_i32_0 : i32, i32
  }
  func.func @transform_2(%arg0: i32) -> (i32, i32) {
    %c0_i32 = arith.constant 0 : i32
    %c0_i32_0 = arith.constant 0 : i32
    %c0_i32_1 = arith.constant 0 : i32
    return %c0_i32, %c0_i32_0 : i32, i32
  }
  func.func @transform_3(%arg0: i32) -> (i32, i32) {
    %c0_i32 = arith.constant 0 : i32
    %c0_i32_0 = arith.constant 0 : i32
    return %arg0, %c0_i32 : i32, i32
  }
}

module attributes {stable_mosaic.version = 11 : i64} {
  func.func @_linear_kernel(%arg0: i32, %arg1: memref<176x640xbf16, #tpu.memory_space<vmem>>, %arg2: memref<640x128xbf16, #tpu.memory_space<vmem>>, %arg3: memref<1x128xf32, #tpu.memory_space<vmem>>, %arg4: memref<176x128xbf16, #tpu.memory_space<vmem>>) attributes {dimension_semantics = [#tpu.dimension_semantics<parallel>], iteration_bounds = array<i64: 1>, scalar_prefetch = 0 : i64, scratch_operands = 0 : i64, tpu.core_type = #tpu.core_type<tc>, window_params = [{transform_indices = @transform_0, window_bounds = array<i64: 176, 640>}, {pipeline_mode = #tpu.pipeline_mode<synchronous>, transform_indices = @transform_1, window_bounds = array<i64: 640, 128>}, {pipeline_mode = #tpu.pipeline_mode<synchronous>, transform_indices = @transform_2, window_bounds = array<i64: 1, 128>}, {transform_indices = @transform_3, window_bounds = array<i64: 176, 128>}]} {
    %c0 = arith.constant 0 : index
    %c0_0 = arith.constant 0 : index
    %0 = vector.load %arg1[%c0, %c0_0] : memref<176x640xbf16, #tpu.memory_space<vmem>>, vector<176x640xbf16>
    %c0_1 = arith.constant 0 : index
    %c0_2 = arith.constant 0 : index
    %1 = vector.load %arg2[%c0_1, %c0_2] : memref<640x128xbf16, #tpu.memory_space<vmem>>, vector<640x128xbf16>
    %cst = arith.constant dense<0.000000e+00> : vector<176x128xf32>
    %2 = tpu.matmul %0, %1, %cst {dimension_numbers = #tpu.dot_dimension_numbers<[1], [0], [0], [1], [0, 0, 1, 1], [], []>} : vector<176x640xbf16>, vector<640x128xbf16>, vector<176x128xf32> -> vector<176x128xf32>
    %c0_3 = arith.constant 0 : index
    %c0_4 = arith.constant 0 : index
    %3 = vector.load %arg3[%c0_3, %c0_4] : memref<1x128xf32, #tpu.memory_space<vmem>>, vector<1x128xf32>
    %4 = vector.broadcast %3 : vector<1x128xf32> to vector<176x128xf32>
    %5 = arith.addf %2, %4 : vector<176x128xf32>
    %cst_5 = arith.constant 0.000000e+00 : f32
    %6 = vector.broadcast %cst_5 : f32 to vector<176x128xf32>
    %7 = arith.cmpf ogt, %5, %6 : vector<176x128xf32>
    %cst_6 = arith.constant 0.00999999977 : f32
    %8 = vector.broadcast %cst_6 : f32 to vector<176x128xf32>
    %9 = arith.mulf %8, %5 : vector<176x128xf32>
    %10 = arith.select %7, %5, %9 : vector<176x128xi1>, vector<176x128xf32>
    %11 = arith.truncf %10 : vector<176x128xf32> to vector<176x128xbf16>
    %c0_7 = arith.constant 0 : index
    %c0_8 = arith.constant 0 : index
    %12 = vector.load %arg4[%c0_7, %c0_8] : memref<176x128xbf16, #tpu.memory_space<vmem>>, vector<176x128xbf16>
    tpu.vector_store %arg4[%c0_7, %c0_8], %11 {strides = array<i32>} : memref<176x128xbf16, #tpu.memory_space<vmem>>, vector<176x128xbf16>,
    return
  }
  func.func @transform_0(%arg0: i32) -> (i32, i32) {
    %c0_i32 = arith.constant 0 : i32
    %c0_i32_0 = arith.constant 0 : i32
    return %arg0, %c0_i32 : i32, i32
  }
  func.func @transform_1(%arg0: i32) -> (i32, i32) {
    %c0_i32 = arith.constant 0 : i32
    %c0_i32_0 = arith.constant 0 : i32
    %c0_i32_1 = arith.constant 0 : i32
    return %c0_i32, %c0_i32_0 : i32, i32
  }
  func.func @transform_2(%arg0: i32) -> (i32, i32) {
    %c0_i32 = arith.constant 0 : i32
    %c0_i32_0 = arith.constant 0 : i32
    %c0_i32_1 = arith.constant 0 : i32
    return %c0_i32, %c0_i32_0 : i32, i32
  }
  func.func @transform_3(%arg0: i32) -> (i32, i32) {
    %c0_i32 = arith.constant 0 : i32
    %c0_i32_0 = arith.constant 0 : i32
    return %arg0, %c0_i32 : i32, i32
  }
}

module attributes {stable_mosaic.version = 11 : i64} {
  func.func @_linear_kernel(%arg0: i32, %arg1: memref<64x1152xbf16, #tpu.memory_space<vmem>>, %arg2: memref<1152x256xbf16, #tpu.memory_space<vmem>>, %arg3: memref<1x256xf32, #tpu.memory_space<vmem>>, %arg4: memref<64x256xbf16, #tpu.memory_space<vmem>>) attributes {dimension_semantics = [#tpu.dimension_semantics<parallel>], iteration_bounds = array<i64: 1>, scalar_prefetch = 0 : i64, scratch_operands = 0 : i64, tpu.core_type = #tpu.core_type<tc>, window_params = [{transform_indices = @transform_0, window_bounds = array<i64: 64, 1152>}, {pipeline_mode = #tpu.pipeline_mode<synchronous>, transform_indices = @transform_1, window_bounds = array<i64: 1152, 256>}, {pipeline_mode = #tpu.pipeline_mode<synchronous>, transform_indices = @transform_2, window_bounds = array<i64: 1, 256>}, {transform_indices = @transform_3, window_bounds = array<i64: 64, 256>}]} {
    %c0 = arith.constant 0 : index
    %c0_0 = arith.constant 0 : index
    %0 = vector.load %arg1[%c0, %c0_0] : memref<64x1152xbf16, #tpu.memory_space<vmem>>, vector<64x1152xbf16>
    %c0_1 = arith.constant 0 : index
    %c0_2 = arith.constant 0 : index
    %1 = vector.load %arg2[%c0_1, %c0_2] : memref<1152x256xbf16, #tpu.memory_space<vmem>>, vector<1152x256xbf16>
    %cst = arith.constant dense<0.000000e+00> : vector<64x256xf32>
    %2 = tpu.matmul %0, %1, %cst {dimension_numbers = #tpu.dot_dimension_numbers<[1], [0], [0], [1], [0, 0, 1, 1], [], []>} : vector<64x1152xbf16>, vector<1152x256xbf16>, vector<64x256xf32> -> vector<64x256xf32>
    %c0_3 = arith.constant 0 : index
    %c0_4 = arith.constant 0 : index
    %3 = vector.load %arg3[%c0_3, %c0_4] : memref<1x256xf32, #tpu.memory_space<vmem>>, vector<1x256xf32>
    %4 = vector.broadcast %3 : vector<1x256xf32> to vector<64x256xf32>
    %5 = arith.addf %2, %4 : vector<64x256xf32>
    %cst_5 = arith.constant 0.000000e+00 : f32
    %6 = vector.broadcast %cst_5 : f32 to vector<64x256xf32>
    %7 = arith.cmpf ogt, %5, %6 : vector<64x256xf32>
    %cst_6 = arith.constant 0.00999999977 : f32
    %8 = vector.broadcast %cst_6 : f32 to vector<64x256xf32>
    %9 = arith.mulf %8, %5 : vector<64x256xf32>
    %10 = arith.select %7, %5, %9 : vector<64x256xi1>, vector<64x256xf32>
    %11 = arith.truncf %10 : vector<64x256xf32> to vector<64x256xbf16>
    %c0_7 = arith.constant 0 : index
    %c0_8 = arith.constant 0 : index
    %12 = vector.load %arg4[%c0_7, %c0_8] : memref<64x256xbf16, #tpu.memory_space<vmem>>, vector<64x256xbf16>
    tpu.vector_store %arg4[%c0_7, %c0_8], %11 {strides = array<i32>} : memref<64x256xbf16, #tpu.memory_space<vmem>>, vector<64x256xbf16>,
    return
  }
  func.func @transform_0(%arg0: i32) -> (i32, i32) {
    %c0_i32 = arith.constant 0 : i32
    %c0_i32_0 = arith.constant 0 : i32
    return %arg0, %c0_i32 : i32, i32
  }
  func.func @transform_1(%arg0: i32) -> (i32, i32) {
    %c0_i32 = arith.constant 0 : i32
    %c0_i32_0 = arith.constant 0 : i32
    %c0_i32_1 = arith.constant 0 : i32
    return %c0_i32, %c0_i32_0 : i32, i32
  }
  func.func @transform_2(%arg0: i32) -> (i32, i32) {
    %c0_i32 = arith.constant 0 : i32
    %c0_i32_0 = arith.constant 0 : i32
    %c0_i32_1 = arith.constant 0 : i32
    return %c0_i32, %c0_i32_0 : i32, i32
  }
  func.func @transform_3(%arg0: i32) -> (i32, i32) {
    %c0_i32 = arith.constant 0 : i32
    %c0_i32_0 = arith.constant 0 : i32
    return %arg0, %c0_i32 : i32, i32
  }
}

module attributes {stable_mosaic.version = 11 : i64} {
  func.func @_linear_kernel(%arg0: i32, %arg1: memref<16x6400xbf16, #tpu.memory_space<vmem>>, %arg2: memref<6400x128xbf16, #tpu.memory_space<vmem>>, %arg3: memref<1x128xf32, #tpu.memory_space<vmem>>, %arg4: memref<16x128xf32, #tpu.memory_space<vmem>>) attributes {dimension_semantics = [#tpu.dimension_semantics<parallel>], iteration_bounds = array<i64: 1>, scalar_prefetch = 0 : i64, scratch_operands = 0 : i64, tpu.core_type = #tpu.core_type<tc>, window_params = [{transform_indices = @transform_0, window_bounds = array<i64: 16, 6400>}, {pipeline_mode = #tpu.pipeline_mode<synchronous>, transform_indices = @transform_1, window_bounds = array<i64: 6400, 128>}, {pipeline_mode = #tpu.pipeline_mode<synchronous>, transform_indices = @transform_2, window_bounds = array<i64: 1, 128>}, {transform_indices = @transform_3, window_bounds = array<i64: 16, 128>}]} {
    %c0 = arith.constant 0 : index
    %c0_0 = arith.constant 0 : index
    %0 = vector.load %arg1[%c0, %c0_0] : memref<16x6400xbf16, #tpu.memory_space<vmem>>, vector<16x6400xbf16>
    %c0_1 = arith.constant 0 : index
    %c0_2 = arith.constant 0 : index
    %1 = vector.load %arg2[%c0_1, %c0_2] : memref<6400x128xbf16, #tpu.memory_space<vmem>>, vector<6400x128xbf16>
    %cst = arith.constant dense<0.000000e+00> : vector<16x128xf32>
    %2 = tpu.matmul %0, %1, %cst {dimension_numbers = #tpu.dot_dimension_numbers<[1], [0], [0], [1], [0, 0, 1, 1], [], []>} : vector<16x6400xbf16>, vector<6400x128xbf16>, vector<16x128xf32> -> vector<16x128xf32>
    %c0_3 = arith.constant 0 : index
    %c0_4 = arith.constant 0 : index
    %3 = vector.load %arg3[%c0_3, %c0_4] : memref<1x128xf32, #tpu.memory_space<vmem>>, vector<1x128xf32>
    %4 = vector.broadcast %3 : vector<1x128xf32> to vector<16x128xf32>
    %5 = arith.addf %2, %4 : vector<16x128xf32>
    %c0_5 = arith.constant 0 : index
    %c0_6 = arith.constant 0 : index
    %6 = vector.load %arg4[%c0_5, %c0_6] : memref<16x128xf32, #tpu.memory_space<vmem>>, vector<16x128xf32>
    tpu.vector_store %arg4[%c0_5, %c0_6], %5 {strides = array<i32>} : memref<16x128xf32, #tpu.memory_space<vmem>>, vector<16x128xf32>,
    return
  }
  func.func @transform_0(%arg0: i32) -> (i32, i32) {
    %c0_i32 = arith.constant 0 : i32
    %c0_i32_0 = arith.constant 0 : i32
    return %arg0, %c0_i32 : i32, i32
  }
  func.func @transform_1(%arg0: i32) -> (i32, i32) {
    %c0_i32 = arith.constant 0 : i32
    %c0_i32_0 = arith.constant 0 : i32
    %c0_i32_1 = arith.constant 0 : i32
    return %c0_i32, %c0_i32_0 : i32, i32
  }
  func.func @transform_2(%arg0: i32) -> (i32, i32) {
    %c0_i32 = arith.constant 0 : i32
    %c0_i32_0 = arith.constant 0 : i32
    %c0_i32_1 = arith.constant 0 : i32
    return %c0_i32, %c0_i32_0 : i32, i32
  }
  func.func @transform_3(%arg0: i32) -> (i32, i32) {
    %c0_i32 = arith.constant 0 : i32
    %c0_i32_0 = arith.constant 0 : i32
    return %arg0, %c0_i32 : i32, i32
  }
}

module attributes {stable_mosaic.version = 11 : i64} {
  func.func @_rollout_kernel(%arg0: i32, %arg1: memref<16x128xf32, #tpu.memory_space<vmem>>, %arg2: memref<1x16x128xf32, #tpu.memory_space<vmem>>, %arg3: memref<128x512xbf16, #tpu.memory_space<vmem>>, %arg4: memref<128x512xbf16, #tpu.memory_space<vmem>>, %arg5: memref<1x512xf32, #tpu.memory_space<vmem>>, %arg6: memref<512x512xbf16, #tpu.memory_space<vmem>>, %arg7: memref<1x512xf32, #tpu.memory_space<vmem>>, %arg8: memref<512x128xbf16, #tpu.memory_space<vmem>>, %arg9: memref<1x128xf32, #tpu.memory_space<vmem>>, %arg10: memref<1x16x128xf32, #tpu.memory_space<vmem>>, %arg11: memref<16x128xf32, #tpu.memory_space<vmem>>) attributes {dimension_semantics = [#tpu.dimension_semantics<arbitrary>], iteration_bounds = array<i64: 3>, scalar_prefetch = 0 : i64, scratch_operands = 1 : i64, tpu.core_type = #tpu.core_type<tc>, window_params = [{pipeline_mode = #tpu.pipeline_mode<synchronous>, transform_indices = @transform_0, window_bounds = array<i64: 16, 128>}, {transform_indices = @transform_1, window_bounds = array<i64: 1, 16, 128>}, {pipeline_mode = #tpu.pipeline_mode<synchronous>, transform_indices = @transform_2, window_bounds = array<i64: 128, 512>}, {pipeline_mode = #tpu.pipeline_mode<synchronous>, transform_indices = @transform_3, window_bounds = array<i64: 128, 512>}, {pipeline_mode = #tpu.pipeline_mode<synchronous>, transform_indices = @transform_4, window_bounds = array<i64: 1, 512>}, {pipeline_mode = #tpu.pipeline_mode<synchronous>, transform_indices = @transform_5, window_bounds = array<i64: 512, 512>}, {pipeline_mode = #tpu.pipeline_mode<synchronous>, transform_indices = @transform_6, window_bounds = array<i64: 1, 512>}, {pipeline_mode = #tpu.pipeline_mode<synchronous>, transform_indices = @transform_7, window_bounds = array<i64: 512, 128>}, {pipeline_mode = #tpu.pipeline_mode<synchronous>, transform_indices = @transform_8, window_bounds = array<i64: 1, 128>}, {transform_indices = @transform_9, window_bounds = array<i64: 1, 16, 128>}]} {
    %c0_i32 = arith.constant 0 : i32
    %0 = arith.cmpi eq, %arg0, %c0_i32 : i32
    %1 = arith.extui %0 : i1 to i32
    %c0_i32_0 = arith.constant 0 : i32
    %2 = arith.cmpi ne, %1, %c0_i32_0 : i32
    scf.if %2 {
      %c0_31 = arith.constant 0 : index
      %c0_32 = arith.constant 0 : index
      %42 = vector.load %arg1[%c0_31, %c0_32] : memref<16x128xf32, #tpu.memory_space<vmem>>, vector<16x128xf32>
      %c0_33 = arith.constant 0 : index
      %c0_34 = arith.constant 0 : index
      %43 = vector.load %arg11[%c0_33, %c0_34] : memref<16x128xf32, #tpu.memory_space<vmem>>, vector<16x128xf32>
      tpu.vector_store %arg11[%c0_33, %c0_34], %42 {strides = array<i32>} : memref<16x128xf32, #tpu.memory_space<vmem>>, vector<16x128xf32>,
    } else {
    }
    %c0 = arith.constant 0 : index
    %c0_1 = arith.constant 0 : index
    %3 = vector.load %arg11[%c0, %c0_1] : memref<16x128xf32, #tpu.memory_space<vmem>>, vector<16x128xf32>
    %4 = arith.truncf %3 : vector<16x128xf32> to vector<16x128xbf16>
    %c0_2 = arith.constant 0 : index
    %c0_3 = arith.constant 0 : index
    %c0_4 = arith.constant 0 : index
    %5 = vector.load %arg2[%c0_2, %c0_3, %c0_4] : memref<1x16x128xf32, #tpu.memory_space<vmem>>, vector<1x16x128xf32>
    %6 = vector.shape_cast %5 : vector<1x16x128xf32> to vector<16x128xf32>
    %7 = arith.truncf %6 : vector<16x128xf32> to vector<16x128xbf16>
    %c0_5 = arith.constant 0 : index
    %c0_6 = arith.constant 0 : index
    %8 = vector.load %arg3[%c0_5, %c0_6] : memref<128x512xbf16, #tpu.memory_space<vmem>>, vector<128x512xbf16>
    %cst = arith.constant dense<0.000000e+00> : vector<16x512xf32>
    %9 = tpu.matmul %4, %8, %cst {dimension_numbers = #tpu.dot_dimension_numbers<[1], [0], [0], [1], [0, 0, 1, 1], [], []>} : vector<16x128xbf16>, vector<128x512xbf16>, vector<16x512xf32> -> vector<16x512xf32>
    %c0_7 = arith.constant 0 : index
    %c0_8 = arith.constant 0 : index
    %10 = vector.load %arg4[%c0_7, %c0_8] : memref<128x512xbf16, #tpu.memory_space<vmem>>, vector<128x512xbf16>
    %cst_9 = arith.constant dense<0.000000e+00> : vector<16x512xf32>
    %11 = tpu.matmul %7, %10, %cst_9 {dimension_numbers = #tpu.dot_dimension_numbers<[1], [0], [0], [1], [0, 0, 1, 1], [], []>} : vector<16x128xbf16>, vector<128x512xbf16>, vector<16x512xf32> -> vector<16x512xf32>
    %12 = arith.addf %9, %11 : vector<16x512xf32>
    %c0_10 = arith.constant 0 : index
    %c0_11 = arith.constant 0 : index
    %13 = vector.load %arg5[%c0_10, %c0_11] : memref<1x512xf32, #tpu.memory_space<vmem>>, vector<1x512xf32>
    %14 = vector.broadcast %13 : vector<1x512xf32> to vector<16x512xf32>
    %15 = arith.addf %12, %14 : vector<16x512xf32>
    %cst_12 = arith.constant 0.000000e+00 : f32
    %16 = vector.broadcast %cst_12 : f32 to vector<16x512xf32>
    %17 = arith.cmpf ogt, %15, %16 : vector<16x512xf32>
    %cst_13 = arith.constant 0.00999999977 : f32
    %18 = vector.broadcast %cst_13 : f32 to vector<16x512xf32>
    %19 = arith.mulf %18, %15 : vector<16x512xf32>
    %20 = arith.select %17, %15, %19 : vector<16x512xi1>, vector<16x512xf32>
    %21 = arith.truncf %20 : vector<16x512xf32> to vector<16x512xbf16>
    %c0_14 = arith.constant 0 : index
    %c0_15 = arith.constant 0 : index
    %22 = vector.load %arg6[%c0_14, %c0_15] : memref<512x512xbf16, #tpu.memory_space<vmem>>, vector<512x512xbf16>
    %cst_16 = arith.constant dense<0.000000e+00> : vector<16x512xf32>
    %23 = tpu.matmul %21, %22, %cst_16 {dimension_numbers = #tpu.dot_dimension_numbers<[1], [0], [0], [1], [0, 0, 1, 1], [], []>} : vector<16x512xbf16>, vector<512x512xbf16>, vector<16x512xf32> -> vector<16x512xf32>
    %c0_17 = arith.constant 0 : index
    %c0_18 = arith.constant 0 : index
    %24 = vector.load %arg7[%c0_17, %c0_18] : memref<1x512xf32, #tpu.memory_space<vmem>>, vector<1x512xf32>
    %25 = vector.broadcast %24 : vector<1x512xf32> to vector<16x512xf32>
    %26 = arith.addf %23, %25 : vector<16x512xf32>
    %cst_19 = arith.constant 0.000000e+00 : f32
    %27 = vector.broadcast %cst_19 : f32 to vector<16x512xf32>
    %28 = arith.cmpf ogt, %26, %27 : vector<16x512xf32>
    %cst_20 = arith.constant 0.00999999977 : f32
    %29 = vector.broadcast %cst_20 : f32 to vector<16x512xf32>
    %30 = arith.mulf %29, %26 : vector<16x512xf32>
    %31 = arith.select %28, %26, %30 : vector<16x512xi1>, vector<16x512xf32>
    %32 = arith.truncf %31 : vector<16x512xf32> to vector<16x512xbf16>
    %c0_21 = arith.constant 0 : index
    %c0_22 = arith.constant 0 : index
    %33 = vector.load %arg8[%c0_21, %c0_22] : memref<512x128xbf16, #tpu.memory_space<vmem>>, vector<512x128xbf16>
    %cst_23 = arith.constant dense<0.000000e+00> : vector<16x128xf32>
    %34 = tpu.matmul %32, %33, %cst_23 {dimension_numbers = #tpu.dot_dimension_numbers<[1], [0], [0], [1], [0, 0, 1, 1], [], []>} : vector<16x512xbf16>, vector<512x128xbf16>, vector<16x128xf32> -> vector<16x128xf32>
    %c0_24 = arith.constant 0 : index
    %c0_25 = arith.constant 0 : index
    %35 = vector.load %arg9[%c0_24, %c0_25] : memref<1x128xf32, #tpu.memory_space<vmem>>, vector<1x128xf32>
    %36 = vector.broadcast %35 : vector<1x128xf32> to vector<16x128xf32>
    %37 = arith.addf %34, %36 : vector<16x128xf32>
    %c0_26 = arith.constant 0 : index
    %c0_27 = arith.constant 0 : index
    %38 = vector.load %arg11[%c0_26, %c0_27] : memref<16x128xf32, #tpu.memory_space<vmem>>, vector<16x128xf32>
    tpu.vector_store %arg11[%c0_26, %c0_27], %37 {strides = array<i32>} : memref<16x128xf32, #tpu.memory_space<vmem>>, vector<16x128xf32>,
    %c0_28 = arith.constant 0 : index
    %c0_29 = arith.constant 0 : index
    %c0_30 = arith.constant 0 : index
    %39 = vector.load %arg10[%c0_28, %c0_29, %c0_30] : memref<1x16x128xf32, #tpu.memory_space<vmem>>, vector<1x16x128xf32>
    %40 = vector.shape_cast %39 : vector<1x16x128xf32> to vector<16x128xf32>
    %41 = vector.shape_cast %37 : vector<16x128xf32> to vector<1x16x128xf32>
    tpu.vector_store %arg10[%c0_28, %c0_29, %c0_30], %41 {strides = array<i32>} : memref<1x16x128xf32, #tpu.memory_space<vmem>>, vector<1x16x128xf32>,
    return
  }
  func.func @transform_0(%arg0: i32) -> (i32, i32) {
    %c0_i32 = arith.constant 0 : i32
    %c0_i32_0 = arith.constant 0 : i32
    %c0_i32_1 = arith.constant 0 : i32
    return %c0_i32, %c0_i32_0 : i32, i32
  }
  func.func @transform_1(%arg0: i32) -> (i32, i32, i32) {
    %c0_i32 = arith.constant 0 : i32
    %c0_i32_0 = arith.constant 0 : i32
    %c0_i32_1 = arith.constant 0 : i32
    return %arg0, %c0_i32, %c0_i32_0 : i32, i32, i32
  }
  func.func @transform_2(%arg0: i32) -> (i32, i32) {
    %c0_i32 = arith.constant 0 : i32
    %c0_i32_0 = arith.constant 0 : i32
    %c0_i32_1 = arith.constant 0 : i32
    return %c0_i32, %c0_i32_0 : i32, i32
  }
  func.func @transform_3(%arg0: i32) -> (i32, i32) {
    %c0_i32 = arith.constant 0 : i32
    %c0_i32_0 = arith.constant 0 : i32
    %c0_i32_1 = arith.constant 0 : i32
    return %c0_i32, %c0_i32_0 : i32, i32
  }
  func.func @transform_4(%arg0: i32) -> (i32, i32) {
    %c0_i32 = arith.constant 0 : i32
    %c0_i32_0 = arith.constant 0 : i32
    %c0_i32_1 = arith.constant 0 : i32
    return %c0_i32, %c0_i32_0 : i32, i32
  }
  func.func @transform_5(%arg0: i32) -> (i32, i32) {
    %c0_i32 = arith.constant 0 : i32
    %c0_i32_0 = arith.constant 0 : i32
    %c0_i32_1 = arith.constant 0 : i32
    return %c0_i32, %c0_i32_0 : i32, i32
  }
  func.func @transform_6(%arg0: i32) -> (i32, i32) {
    %c0_i32 = arith.constant 0 : i32
    %c0_i32_0 = arith.constant 0 : i32
    %c0_i32_1 = arith.constant 0 : i32
    return %c0_i32, %c0_i32_0 : i32, i32
  }
  func.func @transform_7(%arg0: i32) -> (i32, i32) {
    %c0_i32 = arith.constant 0 : i32
    %c0_i32_0 = arith.constant 0 : i32
    %c0_i32_1 = arith.constant 0 : i32
    return %c0_i32, %c0_i32_0 : i32, i32
  }
  func.func @transform_8(%arg0: i32) -> (i32, i32) {
    %c0_i32 = arith.constant 0 : i32
    %c0_i32_0 = arith.constant 0 : i32
    %c0_i32_1 = arith.constant 0 : i32
    return %c0_i32, %c0_i32_0 : i32, i32
  }
  func.func @transform_9(%arg0: i32) -> (i32, i32, i32) {
    %c0_i32 = arith.constant 0 : i32
    %c0_i32_0 = arith.constant 0 : i32
    %c0_i32_1 = arith.constant 0 : i32
    return %arg0, %c0_i32, %c0_i32_0 : i32, i32, i32
  }
}

</mosaic_0001>

<bundles_post_ra>
// kernel: jepa_forward.6
= control target key start
LH: loop header
LB: loop body
LE: loop exit
PB: predicated region body
PF: predicated region fallthrough
CT: control target
= control target key end

     0   :  { %s1096_s12 = smov 0   ;;  %s1267_s0 = inlined_call_operand.vmem [shape: bf16[2304,128], index: 0, kind: input, shape index: {}]   ;;  %s1268_s1 = inlined_call_operand.vmem [shape: bf16[128,32], index: 1, kind: input, shape index: {}]   ;;  %s1269_s2 = inlined_call_operand.vmem [shape: f32[1,32], index: 2, kind: input, shape index: {}]   ;;  %s1270_s3 = inlined_call_operand.vmem [shape: bf16[2304,32], index: 3, kind: output, shape index: {}]  }
   0x1 LB: > { %s848_s13 = sadd.s32 4294967295, %s1074_s12   ;;  %p852_p0 = scmp.ge.s32.totalorder %s1074_s12, 1  ;;  %s1074_s12 = sphi %s1096_s12, %s13_s12  }
   0x2   : > { %p138_p1 = scmp.lt.s32.totalorder %s1074_s12, 10 }
   0x4   : > { %p139_p2 = pnand %p852_p0, %p138_p1 }
   0x5   : > { %s853_s16 = sshll.u32 (!%p139_p2), %s848_s13, 5 }
   0x6   : > { %142 = sbr.rel (%p139_p2) target bundleno = 284 (0x11c), region = 32  ;;  %p163_p3 = scmp.lt.s32.totalorder (!%p139_p2), %s853_s16, 287 }
   0xb   : > { %v1044_v0 = vld [vmem:[%s1268_s1 + $0x38] sm:$0xff]   ;;  %v1045_v1 = vld [vmem:[%s1268_s1 + $0x30] sm:$0xff]   ;;  %s1272_s16 = smov (!%p163_p3, %s853_s16), 287  ;;  %v1046_v2 = vld [vmem:[%s1268_s1 + $0x28] sm:$0xff]   ;;  %vm759_vm2 = vcmask 257024  }
   0xc   : > { %972 = vmatprep.subr.bf16.mxu0 %v1044_v0  ;;  %1020 = vmatprep.subr.bf16.mxu1 %v1044_v0  ;;  %s854_s21 = sshll.u32 %s1272_s16, 2  ;;  %v1047_v3 = vld [vmem:[%s1268_s1 + $0x20] sm:$0xff]   ;;  %v1048_v6 = vld [vmem:[%s1268_s1 + $0x18] sm:$0xff]   ;;  %v1049_v7 = vld [vmem:[%s1268_s1 + $0x10] sm:$0xff]  }
   0xd   : > { %973 = vmatpush3.bf16.msra.mxu0 %v1044_v0  ;;  %1028 = vmatpush3.bf16.msra.mxu1 %v1044_v0  ;;  %s1121_s24 = scalar_lea.vmem %s1267_s0, %s854_s21  ;;  %v1050_v8 = vld [vmem:[%s1268_s1 + $0x8] sm:$0xff]   ;;  %v1051_v9 = vld [vmem:[%s1268_s1] sm:$0xff]   ;;  %s1168_s13 = scalar_lea.vmem %s1270_s3, %s854_s21 }
   0xe   : > { %974 = vmatprep.subr.bf16.mxu0 %v1045_v1  ;;  %1021 = vmatprep.subr.bf16.mxu1 %v1045_v1  ;;  %v1052_v4 = vld [vmem:[%s1121_s24] sm:$0xff]   ;;  %v1054_v10 = vld [vmem:[%s1121_s24 + $0x8] sm:$0xff]   ;;  %v1056_v12 = vld [vmem:[%s1121_s24 + $0x10] sm:$0xff]  }
   0xf   : > { %v1053_v5 = vld [vmem:[%s1121_s24 + $0x40] sm:$0xff]   ;;  %988 = vmatprep.mubr.bf16.mxu0 %v1052_v4  ;;  %v1055_v11 = vld [vmem:[%s1121_s24 + $0x48] sm:$0xff]   ;;  %v1057_v13 = vld [vmem:[%s1121_s24 + $0x50] sm:$0xff]  }
  0x10   : > { %1004 = vmatprep.mubr.bf16.mxu1 %v1053_v5  ;;  %v1058_v14 = vld [vmem:[%s1121_s24 + $0x18] sm:$0xff]   ;;  %v1060_v16 = vld [vmem:[%s1121_s24 + $0x20] sm:$0xff]   ;;  %v1062_v18 = vld [vmem:[%s1121_s24 + $0x28] sm:$0xff]  }
  0x11   : > { %975 = vmatpush3.bf16.msra.mxu0 %v1045_v1  ;;  %1029 = vmatpush3.bf16.msra.mxu1 %v1045_v1  ;;  %v1059_v15 = vld [vmem:[%s1121_s24 + $0x58] sm:$0xff]   ;;  %v1061_v17 = vld [vmem:[%s1121_s24 + $0x60] sm:$0xff]   ;;  %v1063_v19 = vld [vmem:[%s1121_s24 + $0x68] sm:$0xff]  }
  0x12   : > { %976 = vmatprep.subr.bf16.mxu0 %v1046_v2  ;;  %1022 = vmatprep.subr.bf16.mxu1 %v1046_v2  ;;  %v1064_v20 = vld [vmem:[%s1121_s24 + $0x30] sm:$0xff]   ;;  %v1066_v22 = vld [vmem:[%s1121_s24 + $0x38] sm:$0xff]   ;;  %v1157_v24 = vld [vmem:[%s1269_s2] ss:$0 sm:$0xff] }
  0x13   : > { %v1065_v21 = vld [vmem:[%s1121_s24 + $0x70] sm:$0xff]   ;;  %v1067_v23 = vld [vmem:[%s1121_s24 + $0x78] sm:$0xff]  }
  0x15   : > { %977 = vmatpush3.bf16.msra.mxu0 %v1046_v2  ;;  %1030 = vmatpush3.bf16.msra.mxu1 %v1046_v2 }
  0x16   : > { %978 = vmatprep.subr.bf16.mxu0 %v1047_v3  ;;  %1023 = vmatprep.subr.bf16.mxu1 %v1047_v3 }
  0x19   : > { %979 = vmatpush3.bf16.msra.mxu0 %v1047_v3  ;;  %1031 = vmatpush3.bf16.msra.mxu1 %v1047_v3 }
  0x1a   : > { %980 = vmatprep.subr.bf16.mxu0 %v1048_v6  ;;  %1024 = vmatprep.subr.bf16.mxu1 %v1048_v6 }
  0x1d   : > { %981 = vmatpush3.bf16.msra.mxu0 %v1048_v6  ;;  %1032 = vmatpush3.bf16.msra.mxu1 %v1048_v6 }
  0x1e   : > { %982 = vmatprep.subr.bf16.mxu0 %v1049_v7  ;;  %1025 = vmatprep.subr.bf16.mxu1 %v1049_v7 }
  0x21   : > { %983 = vmatpush3.bf16.msra.mxu0 %v1049_v7  ;;  %1033 = vmatpush3.bf16.msra.mxu1 %v1049_v7 }
  0x22   : > { %984 = vmatprep.subr.bf16.mxu0 %v1050_v8  ;;  %1026 = vmatprep.subr.bf16.mxu1 %v1050_v8 }
  0x25   : > { %985 = vmatpush3.bf16.msra.mxu0 %v1050_v8  ;;  %1034 = vmatpush3.bf16.msra.mxu1 %v1050_v8 }
  0x26   : > { %986 = vmatprep.subr.bf16.mxu0 %v1051_v9  ;;  %1027 = vmatprep.subr.bf16.mxu1 %v1051_v9 }
  0x29   : > { %987 = vmatpush3.bf16.msra.mxu0 %v1051_v9  ;;  %1035 = vmatpush3.bf16.msra.mxu1 %v1051_v9 }
  0x2c   : > { %989 = vmatmul.mubr.bf16.vlgmr.msra.gmra.mxu0 %v1054_v10  ;;  %1005 = vmatmul.mubr.bf16.vlgmr.msra.gmra.mxu1 %v1055_v11 }
  0x2d   : > { %992 = vmatprep.mubr.bf16.mxu0 %v1056_v12  ;;  %1008 = vmatprep.mubr.bf16.mxu1 %v1057_v13 }
  0x34   : > { %993 = vmatmul.mubr.bf16.gmra.mxu0 %v1058_v14  ;;  %1009 = vmatmul.mubr.bf16.gmra.mxu1 %v1059_v15 }
  0x35   : > { %996 = vmatprep.mubr.bf16.mxu0 %v1060_v16  ;;  %1012 = vmatprep.mubr.bf16.mxu1 %v1061_v17 }
  0x3c   : > { %997 = vmatmul.mubr.bf16.gmra.mxu0 %v1062_v18  ;;  %1013 = vmatmul.mubr.bf16.gmra.mxu1 %v1063_v19 }
  0x3d   : > { %1000 = vmatprep.mubr.bf16.mxu0 %v1064_v20  ;;  %1016 = vmatprep.mubr.bf16.mxu1 %v1065_v21 }
  0x44   : > { %1001 = vmatmul.mubr.bf16.gmra.mxu0 %v1066_v22  ;;  %1017 = vmatmul.mubr.bf16.gmra.mxu1 %v1067_v23 }
  0xec   : > { %v990_v25 = vpop.f32.mrf.mxu0  ;;  %v1006_v26 = vpop.f32.mrf.mxu1 }
  0xed   : > { %v417_v27 = vadd.f32 %v990_v25, %v1157_v24  ;;  %v481_v28 = vadd.f32 %v1006_v26, %v1157_v24 }
  0xee   : > { %v408_v29 = vpop.f32.mrf.mxu0  ;;  %v472_v30 = vpop.f32.mrf.mxu1 }
  0xef   : > { %vm537_vm0 = vcmp.gt.f32.partialorder %v417_v27, 0.0  ;;  %v569_v31 = vmul.f32 0.01, %v417_v27  ;;  %vm553_vm1 = vcmp.gt.f32.partialorder %v481_v28, 0.0  ;;  %v585_v32 = vmul.f32 0.01, %v481_v28 }
  0xf0   : > { %v409_v33 = vadd.f32 %v1157_v24, %v408_v29  ;;  %v473_v34 = vadd.f32 %v1157_v24, %v472_v30  ;;  %v991_v35 = vpop.f32.mrf.mxu0  ;;  %v1007_v36 = vpop.f32.mrf.mxu1 }
  0xf1   : > { %v601_v37 = vsel %vm537_vm0, %v417_v27, %v569_v31  ;;  %v617_v38 = vsel %vm553_vm1, %v481_v28, %v585_v32  ;;  %v420_v39 = vadd.f32 %v991_v35, %v1157_v24  ;;  %v484_v40 = vadd.f32 %v1007_v36, %v1157_v24 }
  0xf2   : > { %v918_v41 = vpack.c.bf16 %v601_v37, %v601_v37  ;;  %v934_v42 = vpack.c.bf16 %v617_v38, %v617_v38  ;;  %vm535_vm3 = vcmp.gt.f32.partialorder %v409_v33, 0.0  ;;  %v567_v43 = vmul.f32 0.01, %v409_v33  ;;  %v411_v44 = vpop.f32.mrf.mxu0  ;;  %v475_v45 = vpop.f32.mrf.mxu1 }
  0xf3   : > { %vm551_vm4 = vcmp.gt.f32.partialorder %v473_v34, 0.0  ;;  %v583_v46 = vmul.f32 0.01, %v473_v34  ;;  %vm538_vm5 = vcmp.gt.f32.partialorder %v420_v39, 0.0  ;;  %v570_v47 = vmul.f32 0.01, %v420_v39 }
  0xf4   : > { %762 = vst.msk [vmem:[%s1168_s13 + $0x8] sm:$0xf] %vm759_vm2, %v918_v41  ;;  %778 = vst.msk [vmem:[%s1168_s13 + $0x48] sm:$0xf] %vm759_vm2, %v934_v42  ;;  %v599_v48 = vsel %vm535_vm3, %v409_v33, %v567_v43  ;;  %vm554_vm6 = vcmp.gt.f32.partialorder %v484_v40, 0.0  ;;  %v412_v50 = vadd.f32 %v1157_v24, %v411_v44  ;;  %v994_v51 = vpop.f32.mrf.mxu0  ;;  %v1010_v52 = vpop.f32.mrf.mxu1  ;;  %v476_v56 = vadd.f32 %v1157_v24, %v475_v45 }
  0xf5   : > { %v586_v49 = vmul.f32 0.01, %v484_v40  ;;  %v916_v53 = vpack.c.bf16 %v599_v48, %v599_v48  ;;  %v615_v54 = vsel %vm551_vm4, %v473_v34, %v583_v46  ;;  %v602_v55 = vsel %vm538_vm5, %v420_v39, %v570_v47 }
  0xf6   : > { %v932_v57 = vpack.c.bf16 %v615_v54, %v615_v54  ;;  %v919_v58 = vpack.c.bf16 %v602_v55, %v602_v55  ;;  %vm536_vm7 = vcmp.gt.f32.partialorder %v412_v50, 0.0  ;;  %v424_v60 = vpop.f32.mrf.mxu0  ;;  %v488_v61 = vpop.f32.mrf.mxu1  ;;  %v568_v63 = vmul.f32 0.01, %v412_v50 }
  0xf7   : > { %v618_v59 = vsel %vm554_vm6, %v484_v40, %v586_v49  ;;  %760 = vst.msk [vmem:[%s1168_s13] sm:$0xf] %vm759_vm2, %v916_v53  ;;  %vm552_vm8 = vcmp.gt.f32.partialorder %v476_v56, 0.0  ;;  %v584_v0 = vmul.f32 0.01, %v476_v56  ;;  %v433_v1 = vadd.f32 %v994_v51, %v1157_v24 }
  0xf8   : > { %v935_v62 = vpack.c.bf16 %v618_v59, %v618_v59  ;;  %776 = vst.msk [vmem:[%s1168_s13 + $0x40] sm:$0xf] %vm759_vm2, %v932_v57  ;;  %763 = vst.msk [vmem:[%s1168_s13 + $0xc] sm:$0xf] %vm759_vm2, %v919_v58  ;;  %v497_v2 = vadd.f32 %v1010_v52, %v1157_v24  ;;  %v425_v3 = vadd.f32 %v1157_v24, %v424_v60  ;;  %v995_v5 = vpop.f32.mrf.mxu0  ;;  %v1011_v6 = vpop.f32.mrf.mxu1 }
  0xf9   : > { %v489_v4 = vadd.f32 %v1157_v24, %v488_v61  ;;  %v600_v7 = vsel %vm536_vm7, %v412_v50, %v568_v63  ;;  %v616_v8 = vsel %vm552_vm8, %v476_v56, %v584_v0  ;;  %v436_v9 = vadd.f32 %v995_v5, %v1157_v24 }
  0xfa   : > { %779 = vst.msk [vmem:[%s1168_s13 + $0x4c] sm:$0xf] %vm759_vm2, %v935_v62  ;;  %v500_v10 = vadd.f32 %v1011_v6, %v1157_v24  ;;  %v917_v11 = vpack.c.bf16 %v600_v7, %v600_v7  ;;  %v933_v12 = vpack.c.bf16 %v616_v8, %v616_v8  ;;  %vm541_vm9 = vcmp.gt.f32.partialorder %v433_v1, 0.0  ;;  %v427_v14 = vpop.f32.mrf.mxu0  ;;  %v491_v15 = vpop.f32.mrf.mxu1 }
  0xfb   : > { %v573_v13 = vmul.f32 0.01, %v433_v1  ;;  %vm557_vm10 = vcmp.gt.f32.partialorder %v497_v2, 0.0  ;;  %v589_v16 = vmul.f32 0.01, %v497_v2  ;;  %vm539_vm11 = vcmp.gt.f32.partialorder %v425_v3, 0.0 }
  0xfc   : > { %v571_v17 = vmul.f32 0.01, %v425_v3  ;;  %761 = vst.msk [vmem:[%s1168_s13 + $0x4] sm:$0xf] %vm759_vm2, %v917_v11  ;;  %777 = vst.msk [vmem:[%s1168_s13 + $0x44] sm:$0xf] %vm759_vm2, %v933_v12  ;;  %v998_v20 = vpop.f32.mrf.mxu0  ;;  %v1014_v21 = vpop.f32.mrf.mxu1  ;;  %v428_v35 = vadd.f32 %v1157_v24, %v427_v14  ;;  %v492_v37 = vadd.f32 %v1157_v24, %v491_v15 }
  0xfd   : > { %v605_v18 = vsel %vm541_vm9, %v433_v1, %v573_v13  ;;  %vm555_vm12 = vcmp.gt.f32.partialorder %v489_v4, 0.0  ;;  %v587_v19 = vmul.f32 0.01, %v489_v4  ;;  %vm542_vm13 = vcmp.gt.f32.partialorder %v436_v9, 0.0 }
  0xfe   : > { %v922_v22 = vpack.c.bf16 %v605_v18, %v605_v18  ;;  %v621_v23 = vsel %vm557_vm10, %v497_v2, %v589_v16  ;;  %v603_v25 = vsel %vm539_vm11, %v425_v3, %v571_v17  ;;  %v574_v26 = vmul.f32 0.01, %v436_v9  ;;  %v440_v30 = vpop.f32.mrf.mxu0  ;;  %v504_v31 = vpop.f32.mrf.mxu1 }
  0xff   : > { %v938_v27 = vpack.c.bf16 %v621_v23, %v621_v23  ;;  %v920_v28 = vpack.c.bf16 %v603_v25, %v603_v25  ;;  %v619_v29 = vsel %vm555_vm12, %v489_v4, %v587_v19  ;;  %vm558_vm14 = vcmp.gt.f32.partialorder %v500_v10, 0.0 }
 0x100   : > { %766 = vst.msk [vmem:[%s1168_s13 + $0x18] sm:$0xf] %vm759_vm2, %v922_v22  ;;  %v936_v32 = vpack.c.bf16 %v619_v29, %v619_v29  ;;  %v606_v33 = vsel %vm542_vm13, %v436_v9, %v574_v26  ;;  %v590_v34 = vmul.f32 0.01, %v500_v10  ;;  %v449_v38 = vadd.f32 %v998_v20, %v1157_v24  ;;  %v999_v40 = vpop.f32.mrf.mxu0  ;;  %v1015_v41 = vpop.f32.mrf.mxu1 }
 0x101   : > { %782 = vst.msk [vmem:[%s1168_s13 + $0x58] sm:$0xf] %vm759_vm2, %v938_v27  ;;  %764 = vst.msk [vmem:[%s1168_s13 + $0x10] sm:$0xf] %vm759_vm2, %v920_v28  ;;  %v923_v36 = vpack.c.bf16 %v606_v33, %v606_v33  ;;  %v513_v39 = vadd.f32 %v1014_v21, %v1157_v24  ;;  %vm540_vm15 = vcmp.gt.f32.partialorder %v428_v35, 0.0  ;;  %v441_v44 = vadd.f32 %v1157_v24, %v440_v30 }
 0x102   : > { %780 = vst.msk [vmem:[%s1168_s13 + $0x50] sm:$0xf] %vm759_vm2, %v936_v32  ;;  %v622_v42 = vsel %vm558_vm14, %v500_v10, %v590_v34  ;;  %v572_v43 = vmul.f32 0.01, %v428_v35  ;;  %vm556_vm0 = vcmp.gt.f32.partialorder %v492_v37, 0.0  ;;  %vm545_vm1 = vcmp.gt.f32.partialorder %v449_v38, 0.0  ;;  %v443_v47 = vpop.f32.mrf.mxu0  ;;  %v507_v48 = vpop.f32.mrf.mxu1 }
 0x103   : > { %767 = vst.msk [vmem:[%s1168_s13 + $0x1c] sm:$0xf] %vm759_vm2, %v923_v36  ;;  %v939_v45 = vpack.c.bf16 %v622_v42, %v622_v42  ;;  %v588_v46 = vmul.f32 0.01, %v492_v37  ;;  %v577_v50 = vmul.f32 0.01, %v449_v38  ;;  %v505_v60 = vadd.f32 %v1157_v24, %v504_v31 }
 0x104   : > { %v604_v49 = vsel %vm540_vm15, %v428_v35, %v572_v43  ;;  %vm561_vm3 = vcmp.gt.f32.partialorder %v513_v39, 0.0  ;;  %v593_v51 = vmul.f32 0.01, %v513_v39  ;;  %vm543_vm4 = vcmp.gt.f32.partialorder %v441_v44, 0.0  ;;  %v1002_v55 = vpop.f32.mrf.mxu0  ;;  %v1018_v56 = vpop.f32.mrf.mxu1 }
 0x105   : > { %783 = vst.msk [vmem:[%s1168_s13 + $0x5c] sm:$0xf] %vm759_vm2, %v939_v45  ;;  %v921_v52 = vpack.c.bf16 %v604_v49, %v604_v49  ;;  %v620_v53 = vsel %vm556_vm0, %v492_v37, %v588_v46  ;;  %v575_v54 = vmul.f32 0.01, %v441_v44  ;;  %v609_v58 = vsel %vm545_vm1, %v449_v38, %v577_v50 }
 0x106   : > { %v937_v57 = vpack.c.bf16 %v620_v53, %v620_v53  ;;  %v625_v59 = vsel %vm561_vm3, %v513_v39, %v593_v51  ;;  %v926_v61 = vpack.c.bf16 %v609_v58, %v609_v58  ;;  %v452_v0 = vadd.f32 %v999_v40, %v1157_v24  ;;  %v456_v1 = vpop.f32.mrf.mxu0  ;;  %v520_v5 = vpop.f32.mrf.mxu1 }
 0x107   : > { %765 = vst.msk [vmem:[%s1168_s13 + $0x14] sm:$0xf] %vm759_vm2, %v921_v52  ;;  %v942_v62 = vpack.c.bf16 %v625_v59, %v625_v59  ;;  %v607_v63 = vsel %vm543_vm4, %v441_v44, %v575_v54  ;;  %vm559_vm5 = vcmp.gt.f32.partialorder %v505_v60, 0.0  ;;  %v591_v3 = vmul.f32 0.01, %v505_v60 }
 0x108   : > { %781 = vst.msk [vmem:[%s1168_s13 + $0x54] sm:$0xf] %vm759_vm2, %v937_v57  ;;  %v924_v2 = vpack.c.bf16 %v607_v63, %v607_v63  ;;  %v516_v4 = vadd.f32 %v1015_v41, %v1157_v24  ;;  %770 = vst.msk [vmem:[%s1168_s13 + $0x28] sm:$0xf] %vm759_vm2, %v926_v61  ;;  %vm546_vm6 = vcmp.gt.f32.partialorder %v452_v0, 0.0  ;;  %v444_v7 = vadd.f32 %v1157_v24, %v443_v47  ;;  %v1003_v15 = vpop.f32.mrf.mxu0  ;;  %v1019_v19 = vpop.f32.mrf.mxu1 }
 0x109   : > { %786 = vst.msk [vmem:[%s1168_s13 + $0x68] sm:$0xf] %vm759_vm2, %v942_v62  ;;  %v578_v6 = vmul.f32 0.01, %v452_v0  ;;  %v508_v8 = vadd.f32 %v1157_v24, %v507_v48  ;;  %v623_v9 = vsel %vm559_vm5, %v505_v60, %v591_v3  ;;  %v465_v11 = vadd.f32 %v1002_v55, %v1157_v24 }
 0x10a   : > { %768 = vst.msk [vmem:[%s1168_s13 + $0x20] sm:$0xf] %vm759_vm2, %v924_v2  ;;  %vm562_vm7 = vcmp.gt.f32.partialorder %v516_v4, 0.0  ;;  %v594_v10 = vmul.f32 0.01, %v516_v4  ;;  %v940_v12 = vpack.c.bf16 %v623_v9, %v623_v9  ;;  %vm544_vm8 = vcmp.gt.f32.partialorder %v444_v7, 0.0  ;;  %v459_v32 = vpop.f32.mrf.mxu0  ;;  %v523_v35 = vpop.f32.mrf.mxu1 }
 0x10b   : > { %v610_v13 = vsel %vm546_vm6, %v452_v0, %v578_v6  ;;  %v576_v14 = vmul.f32 0.01, %v444_v7  ;;  %vm560_vm9 = vcmp.gt.f32.partialorder %v508_v8, 0.0  ;;  %v592_v18 = vmul.f32 0.01, %v508_v8 }
 0x10c   : > { %v927_v16 = vpack.c.bf16 %v610_v13, %v610_v13  ;;  %v626_v17 = vsel %vm562_vm7, %v516_v4, %v594_v10  ;;  %784 = vst.msk [vmem:[%s1168_s13 + $0x60] sm:$0xf] %vm759_vm2, %v940_v12  ;;  %vm549_vm10 = vcmp.gt.f32.partialorder %v465_v11, 0.0  ;;  %v581_v22 = vmul.f32 0.01, %v465_v11 }
 0x10d   : > { %v943_v20 = vpack.c.bf16 %v626_v17, %v626_v17  ;;  %v608_v21 = vsel %vm544_vm8, %v444_v7, %v576_v14  ;;  %v624_v25 = vsel %vm560_vm9, %v508_v8, %v592_v18  ;;  %v529_v26 = vadd.f32 %v1018_v56, %v1157_v24 }
 0x10e   : > { %771 = vst.msk [vmem:[%s1168_s13 + $0x2c] sm:$0xf] %vm759_vm2, %v927_v16  ;;  %v925_v23 = vpack.c.bf16 %v608_v21, %v608_v21  ;;  %v457_v27 = vadd.f32 %v1157_v24, %v456_v1  ;;  %v941_v28 = vpack.c.bf16 %v624_v25, %v624_v25  ;;  %v613_v29 = vsel %vm549_vm10, %v465_v11, %v581_v22 }
 0x10f   : > { %787 = vst.msk [vmem:[%s1168_s13 + $0x6c] sm:$0xf] %vm759_vm2, %v943_v20  ;;  %v521_v30 = vadd.f32 %v1157_v24, %v520_v5  ;;  %v468_v31 = vadd.f32 %v1003_v15, %v1157_v24  ;;  %v930_v33 = vpack.c.bf16 %v613_v29, %v613_v29  ;;  %vm565_vm11 = vcmp.gt.f32.partialorder %v529_v26, 0.0 }
 0x110   : > { %769 = vst.msk [vmem:[%s1168_s13 + $0x24] sm:$0xf] %vm759_vm2, %v925_v23  ;;  %v597_v34 = vmul.f32 0.01, %v529_v26  ;;  %vm547_vm12 = vcmp.gt.f32.partialorder %v457_v27, 0.0  ;;  %v532_v40 = vadd.f32 %v1019_v19, %v1157_v24  ;;  %v460_v41 = vadd.f32 %v1157_v24, %v459_v32 }
 0x111   : > { %785 = vst.msk [vmem:[%s1168_s13 + $0x64] sm:$0xf] %vm759_vm2, %v941_v28  ;;  %v579_v36 = vmul.f32 0.01, %v457_v27  ;;  %vm563_vm13 = vcmp.gt.f32.partialorder %v521_v30, 0.0  ;;  %vm550_vm14 = vcmp.gt.f32.partialorder %v468_v31, 0.0  ;;  %v524_v45 = vadd.f32 %v1157_v24, %v523_v35 }
 0x112   : > { %v595_v37 = vmul.f32 0.01, %v521_v30  ;;  %774 = vst.msk [vmem:[%s1168_s13 + $0x38] sm:$0xf] %vm759_vm2, %v930_v33  ;;  %v629_v38 = vsel %vm565_vm11, %v529_v26, %v597_v34  ;;  %v582_v39 = vmul.f32 0.01, %v468_v31 }
 0x113   : > { %v946_v42 = vpack.c.bf16 %v629_v38, %v629_v38  ;;  %v611_v43 = vsel %vm547_vm12, %v457_v27, %v579_v36  ;;  %vm566_vm15 = vcmp.gt.f32.partialorder %v532_v40, 0.0  ;;  %v598_v50 = vmul.f32 0.01, %v532_v40 }
 0x114   : > { %v627_v44 = vsel %vm563_vm13, %v521_v30, %v595_v37  ;;  %v928_v46 = vpack.c.bf16 %v611_v43, %v611_v43  ;;  %v614_v48 = vsel %vm550_vm14, %v468_v31, %v582_v39  ;;  %vm548_vm0 = vcmp.gt.f32.partialorder %v460_v41, 0.0 }
 0x115   : > { %v944_v47 = vpack.c.bf16 %v627_v44, %v627_v44  ;;  %790 = vst.msk [vmem:[%s1168_s13 + $0x78] sm:$0xf] %vm759_vm2, %v946_v42  ;;  %v931_v49 = vpack.c.bf16 %v614_v48, %v614_v48  ;;  %v580_v51 = vmul.f32 0.01, %v460_v41  ;;  %vm564_vm1 = vcmp.gt.f32.partialorder %v524_v45, 0.0 }
 0x116   : > { %772 = vst.msk [vmem:[%s1168_s13 + $0x30] sm:$0xf] %vm759_vm2, %v928_v46  ;;  %v596_v52 = vmul.f32 0.01, %v524_v45  ;;  %v630_v24 = vsel %vm566_vm15, %v532_v40, %v598_v50 }
 0x117   : > { %788 = vst.msk [vmem:[%s1168_s13 + $0x70] sm:$0xf] %vm759_vm2, %v944_v47  ;;  %775 = vst.msk [vmem:[%s1168_s13 + $0x3c] sm:$0xf] %vm759_vm2, %v931_v49  ;;  %v612_v53 = vsel %vm548_vm0, %v460_v41, %v580_v51  ;;  %v947_v54 = vpack.c.bf16 %v630_v24, %v630_v24 }
 0x118   : > { %v929_v55 = vpack.c.bf16 %v612_v53, %v612_v53  ;;  %v628_v56 = vsel %vm564_vm1, %v524_v45, %v596_v52 }
 0x119   : > { %v945_v57 = vpack.c.bf16 %v628_v56, %v628_v56  ;;  %791 = vst.msk [vmem:[%s1168_s13 + $0x7c] sm:$0xf] %vm759_vm2, %v947_v54 }
 0x11a   : > { %773 = vst.msk [vmem:[%s1168_s13 + $0x34] sm:$0xf] %vm759_vm2, %v929_v55 }
 0x11b   : > { %789 = vst.msk [vmem:[%s1168_s13 + $0x74] sm:$0xf] %vm759_vm2, %v945_v57 }
 0x11c PF: > { %s13_s12 = sadd.s32 1, %s1074_s12  }
 0x11d   : > { %p10_p4 = scmp.ge.s32.totalorder %s13_s12, 11  }
 0x11f   :  { %12 = sbr.rel (!%p10_p4) target bundleno = 1 (0x1), region = 62 }

// kernel: jepa_forward.7
= control target key start
LH: loop header
LB: loop body
LE: loop exit
PB: predicated region body
PF: predicated region fallthrough
CT: control target
= control target key end

     0   :  { %s1805_s12 = smov 0   ;;  %s2094_s0 = inlined_call_operand.vmem [shape: bf16[768,384], index: 0, kind: input, shape index: {}]   ;;  %s2095_s1 = inlined_call_operand.vmem [shape: bf16[384,64], index: 1, kind: input, shape index: {}]   ;;  %s2096_s2 = inlined_call_operand.vmem [shape: f32[1,64], index: 2, kind: input, shape index: {}]   ;;  %s2097_s3 = inlined_call_operand.vmem [shape: bf16[768,64], index: 3, kind: output, shape index: {}]  }
   0x1 LB: > { %s1332_s13 = sadd.s32 4294967295, %s1783_s12   ;;  %p1336_p0 = scmp.ge.s32.totalorder %s1783_s12, 1  ;;  %s1783_s12 = sphi %s1805_s12, %s13_s12  }
   0x2   : > { %p139_p1 = scmp.lt.s32.totalorder %s1783_s12, 4 }
   0x4   : > { %p140_p2 = pnand %p1336_p0, %p139_p1 }
   0x5   : > { %s1337_s16 = sshll.u32 (!%p140_p2), %s1332_s13, 5 }
   0x6   : > { %143 = sbr.rel (%p140_p2) target bundleno = 344 (0x158), region = 32  ;;  %p165_p3 = scmp.lt.s32.totalorder (!%p140_p2), %s1337_s16, 95 }
   0xb   : > { %v1689_v0 = vld [vmem:[%s2095_s1 + $0x78] sm:$0xff]   ;;  %v1691_v2 = vld [vmem:[%s2095_s1 + $0x70] sm:$0xff]   ;;  %v1693_v4 = vld [vmem:[%s2095_s1 + $0x68] sm:$0xff]   ;;  %s2099_s16 = smov (!%p165_p3, %s1337_s16), 95  ;;  %vm1243_vm1 = vcmask 519168  }
   0xc   : > { %v1690_v1 = vld [vmem:[%s2095_s1 + $0x38] sm:$0xff]   ;;  %1480 = vmatprep.subr.bf16.mxu0 %v1689_v0  ;;  %1664 = vmatprep.subr.bf16.mxu1 %v1689_v0  ;;  %v1692_v3 = vld [vmem:[%s2095_s1 + $0x30] sm:$0xff]   ;;  %v1694_v5 = vld [vmem:[%s2095_s1 + $0x28] sm:$0xff]   ;;  %s1680_s29 = smul.u32 12, %s2099_s16  ;;  %s1340_s19 = sshll.u32 %s2099_s16, 2 }
   0xd   : > { %1481 = vmatpush3.bf16.msra.mxu0 %v1690_v1  ;;  %1672 = vmatpush3.bf16.msra.mxu1 %v1690_v1  ;;  %v1695_v6 = vld [vmem:[%s2095_s1 + $0x60] sm:$0xff]   ;;  %v1697_v8 = vld [vmem:[%s2095_s1 + $0x58] sm:$0xff]   ;;  %v1699_v10 = vld [vmem:[%s2095_s1 + $0x50] sm:$0xff]   ;;  %s1973_s22 = scalar_lea.vmem %s2097_s3, %s1340_s19 }
   0xe   : > { %1482 = vmatprep.subr.bf16.mxu0 %v1691_v2  ;;  %1665 = vmatprep.subr.bf16.mxu1 %v1691_v2  ;;  %v1696_v7 = vld [vmem:[%s2095_s1 + $0x20] sm:$0xff]   ;;  %s1846_s9 = scalar_lea.vmem %s2094_s0, %s1680_s29  ;;  %v1698_v9 = vld [vmem:[%s2095_s1 + $0x18] sm:$0xff]   ;;  %v1700_v13 = vld [vmem:[%s2095_s1 + $0x10] sm:$0xff]  }
   0xf   : > { %v1707_v11 = vld [vmem:[%s1846_s9 + $0x4] ss:$12 sps:$4 sm:$0xff]   ;;  %v1701_v14 = vld [vmem:[%s2095_s1 + $0x48] sm:$0xff]   ;;  %v1711_v18 = vld [vmem:[%s2095_s1 + $0xb8] sm:$0xff]  }
  0x10   : > { %v1710_v12 = vld [vmem:[%s1846_s9 + $0x124] ss:$12 sps:$4 sm:$0xff]   ;;  %729 = vmatprep.mubr.bf16.mxu0 %v1707_v11  ;;  %v1702_v15 = vld [vmem:[%s2095_s1 + $0x8] sm:$0xff]   ;;  %v1721_v28 = vld [vmem:[%s1846_s9 + $0x34] ss:$12 sps:$4 sm:$0xff]  }
  0x11   : > { %1483 = vmatpush3.bf16.msra.mxu0 %v1692_v3  ;;  %1673 = vmatpush3.bf16.msra.mxu1 %v1692_v3  ;;  %v1703_v16 = vld [vmem:[%s2095_s1 + $0x40] sm:$0xff]   ;;  %v1713_v21 = vld [vmem:[%s1846_s9 + $0x1c] ss:$12 sps:$4 sm:$0xff]   ;;  %v1712_v22 = vld [vmem:[%s2095_s1 + $0xb0] sm:$0xff]  }
  0x12   : > { %1484 = vmatprep.subr.bf16.mxu0 %v1693_v4  ;;  %1666 = vmatprep.subr.bf16.mxu1 %v1693_v4  ;;  %v1704_v17 = vld [vmem:[%s2095_s1] sm:$0xff]   ;;  %v1715_v23 = vld [vmem:[%s1846_s9 + $0x13c] ss:$12 sps:$4 sm:$0xff]   ;;  %v1728_v33 = vld [vmem:[%s2095_s1 + $0x90] sm:$0xff]  }
  0x13   : > { %825 = vmatprep.mubr.bf16.mxu1 %v1710_v12  ;;  %v1705_v19 = vld [vmem:[%s1846_s9] ss:$12 sps:$4 sm:$0xff]   ;;  %v1717_v24 = vld [vmem:[%s1846_s9 + $0x18] ss:$12 sps:$4 sm:$0xff]   ;;  %v1725_v31 = vld [vmem:[%s1846_s9 + $0x30] ss:$12 sps:$4 sm:$0xff]  }
  0x14   : > { %v1708_v20 = vld [vmem:[%s1846_s9 + $0x120] ss:$12 sps:$4 sm:$0xff]   ;;  %v1718_v26 = vld [vmem:[%s1846_s9 + $0x138] ss:$12 sps:$4 sm:$0xff]   ;;  %v1726_v32 = vld [vmem:[%s1846_s9 + $0x150] ss:$12 sps:$4 sm:$0xff]  }
  0x15   : > { %1485 = vmatpush3.bf16.msra.mxu0 %v1694_v5  ;;  %1674 = vmatpush3.bf16.msra.mxu1 %v1694_v5  ;;  %v1719_v25 = vld [vmem:[%s2095_s1 + $0xa8] sm:$0xff]   ;;  %v1720_v27 = vld [vmem:[%s2095_s1 + $0xa0] sm:$0xff]   ;;  %v1727_v30 = vld [vmem:[%s2095_s1 + $0x98] sm:$0xff]  }
  0x16   : > { %1486 = vmatprep.subr.bf16.mxu0 %v1695_v6  ;;  %1667 = vmatprep.subr.bf16.mxu1 %v1695_v6  ;;  %v1723_v29 = vld [vmem:[%s1846_s9 + $0x154] ss:$12 sps:$4 sm:$0xff]   ;;  %v1729_v34 = vld [vmem:[%s1846_s9 + $0x4c] ss:$12 sps:$4 sm:$0xff]   ;;  %v1737_v39 = vld [vmem:[%s1846_s9 + $0x64] ss:$12 sps:$4 sm:$0xff]  }
  0x17   : > { %v1731_v35 = vld [vmem:[%s1846_s9 + $0x16c] ss:$12 sps:$4 sm:$0xff]   ;;  %v1733_v37 = vld [vmem:[%s1846_s9 + $0x48] ss:$12 sps:$4 sm:$0xff]   ;;  %v1736_v40 = vld [vmem:[%s2095_s1 + $0x80] sm:$0xff]  }
  0x18   : > { %v1735_v36 = vld [vmem:[%s2095_s1 + $0x88] sm:$0xff]   ;;  %v1744_v45 = vld [vmem:[%s1846_s9 + $0x38] ss:$12 sps:$4 sm:$0xff]   ;;  %v1746_v47 = vld [vmem:[%s1846_s9 + $0x50] ss:$12 sps:$4 sm:$0xff]  }
  0x19   : > { %1487 = vmatpush3.bf16.msra.mxu0 %v1696_v7  ;;  %1675 = vmatpush3.bf16.msra.mxu1 %v1696_v7  ;;  %v1734_v38 = vld [vmem:[%s1846_s9 + $0x168] ss:$12 sps:$4 sm:$0xff]   ;;  %v1740_v42 = vld [vmem:[%s1846_s9 + $0x60] ss:$12 sps:$4 sm:$0xff]   ;;  %v1745_v46 = vld [vmem:[%s1846_s9 + $0x78] ss:$12 sps:$4 sm:$0xff]  }
  0x1a   : > { %1488 = vmatprep.subr.bf16.mxu0 %v1697_v8  ;;  %1668 = vmatprep.subr.bf16.mxu1 %v1697_v8  ;;  %v1739_v41 = vld [vmem:[%s1846_s9 + $0x8] ss:$12 sps:$4 sm:$0xff]   ;;  %v1741_v43 = vld [vmem:[%s1846_s9 + $0x20] ss:$12 sps:$4 sm:$0xff]   ;;  %v1750_v50 = vld [vmem:[%s1846_s9 + $0x90] ss:$12 sps:$4 sm:$0xff]  }
  0x1b   : > { %v1742_v44 = vld [vmem:[%s1846_s9 + $0x7c] ss:$12 sps:$4 sm:$0xff]   ;;  %v1747_v48 = vld [vmem:[%s1846_s9 + $0x94] ss:$12 sps:$4 sm:$0xff]   ;;  %v1752_v52 = vld [vmem:[%s1846_s9 + $0xac] ss:$12 sps:$4 sm:$0xff]  }
  0x1c   : > { %v1749_v49 = vld [vmem:[%s1846_s9 + $0x68] ss:$12 sps:$4 sm:$0xff]   ;;  %v1751_v51 = vld [vmem:[%s1846_s9 + $0x80] ss:$12 sps:$4 sm:$0xff]   ;;  %v1754_v53 = vld [vmem:[%s1846_s9 + $0x98] ss:$12 sps:$4 sm:$0xff]  }
  0x1d   : > { %1489 = vmatpush3.bf16.msra.mxu0 %v1698_v9  ;;  %1676 = vmatpush3.bf16.msra.mxu1 %v1698_v9  ;;  %v1755_v54 = vld [vmem:[%s1846_s9 + $0xa8] ss:$12 sps:$4 sm:$0xff]   ;;  %v1756_v55 = vld [vmem:[%s1846_s9 + $0xb0] ss:$12 sps:$4 sm:$0xff]   ;;  %v1760_v58 = vld [vmem:[%s1846_s9 + $0xc0] ss:$12 sps:$4 sm:$0xff]  }
  0x1e   : > { %1490 = vmatprep.subr.bf16.mxu0 %v1699_v10  ;;  %1669 = vmatprep.subr.bf16.mxu1 %v1699_v10  ;;  %v1757_v56 = vld [vmem:[%s1846_s9 + $0xc4] ss:$12 sps:$4 sm:$0xff]   ;;  %v1759_v57 = vld [vmem:[%s1846_s9 + $0xc8] ss:$12 sps:$4 sm:$0xff]   ;;  %v1761_v59 = vld [vmem:[%s1846_s9 + $0xe0] ss:$12 sps:$4 sm:$0xff]  }
  0x1f   : > { %v1762_v60 = vld [vmem:[%s1846_s9 + $0xdc] ss:$12 sps:$4 sm:$0xff]   ;;  %v1764_v61 = vld [vmem:[%s1846_s9 + $0xf8] ss:$12 sps:$4 sm:$0xff]   ;;  %v1767_v0 = vld [vmem:[%s1846_s9 + $0xf4] ss:$12 sps:$4 sm:$0xff]  }
  0x20   : > { %v1765_v62 = vld [vmem:[%s1846_s9 + $0xd8] ss:$12 sps:$4 sm:$0xff]   ;;  %v1766_v63 = vld [vmem:[%s1846_s9 + $0x110] ss:$12 sps:$4 sm:$0xff]   ;;  %v1769_v1 = vld [vmem:[%s1846_s9 + $0x128] ss:$12 sps:$4 sm:$0xff]  }
  0x21   : > { %1491 = vmatpush3.bf16.msra.mxu0 %v1700_v13  ;;  %1677 = vmatpush3.bf16.msra.mxu1 %v1700_v13  ;;  %v1770_v2 = vld [vmem:[%s1846_s9 + $0xf0] ss:$12 sps:$4 sm:$0xff]   ;;  %v1771_v3 = vld [vmem:[%s1846_s9 + $0x140] ss:$12 sps:$4 sm:$0xff]   ;;  %v1774_v5 = vld [vmem:[%s1846_s9 + $0x158] ss:$12 sps:$4 sm:$0xff]  }
  0x22   : > { %1492 = vmatprep.subr.bf16.mxu0 %v1701_v14  ;;  %1670 = vmatprep.subr.bf16.mxu1 %v1701_v14  ;;  %v1772_v4 = vld [vmem:[%s1846_s9 + $0x10c] ss:$12 sps:$4 sm:$0xff]   ;;  %v1775_v6 = vld [vmem:[%s1846_s9 + $0x108] ss:$12 sps:$4 sm:$0xff]   ;;  %v1776_v7 = vld [vmem:[%s1846_s9 + $0x170] ss:$12 sps:$4 sm:$0xff]  }
  0x25   : > { %1493 = vmatpush3.bf16.msra.mxu0 %v1702_v15  ;;  %1678 = vmatpush3.bf16.msra.mxu1 %v1702_v15 }
  0x26   : > { %1494 = vmatprep.subr.bf16.mxu0 %v1703_v16  ;;  %1671 = vmatprep.subr.bf16.mxu1 %v1703_v16 }
  0x29   : > { %1495 = vmatpush3.bf16.msra.mxu0 %v1704_v17  ;;  %1679 = vmatpush3.bf16.msra.mxu1 %v1704_v17 }
  0x2a   : > { %1616 = vmatprep.subr.bf16.mxu1 %v1711_v18 }
  0x2c   : > { %730 = vmatmul.mubr.bf16.vlgmr.msra.gmra.mxu0 %v1705_v19  ;;  %826 = vmatmul.mubr.bf16.vlgmr.msra.gmra.mxu1 %v1708_v20 }
  0x2d   : > { %1617 = vmatpush3.bf16.msra.mxu1 %v1711_v18  ;;  %737 = vmatprep.mubr.bf16.mxu0 %v1713_v21 }
  0x2e   : > { %1618 = vmatprep.subr.bf16.mxu1 %v1712_v22  ;;  %833 = vmatprep.mubr.bf16.mxu1 %v1715_v23 }
  0x31   : > { %1619 = vmatpush3.bf16.msra.mxu1 %v1712_v22 }
  0x32   : > { %1620 = vmatprep.subr.bf16.mxu1 %v1719_v25 }
  0x34   : > { %738 = vmatmul.mubr.bf16.gmra.mxu0 %v1717_v24  ;;  %834 = vmatmul.mubr.bf16.gmra.mxu1 %v1718_v26 }
  0x35   : > { %1621 = vmatpush3.bf16.msra.mxu1 %v1719_v25  ;;  %745 = vmatprep.mubr.bf16.mxu0 %v1721_v28 }
  0x36   : > { %1622 = vmatprep.subr.bf16.mxu1 %v1720_v27  ;;  %841 = vmatprep.mubr.bf16.mxu1 %v1723_v29 }
  0x39   : > { %1623 = vmatpush3.bf16.msra.mxu1 %v1720_v27 }
  0x3a   : > { %1624 = vmatprep.subr.bf16.mxu1 %v1727_v30 }
  0x3c   : > { %746 = vmatmul.mubr.bf16.gmra.mxu0 %v1725_v31  ;;  %842 = vmatmul.mubr.bf16.gmra.mxu1 %v1726_v32 }
  0x3d   : > { %1625 = vmatpush3.bf16.msra.mxu1 %v1727_v30  ;;  %753 = vmatprep.mubr.bf16.mxu0 %v1729_v34 }
  0x3e   : > { %1626 = vmatprep.subr.bf16.mxu1 %v1728_v33  ;;  %849 = vmatprep.mubr.bf16.mxu1 %v1731_v35 }
  0x41   : > { %1627 = vmatpush3.bf16.msra.mxu1 %v1728_v33 }
  0x42   : > { %1628 = vmatprep.subr.bf16.mxu1 %v1735_v36 }
  0x44   : > { %754 = vmatmul.mubr.bf16.gmra.mxu0 %v1733_v37  ;;  %850 = vmatmul.mubr.bf16.gmra.mxu1 %v1734_v38 }
  0x45   : > { %1629 = vmatpush3.bf16.msra.mxu1 %v1735_v36  ;;  %761 = vmatprep.mubr.bf16.mxu0 %v1737_v39 }
  0x46   : > { %1630 = vmatprep.subr.bf16.mxu1 %v1736_v40  ;;  %1632 = vmatprep.mubr.bf16.mxu1 %v1739_v41 }
  0x49   : > { %1631 = vmatpush3.bf16.msra.mxu1 %v1736_v40 }
  0x4c   : > { %762 = vmatmul.mubr.bf16.gmra.mxu0 %v1740_v42  ;;  %1633 = vmatmul.mubr.bf16.vlgmr.msra.gmra.mxu1 %v1741_v43 }
  0x4d   : > { %769 = vmatprep.mubr.bf16.mxu0 %v1742_v44  ;;  %1636 = vmatprep.mubr.bf16.mxu1 %v1744_v45 }
  0x54   : > { %770 = vmatmul.mubr.bf16.gmra.mxu0 %v1745_v46  ;;  %1637 = vmatmul.mubr.bf16.gmra.mxu1 %v1746_v47 }
  0x55   : > { %777 = vmatprep.mubr.bf16.mxu0 %v1747_v48  ;;  %1640 = vmatprep.mubr.bf16.mxu1 %v1749_v49  ;;  %v1964_v49 = vld [vmem:[%s2096_s2] ss:$0 sm:$0xff] }
  0x5c   : > { %778 = vmatmul.mubr.bf16.gmra.mxu0 %v1750_v50  ;;  %1641 = vmatmul.mubr.bf16.gmra.mxu1 %v1751_v51 }
  0x5d   : > { %785 = vmatprep.mubr.bf16.mxu0 %v1752_v52  ;;  %1644 = vmatprep.mubr.bf16.mxu1 %v1754_v53 }
  0x64   : > { %786 = vmatmul.mubr.bf16.gmra.mxu0 %v1755_v54  ;;  %1645 = vmatmul.mubr.bf16.gmra.mxu1 %v1756_v55 }
  0x65   : > { %793 = vmatprep.mubr.bf16.mxu0 %v1757_v56  ;;  %1648 = vmatprep.mubr.bf16.mxu1 %v1759_v57 }
  0x6c   : > { %794 = vmatmul.mubr.bf16.gmra.mxu0 %v1760_v58  ;;  %1649 = vmatmul.mubr.bf16.gmra.mxu1 %v1761_v59 }
  0x6d   : > { %801 = vmatprep.mubr.bf16.mxu0 %v1762_v60  ;;  %1652 = vmatprep.mubr.bf16.mxu1 %v1764_v61 }
  0x74   : > { %802 = vmatmul.mubr.bf16.gmra.mxu0 %v1765_v62  ;;  %1653 = vmatmul.mubr.bf16.gmra.mxu1 %v1766_v63 }
  0x75   : > { %809 = vmatprep.mubr.bf16.mxu0 %v1767_v0  ;;  %1656 = vmatprep.mubr.bf16.mxu1 %v1769_v1 }
  0x7c   : > { %810 = vmatmul.mubr.bf16.gmra.mxu0 %v1770_v2  ;;  %1657 = vmatmul.mubr.bf16.gmra.mxu1 %v1771_v3 }
  0x7d   : > { %817 = vmatprep.mubr.bf16.mxu0 %v1772_v4  ;;  %1660 = vmatprep.mubr.bf16.mxu1 %v1774_v5 }
  0x84   : > { %818 = vmatmul.mubr.bf16.gmra.mxu0 %v1775_v6  ;;  %1661 = vmatmul.mubr.bf16.gmra.mxu1 %v1776_v7 }
  0xec   : > { %v1496_v8 = vpop.f32.mrf.mxu0  ;;  %v1568_v9 = vpop.f32.mrf.mxu1 }
  0xee   : > { %v1497_v10 = vpop.f32.mrf.mxu0  ;;  %v1569_v11 = vpop.f32.mrf.mxu1 }
  0xef   : > { %v1941_v12 = vadd.f32 %v1569_v11, %v1568_v9  ;;  %v1498_v45 = vadd.f32 %v1497_v10, %v1496_v8 }
  0xf0   : > { %v1499_v13 = vpop.f32.mrf.mxu0  ;;  %v1571_v14 = vpop.f32.mrf.mxu1 }
  0xf1   : > { %v732_v54 = vadd.f32 %v1498_v45, %v1964_v49 }
  0xf2   : > { %v1500_v15 = vpop.f32.mrf.mxu0  ;;  %v1572_v16 = vpop.f32.mrf.mxu1 }
  0xf3   : > { %v1943_v17 = vadd.f32 %v1572_v16, %v1571_v14  ;;  %v1501_v55 = vadd.f32 %v1500_v15, %v1499_v13 }
  0xf4   : > { %v1502_v18 = vpop.f32.mrf.mxu0  ;;  %v1574_v19 = vpop.f32.mrf.mxu1 }
  0xf5   : > { %v735_v6 = vadd.f32 %v1501_v55, %v1964_v49 }
  0xf6   : > { %v1503_v20 = vpop.f32.mrf.mxu0  ;;  %v1575_v21 = vpop.f32.mrf.mxu1 }
  0xf7   : > { %v1945_v22 = vadd.f32 %v1575_v21, %v1574_v19  ;;  %v1504_v42 = vadd.f32 %v1503_v20, %v1502_v18 }
  0xf8   : > { %v1505_v23 = vpop.f32.mrf.mxu0  ;;  %v1577_v24 = vpop.f32.mrf.mxu1 }
  0xf9   : > { %v740_v50 = vadd.f32 %v1504_v42, %v1964_v49 }
  0xfa   : > { %v1506_v25 = vpop.f32.mrf.mxu0  ;;  %v1578_v26 = vpop.f32.mrf.mxu1 }
  0xfb   : > { %v1947_v27 = vadd.f32 %v1578_v26, %v1577_v24  ;;  %v1507_v46 = vadd.f32 %v1506_v25, %v1505_v23 }
  0xfc   : > { %v1508_v28 = vpop.f32.mrf.mxu0  ;;  %v1580_v29 = vpop.f32.mrf.mxu1 }
  0xfd   : > { %v743_v58 = vadd.f32 %v1507_v46, %v1964_v49 }
  0xfe   : > { %v1509_v30 = vpop.f32.mrf.mxu0  ;;  %v1581_v31 = vpop.f32.mrf.mxu1 }
  0xff   : > { %v1949_v32 = vadd.f32 %v1581_v31, %v1580_v29  ;;  %v1510_v62 = vadd.f32 %v1509_v30, %v1508_v28 }
 0x100   : > { %v1511_v33 = vpop.f32.mrf.mxu0  ;;  %v1583_v34 = vpop.f32.mrf.mxu1 }
 0x101   : > { %v748_v21 = vadd.f32 %v1510_v62, %v1964_v49 }
 0x102   : > { %v1512_v35 = vpop.f32.mrf.mxu0  ;;  %v1584_v36 = vpop.f32.mrf.mxu1 }
 0x103   : > { %v1951_v37 = vadd.f32 %v1584_v36, %v1583_v34  ;;  %v1513_v11 = vadd.f32 %v1512_v35, %v1511_v33 }
 0x104   : > { %v1514_v38 = vpop.f32.mrf.mxu0  ;;  %v1953_v39 = vpop.f32.mrf.mxu1 }
 0x105   : > { %v751_v36 = vadd.f32 %v1513_v11, %v1964_v49 }
 0x106   : > { %v1515_v40 = vpop.f32.mrf.mxu0  ;;  %v1955_v41 = vpop.f32.mrf.mxu1 }
 0x107   : > { %v1516_v59 = vadd.f32 %v1515_v40, %v1514_v38 }
 0x108   : > { %v1517_v43 = vpop.f32.mrf.mxu0  ;;  %v1957_v44 = vpop.f32.mrf.mxu1 }
 0x109   : > { %v756_v10 = vadd.f32 %v1516_v59, %v1964_v49 }
 0x10a   : > { %v1518_v47 = vpop.f32.mrf.mxu0  ;;  %v1959_v48 = vpop.f32.mrf.mxu1 }
 0x10b   : > { %v1519_v13 = vadd.f32 %v1518_v47, %v1517_v43 }
 0x10c   : > { %v1520_v51 = vpop.f32.mrf.mxu0  ;;  %v1634_v52 = vpop.f32.mrf.mxu1 }
 0x10d   : > { %v901_v53 = vadd.f32 %v1634_v52, %v740_v50  ;;  %v759_v34 = vadd.f32 %v1519_v13, %v1964_v49 }
 0x10e   : > { %v1521_v56 = vpop.f32.mrf.mxu0  ;;  %v892_v57 = vpop.f32.mrf.mxu1 }
 0x10f   : > { %vm1021_vm0 = vcmp.gt.f32.partialorder %v901_v53, 0.0  ;;  %v1053_v60 = vmul.f32 0.01, %v901_v53  ;;  %v893_v61 = vadd.f32 %v892_v57, %v732_v54  ;;  %v1522_v43 = vadd.f32 %v1521_v56, %v1520_v51 }
 0x110   : > { %v1523_v63 = vpop.f32.mrf.mxu0  ;;  %v1635_v0 = vpop.f32.mrf.mxu1 }
 0x111   : > { %v1085_v1 = vsel %vm1021_vm0, %v901_v53, %v1053_v60  ;;  %vm1019_vm2 = vcmp.gt.f32.partialorder %v893_v61, 0.0  ;;  %v1051_v2 = vmul.f32 0.01, %v893_v61  ;;  %v904_v3 = vadd.f32 %v1635_v0, %v743_v58 }
 0x112   : > { %v1450_v4 = vpack.c.bf16 %v1085_v1, %v1085_v1  ;;  %v1524_v5 = vpop.f32.mrf.mxu0  ;;  %v895_v7 = vpop.f32.mrf.mxu1  ;;  %v764_v1 = vadd.f32 %v1522_v43, %v1964_v49 }
 0x113   : > { %v1083_v8 = vsel %vm1019_vm2, %v893_v61, %v1051_v2  ;;  %vm1022_vm3 = vcmp.gt.f32.partialorder %v904_v3, 0.0  ;;  %v1054_v9 = vmul.f32 0.01, %v904_v3  ;;  %v896_v15 = vadd.f32 %v895_v7, %v735_v6 }
 0x114   : > { %1246 = vst.msk [vmem:[%s1973_s22 + $0x8] sm:$0xf] %vm1243_vm1, %v1450_v4  ;;  %v1448_v14 = vpack.c.bf16 %v1083_v8, %v1083_v8  ;;  %v1526_v16 = vpop.f32.mrf.mxu0  ;;  %v1638_v18 = vpop.f32.mrf.mxu1  ;;  %v1525_v51 = vadd.f32 %v1524_v5, %v1523_v63 }
 0x115   : > { %v1086_v19 = vsel %vm1022_vm3, %v904_v3, %v1054_v9  ;;  %v917_v20 = vadd.f32 %v1638_v18, %v756_v10  ;;  %vm1020_vm4 = vcmp.gt.f32.partialorder %v896_v15, 0.0  ;;  %v1052_v24 = vmul.f32 0.01, %v896_v15 }
 0x116   : > { %1244 = vst.msk [vmem:[%s1973_s22] sm:$0xf] %vm1243_vm1, %v1448_v14  ;;  %v1451_v23 = vpack.c.bf16 %v1086_v19, %v1086_v19  ;;  %v1527_v25 = vpop.f32.mrf.mxu0  ;;  %v908_v26 = vpop.f32.mrf.mxu1  ;;  %v767_v14 = vadd.f32 %v1525_v51, %v1964_v49 }
 0x117   : > { %vm1025_vm5 = vcmp.gt.f32.partialorder %v917_v20, 0.0  ;;  %v1057_v28 = vmul.f32 0.01, %v917_v20  ;;  %v1528_v29 = vadd.f32 %v1527_v25, %v1526_v16  ;;  %v909_v30 = vadd.f32 %v908_v26, %v748_v21 }
 0x118   : > { %1247 = vst.msk [vmem:[%s1973_s22 + $0xc] sm:$0xf] %vm1243_vm1, %v1451_v23  ;;  %v1084_v31 = vsel %vm1020_vm4, %v896_v15, %v1052_v24  ;;  %v1529_v33 = vpop.f32.mrf.mxu0  ;;  %v1639_v35 = vpop.f32.mrf.mxu1 }
 0x119   : > { %v1449_v38 = vpack.c.bf16 %v1084_v31, %v1084_v31  ;;  %v1089_v40 = vsel %vm1025_vm5, %v917_v20, %v1057_v28  ;;  %vm1023_vm6 = vcmp.gt.f32.partialorder %v909_v30, 0.0  ;;  %v1055_v42 = vmul.f32 0.01, %v909_v30 }
 0x11a   : > { %v1454_v45 = vpack.c.bf16 %v1089_v40, %v1089_v40  ;;  %v920_v46 = vadd.f32 %v1639_v35, %v759_v34  ;;  %v1530_v47 = vpop.f32.mrf.mxu0  ;;  %v911_v50 = vpop.f32.mrf.mxu1  ;;  %v772_v55 = vadd.f32 %v1528_v29, %v1964_v49 }
 0x11b   : > { %1245 = vst.msk [vmem:[%s1973_s22 + $0x4] sm:$0xf] %vm1243_vm1, %v1449_v38  ;;  %v1087_v52 = vsel %vm1023_vm6, %v909_v30, %v1055_v42  ;;  %v1531_v53 = vadd.f32 %v1530_v47, %v1529_v33  ;;  %v912_v54 = vadd.f32 %v911_v50, %v751_v36 }
 0x11c   : > { %1250 = vst.msk [vmem:[%s1973_s22 + $0x18] sm:$0xf] %vm1243_vm1, %v1454_v45  ;;  %v1452_v57 = vpack.c.bf16 %v1087_v52, %v1087_v52  ;;  %vm1026_vm7 = vcmp.gt.f32.partialorder %v920_v46, 0.0  ;;  %v1058_v58 = vmul.f32 0.01, %v920_v46  ;;  %v1532_v59 = vpop.f32.mrf.mxu0  ;;  %v1642_v60 = vpop.f32.mrf.mxu1 }
 0x11d   : > { %vm1024_vm8 = vcmp.gt.f32.partialorder %v912_v54, 0.0  ;;  %v1056_v56 = vmul.f32 0.01, %v912_v54  ;;  %v933_v61 = vadd.f32 %v1642_v60, %v772_v55  ;;  %v775_v3 = vadd.f32 %v1531_v53, %v1964_v49 }
 0x11e   : > { %1248 = vst.msk [vmem:[%s1973_s22 + $0x10] sm:$0xf] %vm1243_vm1, %v1452_v57  ;;  %v1090_v62 = vsel %vm1026_vm7, %v920_v46, %v1058_v58  ;;  %v1533_v0 = vpop.f32.mrf.mxu0  ;;  %v924_v2 = vpop.f32.mrf.mxu1 }
 0x11f   : > { %v1455_v4 = vpack.c.bf16 %v1090_v62, %v1090_v62  ;;  %v1088_v6 = vsel %vm1024_vm8, %v912_v54, %v1056_v56  ;;  %vm1029_vm9 = vcmp.gt.f32.partialorder %v933_v61, 0.0  ;;  %v1061_v7 = vmul.f32 0.01, %v933_v61 }
 0x120   : > { %v1453_v8 = vpack.c.bf16 %v1088_v6, %v1088_v6  ;;  %v1534_v63 = vadd.f32 %v1533_v0, %v1532_v59  ;;  %v925_v5 = vadd.f32 %v924_v2, %v764_v1  ;;  %v1535_v9 = vpop.f32.mrf.mxu0  ;;  %v1643_v10 = vpop.f32.mrf.mxu1 }
 0x121   : > { %1251 = vst.msk [vmem:[%s1973_s22 + $0x1c] sm:$0xf] %vm1243_vm1, %v1455_v4  ;;  %v1093_v11 = vsel %vm1029_vm9, %v933_v61, %v1061_v7  ;;  %v936_v13 = vadd.f32 %v1643_v10, %v775_v3 }
 0x122   : > { %1249 = vst.msk [vmem:[%s1973_s22 + $0x14] sm:$0xf] %vm1243_vm1, %v1453_v8  ;;  %v1458_v15 = vpack.c.bf16 %v1093_v11, %v1093_v11  ;;  %vm1027_vm10 = vcmp.gt.f32.partialorder %v925_v5, 0.0  ;;  %v1059_v16 = vmul.f32 0.01, %v925_v5  ;;  %v1536_v18 = vpop.f32.mrf.mxu0  ;;  %v927_v19 = vpop.f32.mrf.mxu1  ;;  %v780_v28 = vadd.f32 %v1534_v63, %v1964_v49 }
 0x123   : > { %vm1030_vm11 = vcmp.gt.f32.partialorder %v936_v13, 0.0  ;;  %v1062_v20 = vmul.f32 0.01, %v936_v13  ;;  %v928_v21 = vadd.f32 %v927_v19, %v767_v14  ;;  %v1537_v24 = vadd.f32 %v1536_v18, %v1535_v9 }
 0x124   : > { %1254 = vst.msk [vmem:[%s1973_s22 + $0x28] sm:$0xf] %vm1243_vm1, %v1458_v15  ;;  %v1091_v23 = vsel %vm1027_vm10, %v925_v5, %v1059_v16  ;;  %v1538_v25 = vpop.f32.mrf.mxu0  ;;  %v1646_v26 = vpop.f32.mrf.mxu1 }
 0x125   : > { %v1456_v29 = vpack.c.bf16 %v1091_v23, %v1091_v23  ;;  %v1094_v30 = vsel %vm1030_vm11, %v936_v13, %v1062_v20  ;;  %vm1028_vm12 = vcmp.gt.f32.partialorder %v928_v21, 0.0  ;;  %v1060_v31 = vmul.f32 0.01, %v928_v21 }
 0x126   : > { %v1459_v33 = vpack.c.bf16 %v1094_v30, %v1094_v30  ;;  %v1539_v34 = vpop.f32.mrf.mxu0  ;;  %v940_v35 = vpop.f32.mrf.mxu1  ;;  %v783_v50 = vadd.f32 %v1537_v24, %v1964_v49 }
 0x127   : > { %1252 = vst.msk [vmem:[%s1973_s22 + $0x20] sm:$0xf] %vm1243_vm1, %v1456_v29  ;;  %v1092_v36 = vsel %vm1028_vm12, %v928_v21, %v1060_v31  ;;  %v1540_v38 = vadd.f32 %v1539_v34, %v1538_v25  ;;  %v941_v40 = vadd.f32 %v940_v35, %v780_v28 }
 0x128   : > { %1255 = vst.msk [vmem:[%s1973_s22 + $0x2c] sm:$0xf] %vm1243_vm1, %v1459_v33  ;;  %v1457_v42 = vpack.c.bf16 %v1092_v36, %v1092_v36  ;;  %v1541_v43 = vpop.f32.mrf.mxu0  ;;  %v1647_v45 = vpop.f32.mrf.mxu1  ;;  %v1588_v36 = vadd.f32 %v1955_v41, %v1953_v39  ;;  %v831_v39 = vadd.f32 %v1943_v17, %v1964_v49  ;;  %v2049_v17 = vadd.f32 %v1951_v37, %v1964_v49 }
 0x129   : > { %v788_v46 = vadd.f32 %v1540_v38, %v1964_v49  ;;  %vm1031_vm13 = vcmp.gt.f32.partialorder %v941_v40, 0.0  ;;  %v1063_v47 = vmul.f32 0.01, %v941_v40 }
 0x12a   : > { %1253 = vst.msk [vmem:[%s1973_s22 + $0x24] sm:$0xf] %vm1243_vm1, %v1457_v42  ;;  %v1542_v52 = vpop.f32.mrf.mxu0  ;;  %v943_v53 = vpop.f32.mrf.mxu1 }
 0x12b   : > { %v949_v54 = vadd.f32 %v1646_v26, %v788_v46  ;;  %v1095_v55 = vsel %vm1031_vm13, %v941_v40, %v1063_v47  ;;  %v1543_v57 = vadd.f32 %v1542_v52, %v1541_v43  ;;  %v944_v58 = vadd.f32 %v943_v53, %v783_v50 }
 0x12c   : > { %v1460_v59 = vpack.c.bf16 %v1095_v55, %v1095_v55  ;;  %v1544_v60 = vpop.f32.mrf.mxu0  ;;  %v1650_v51 = vpop.f32.mrf.mxu1  ;;  %v836_v46 = vadd.f32 %v1945_v22, %v1964_v49  ;;  %v828_v53 = vadd.f32 %v1941_v12, %v1964_v49  ;;  %v839_v22 = vadd.f32 %v1947_v27, %v1964_v49 }
 0x12d   : > { %vm1033_vm14 = vcmp.gt.f32.partialorder %v949_v54, 0.0  ;;  %v1065_v56 = vmul.f32 0.01, %v949_v54  ;;  %v791_v61 = vadd.f32 %v1543_v57, %v1964_v49  ;;  %vm1032_vm15 = vcmp.gt.f32.partialorder %v944_v58, 0.0 }
 0x12e   : > { %1256 = vst.msk [vmem:[%s1973_s22 + $0x30] sm:$0xf] %vm1243_vm1, %v1460_v59  ;;  %v1064_v62 = vmul.f32 0.01, %v944_v58  ;;  %v1545_v0 = vpop.f32.mrf.mxu0  ;;  %v956_v1 = vpop.f32.mrf.mxu1  ;;  %v852_v59 = vadd.f32 %v1588_v36, %v1964_v49  ;;  %v844_v12 = vadd.f32 %v1949_v32, %v1964_v49 }
 0x12f   : > { %v1097_v2 = vsel %vm1033_vm14, %v949_v54, %v1065_v56  ;;  %v952_v3 = vadd.f32 %v1647_v45, %v791_v61  ;;  %v1546_v4 = vadd.f32 %v1545_v0, %v1544_v60  ;;  %v1591_v61 = vadd.f32 %v1959_v48, %v1957_v44 }
 0x130   : > { %v1462_v6 = vpack.c.bf16 %v1097_v2, %v1097_v2  ;;  %v1096_v7 = vsel %vm1032_vm15, %v944_v58, %v1064_v62  ;;  %v1547_v8 = vpop.f32.mrf.mxu0  ;;  %v1651_v63 = vpop.f32.mrf.mxu1 }
 0x131   : > { %vm1034_vm0 = vcmp.gt.f32.partialorder %v952_v3, 0.0  ;;  %v1066_v5 = vmul.f32 0.01, %v952_v3  ;;  %v1461_v9 = vpack.c.bf16 %v1096_v7, %v1096_v7  ;;  %v796_v10 = vadd.f32 %v1546_v4, %v1964_v49 }
 0x132   : > { %1258 = vst.msk [vmem:[%s1973_s22 + $0x38] sm:$0xf] %vm1243_vm1, %v1462_v6  ;;  %v1548_v11 = vpop.f32.mrf.mxu0  ;;  %v959_v13 = vpop.f32.mrf.mxu1 }
 0x133   : > { %v1098_v14 = vsel %vm1034_vm0, %v952_v3, %v1066_v5  ;;  %1257 = vst.msk [vmem:[%s1973_s22 + $0x34] sm:$0xf] %vm1243_vm1, %v1461_v9  ;;  %v957_v15 = vadd.f32 %v956_v1, %v796_v10  ;;  %v1549_v16 = vadd.f32 %v1548_v11, %v1547_v8 }
 0x134   : > { %v1463_v18 = vpack.c.bf16 %v1098_v14, %v1098_v14  ;;  %v1550_v19 = vpop.f32.mrf.mxu0  ;;  %v2019_v20 = vpop.f32.mrf.mxu1 }
 0x135   : > { %vm1035_vm2 = vcmp.gt.f32.partialorder %v957_v15, 0.0  ;;  %v1067_v21 = vmul.f32 0.01, %v957_v15  ;;  %v799_v23 = vadd.f32 %v1549_v16, %v1964_v49 }
 0x136   : > { %1259 = vst.msk [vmem:[%s1973_s22 + $0x3c] sm:$0xf] %vm1243_vm1, %v1463_v18  ;;  %v1551_v24 = vpop.f32.mrf.mxu0  ;;  %v972_v25 = vpop.f32.mrf.mxu1 }
 0x137   : > { %v1099_v26 = vsel %vm1035_vm2, %v957_v15, %v1067_v21  ;;  %v960_v28 = vadd.f32 %v959_v13, %v799_v23  ;;  %v1552_v29 = vadd.f32 %v1551_v24, %v1550_v19 }
 0x138   : > { %v1464_v30 = vpack.c.bf16 %v1099_v26, %v1099_v26  ;;  %v1553_v31 = vpop.f32.mrf.mxu0  ;;  %v2024_v33 = vpop.f32.mrf.mxu1 }
 0x139   : > { %vm1036_vm3 = vcmp.gt.f32.partialorder %v960_v28, 0.0  ;;  %v1068_v34 = vmul.f32 0.01, %v960_v28  ;;  %v804_v35 = vadd.f32 %v1552_v29, %v1964_v49 }
 0x13a   : > { %1260 = vst.msk [vmem:[%s1973_s22 + $0x40] sm:$0xf] %vm1243_vm1, %v1464_v30  ;;  %v1554_v38 = vpop.f32.mrf.mxu0  ;;  %v2031_v40 = vpop.f32.mrf.mxu1 }
 0x13b   : > { %v1100_v42 = vsel %vm1036_vm3, %v960_v28, %v1068_v34  ;;  %v965_v43 = vadd.f32 %v1650_v51, %v804_v35  ;;  %v1555_v45 = vadd.f32 %v1554_v38, %v1553_v31  ;;  %v855_v38 = vadd.f32 %v1591_v61, %v1964_v49 }
 0x13c   : > { %v1465_v47 = vpack.c.bf16 %v1100_v42, %v1100_v42  ;;  %v1556_v50 = vpop.f32.mrf.mxu0  ;;  %v1658_v52 = vpop.f32.mrf.mxu1 }
 0x13d   : > { %vm1037_vm4 = vcmp.gt.f32.partialorder %v965_v43, 0.0  ;;  %v1069_v41 = vmul.f32 0.01, %v965_v43  ;;  %v807_v54 = vadd.f32 %v1555_v45, %v1964_v49  ;;  %v997_v55 = vadd.f32 %v1658_v52, %v836_v46 }
 0x13e   : > { %1261 = vst.msk [vmem:[%s1973_s22 + $0x44] sm:$0xf] %vm1243_vm1, %v1465_v47  ;;  %v1557_v57 = vpop.f32.mrf.mxu0  ;;  %v988_v58 = vpop.f32.mrf.mxu1 }
 0x13f   : > { %v1101_v60 = vsel %vm1037_vm4, %v965_v43, %v1069_v41  ;;  %v968_v51 = vadd.f32 %v1651_v63, %v807_v54  ;;  %vm1045_vm5 = vcmp.gt.f32.partialorder %v997_v55, 0.0  ;;  %v1077_v56 = vmul.f32 0.01, %v997_v55 }
 0x140   : > { %v1466_v62 = vpack.c.bf16 %v1101_v60, %v1101_v60  ;;  %v1558_v0 = vadd.f32 %v1557_v57, %v1556_v50  ;;  %v989_v27 = vadd.f32 %v988_v58, %v828_v53  ;;  %v1559_v1 = vpop.f32.mrf.mxu0  ;;  %v1659_v2 = vpop.f32.mrf.mxu1 }
 0x141   : > { %vm1038_vm6 = vcmp.gt.f32.partialorder %v968_v51, 0.0  ;;  %v1070_v32 = vmul.f32 0.01, %v968_v51  ;;  %v1109_v3 = vsel %vm1045_vm5, %v997_v55, %v1077_v56  ;;  %v1000_v4 = vadd.f32 %v1659_v2, %v839_v22 }
 0x142   : > { %1262 = vst.msk [vmem:[%s1973_s22 + $0x48] sm:$0xf] %vm1243_vm1, %v1466_v62  ;;  %v1474_v37 = vpack.c.bf16 %v1109_v3, %v1109_v3  ;;  %v812_v6 = vadd.f32 %v1558_v0, %v1964_v49  ;;  %vm1043_vm7 = vcmp.gt.f32.partialorder %v989_v27, 0.0  ;;  %v1075_v7 = vmul.f32 0.01, %v989_v27  ;;  %v1560_v8 = vpop.f32.mrf.mxu0  ;;  %v991_v63 = vpop.f32.mrf.mxu1 }
 0x143   : > { %v1102_v44 = vsel %vm1038_vm6, %v968_v51, %v1070_v32  ;;  %vm1046_vm8 = vcmp.gt.f32.partialorder %v1000_v4, 0.0  ;;  %v1078_v48 = vmul.f32 0.01, %v1000_v4  ;;  %v1561_v5 = vadd.f32 %v1560_v8, %v1559_v1 }
 0x144   : > { %v1467_v9 = vpack.c.bf16 %v1102_v44, %v1102_v44  ;;  %1270 = vst.msk [vmem:[%s1973_s22 + $0x68] sm:$0xf] %vm1243_vm1, %v1474_v37  ;;  %v973_v10 = vadd.f32 %v972_v25, %v812_v6  ;;  %v1107_v11 = vsel %vm1043_vm7, %v989_v27, %v1075_v7  ;;  %v992_v13 = vadd.f32 %v991_v63, %v831_v39  ;;  %v1562_v14 = vpop.f32.mrf.mxu0  ;;  %v1662_v15 = vpop.f32.mrf.mxu1 }
 0x145   : > { %v1472_v16 = vpack.c.bf16 %v1107_v11, %v1107_v11  ;;  %v1110_v18 = vsel %vm1046_vm8, %v1000_v4, %v1078_v48  ;;  %v815_v19 = vadd.f32 %v1561_v5, %v1964_v49  ;;  %v1013_v21 = vadd.f32 %v1662_v15, %v852_v59 }
 0x146   : > { %1263 = vst.msk [vmem:[%s1973_s22 + $0x4c] sm:$0xf] %vm1243_vm1, %v1467_v9  ;;  %vm1039_vm9 = vcmp.gt.f32.partialorder %v973_v10, 0.0  ;;  %v1071_v23 = vmul.f32 0.01, %v973_v10  ;;  %v1475_v24 = vpack.c.bf16 %v1110_v18, %v1110_v18  ;;  %vm1044_vm10 = vcmp.gt.f32.partialorder %v992_v13, 0.0  ;;  %v1563_v26 = vpop.f32.mrf.mxu0  ;;  %v1004_v28 = vpop.f32.mrf.mxu1 }
 0x147   : > { %1268 = vst.msk [vmem:[%s1973_s22 + $0x60] sm:$0xf] %vm1243_vm1, %v1472_v16  ;;  %v976_v25 = vadd.f32 %v2031_v40, %v815_v19  ;;  %v1076_v29 = vmul.f32 0.01, %v992_v13  ;;  %vm1049_vm11 = vcmp.gt.f32.partialorder %v1013_v21, 0.0  ;;  %v1564_v34 = vadd.f32 %v1563_v26, %v1562_v14 }
 0x148   : > { %v1081_v30 = vmul.f32 0.01, %v1013_v21  ;;  %v1103_v31 = vsel %vm1039_vm9, %v973_v10, %v1071_v23  ;;  %1271 = vst.msk [vmem:[%s1973_s22 + $0x6c] sm:$0xf] %vm1243_vm1, %v1475_v24  ;;  %v1005_v35 = vadd.f32 %v1004_v28, %v844_v12  ;;  %v1565_v36 = vpop.f32.mrf.mxu0  ;;  %v1663_v42 = vpop.f32.mrf.mxu1 }
 0x149   : > { %v1468_v43 = vpack.c.bf16 %v1103_v31, %v1103_v31  ;;  %vm1040_vm12 = vcmp.gt.f32.partialorder %v976_v25, 0.0  ;;  %v1072_v45 = vmul.f32 0.01, %v976_v25  ;;  %v1108_v46 = vsel %vm1044_vm10, %v992_v13, %v1076_v29 }
 0x14a   : > { %v1473_v40 = vpack.c.bf16 %v1108_v46, %v1108_v46  ;;  %v1113_v47 = vsel %vm1049_vm11, %v1013_v21, %v1081_v30  ;;  %v820_v50 = vadd.f32 %v1564_v34, %v1964_v49  ;;  %vm1047_vm13 = vcmp.gt.f32.partialorder %v1005_v35, 0.0  ;;  %v1566_v52 = vpop.f32.mrf.mxu0  ;;  %v1007_v53 = vpop.f32.mrf.mxu1 }
 0x14b   : > { %1264 = vst.msk [vmem:[%s1973_s22 + $0x50] sm:$0xf] %vm1243_vm1, %v1468_v43  ;;  %v1104_v39 = vsel %vm1040_vm12, %v976_v25, %v1072_v45  ;;  %v1478_v41 = vpack.c.bf16 %v1113_v47, %v1113_v47  ;;  %v1079_v54 = vmul.f32 0.01, %v1005_v35  ;;  %v1016_v55 = vadd.f32 %v1663_v42, %v855_v38 }
 0x14c   : > { %v1469_v57 = vpack.c.bf16 %v1104_v39, %v1104_v39  ;;  %1269 = vst.msk [vmem:[%s1973_s22 + $0x64] sm:$0xf] %vm1243_vm1, %v1473_v40  ;;  %v981_v58 = vadd.f32 %v2019_v20, %v820_v50  ;;  %v1567_v22 = vadd.f32 %v1566_v52, %v1565_v36  ;;  %v1008_v59 = vadd.f32 %v1007_v53, %v2049_v17 }
 0x14d   : > { %1274 = vst.msk [vmem:[%s1973_s22 + $0x78] sm:$0xf] %vm1243_vm1, %v1478_v41  ;;  %v1111_v12 = vsel %vm1047_vm13, %v1005_v35, %v1079_v54  ;;  %vm1050_vm14 = vcmp.gt.f32.partialorder %v1016_v55, 0.0  ;;  %v1082_v60 = vmul.f32 0.01, %v1016_v55 }
 0x14e   : > { %1265 = vst.msk [vmem:[%s1973_s22 + $0x54] sm:$0xf] %vm1243_vm1, %v1469_v57  ;;  %vm1041_vm15 = vcmp.gt.f32.partialorder %v981_v58, 0.0  ;;  %v1073_v51 = vmul.f32 0.01, %v981_v58  ;;  %v1476_v56 = vpack.c.bf16 %v1111_v12, %v1111_v12  ;;  %v823_v61 = vadd.f32 %v1567_v22, %v1964_v49 }
 0x14f   : > { %v1114_v20 = vsel %vm1050_vm14, %v1016_v55, %v1082_v60  ;;  %vm1048_vm0 = vcmp.gt.f32.partialorder %v1008_v59, 0.0  ;;  %v1080_v62 = vmul.f32 0.01, %v1008_v59 }
 0x150   : > { %v1105_v17 = vsel %vm1041_vm15, %v981_v58, %v1073_v51  ;;  %1272 = vst.msk [vmem:[%s1973_s22 + $0x70] sm:$0xf] %vm1243_vm1, %v1476_v56  ;;  %v1479_v0 = vpack.c.bf16 %v1114_v20, %v1114_v20  ;;  %v984_v27 = vadd.f32 %v2024_v33, %v823_v61 }
 0x151   : > { %v1470_v1 = vpack.c.bf16 %v1105_v17, %v1105_v17  ;;  %v1112_v2 = vsel %vm1048_vm0, %v1008_v59, %v1080_v62 }
 0x152   : > { %1275 = vst.msk [vmem:[%s1973_s22 + $0x7c] sm:$0xf] %vm1243_vm1, %v1479_v0  ;;  %vm1042_vm2 = vcmp.gt.f32.partialorder %v984_v27, 0.0  ;;  %v1074_v32 = vmul.f32 0.01, %v984_v27  ;;  %v1477_v3 = vpack.c.bf16 %v1112_v2, %v1112_v2 }
 0x153   : > { %1266 = vst.msk [vmem:[%s1973_s22 + $0x58] sm:$0xf] %vm1243_vm1, %v1470_v1 }
 0x154   : > { %v1106_v49 = vsel %vm1042_vm2, %v984_v27, %v1074_v32  ;;  %1273 = vst.msk [vmem:[%s1973_s22 + $0x74] sm:$0xf] %vm1243_vm1, %v1477_v3 }
 0x155   : > { %v1471_v4 = vpack.c.bf16 %v1106_v49, %v1106_v49 }
 0x157   : > { %1267 = vst.msk [vmem:[%s1973_s22 + $0x5c] sm:$0xf] %vm1243_vm1, %v1471_v4 }
 0x158 PF: > { %s13_s12 = sadd.s32 1, %s1783_s12  }
 0x159   : > { %p10_p4 = scmp.ge.s32.totalorder %s13_s12, 5  }
 0x15b   :  { %12 = sbr.rel (!%p10_p4) target bundleno = 1 (0x1), region = 62 }

// kernel: jepa_forward.8
= control target key start
LH: loop header
LB: loop body
LE: loop exit
PB: predicated region body
PF: predicated region fallthrough
CT: control target
= control target key end

     0   :  { %v1820_v23 = vmov 0.0   ;;  %vm1821_vm0 = vmmov 0   ;;  %s2307_s1 = inlined_call_operand.vmem [shape: bf16[640,128], index: 1, kind: input, shape index: {}]   ;;  %s2308_s0 = inlined_call_operand.vmem [shape: bf16[176,640], index: 0, kind: input, shape index: {}]   ;;  %s2309_s2 = inlined_call_operand.vmem [shape: f32[1,128], index: 2, kind: input, shape index: {}]   ;;  %s2310_s3 = inlined_call_operand.vmem [shape: bf16[176,128], index: 3, kind: output, shape index: {}]  }
   0x1   :  { %v1703_v0 = vld [vmem:[%s2307_s1 + $0x78] sm:$0xff]   ;;  %v1705_v2 = vld [vmem:[%s2307_s1 + $0x70] sm:$0xff]   ;;  %v1707_v4 = vld [vmem:[%s2307_s1 + $0x68] sm:$0xff]  }
   0x2   :  { %v1704_v1 = vld [vmem:[%s2307_s1 + $0x38] sm:$0xff]   ;;  %1442 = vmatprep.subr.bf16.mxu0 %v1703_v0  ;;  %1685 = vmatprep.subr.bf16.mxu1 %v1703_v0  ;;  %v1706_v3 = vld [vmem:[%s2307_s1 + $0x30] sm:$0xff]   ;;  %v1708_v5 = vld [vmem:[%s2307_s1 + $0x28] sm:$0xff]  }
   0x3   :  { %1443 = vmatpush3.bf16.msra.mxu0 %v1704_v1  ;;  %1693 = vmatpush3.bf16.msra.mxu1 %v1704_v1  ;;  %v1709_v6 = vld [vmem:[%s2307_s1 + $0x60] sm:$0xff]   ;;  %v1711_v8 = vld [vmem:[%s2307_s1 + $0x58] sm:$0xff]   ;;  %v1713_v10 = vld [vmem:[%s2307_s1 + $0x50] sm:$0xff]  }
   0x4   :  { %1444 = vmatprep.subr.bf16.mxu0 %v1705_v2  ;;  %1686 = vmatprep.subr.bf16.mxu1 %v1705_v2  ;;  %v1710_v7 = vld [vmem:[%s2307_s1 + $0x20] sm:$0xff]   ;;  %v1712_v9 = vld [vmem:[%s2307_s1 + $0x18] sm:$0xff]   ;;  %v1724_v12 = vld [vmem:[%s2308_s0 + $0xf4] ss:$20 sps:$4 sm:$0xff]  }
   0x5   :  { %v1721_v11 = vld [vmem:[%s2308_s0 + $0x4] ss:$20 sps:$4 sm:$0xff]   ;;  %v1714_v13 = vld [vmem:[%s2307_s1 + $0x10] sm:$0xff]   ;;  %v1715_v14 = vld [vmem:[%s2307_s1 + $0x48] sm:$0xff]   ;;  %774 = vmatprep.mubr.bf16.mxu1 %v1724_v12 }
   0x6   :  { %726 = vmatprep.mubr.bf16.mxu0 %v1721_v11  ;;  %v1716_v15 = vld [vmem:[%s2307_s1 + $0x8] sm:$0xff]   ;;  %v1717_v16 = vld [vmem:[%s2307_s1 + $0x40] sm:$0xff]   ;;  %v1726_v19 = vld [vmem:[%s2307_s1 + $0xf8] sm:$0xff]  }
   0x7   :  { %1445 = vmatpush3.bf16.msra.mxu0 %v1706_v3  ;;  %1694 = vmatpush3.bf16.msra.mxu1 %v1706_v3  ;;  %v1718_v17 = vld [vmem:[%s2307_s1] sm:$0xff]   ;;  %v1725_v21 = vld [vmem:[%s2307_s1 + $0x138] sm:$0xff]   ;;  %v1732_v26 = vld [vmem:[%s2307_s1 + $0xf0] sm:$0xff]  }
   0x8   :  { %1446 = vmatprep.subr.bf16.mxu0 %v1707_v4  ;;  %1687 = vmatprep.subr.bf16.mxu1 %v1707_v4  ;;  %v1719_v18 = vld [vmem:[%s2308_s0] ss:$20 sps:$4 sm:$0xff]   ;;  %v1722_v20 = vld [vmem:[%s2308_s0 + $0xf0] ss:$20 sps:$4 sm:$0xff]   ;;  %v1727_v22 = vld [vmem:[%s2307_s1 + $0xb8] sm:$0xff]  }
   0x9   :  { %v1728_v24 = vld [vmem:[%s2308_s0 + $0x2c] ss:$20 sps:$4 sm:$0xff]   ;;  %v1730_v25 = vld [vmem:[%s2308_s0 + $0x11c] ss:$20 sps:$4 sm:$0xff]   ;;  %v1740_v34 = vld [vmem:[%s2308_s0 + $0x54] ss:$20 sps:$4 sm:$0xff]  }
   0xa   :  { %v1733_v27 = vld [vmem:[%s2307_s1 + $0x130] sm:$0xff]   ;;  %v1734_v29 = vld [vmem:[%s2308_s0 + $0x28] ss:$20 sps:$4 sm:$0xff]   ;;  %v1735_v31 = vld [vmem:[%s2308_s0 + $0x118] ss:$20 sps:$4 sm:$0xff]  }
   0xb   :  { %1447 = vmatpush3.bf16.msra.mxu0 %v1708_v5  ;;  %1695 = vmatpush3.bf16.msra.mxu1 %v1708_v5  ;;  %v1736_v28 = vld [vmem:[%s2307_s1 + $0xb0] sm:$0xff]   ;;  %v1737_v30 = vld [vmem:[%s2307_s1 + $0xe8] sm:$0xff]   ;;  %v1742_v35 = vld [vmem:[%s2308_s0 + $0x144] ss:$20 sps:$4 sm:$0xff]  }
   0xc   :  { %1448 = vmatprep.subr.bf16.mxu0 %v1709_v6  ;;  %1688 = vmatprep.subr.bf16.mxu1 %v1709_v6  ;;  %v1738_v32 = vld [vmem:[%s2307_s1 + $0xa8] sm:$0xff]   ;;  %v1746_v36 = vld [vmem:[%s2307_s1 + $0xe0] sm:$0xff]   ;;  %v1749_v40 = vld [vmem:[%s2307_s1 + $0xd8] sm:$0xff]  }
   0xd   :  { %v1739_v33 = vld [vmem:[%s2307_s1 + $0x128] sm:$0xff]   ;;  %v1747_v37 = vld [vmem:[%s2307_s1 + $0xa0] sm:$0xff]   ;;  %v1750_v42 = vld [vmem:[%s2308_s0 + $0x7c] ss:$20 sps:$4 sm:$0xff]  }
   0xe   :  { %v1748_v38 = vld [vmem:[%s2307_s1 + $0x120] sm:$0xff]   ;;  %v1754_v44 = vld [vmem:[%s2307_s1 + $0x98] sm:$0xff]   ;;  %v1758_v46 = vld [vmem:[%s2307_s1 + $0xd0] sm:$0xff]  }
   0xf   :  { %1449 = vmatpush3.bf16.msra.mxu0 %v1710_v7  ;;  %1696 = vmatpush3.bf16.msra.mxu1 %v1710_v7  ;;  %v1744_v39 = vld [vmem:[%s2308_s0 + $0x50] ss:$20 sps:$4 sm:$0xff]   ;;  %v1745_v41 = vld [vmem:[%s2308_s0 + $0x140] ss:$20 sps:$4 sm:$0xff]   ;;  %v1757_v45 = vld [vmem:[%s2307_s1 + $0x118] sm:$0xff]  }
  0x10   :  { %1450 = vmatprep.subr.bf16.mxu0 %v1711_v8  ;;  %1689 = vmatprep.subr.bf16.mxu1 %v1711_v8  ;;  %v1752_v43 = vld [vmem:[%s2308_s0 + $0x16c] ss:$20 sps:$4 sm:$0xff]   ;;  %v1759_v47 = vld [vmem:[%s2307_s1 + $0x90] sm:$0xff]   ;;  %v1756_v51 = vld [vmem:[%s2308_s0 + $0x168] ss:$20 sps:$4 sm:$0xff]  }
  0x11   :  { %v1755_v48 = vld [vmem:[%s2308_s0 + $0x78] ss:$20 sps:$4 sm:$0xff]   ;;  %v1764_v49 = vld [vmem:[%s2307_s1 + $0x110] sm:$0xff]   ;;  %v1769_v56 = vld [vmem:[%s2307_s1 + $0xc0] sm:$0xff]  }
  0x12   :  { %v1767_v50 = vld [vmem:[%s2307_s1 + $0xc8] sm:$0xff]   ;;  %v1760_v52 = vld [vmem:[%s2308_s0 + $0xa4] ss:$20 sps:$4 sm:$0xff]   ;;  %v1765_v59 = vld [vmem:[%s2308_s0 + $0xa0] ss:$20 sps:$4 sm:$0xff]  }
  0x13   :  { %1451 = vmatpush3.bf16.msra.mxu0 %v1712_v9  ;;  %1697 = vmatpush3.bf16.msra.mxu1 %v1712_v9  ;;  %v1762_v53 = vld [vmem:[%s2308_s0 + $0x194] ss:$20 sps:$4 sm:$0xff]   ;;  %v1770_v57 = vld [vmem:[%s2307_s1 + $0x80] sm:$0xff]   ;;  %v1783_v4 = vld [vmem:[%s2308_s0 + $0x5c] ss:$20 sps:$4 sm:$0xff]  }
  0x14   :  { %1452 = vmatprep.subr.bf16.mxu0 %v1713_v10  ;;  %1690 = vmatprep.subr.bf16.mxu1 %v1713_v10  ;;  %v1768_v54 = vld [vmem:[%s2307_s1 + $0x88] sm:$0xff]   ;;  %v1778_v58 = vld [vmem:[%s2307_s1 + $0x100] sm:$0xff]  }
  0x15   :  { %v1771_v55 = vld [vmem:[%s2307_s1 + $0x108] sm:$0xff]   ;;  %v1766_v60 = vld [vmem:[%s2308_s0 + $0x190] ss:$20 sps:$4 sm:$0xff]   ;;  %v1789_v8 = vld [vmem:[%s2308_s0 + $0x80] ss:$20 sps:$4 sm:$0xff]  }
  0x16   :  { %v1772_v61 = vld [vmem:[%s2308_s0 + $0xcc] ss:$20 sps:$4 sm:$0xff]   ;;  %v1774_v63 = vld [vmem:[%s2308_s0 + $0x8] ss:$20 sps:$4 sm:$0xff]   ;;  %v1781_v2 = vld [vmem:[%s2308_s0 + $0x30] ss:$20 sps:$4 sm:$0xff]  }
  0x17   :  { %1453 = vmatpush3.bf16.msra.mxu0 %v1714_v13  ;;  %1698 = vmatpush3.bf16.msra.mxu1 %v1714_v13  ;;  %v1776_v62 = vld [vmem:[%s2308_s0 + $0xc] ss:$20 sps:$4 sm:$0xff]   ;;  %v1777_v0 = vld [vmem:[%s2308_s0 + $0xc8] ss:$20 sps:$4 sm:$0xff]   ;;  %v1782_v3 = vld [vmem:[%s2308_s0 + $0x10] ss:$20 sps:$4 sm:$0xff]  }
  0x18   :  { %1454 = vmatprep.subr.bf16.mxu0 %v1715_v14  ;;  %1691 = vmatprep.subr.bf16.mxu1 %v1715_v14  ;;  %v1779_v1 = vld [vmem:[%s2308_s0 + $0x34] ss:$20 sps:$4 sm:$0xff]   ;;  %v1785_v5 = vld [vmem:[%s2308_s0 + $0x58] ss:$20 sps:$4 sm:$0xff]   ;;  %v1797_v14 = vld [vmem:[%s2308_s0 + $0xd0] ss:$20 sps:$4 sm:$0xff]  }
  0x19   :  { %v1786_v6 = vld [vmem:[%s2308_s0 + $0x38] ss:$20 sps:$4 sm:$0xff]   ;;  %v1790_v9 = vld [vmem:[%s2308_s0 + $0x60] ss:$20 sps:$4 sm:$0xff]   ;;  %v1793_v11 = vld [vmem:[%s2308_s0 + $0xa8] ss:$20 sps:$4 sm:$0xff]  }
  0x1a   :  { %v1787_v7 = vld [vmem:[%s2308_s0 + $0x84] ss:$20 sps:$4 sm:$0xff]   ;;  %v1791_v10 = vld [vmem:[%s2308_s0 + $0xac] ss:$20 sps:$4 sm:$0xff]   ;;  %v1794_v12 = vld [vmem:[%s2308_s0 + $0x88] ss:$20 sps:$4 sm:$0xff]  }
  0x1b   :  { %1455 = vmatpush3.bf16.msra.mxu0 %v1716_v15  ;;  %1699 = vmatpush3.bf16.msra.mxu1 %v1716_v15  ;;  %v1795_v13 = vld [vmem:[%s2308_s0 + $0xd4] ss:$20 sps:$4 sm:$0xff]   ;;  %v1798_v15 = vld [vmem:[%s2308_s0 + $0xb0] ss:$20 sps:$4 sm:$0xff]  }
  0x1c   :  { %1456 = vmatprep.subr.bf16.mxu0 %v1717_v16  ;;  %1692 = vmatprep.subr.bf16.mxu1 %v1717_v16  ;;  %v1799_v16 = vld [vmem:[%s2308_s0 + $0xfc] ss:$20 sps:$4 sm:$0xff]  }
  0x1f   :  { %1457 = vmatpush3.bf16.msra.mxu0 %v1718_v17  ;;  %1700 = vmatpush3.bf16.msra.mxu1 %v1718_v17  ;;  %v1801_v17 = vld [vmem:[%s2308_s0 + $0xf8] ss:$20 sps:$4 sm:$0xff]  }
  0x20   :  { %1625 = vmatprep.subr.bf16.mxu0 %v1820_v23  ;;  %1524 = vmatprep.subr.bf16.mxu1 %v1726_v19  ;;  %v1803_v19 = vld [vmem:[%s2308_s0 + $0x124] ss:$20 sps:$4 sm:$0xff]  }
  0x22   :  { %727 = vmatmul.mubr.bf16.vlgmr.msra.gmra.mxu0 %v1719_v18  ;;  %775 = vmatmul.mubr.bf16.vlgmr.msra.gmra.mxu1 %v1722_v20  ;;  %v1802_v18 = vld [vmem:[%s2308_s0 + $0xd8] ss:$20 sps:$4 sm:$0xff]   ;;  %v1805_v20 = vld [vmem:[%s2308_s0 + $0x120] ss:$20 sps:$4 sm:$0xff]  }
  0x23   :  { %1626 = vmatpush3.bf16.msra.mxu0 %v1725_v21  ;;  %1525 = vmatpush3.bf16.msra.mxu1 %v1727_v22  ;;  %v1806_v21 = vld [vmem:[%s2308_s0 + $0x100] ss:$20 sps:$4 sm:$0xff]  }
  0x24   :  { %1627 = vmatprep.subr.bf16.mxu0 %v1820_v23  ;;  %734 = vmatprep.mubr.bf16.mxu0 %v1728_v24  ;;  %v1807_v22 = vld [vmem:[%s2308_s0 + $0x14c] ss:$20 sps:$4 sm:$0xff]   ;;  %v1809_v24 = vld [vmem:[%s2308_s0 + $0x148] ss:$20 sps:$4 sm:$0xff]  }
  0x25   :  { %782 = vmatprep.mubr.bf16.mxu1 %v1730_v25  ;;  %1526 = vmatprep.subr.bf16.mxu1 %v1732_v26  ;;  %v1810_v25 = vld [vmem:[%s2308_s0 + $0x128] ss:$20 sps:$4 sm:$0xff]  }
  0x26   :  { %v1811_v26 = vld [vmem:[%s2308_s0 + $0x174] ss:$20 sps:$4 sm:$0xff]  }
  0x27   :  { %1628 = vmatpush3.bf16.msra.mxu0 %v1733_v27  ;;  %1527 = vmatpush3.bf16.msra.mxu1 %v1736_v28  ;;  %v1813_v27 = vld [vmem:[%s2308_s0 + $0x170] ss:$20 sps:$4 sm:$0xff]  }
  0x28   :  { %1528 = vmatprep.subr.bf16.mxu1 %v1737_v30  ;;  %1629 = vmatprep.subr.bf16.mxu0 %v1820_v23  ;;  %v1814_v28 = vld [vmem:[%s2308_s0 + $0x150] ss:$20 sps:$4 sm:$0xff]   ;;  %v1817_v30 = vld [vmem:[%s2308_s0 + $0x198] ss:$20 sps:$4 sm:$0xff]  }
  0x2a   :  { %735 = vmatmul.mubr.bf16.gmra.mxu0 %v1734_v29  ;;  %783 = vmatmul.mubr.bf16.gmra.mxu1 %v1735_v31  ;;  %v1815_v29 = vld [vmem:[%s2308_s0 + $0x19c] ss:$20 sps:$4 sm:$0xff]   ;;  %v1818_v31 = vld [vmem:[%s2308_s0 + $0x178] ss:$20 sps:$4 sm:$0xff]  }
  0x2b   :  { %1529 = vmatpush3.bf16.msra.mxu1 %v1738_v32  ;;  %1630 = vmatpush3.bf16.msra.mxu0 %v1739_v33  ;;  %v1819_v32 = vld [vmem:[%s2308_s0 + $0x1a0] ss:$20 sps:$4 sm:$0xff]  }
  0x2c   :  { %742 = vmatprep.mubr.bf16.mxu0 %v1740_v34  ;;  %790 = vmatprep.mubr.bf16.mxu1 %v1742_v35 }
  0x2d   :  { %1530 = vmatprep.subr.bf16.mxu1 %v1746_v36  ;;  %1631 = vmatprep.subr.bf16.mxu0 %v1820_v23 }
  0x2f   :  { %1531 = vmatpush3.bf16.msra.mxu1 %v1747_v37  ;;  %1632 = vmatpush3.bf16.msra.mxu0 %v1748_v38 }
  0x30   :  { %1532 = vmatprep.subr.bf16.mxu1 %v1749_v40  ;;  %1633 = vmatprep.subr.bf16.mxu0 %v1820_v23 }
  0x32   :  { %743 = vmatmul.mubr.bf16.gmra.mxu0 %v1744_v39  ;;  %791 = vmatmul.mubr.bf16.gmra.mxu1 %v1745_v41 }
  0x33   :  { %750 = vmatprep.mubr.bf16.mxu0 %v1750_v42  ;;  %798 = vmatprep.mubr.bf16.mxu1 %v1752_v43 }
  0x34   :  { %1533 = vmatpush3.bf16.msra.mxu1 %v1754_v44  ;;  %1634 = vmatpush3.bf16.msra.mxu0 %v1757_v45 }
  0x35   :  { %1534 = vmatprep.subr.bf16.mxu1 %v1758_v46  ;;  %1635 = vmatprep.subr.bf16.mxu0 %v1820_v23 }
  0x38   :  { %1535 = vmatpush3.bf16.msra.mxu1 %v1759_v47  ;;  %1636 = vmatpush3.bf16.msra.mxu0 %v1764_v49 }
  0x39   :  { %1536 = vmatprep.subr.bf16.mxu1 %v1767_v50  ;;  %1637 = vmatprep.subr.bf16.mxu0 %v1820_v23 }
  0x3a   :  { %751 = vmatmul.mubr.bf16.gmra.mxu0 %v1755_v48  ;;  %799 = vmatmul.mubr.bf16.gmra.mxu1 %v1756_v51 }
  0x3b   :  { %758 = vmatprep.mubr.bf16.mxu0 %v1760_v52  ;;  %806 = vmatprep.mubr.bf16.mxu1 %v1762_v53 }
  0x3c   :  { %1537 = vmatpush3.bf16.msra.mxu1 %v1768_v54  ;;  %1638 = vmatpush3.bf16.msra.mxu0 %v1771_v55 }
  0x3d   :  { %1538 = vmatprep.subr.bf16.mxu1 %v1769_v56  ;;  %1639 = vmatprep.subr.bf16.mxu0 %v1820_v23 }
  0x40   :  { %1539 = vmatpush3.bf16.msra.mxu1 %v1770_v57  ;;  %1640 = vmatpush3.bf16.msra.mxu0 %v1778_v58  ;;  %v2180_v57 = vld [vmem:[%s2309_s2] ss:$0 sm:$0xff] }
  0x42   :  { %759 = vmatmul.mubr.bf16.gmra.mxu0 %v1765_v59  ;;  %807 = vmatmul.mubr.bf16.gmra.mxu1 %v1766_v60 }
  0x43   :  { %766 = vmatprep.mubr.bf16.mxu0 %v1772_v61  ;;  %847 = vmatprep.mubr.bf16.mxu1 %v1776_v62 }
  0x4a   :  { %767 = vmatmul.mubr.bf16.gmra.mxu0 %v1777_v0  ;;  %848 = vmatmul.mubr.bf16.vlgmr.msra.gmra.mxu1 %v1774_v63 }
  0x4b   :  { %855 = vmatprep.mubr.bf16.mxu1 %v1779_v1  ;;  %1641 = vmatprep.mubr.msk.bf16.mxu0 %vm1821_vm0, %v1820_v23 }
  0x52   :  { %856 = vmatmul.mubr.bf16.gmra.mxu1 %v1781_v2  ;;  %1642 = vmatmul.mubr.bf16.vlgmr.msra.gmra.mxu0 %v1782_v3 }
  0x53   :  { %863 = vmatprep.mubr.bf16.mxu1 %v1783_v4  ;;  %1645 = vmatprep.mubr.msk.bf16.mxu0 %vm1821_vm0, %v1820_v23 }
  0x5a   :  { %864 = vmatmul.mubr.bf16.gmra.mxu1 %v1785_v5  ;;  %1646 = vmatmul.mubr.bf16.gmra.mxu0 %v1786_v6 }
  0x5b   :  { %871 = vmatprep.mubr.bf16.mxu1 %v1787_v7  ;;  %1649 = vmatprep.mubr.msk.bf16.mxu0 %vm1821_vm0, %v1820_v23 }
  0x62   :  { %872 = vmatmul.mubr.bf16.gmra.mxu1 %v1789_v8  ;;  %1650 = vmatmul.mubr.bf16.gmra.mxu0 %v1790_v9 }
  0x63   :  { %879 = vmatprep.mubr.bf16.mxu1 %v1791_v10  ;;  %1653 = vmatprep.mubr.msk.bf16.mxu0 %vm1821_vm0, %v1820_v23 }
  0x6a   :  { %880 = vmatmul.mubr.bf16.gmra.mxu1 %v1793_v11  ;;  %1654 = vmatmul.mubr.bf16.gmra.mxu0 %v1794_v12 }
  0x6b   :  { %887 = vmatprep.mubr.bf16.mxu1 %v1795_v13  ;;  %1657 = vmatprep.mubr.msk.bf16.mxu0 %vm1821_vm0, %v1820_v23 }
  0x72   :  { %888 = vmatmul.mubr.bf16.gmra.mxu1 %v1797_v14  ;;  %1658 = vmatmul.mubr.bf16.gmra.mxu0 %v1798_v15 }
  0x73   :  { %895 = vmatprep.mubr.bf16.mxu1 %v1799_v16  ;;  %1661 = vmatprep.mubr.msk.bf16.mxu0 %vm1821_vm0, %v1820_v23 }
  0x7a   :  { %896 = vmatmul.mubr.bf16.gmra.mxu1 %v1801_v17  ;;  %1662 = vmatmul.mubr.bf16.gmra.mxu0 %v1802_v18 }
  0x7b   :  { %903 = vmatprep.mubr.bf16.mxu1 %v1803_v19  ;;  %1665 = vmatprep.mubr.msk.bf16.mxu0 %vm1821_vm0, %v1820_v23 }
  0x82   :  { %904 = vmatmul.mubr.bf16.gmra.mxu1 %v1805_v20  ;;  %1666 = vmatmul.mubr.bf16.gmra.mxu0 %v1806_v21 }
  0x83   :  { %911 = vmatprep.mubr.bf16.mxu1 %v1807_v22  ;;  %1669 = vmatprep.mubr.msk.bf16.mxu0 %vm1821_vm0, %v1820_v23 }
  0x8a   :  { %912 = vmatmul.mubr.bf16.gmra.mxu1 %v1809_v24  ;;  %1670 = vmatmul.mubr.bf16.gmra.mxu0 %v1810_v25 }
  0x8b   :  { %919 = vmatprep.mubr.bf16.mxu1 %v1811_v26  ;;  %1673 = vmatprep.mubr.msk.bf16.mxu0 %vm1821_vm0, %v1820_v23 }
  0x92   :  { %920 = vmatmul.mubr.bf16.gmra.mxu1 %v1813_v27  ;;  %1674 = vmatmul.mubr.bf16.gmra.mxu0 %v1814_v28 }
  0x93   :  { %927 = vmatprep.mubr.bf16.mxu1 %v1815_v29  ;;  %1677 = vmatprep.mubr.msk.bf16.mxu0 %vm1821_vm0, %v1820_v23 }
  0x9a   :  { %928 = vmatmul.mubr.bf16.gmra.mxu1 %v1817_v30  ;;  %1678 = vmatmul.mubr.bf16.gmra.mxu0 %v1818_v31 }
  0x9b   :  { %1681 = vmatprep.mubr.msk.bf16.mxu0 %vm1821_vm0, %v1820_v23 }
  0xa2   :  { %1682 = vmatmul.mubr.bf16.gmra.mxu0 %v1819_v32 }
  0xe2   :  { %v1458_v33 = vpop.f32.mrf.mxu0  ;;  %v1494_v34 = vpop.f32.mrf.mxu1 }
  0xe4   :  { %v1459_v35 = vpop.f32.mrf.mxu0  ;;  %v1495_v36 = vpop.f32.mrf.mxu1 }
  0xe5   :  { %v2157_v37 = vadd.f32 %v1495_v36, %v1494_v34  ;;  %v1460_v27 = vadd.f32 %v1459_v35, %v1458_v33 }
  0xe6   :  { %v1461_v38 = vpop.f32.mrf.mxu0  ;;  %v1497_v39 = vpop.f32.mrf.mxu1 }
  0xe7   :  { %v729_v36 = vadd.f32 %v1460_v27, %v2180_v57 }
  0xe8   :  { %v1462_v40 = vpop.f32.mrf.mxu0  ;;  %v1498_v41 = vpop.f32.mrf.mxu1 }
  0xe9   :  { %v2159_v42 = vadd.f32 %v1498_v41, %v1497_v39  ;;  %v1463_v39 = vadd.f32 %v1462_v40, %v1461_v38 }
  0xea   :  { %v2161_v43 = vpop.f32.mrf.mxu0  ;;  %v1500_v23 = vpop.f32.mrf.mxu1 }
  0xeb   :  { %v732_v35 = vadd.f32 %v1463_v39, %v2180_v57 }
  0xec   :  { %v2163_v44 = vpop.f32.mrf.mxu0  ;;  %v1501_v45 = vpop.f32.mrf.mxu1 }
  0xed   :  { %v2165_v46 = vadd.f32 %v1501_v45, %v1500_v23 }
  0xee   :  { %v2167_v47 = vpop.f32.mrf.mxu0  ;;  %v1503_v48 = vpop.f32.mrf.mxu1 }
  0xf0   :  { %v2169_v49 = vpop.f32.mrf.mxu0  ;;  %v1504_v50 = vpop.f32.mrf.mxu1 }
  0xf1   :  { %v2171_v51 = vadd.f32 %v1504_v50, %v1503_v48  ;;  %v1469_v38 = vadd.f32 %v2169_v49, %v2167_v47 }
  0xf2   :  { %v2173_v52 = vpop.f32.mrf.mxu0  ;;  %v1506_v53 = vpop.f32.mrf.mxu1 }
  0xf4   :  { %v2175_v54 = vpop.f32.mrf.mxu0  ;;  %v1507_v55 = vpop.f32.mrf.mxu1 }
  0xf5   :  { %v1508_v56 = vadd.f32 %v1507_v55, %v1506_v53  ;;  %v1466_v53 = vadd.f32 %v2163_v44, %v2161_v43  ;;  %v1472_v47 = vadd.f32 %v2175_v54, %v2173_v52 }
  0xf6   :  { %v2182_v58 = vpop.f32.mrf.mxu0  ;;  %v1509_v59 = vpop.f32.mrf.mxu1 }
  0xf7   :  { %v2185_v60 = vadd.f32 %v1508_v56, %v2180_v57 }
  0xf8   :  { %v2187_v61 = vpop.f32.mrf.mxu0  ;;  %v1510_v62 = vpop.f32.mrf.mxu1 }
  0xf9   :  { %v1511_v63 = vadd.f32 %v1510_v62, %v1509_v59 }
  0xfa   :  { %v2189_v0 = vpop.f32.mrf.mxu0  ;;  %v1512_v1 = vpop.f32.mrf.mxu1 }
  0xfb   :  { %v2192_v2 = vadd.f32 %v1511_v63, %v2180_v57 }
  0xfc   :  { %v2194_v3 = vpop.f32.mrf.mxu0  ;;  %v1513_v4 = vpop.f32.mrf.mxu1 }
  0xfd   :  { %v1514_v5 = vadd.f32 %v1513_v4, %v1512_v1  ;;  %v737_v4 = vadd.f32 %v1466_v53, %v2180_v57 }
  0xfe   :  { %v2196_v6 = vpop.f32.mrf.mxu0  ;;  %v1515_v7 = vpop.f32.mrf.mxu1 }
  0xff   :  { %v2199_v8 = vadd.f32 %v1514_v5, %v2180_v57 }
 0x100   :  { %v2201_v9 = vpop.f32.mrf.mxu0  ;;  %v1516_v10 = vpop.f32.mrf.mxu1 }
 0x101   :  { %v1517_v11 = vadd.f32 %v1516_v10, %v1515_v7 }
 0x102   :  { %v2203_v12 = vpop.f32.mrf.mxu0  ;;  %v1518_v13 = vpop.f32.mrf.mxu1 }
 0x103   :  { %v2206_v14 = vadd.f32 %v1517_v11, %v2180_v57 }
 0x104   :  { %v2208_v15 = vpop.f32.mrf.mxu0  ;;  %v1519_v16 = vpop.f32.mrf.mxu1 }
 0x105   :  { %v1520_v17 = vadd.f32 %v1519_v16, %v1518_v13  ;;  %v740_v16 = vadd.f32 %v1469_v38, %v2180_v57 }
 0x106   :  { %v2210_v18 = vpop.f32.mrf.mxu0  ;;  %v1521_v19 = vpop.f32.mrf.mxu1 }
 0x107   :  { %v2213_v20 = vadd.f32 %v1520_v17, %v2180_v57 }
 0x108   :  { %v2215_v21 = vpop.f32.mrf.mxu0  ;;  %v1522_v22 = vpop.f32.mrf.mxu1 }
 0x109   :  { %v1523_v24 = vadd.f32 %v1522_v22, %v1521_v19 }
 0x10a   :  { %v2217_v25 = vpop.f32.mrf.mxu0  ;;  %v1540_v26 = vpop.f32.mrf.mxu1 }
 0x10b   :  { %v2220_v28 = vadd.f32 %v1523_v24, %v2180_v57 }
 0x10c   :  { %v2222_v29 = vpop.f32.mrf.mxu0  ;;  %v1541_v30 = vpop.f32.mrf.mxu1 }
 0x10d   :  { %v1542_v31 = vadd.f32 %v1541_v30, %v1540_v26 }
 0x10e   :  { %v2224_v32 = vpop.f32.mrf.mxu0  ;;  %v1543_v34 = vpop.f32.mrf.mxu1 }
 0x10f   :  { %v850_v48 = vadd.f32 %v1542_v31, %v729_v36  ;;  %v1475_v36 = vadd.f32 %v2187_v61, %v2182_v58 }
 0x110   :  { %v2227_v41 = vpop.f32.mrf.mxu0  ;;  %v1544_v23 = vpop.f32.mrf.mxu1 }
 0x111   :  { %v1545_v45 = vadd.f32 %v1544_v23, %v1543_v34 }
 0x112   :  { %v1546_v50 = vpop.f32.mrf.mxu1  ;;  %v970_v33 = vpop.f32.mrf.mxu0 }
 0x113   :  { %v971_v55 = vadd.f32 %v970_v33, %v850_v48  ;;  %v853_v63 = vadd.f32 %v1545_v45, %v732_v35  ;;  %v745_v45 = vadd.f32 %v1472_v47, %v2180_v57 }
 0x114   :  { %v1547_v56 = vpop.f32.mrf.mxu1  ;;  %v1643_v59 = vpop.f32.mrf.mxu0 }
 0x115   :  { %v1548_v62 = vadd.f32 %v1547_v56, %v1546_v50  ;;  %v1079_v5 = vmul.f32 0.01, %v971_v55  ;;  %vm1057_vm1 = vcmp.gt.f32.partialorder %v971_v55, 0.0  ;;  %v1478_v56 = vadd.f32 %v2194_v3, %v2189_v0 }
 0x116   :  { %v1549_v40 = vpop.f32.mrf.mxu1  ;;  %v973_v1 = vpop.f32.mrf.mxu0 }
 0x117   :  { %v974_v7 = vadd.f32 %v973_v1, %v853_v63  ;;  %v858_v44 = vadd.f32 %v1548_v62, %v737_v4  ;;  %v1101_v49 = vsel %vm1057_vm1, %v971_v55, %v1079_v5  ;;  %v748_v55 = vadd.f32 %v1475_v36, %v2180_v57 }
 0x118   :  { %v1550_v10 = vpop.f32.mrf.mxu1  ;;  %v1644_v11 = vpop.f32.mrf.mxu0 }
 0x119   :  { %vm1058_vm2 = vcmp.gt.f32.partialorder %v974_v7, 0.0  ;;  %v1080_v13 = vmul.f32 0.01, %v974_v7  ;;  %v1551_v43 = vadd.f32 %v1550_v10, %v1549_v40 }
 0x11a   :  { %v1552_v17 = vpop.f32.mrf.mxu1  ;;  %v978_v19 = vpop.f32.mrf.mxu0 }
 0x11b   :  { %v1102_v22 = vsel %vm1058_vm2, %v974_v7, %v1080_v13  ;;  %v979_v24 = vadd.f32 %v978_v19, %v858_v44  ;;  %v861_v34 = vadd.f32 %v1551_v43, %v740_v16  ;;  %v1481_v7 = vadd.f32 %v2201_v9, %v2196_v6 }
 0x11c   :  { %v1380_v26 = vpack.c.bf16 %v1102_v22, %v1101_v49  ;;  %v1553_v27 = vpop.f32.mrf.mxu1  ;;  %v1647_v30 = vpop.f32.mrf.mxu0  ;;  %v753_v13 = vadd.f32 %v1478_v56, %v2180_v57  ;;  %v1484_v49 = vadd.f32 %v2208_v15, %v2203_v12 }
 0x11d   :  { %v1554_v31 = vadd.f32 %v1553_v27, %v1552_v17  ;;  %v1081_v52 = vmul.f32 0.01, %v979_v24  ;;  %vm1059_vm3 = vcmp.gt.f32.partialorder %v979_v24, 0.0  ;;  %v756_v47 = vadd.f32 %v1481_v7, %v2180_v57 }
 0x11e   :  { %1381 = vst [vmem:[%s2310_s3] sm:$0xff] %v1380_v26   ;;  %v1555_v39 = vpop.f32.mrf.mxu1  ;;  %v981_v23 = vpop.f32.mrf.mxu0  ;;  %v1493_v7 = vadd.f32 %v2227_v41, %v2224_v32 }
 0x11f   :  { %v982_v54 = vadd.f32 %v981_v23, %v861_v34  ;;  %v866_v53 = vadd.f32 %v1554_v31, %v745_v45  ;;  %v1103_v59 = vsel %vm1059_vm3, %v979_v24, %v1081_v52  ;;  %v761_v52 = vadd.f32 %v1484_v49, %v2180_v57 }
 0x120   :  { %v1556_v48 = vpop.f32.mrf.mxu1  ;;  %v1648_v50 = vpop.f32.mrf.mxu0 }
 0x121   :  { %vm1060_vm4 = vcmp.gt.f32.partialorder %v982_v54, 0.0  ;;  %v1082_v33 = vmul.f32 0.01, %v982_v54  ;;  %v1557_v35 = vadd.f32 %v1556_v48, %v1555_v39  ;;  %v1487_v39 = vadd.f32 %v2215_v21, %v2210_v18 }
 0x122   :  { %v1558_v58 = vpop.f32.mrf.mxu1  ;;  %v986_v61 = vpop.f32.mrf.mxu0 }
 0x123   :  { %v1104_v62 = vsel %vm1060_vm4, %v982_v54, %v1082_v33  ;;  %v987_v63 = vadd.f32 %v986_v61, %v866_v53  ;;  %v869_v5 = vadd.f32 %v1557_v35, %v748_v55  ;;  %v764_v53 = vadd.f32 %v1487_v39, %v2180_v57 }
 0x124   :  { %v1385_v38 = vpack.c.bf16 %v1104_v62, %v1103_v59  ;;  %v1559_v40 = vpop.f32.mrf.mxu1  ;;  %v1651_v1 = vpop.f32.mrf.mxu0  ;;  %v1490_v55 = vadd.f32 %v2222_v29, %v2217_v25 }
 0x125   :  { %v1560_v4 = vadd.f32 %v1559_v40, %v1558_v58  ;;  %v1083_v0 = vmul.f32 0.01, %v987_v63  ;;  %vm1061_vm5 = vcmp.gt.f32.partialorder %v987_v63, 0.0 }
 0x126   :  { %1432 = vst [vmem:[%s2310_s3 + $0x8] sm:$0xff] %v1385_v38   ;;  %v1561_v10 = vpop.f32.mrf.mxu1  ;;  %v989_v11 = vpop.f32.mrf.mxu0 }
 0x127   :  { %v990_v3 = vadd.f32 %v989_v11, %v869_v5  ;;  %v874_v19 = vadd.f32 %v1560_v4, %v753_v13  ;;  %v1105_v22 = vsel %vm1061_vm5, %v987_v63, %v1083_v0  ;;  %v769_v5 = vadd.f32 %v1490_v55, %v2180_v57 }
 0x128   :  { %v1562_v43 = vpop.f32.mrf.mxu1  ;;  %v1652_v44 = vpop.f32.mrf.mxu0  ;;  %v785_v55 = vadd.f32 %v2165_v46, %v2180_v57 }
 0x129   :  { %vm1062_vm6 = vcmp.gt.f32.partialorder %v990_v3, 0.0  ;;  %v1084_v16 = vmul.f32 0.01, %v990_v3  ;;  %v1563_v17 = vadd.f32 %v1562_v43, %v1561_v10 }
 0x12a   :  { %v1564_v6 = vpop.f32.mrf.mxu1  ;;  %v994_v9 = vpop.f32.mrf.mxu0 }
 0x12b   :  { %v1106_v24 = vsel %vm1062_vm6, %v990_v3, %v1084_v16  ;;  %v995_v26 = vadd.f32 %v994_v9, %v874_v19  ;;  %v877_v36 = vadd.f32 %v1563_v17, %v756_v47  ;;  %v772_v16 = vadd.f32 %v1493_v7, %v2180_v57 }
 0x12c   :  { %v1390_v27 = vpack.c.bf16 %v1106_v24, %v1105_v22  ;;  %v1565_v30 = vpop.f32.mrf.mxu1  ;;  %v1655_v31 = vpop.f32.mrf.mxu0 }
 0x12d   :  { %v1566_v34 = vadd.f32 %v1565_v30, %v1564_v6  ;;  %v1085_v12 = vmul.f32 0.01, %v995_v26  ;;  %vm1063_vm7 = vcmp.gt.f32.partialorder %v995_v26, 0.0 }
 0x12e   :  { %1433 = vst [vmem:[%s2310_s3 + $0x10] sm:$0xff] %v1390_v27   ;;  %v1567_v23 = vpop.f32.mrf.mxu1  ;;  %v997_v45 = vpop.f32.mrf.mxu0 }
 0x12f   :  { %v998_v15 = vadd.f32 %v997_v45, %v877_v36  ;;  %v882_v35 = vadd.f32 %v1566_v34, %v761_v52  ;;  %v1107_v58 = vsel %vm1063_vm7, %v995_v26, %v1085_v12  ;;  %v777_v26 = vadd.f32 %v2157_v37, %v2180_v57 }
 0x130   :  { %v1568_v54 = vpop.f32.mrf.mxu1  ;;  %v1656_v48 = vpop.f32.mrf.mxu0  ;;  %v780_v12 = vadd.f32 %v2159_v42, %v2180_v57 }
 0x131   :  { %vm1064_vm8 = vcmp.gt.f32.partialorder %v998_v15, 0.0  ;;  %v1086_v50 = vmul.f32 0.01, %v998_v15  ;;  %v1569_v33 = vadd.f32 %v1568_v54, %v1567_v23 }
 0x132   :  { %v1570_v18 = vpop.f32.mrf.mxu1  ;;  %v1002_v21 = vpop.f32.mrf.mxu0 }
 0x133   :  { %v1108_v61 = vsel %vm1064_vm8, %v998_v15, %v1086_v50  ;;  %v1003_v56 = vadd.f32 %v1002_v21, %v882_v35  ;;  %v885_v40 = vadd.f32 %v1569_v33, %v764_v53 }
 0x134   :  { %v1395_v59 = vpack.c.bf16 %v1108_v61, %v1107_v58  ;;  %v1571_v62 = vpop.f32.mrf.mxu1  ;;  %v1659_v63 = vpop.f32.mrf.mxu0 }
 0x135   :  { %v1572_v38 = vadd.f32 %v1571_v62, %v1570_v18  ;;  %v1087_v25 = vmul.f32 0.01, %v1003_v56  ;;  %vm1065_vm9 = vcmp.gt.f32.partialorder %v1003_v56, 0.0 }
 0x136   :  { %1434 = vst [vmem:[%s2310_s3 + $0x18] sm:$0xff] %v1395_v59   ;;  %v1573_v1 = vpop.f32.mrf.mxu1  ;;  %v1005_v4 = vpop.f32.mrf.mxu0 }
 0x137   :  { %v1006_v29 = vadd.f32 %v1005_v4, %v885_v40  ;;  %v890_v3 = vadd.f32 %v1572_v38, %v769_v5  ;;  %v1109_v17 = vsel %vm1065_vm9, %v1003_v56, %v1087_v25 }
 0x138   :  { %v1574_v10 = vpop.f32.mrf.mxu1  ;;  %v1660_v11 = vpop.f32.mrf.mxu0 }
 0x139   :  { %vm1066_vm10 = vcmp.gt.f32.partialorder %v1006_v29, 0.0  ;;  %v1088_v13 = vmul.f32 0.01, %v1006_v29  ;;  %v1575_v0 = vadd.f32 %v1574_v10, %v1573_v1  ;;  %v788_v1 = vadd.f32 %v2171_v51, %v2180_v57 }
 0x13a   :  { %v1576_v43 = vpop.f32.mrf.mxu1  ;;  %v1010_v44 = vpop.f32.mrf.mxu0 }
 0x13b   :  { %v1110_v19 = vsel %vm1066_vm10, %v1006_v29, %v1088_v13  ;;  %v1011_v47 = vadd.f32 %v1010_v44, %v890_v3  ;;  %v893_v41 = vadd.f32 %v1575_v0, %v772_v16 }
 0x13c   :  { %v1400_v6 = vpack.c.bf16 %v1110_v19, %v1109_v17  ;;  %v1577_v9 = vpop.f32.mrf.mxu1  ;;  %v1663_v49 = vpop.f32.mrf.mxu0 }
 0x13d   :  { %v1578_v32 = vadd.f32 %v1577_v9, %v1576_v43  ;;  %v1089_v27 = vmul.f32 0.01, %v1011_v47  ;;  %vm1067_vm11 = vcmp.gt.f32.partialorder %v1011_v47, 0.0 }
 0x13e   :  { %1435 = vst [vmem:[%s2310_s3 + $0x20] sm:$0xff] %v1400_v6   ;;  %v1579_v22 = vpop.f32.mrf.mxu1  ;;  %v1013_v24 = vpop.f32.mrf.mxu0 }
 0x13f   :  { %v1014_v30 = vadd.f32 %v1013_v24, %v893_v41  ;;  %v898_v23 = vadd.f32 %v1578_v32, %v777_v26  ;;  %v1111_v15 = vsel %vm1067_vm11, %v1011_v47, %v1089_v27 }
 0x140   :  { %v1580_v31 = vpop.f32.mrf.mxu1  ;;  %v1664_v34 = vpop.f32.mrf.mxu0 }
 0x141   :  { %vm1068_vm12 = vcmp.gt.f32.partialorder %v1014_v30, 0.0  ;;  %v1090_v36 = vmul.f32 0.01, %v1014_v30  ;;  %v1581_v39 = vadd.f32 %v1580_v31, %v1579_v22 }
 0x142   :  { %v1582_v45 = vpop.f32.mrf.mxu1  ;;  %v1018_v52 = vpop.f32.mrf.mxu0 }
 0x143   :  { %v1112_v54 = vsel %vm1068_vm12, %v1014_v30, %v1090_v36  ;;  %v1019_v48 = vadd.f32 %v1018_v52, %v898_v23  ;;  %v901_v53 = vadd.f32 %v1581_v39, %v780_v12 }
 0x144   :  { %v1405_v50 = vpack.c.bf16 %v1112_v54, %v1111_v15  ;;  %v1583_v33 = vpop.f32.mrf.mxu1  ;;  %v1667_v37 = vpop.f32.mrf.mxu0 }
 0x145   :  { %v1584_v35 = vadd.f32 %v1583_v33, %v1582_v45  ;;  %v1091_v58 = vmul.f32 0.01, %v1019_v48  ;;  %vm1069_vm13 = vcmp.gt.f32.partialorder %v1019_v48, 0.0 }
 0x146   :  { %1436 = vst [vmem:[%s2310_s3 + $0x28] sm:$0xff] %v1405_v50   ;;  %v1585_v18 = vpop.f32.mrf.mxu1  ;;  %v1021_v21 = vpop.f32.mrf.mxu0 }
 0x147   :  { %v1022_v61 = vadd.f32 %v1021_v21, %v901_v53  ;;  %v906_v63 = vadd.f32 %v1584_v35, %v785_v55  ;;  %v1113_v4 = vsel %vm1069_vm13, %v1019_v48, %v1091_v58 }
 0x148   :  { %v1586_v42 = vpop.f32.mrf.mxu1  ;;  %v1668_v56 = vpop.f32.mrf.mxu0 }
 0x149   :  { %vm1070_vm14 = vcmp.gt.f32.partialorder %v1022_v61, 0.0  ;;  %v1092_v59 = vmul.f32 0.01, %v1022_v61  ;;  %v1587_v62 = vadd.f32 %v1586_v42, %v1585_v18 }
 0x14a   :  { %v1588_v38 = vpop.f32.mrf.mxu1  ;;  %v1026_v40 = vpop.f32.mrf.mxu0 }
 0x14b   :  { %v1114_v5 = vsel %vm1070_vm14, %v1022_v61, %v1092_v59  ;;  %v1027_v7 = vadd.f32 %v1026_v40, %v906_v63  ;;  %v909_v11 = vadd.f32 %v1587_v62, %v788_v1 }
 0x14c   :  { %v1410_v25 = vpack.c.bf16 %v1114_v5, %v1113_v4  ;;  %v1589_v29 = vpop.f32.mrf.mxu1  ;;  %v1671_v46 = vpop.f32.mrf.mxu0 }
 0x14d   :  { %v1590_v10 = vadd.f32 %v1589_v29, %v1588_v38  ;;  %v1093_v3 = vmul.f32 0.01, %v1027_v7  ;;  %vm1071_vm15 = vcmp.gt.f32.partialorder %v1027_v7, 0.0 }
 0x14e   :  { %1437 = vst [vmem:[%s2310_s3 + $0x30] sm:$0xff] %v1410_v25   ;;  %v1591_v13 = vpop.f32.mrf.mxu1  ;;  %v1029_v0 = vpop.f32.mrf.mxu0 }
 0x14f   :  { %v1030_v43 = vadd.f32 %v1029_v0, %v909_v11  ;;  %v914_v17 = vadd.f32 %v1590_v10, %v2185_v60  ;;  %v1115_v6 = vsel %vm1071_vm15, %v1027_v7, %v1093_v3 }
 0x150   :  { %v1592_v44 = vpop.f32.mrf.mxu1  ;;  %v1672_v16 = vpop.f32.mrf.mxu0 }
 0x151   :  { %vm1072_vm0 = vcmp.gt.f32.partialorder %v1030_v43, 0.0  ;;  %v1094_v51 = vmul.f32 0.01, %v1030_v43  ;;  %v1593_v57 = vadd.f32 %v1592_v44, %v1591_v13 }
 0x152   :  { %v1594_v19 = vpop.f32.mrf.mxu1  ;;  %v1034_v47 = vpop.f32.mrf.mxu0 }
 0x153   :  { %v1116_v9 = vsel %vm1072_vm0, %v1030_v43, %v1094_v51  ;;  %v1035_v49 = vadd.f32 %v1034_v47, %v914_v17  ;;  %v917_v26 = vadd.f32 %v1593_v57, %v2192_v2 }
 0x154   :  { %v1415_v32 = vpack.c.bf16 %v1116_v9, %v1115_v6  ;;  %v1595_v41 = vpop.f32.mrf.mxu1  ;;  %v1675_v22 = vpop.f32.mrf.mxu0 }
 0x155   :  { %v1596_v24 = vadd.f32 %v1595_v41, %v1594_v19  ;;  %v1095_v31 = vmul.f32 0.01, %v1035_v49  ;;  %vm1073_vm1 = vcmp.gt.f32.partialorder %v1035_v49, 0.0 }
 0x156   :  { %1438 = vst [vmem:[%s2310_s3 + $0x38] sm:$0xff] %v1415_v32   ;;  %v1597_v27 = vpop.f32.mrf.mxu1  ;;  %v1037_v30 = vpop.f32.mrf.mxu0 }
 0x157   :  { %v1038_v34 = vadd.f32 %v1037_v30, %v917_v26  ;;  %v922_v45 = vadd.f32 %v1596_v24, %v2199_v8  ;;  %v1117_v15 = vsel %vm1073_vm1, %v1035_v49, %v1095_v31 }
 0x158   :  { %v1598_v60 = vpop.f32.mrf.mxu1  ;;  %v1676_v36 = vpop.f32.mrf.mxu0 }
 0x159   :  { %vm1074_vm2 = vcmp.gt.f32.partialorder %v1038_v34, 0.0  ;;  %v1096_v39 = vmul.f32 0.01, %v1038_v34  ;;  %v1599_v23 = vadd.f32 %v1598_v60, %v1597_v27 }
 0x15a   :  { %v1600_v52 = vpop.f32.mrf.mxu1  ;;  %v1042_v12 = vpop.f32.mrf.mxu0 }
 0x15b   :  { %v1118_v2 = vsel %vm1074_vm2, %v1038_v34, %v1096_v39  ;;  %v1043_v54 = vadd.f32 %v1042_v12, %v922_v45  ;;  %v925_v35 = vadd.f32 %v1599_v23, %v2206_v14 }
 0x15c   :  { %v1420_v48 = vpack.c.bf16 %v1118_v2, %v1117_v15  ;;  %v1601_v50 = vpop.f32.mrf.mxu1  ;;  %v1679_v33 = vpop.f32.mrf.mxu0 }
 0x15d   :  { %v1602_v37 = vadd.f32 %v1601_v50, %v1600_v52  ;;  %v1097_v21 = vmul.f32 0.01, %v1043_v54  ;;  %vm1075_vm3 = vcmp.gt.f32.partialorder %v1043_v54, 0.0 }
 0x15e   :  { %1439 = vst [vmem:[%s2310_s3 + $0x40] sm:$0xff] %v1420_v48   ;;  %v1603_v53 = vpop.f32.mrf.mxu1  ;;  %v1045_v18 = vpop.f32.mrf.mxu0 }
 0x15f   :  { %v1046_v55 = vadd.f32 %v1045_v18, %v925_v35  ;;  %v930_v56 = vadd.f32 %v1602_v37, %v2213_v20  ;;  %v1119_v62 = vsel %vm1075_vm3, %v1043_v54, %v1097_v21 }
 0x160   :  { %v1604_v8 = vpop.f32.mrf.mxu1  ;;  %v1680_v58 = vpop.f32.mrf.mxu0 }
 0x161   :  { %vm1076_vm4 = vcmp.gt.f32.partialorder %v1046_v55, 0.0  ;;  %v1098_v61 = vmul.f32 0.01, %v1046_v55  ;;  %v1605_v42 = vadd.f32 %v1604_v8, %v1603_v53 }
 0x162   :  { %v1050_v59 = vpop.f32.mrf.mxu0 }
 0x163   :  { %v1120_v63 = vsel %vm1076_vm4, %v1046_v55, %v1098_v61  ;;  %v1051_v14 = vadd.f32 %v1050_v59, %v930_v56  ;;  %v933_v1 = vadd.f32 %v1605_v42, %v2220_v28 }
 0x164   :  { %v1425_v38 = vpack.c.bf16 %v1120_v63, %v1119_v62  ;;  %v1683_v40 = vpop.f32.mrf.mxu0 }
 0x165   :  { %v1099_v5 = vmul.f32 0.01, %v1051_v14  ;;  %vm1077_vm5 = vcmp.gt.f32.partialorder %v1051_v14, 0.0 }
 0x166   :  { %1440 = vst [vmem:[%s2310_s3 + $0x48] sm:$0xff] %v1425_v38   ;;  %v1053_v4 = vpop.f32.mrf.mxu0 }
 0x167   :  { %v1054_v7 = vadd.f32 %v1053_v4, %v933_v1  ;;  %v1121_v20 = vsel %vm1077_vm5, %v1051_v14, %v1099_v5 }
 0x168   :  { %v1684_v25 = vpop.f32.mrf.mxu0 }
 0x169   :  { %vm1078_vm6 = vcmp.gt.f32.partialorder %v1054_v7, 0.0  ;;  %v1100_v29 = vmul.f32 0.01, %v1054_v7 }
 0x16b   :  { %v1122_v46 = vsel %vm1078_vm6, %v1054_v7, %v1100_v29 }
 0x16c   :  { %v1430_v10 = vpack.c.bf16 %v1122_v46, %v1121_v20 }
 0x16e   :  { %1441 = vst [vmem:[%s2310_s3 + $0x50] sm:$0xff] %v1430_v10  }

// kernel: jepa_forward.9
= control target key start
LH: loop header
LB: loop body
LE: loop exit
PB: predicated region body
PF: predicated region fallthrough
CT: control target
= control target key end

     0   :  { %s2753_s1 = inlined_call_operand.vmem [shape: bf16[1152,256], index: 1, kind: input, shape index: {}]   ;;  %s2754_s0 = inlined_call_operand.vmem [shape: bf16[64,1152], index: 0, kind: input, shape index: {}]   ;;  %s2755_s2 = inlined_call_operand.vmem [shape: f32[1,256], index: 2, kind: input, shape index: {}]   ;;  %s2756_s3 = inlined_call_operand.vmem [shape: bf16[64,256], index: 3, kind: output, shape index: {}]  }
   0x1   :  { %v1801_v0 = vld [vmem:[%s2753_s1 + $0x74] ss:$8 sps:$4 sm:$0xff]   ;;  %v1805_v2 = vld [vmem:[%s2753_s1 + $0x70] ss:$8 sps:$4 sm:$0xff]   ;;  %v1807_v4 = vld [vmem:[%s2753_s1 + $0x64] ss:$8 sps:$4 sm:$0xff]  }
   0x2   :  { %v1803_v1 = vld [vmem:[%s2753_s1 + $0x174] ss:$8 sps:$4 sm:$0xff]   ;;  %1115 = vmatprep.subr.bf16.mxu0 %v1801_v0  ;;  %v1806_v3 = vld [vmem:[%s2753_s1 + $0x170] ss:$8 sps:$4 sm:$0xff]   ;;  %v1809_v5 = vld [vmem:[%s2753_s1 + $0x164] ss:$8 sps:$4 sm:$0xff]  }
   0x3   :  { %1188 = vmatprep.subr.bf16.mxu1 %v1803_v1  ;;  %1116 = vmatpush1.bf16.msra.mxu0 %v1805_v2  ;;  %v1811_v6 = vld [vmem:[%s2753_s1 + $0x60] ss:$8 sps:$4 sm:$0xff]   ;;  %v1813_v8 = vld [vmem:[%s2753_s1 + $0x54] ss:$8 sps:$4 sm:$0xff]   ;;  %v1817_v10 = vld [vmem:[%s2753_s1 + $0x50] ss:$8 sps:$4 sm:$0xff]  }
   0x4   :  { %1189 = vmatpush1.bf16.msra.mxu1 %v1806_v3  ;;  %1117 = vmatprep.subr.bf16.mxu0 %v1807_v4  ;;  %v1812_v7 = vld [vmem:[%s2753_s1 + $0x160] ss:$8 sps:$4 sm:$0xff]   ;;  %v1815_v9 = vld [vmem:[%s2753_s1 + $0x154] ss:$8 sps:$4 sm:$0xff]   ;;  %v1818_v11 = vld [vmem:[%s2753_s1 + $0x150] ss:$8 sps:$4 sm:$0xff]  }
   0x5   :  { %1190 = vmatprep.subr.bf16.mxu1 %v1809_v5  ;;  %v1819_v12 = vld [vmem:[%s2753_s1 + $0x44] ss:$8 sps:$4 sm:$0xff]   ;;  %v1823_v14 = vld [vmem:[%s2753_s1 + $0x40] ss:$8 sps:$4 sm:$0xff]   ;;  %v1825_v16 = vld [vmem:[%s2753_s1 + $0x34] ss:$8 sps:$4 sm:$0xff]  }
   0x6   :  { %v1821_v13 = vld [vmem:[%s2753_s1 + $0x144] ss:$8 sps:$4 sm:$0xff]   ;;  %v1824_v15 = vld [vmem:[%s2753_s1 + $0x140] ss:$8 sps:$4 sm:$0xff]   ;;  %v1827_v17 = vld [vmem:[%s2753_s1 + $0x134] ss:$8 sps:$4 sm:$0xff]  }
   0x7   :  { %1118 = vmatpush1.bf16.msra.mxu0 %v1811_v6  ;;  %v1829_v18 = vld [vmem:[%s2753_s1 + $0x30] ss:$8 sps:$4 sm:$0xff]   ;;  %v1831_v20 = vld [vmem:[%s2753_s1 + $0x24] ss:$8 sps:$4 sm:$0xff]   ;;  %v1835_v22 = vld [vmem:[%s2753_s1 + $0x20] ss:$8 sps:$4 sm:$0xff]  }
   0x8   :  { %1191 = vmatpush1.bf16.msra.mxu1 %v1812_v7  ;;  %1119 = vmatprep.subr.bf16.mxu0 %v1813_v8  ;;  %v1830_v19 = vld [vmem:[%s2753_s1 + $0x130] ss:$8 sps:$4 sm:$0xff]   ;;  %v1833_v21 = vld [vmem:[%s2753_s1 + $0x124] ss:$8 sps:$4 sm:$0xff]   ;;  %v1836_v23 = vld [vmem:[%s2753_s1 + $0x120] ss:$8 sps:$4 sm:$0xff]  }
   0x9   :  { %1192 = vmatprep.subr.bf16.mxu1 %v1815_v9  ;;  %v1837_v24 = vld [vmem:[%s2753_s1 + $0x14] ss:$8 sps:$4 sm:$0xff]   ;;  %v1841_v26 = vld [vmem:[%s2753_s1 + $0x10] ss:$8 sps:$4 sm:$0xff]   ;;  %v1843_v28 = vld [vmem:[%s2753_s1 + $0x4] ss:$8 sps:$4 sm:$0xff]  }
   0xa   :  { %v1839_v25 = vld [vmem:[%s2753_s1 + $0x114] ss:$8 sps:$4 sm:$0xff]   ;;  %v1842_v27 = vld [vmem:[%s2753_s1 + $0x110] ss:$8 sps:$4 sm:$0xff]   ;;  %v1845_v29 = vld [vmem:[%s2753_s1 + $0x104] ss:$8 sps:$4 sm:$0xff]  }
   0xb   :  { %1120 = vmatpush1.bf16.msra.mxu0 %v1817_v10  ;;  %v1847_v30 = vld [vmem:[%s2753_s1] ss:$8 sps:$4 sm:$0xff]   ;;  %v1849_v32 = vld [vmem:[%s2753_s1 + $0xf4] ss:$8 sps:$4 sm:$0xff]   ;;  %v1853_v34 = vld [vmem:[%s2753_s1 + $0xf0] ss:$8 sps:$4 sm:$0xff]  }
   0xc   :  { %1193 = vmatpush1.bf16.msra.mxu1 %v1818_v11  ;;  %1121 = vmatprep.subr.bf16.mxu0 %v1819_v12  ;;  %v1848_v31 = vld [vmem:[%s2753_s1 + $0x100] ss:$8 sps:$4 sm:$0xff]   ;;  %v1851_v33 = vld [vmem:[%s2753_s1 + $0x1f4] ss:$8 sps:$4 sm:$0xff]   ;;  %v1854_v35 = vld [vmem:[%s2753_s1 + $0x1f0] ss:$8 sps:$4 sm:$0xff]  }
   0xd   :  { %1194 = vmatprep.subr.bf16.mxu1 %v1821_v13  ;;  %v1855_v36 = vld [vmem:[%s2753_s1 + $0xe4] ss:$8 sps:$4 sm:$0xff]   ;;  %v1859_v38 = vld [vmem:[%s2753_s1 + $0xe0] ss:$8 sps:$4 sm:$0xff]   ;;  %v1861_v40 = vld [vmem:[%s2753_s1 + $0xd4] ss:$8 sps:$4 sm:$0xff]  }
   0xe   :  { %v1857_v37 = vld [vmem:[%s2753_s1 + $0x1e4] ss:$8 sps:$4 sm:$0xff]   ;;  %v1860_v39 = vld [vmem:[%s2753_s1 + $0x1e0] ss:$8 sps:$4 sm:$0xff]   ;;  %v1863_v41 = vld [vmem:[%s2753_s1 + $0x1d4] ss:$8 sps:$4 sm:$0xff]  }
   0xf   :  { %1122 = vmatpush1.bf16.msra.mxu0 %v1823_v14  ;;  %v1865_v42 = vld [vmem:[%s2753_s1 + $0xd0] ss:$8 sps:$4 sm:$0xff]   ;;  %v1867_v44 = vld [vmem:[%s2753_s1 + $0xc4] ss:$8 sps:$4 sm:$0xff]   ;;  %v1871_v46 = vld [vmem:[%s2753_s1 + $0xc0] ss:$8 sps:$4 sm:$0xff]  }
  0x10   :  { %1195 = vmatpush1.bf16.msra.mxu1 %v1824_v15  ;;  %1123 = vmatprep.subr.bf16.mxu0 %v1825_v16  ;;  %v1866_v43 = vld [vmem:[%s2753_s1 + $0x1d0] ss:$8 sps:$4 sm:$0xff]   ;;  %v1869_v45 = vld [vmem:[%s2753_s1 + $0x1c4] ss:$8 sps:$4 sm:$0xff]   ;;  %v1872_v47 = vld [vmem:[%s2753_s1 + $0x1c0] ss:$8 sps:$4 sm:$0xff]  }
  0x11   :  { %1196 = vmatprep.subr.bf16.mxu1 %v1827_v17  ;;  %v1873_v48 = vld [vmem:[%s2753_s1 + $0xb4] ss:$8 sps:$4 sm:$0xff]   ;;  %v1899_v49 = vld [vmem:[%s2754_s0 + $0x4] ss:$36 sps:$4 sm:$0xff]   ;;  %v1902_v51 = vld [vmem:[%s2754_s0 + $0xc] ss:$36 sps:$4 sm:$0xff]  }
  0x12   :  { %v1875_v50 = vld [vmem:[%s2753_s1 + $0x1b4] ss:$8 sps:$4 sm:$0xff]   ;;  %1147 = vmatprep.mubr.bf16.mxu0 %v1899_v49  ;;  %v1877_v52 = vld [vmem:[%s2753_s1 + $0xb0] ss:$8 sps:$4 sm:$0xff]   ;;  %1220 = vmatprep.mubr.bf16.mxu1 %v1902_v51  ;;  %v1879_v54 = vld [vmem:[%s2753_s1 + $0xa4] ss:$8 sps:$4 sm:$0xff]  }
  0x13   :  { %1124 = vmatpush1.bf16.msra.mxu0 %v1829_v18  ;;  %v1878_v53 = vld [vmem:[%s2753_s1 + $0x1b0] ss:$8 sps:$4 sm:$0xff]   ;;  %v1881_v55 = vld [vmem:[%s2753_s1 + $0x1a4] ss:$8 sps:$4 sm:$0xff]   ;;  %v1883_v56 = vld [vmem:[%s2753_s1 + $0xa0] ss:$8 sps:$4 sm:$0xff]  }
  0x14   :  { %1197 = vmatpush1.bf16.msra.mxu1 %v1830_v19  ;;  %1125 = vmatprep.subr.bf16.mxu0 %v1831_v20  ;;  %v1884_v57 = vld [vmem:[%s2753_s1 + $0x1a0] ss:$8 sps:$4 sm:$0xff]   ;;  %v1885_v58 = vld [vmem:[%s2753_s1 + $0x94] ss:$8 sps:$4 sm:$0xff]   ;;  %v1889_v60 = vld [vmem:[%s2753_s1 + $0x90] ss:$8 sps:$4 sm:$0xff]  }
  0x15   :  { %1198 = vmatprep.subr.bf16.mxu1 %v1833_v21  ;;  %v1887_v59 = vld [vmem:[%s2753_s1 + $0x194] ss:$8 sps:$4 sm:$0xff]   ;;  %v1890_v61 = vld [vmem:[%s2753_s1 + $0x190] ss:$8 sps:$4 sm:$0xff]   ;;  %v1891_v62 = vld [vmem:[%s2753_s1 + $0x84] ss:$8 sps:$4 sm:$0xff]  }
  0x16   :  { %v1893_v63 = vld [vmem:[%s2753_s1 + $0x184] ss:$8 sps:$4 sm:$0xff]   ;;  %v1895_v0 = vld [vmem:[%s2753_s1 + $0x80] ss:$8 sps:$4 sm:$0xff]   ;;  %v1905_v2 = vld [vmem:[%s2753_s1 + $0x274] ss:$8 sps:$4 sm:$0xff]  }
  0x17   :  { %1126 = vmatpush1.bf16.msra.mxu0 %v1835_v22  ;;  %v1896_v1 = vld [vmem:[%s2753_s1 + $0x180] ss:$8 sps:$4 sm:$0xff]   ;;  %v1908_v3 = vld [vmem:[%s2753_s1 + $0x374] ss:$8 sps:$4 sm:$0xff]   ;;  %v1903_v6 = vld [vmem:[%s2753_s1 + $0x270] ss:$8 sps:$4 sm:$0xff]  }
  0x18   :  { %1199 = vmatpush1.bf16.msra.mxu1 %v1836_v23  ;;  %1127 = vmatprep.subr.bf16.mxu0 %v1837_v24  ;;  %v1897_v4 = vld [vmem:[%s2754_s0] ss:$36 sps:$4 sm:$0xff]   ;;  %v1900_v5 = vld [vmem:[%s2754_s0 + $0x8] ss:$36 sps:$4 sm:$0xff]   ;;  %v1906_v7 = vld [vmem:[%s2753_s1 + $0x370] ss:$8 sps:$4 sm:$0xff]  }
  0x19   :  { %1200 = vmatprep.subr.bf16.mxu1 %v1839_v25  ;;  %v1911_v8 = vld [vmem:[%s2753_s1 + $0x264] ss:$8 sps:$4 sm:$0xff]   ;;  %v1909_v10 = vld [vmem:[%s2753_s1 + $0x260] ss:$8 sps:$4 sm:$0xff]   ;;  %v1917_v13 = vld [vmem:[%s2753_s1 + $0x254] ss:$8 sps:$4 sm:$0xff]  }
  0x1a   :  { %v1914_v9 = vld [vmem:[%s2753_s1 + $0x364] ss:$8 sps:$4 sm:$0xff]   ;;  %v1912_v12 = vld [vmem:[%s2753_s1 + $0x360] ss:$8 sps:$4 sm:$0xff]   ;;  %v1920_v14 = vld [vmem:[%s2753_s1 + $0x354] ss:$8 sps:$4 sm:$0xff]  }
  0x1b   :  { %1128 = vmatpush1.bf16.msra.mxu0 %v1841_v26  ;;  %v1951_v11 = vld [vmem:[%s2754_s0 + $0x4c] ss:$36 sps:$4 sm:$0xff]   ;;  %v1960_v18 = vld [vmem:[%s2754_s0 + $0x54] ss:$36 sps:$4 sm:$0xff]   ;;  %v1921_v22 = vld [vmem:[%s2753_s1 + $0x240] ss:$8 sps:$4 sm:$0xff]  }
  0x1c   :  { %1201 = vmatpush1.bf16.msra.mxu1 %v1842_v27  ;;  %1129 = vmatprep.subr.bf16.mxu0 %v1843_v28  ;;  %v1915_v15 = vld [vmem:[%s2753_s1 + $0x250] ss:$8 sps:$4 sm:$0xff]   ;;  %v1959_v17 = vld [vmem:[%s2754_s0 + $0x48] ss:$36 sps:$4 sm:$0xff]   ;;  %v1929_v25 = vld [vmem:[%s2753_s1 + $0x234] ss:$8 sps:$4 sm:$0xff]  }
  0x1d   :  { %1202 = vmatprep.subr.bf16.mxu1 %v1845_v29  ;;  %v1918_v16 = vld [vmem:[%s2753_s1 + $0x350] ss:$8 sps:$4 sm:$0xff]   ;;  %v1923_v20 = vld [vmem:[%s2753_s1 + $0x244] ss:$8 sps:$4 sm:$0xff]   ;;  %v1924_v24 = vld [vmem:[%s2753_s1 + $0x340] ss:$8 sps:$4 sm:$0xff]  }
  0x1e   :  { %v1962_v19 = vld [vmem:[%s2754_s0 + $0x50] ss:$36 sps:$4 sm:$0xff]   ;;  %v1926_v21 = vld [vmem:[%s2753_s1 + $0x344] ss:$8 sps:$4 sm:$0xff]  }
  0x1f   :  { %1130 = vmatpush1.bf16.msra.mxu0 %v1847_v30  ;;  %v1969_v23 = vld [vmem:[%s2754_s0 + $0x94] ss:$36 sps:$4 sm:$0xff]   ;;  %v1978_v30 = vld [vmem:[%s2754_s0 + $0x9c] ss:$36 sps:$4 sm:$0xff]  }
  0x20   :  { %1203 = vmatpush1.bf16.msra.mxu1 %v1848_v31  ;;  %1131 = vmatprep.subr.bf16.mxu0 %v1849_v32  ;;  %v1932_v26 = vld [vmem:[%s2753_s1 + $0x334] ss:$8 sps:$4 sm:$0xff]   ;;  %v1927_v27 = vld [vmem:[%s2753_s1 + $0x230] ss:$8 sps:$4 sm:$0xff]   ;;  %v1935_v32 = vld [vmem:[%s2753_s1 + $0x224] ss:$8 sps:$4 sm:$0xff]  }
  0x21   :  { %1204 = vmatprep.subr.bf16.mxu1 %v1851_v33  ;;  %v1930_v28 = vld [vmem:[%s2753_s1 + $0x330] ss:$8 sps:$4 sm:$0xff]   ;;  %v1938_v33 = vld [vmem:[%s2753_s1 + $0x324] ss:$8 sps:$4 sm:$0xff]   ;;  %v1958_v49 = vld [vmem:[%s2753_s1 + $0x3f4] ss:$8 sps:$4 sm:$0xff]  }
  0x22   :  { %v1977_v29 = vld [vmem:[%s2754_s0 + $0x90] ss:$36 sps:$4 sm:$0xff]   ;;  %v1980_v31 = vld [vmem:[%s2754_s0 + $0x98] ss:$36 sps:$4 sm:$0xff]  }
  0x23   :  { %1132 = vmatpush2.bf16.msra.mxu0 %v1853_v34  ;;  %v1933_v34 = vld [vmem:[%s2753_s1 + $0x220] ss:$8 sps:$4 sm:$0xff]   ;;  %v1956_v51 = vld [vmem:[%s2753_s1 + $0x3f0] ss:$8 sps:$4 sm:$0xff]  }
  0x24   :  { %1205 = vmatpush2.bf16.msra.mxu1 %v1854_v35  ;;  %1133 = vmatprep.subr.bf16.mxu0 %v1855_v36  ;;  %v1987_v35 = vld [vmem:[%s2754_s0 + $0xdc] ss:$36 sps:$4 sm:$0xff]  }
  0x25   :  { %1206 = vmatprep.subr.bf16.mxu1 %v1857_v37  ;;  %v1936_v36 = vld [vmem:[%s2753_s1 + $0x320] ss:$8 sps:$4 sm:$0xff]   ;;  %v1941_v37 = vld [vmem:[%s2753_s1 + $0x214] ss:$8 sps:$4 sm:$0xff]  }
  0x27   :  { %1134 = vmatpush2.bf16.msra.mxu0 %v1859_v38  ;;  %v1944_v38 = vld [vmem:[%s2753_s1 + $0x314] ss:$8 sps:$4 sm:$0xff]  }
  0x28   :  { %1207 = vmatpush2.bf16.msra.mxu1 %v1860_v39  ;;  %1135 = vmatprep.subr.bf16.mxu0 %v1861_v40  ;;  %v1939_v39 = vld [vmem:[%s2753_s1 + $0x210] ss:$8 sps:$4 sm:$0xff]  }
  0x29   :  { %1208 = vmatprep.subr.bf16.mxu1 %v1863_v41  ;;  %v1942_v40 = vld [vmem:[%s2753_s1 + $0x310] ss:$8 sps:$4 sm:$0xff]  }
  0x2a   :  { %v1995_v41 = vld [vmem:[%s2754_s0 + $0xd8] ss:$36 sps:$4 sm:$0xff]  }
  0x2b   :  { %1136 = vmatpush2.bf16.msra.mxu0 %v1865_v42  ;;  %v1996_v42 = vld [vmem:[%s2754_s0 + $0xe4] ss:$36 sps:$4 sm:$0xff]  }
  0x2c   :  { %1209 = vmatpush2.bf16.msra.mxu1 %v1866_v43  ;;  %1137 = vmatprep.subr.bf16.mxu0 %v1867_v44  ;;  %v1998_v43 = vld [vmem:[%s2754_s0 + $0xe0] ss:$36 sps:$4 sm:$0xff]  }
  0x2d   :  { %1210 = vmatprep.subr.bf16.mxu1 %v1869_v45  ;;  %v1947_v44 = vld [vmem:[%s2753_s1 + $0x204] ss:$8 sps:$4 sm:$0xff]  }
  0x2e   :  { %v1950_v45 = vld [vmem:[%s2753_s1 + $0x304] ss:$8 sps:$4 sm:$0xff]  }
  0x2f   :  { %1138 = vmatpush2.bf16.msra.mxu0 %v1871_v46  ;;  %v1945_v46 = vld [vmem:[%s2753_s1 + $0x200] ss:$8 sps:$4 sm:$0xff]  }
  0x30   :  { %1211 = vmatpush2.bf16.msra.mxu1 %v1872_v47  ;;  %1139 = vmatprep.subr.bf16.mxu0 %v1873_v48  ;;  %v1948_v47 = vld [vmem:[%s2753_s1 + $0x300] ss:$8 sps:$4 sm:$0xff]   ;;  %v1955_v48 = vld [vmem:[%s2753_s1 + $0x2f4] ss:$8 sps:$4 sm:$0xff]  }
  0x31   :  { %1212 = vmatprep.subr.bf16.mxu1 %v1875_v50  ;;  %v1953_v50 = vld [vmem:[%s2753_s1 + $0x2f0] ss:$8 sps:$4 sm:$0xff]  }
  0x33   :  { %1140 = vmatpush2.bf16.msra.mxu0 %v1877_v52  ;;  %v1965_v52 = vld [vmem:[%s2753_s1 + $0x2e4] ss:$8 sps:$4 sm:$0xff]  }
  0x34   :  { %1213 = vmatpush2.bf16.msra.mxu1 %v1878_v53  ;;  %1141 = vmatprep.subr.bf16.mxu0 %v1879_v54  ;;  %v1968_v53 = vld [vmem:[%s2753_s1 + $0x3e4] ss:$8 sps:$4 sm:$0xff]   ;;  %v2019_v54 = vld [vmem:[%s2754_s0 + $0x14] ss:$36 sps:$4 sm:$0xff]  }
  0x35   :  { %1214 = vmatprep.subr.bf16.mxu1 %v1881_v55  ;;  %v2022_v55 = vld [vmem:[%s2754_s0 + $0x1c] ss:$36 sps:$4 sm:$0xff]  }
  0x37   :  { %1142 = vmatpush2.bf16.msra.mxu0 %v1883_v56  ;;  %v1963_v56 = vld [vmem:[%s2753_s1 + $0x2e0] ss:$8 sps:$4 sm:$0xff]  }
  0x38   :  { %1215 = vmatpush2.bf16.msra.mxu1 %v1884_v57  ;;  %1143 = vmatprep.subr.bf16.mxu0 %v1885_v58  ;;  %v1966_v57 = vld [vmem:[%s2753_s1 + $0x3e0] ss:$8 sps:$4 sm:$0xff]   ;;  %v1973_v58 = vld [vmem:[%s2753_s1 + $0x2d4] ss:$8 sps:$4 sm:$0xff]  }
  0x39   :  { %1216 = vmatprep.subr.bf16.mxu1 %v1887_v59  ;;  %v1976_v59 = vld [vmem:[%s2753_s1 + $0x3d4] ss:$8 sps:$4 sm:$0xff]  }
  0x3b   :  { %1144 = vmatpush2.bf16.msra.mxu0 %v1889_v60  ;;  %v1971_v60 = vld [vmem:[%s2753_s1 + $0x2d0] ss:$8 sps:$4 sm:$0xff]  }
  0x3c   :  { %1217 = vmatpush2.bf16.msra.mxu1 %v1890_v61  ;;  %1145 = vmatprep.subr.bf16.mxu0 %v1891_v62  ;;  %v1974_v61 = vld [vmem:[%s2753_s1 + $0x3d0] ss:$8 sps:$4 sm:$0xff]   ;;  %v1983_v62 = vld [vmem:[%s2753_s1 + $0x2c4] ss:$8 sps:$4 sm:$0xff]  }
  0x3d   :  { %1218 = vmatprep.subr.bf16.mxu1 %v1893_v63  ;;  %v1986_v63 = vld [vmem:[%s2753_s1 + $0x3c4] ss:$8 sps:$4 sm:$0xff]  }
  0x3f   :  { %1146 = vmatpush2.bf16.msra.mxu0 %v1895_v0  ;;  %v1981_v0 = vld [vmem:[%s2753_s1 + $0x2c0] ss:$8 sps:$4 sm:$0xff]  }
  0x40   :  { %1219 = vmatpush2.bf16.msra.mxu1 %v1896_v1  ;;  %1261 = vmatprep.subr.bf16.mxu0 %v1905_v2  ;;  %v1984_v1 = vld [vmem:[%s2753_s1 + $0x3c0] ss:$8 sps:$4 sm:$0xff]   ;;  %v1991_v2 = vld [vmem:[%s2753_s1 + $0x2b4] ss:$8 sps:$4 sm:$0xff]  }
  0x41   :  { %1334 = vmatprep.subr.bf16.mxu1 %v1908_v3  ;;  %v1994_v3 = vld [vmem:[%s2753_s1 + $0x3b4] ss:$8 sps:$4 sm:$0xff]  }
  0x42   :  { %1148 = vmatmul.mubr.bf16.vlgmr.msra.gmra.mxu0 %v1897_v4  ;;  %v1989_v4 = vld [vmem:[%s2753_s1 + $0x2b0] ss:$8 sps:$4 sm:$0xff]  }
  0x43   :  { %1221 = vmatmul.mubr.bf16.vlgmr.msra.gmra.mxu1 %v1900_v5  ;;  %1262 = vmatpush1.bf16.msra.mxu0 %v1903_v6  ;;  %v1992_v5 = vld [vmem:[%s2753_s1 + $0x3b0] ss:$8 sps:$4 sm:$0xff]   ;;  %v2001_v6 = vld [vmem:[%s2753_s1 + $0x2a4] ss:$8 sps:$4 sm:$0xff]  }
  0x44   :  { %1335 = vmatpush1.bf16.msra.mxu1 %v1906_v7  ;;  %1263 = vmatprep.subr.bf16.mxu0 %v1911_v8  ;;  %v2004_v7 = vld [vmem:[%s2753_s1 + $0x3a4] ss:$8 sps:$4 sm:$0xff]   ;;  %v1999_v8 = vld [vmem:[%s2753_s1 + $0x2a0] ss:$8 sps:$4 sm:$0xff]  }
  0x45   :  { %1336 = vmatprep.subr.bf16.mxu1 %v1914_v9  ;;  %1157 = vmatprep.mubr.bf16.mxu0 %v1951_v11  ;;  %v2002_v9 = vld [vmem:[%s2753_s1 + $0x3a0] ss:$8 sps:$4 sm:$0xff]   ;;  %v2010_v11 = vld [vmem:[%s2753_s1 + $0x394] ss:$8 sps:$4 sm:$0xff]  }
  0x46   :  { %1230 = vmatprep.mubr.bf16.mxu1 %v1960_v18  ;;  %v2025_v18 = vld [vmem:[%s2753_s1 + $0x474] ss:$8 sps:$4 sm:$0xff]  }
  0x47   :  { %1264 = vmatpush1.bf16.msra.mxu0 %v1909_v10  ;;  %v2007_v10 = vld [vmem:[%s2753_s1 + $0x294] ss:$8 sps:$4 sm:$0xff]  }
  0x48   :  { %1337 = vmatpush1.bf16.msra.mxu1 %v1912_v12  ;;  %1265 = vmatprep.subr.bf16.mxu0 %v1917_v13  ;;  %v2005_v12 = vld [vmem:[%s2753_s1 + $0x290] ss:$8 sps:$4 sm:$0xff]  }
  0x49   :  { %1338 = vmatprep.subr.bf16.mxu1 %v1920_v14  ;;  %v2008_v13 = vld [vmem:[%s2753_s1 + $0x390] ss:$8 sps:$4 sm:$0xff]   ;;  %v2013_v14 = vld [vmem:[%s2753_s1 + $0x284] ss:$8 sps:$4 sm:$0xff]  }
  0x4a   :  { %1158 = vmatmul.mubr.bf16.gmra.mxu0 %v1959_v17  ;;  %v2014_v17 = vld [vmem:[%s2753_s1 + $0x380] ss:$8 sps:$4 sm:$0xff]  }
  0x4b   :  { %1231 = vmatmul.mubr.bf16.gmra.mxu1 %v1962_v19  ;;  %1266 = vmatpush1.bf16.msra.mxu0 %v1915_v15  ;;  %v2016_v15 = vld [vmem:[%s2753_s1 + $0x384] ss:$8 sps:$4 sm:$0xff]   ;;  %v2017_v19 = vld [vmem:[%s2754_s0 + $0x10] ss:$36 sps:$4 sm:$0xff]  }
  0x4c   :  { %1339 = vmatpush1.bf16.msra.mxu1 %v1918_v16  ;;  %1267 = vmatprep.subr.bf16.mxu0 %v1923_v20  ;;  %v2011_v16 = vld [vmem:[%s2753_s1 + $0x280] ss:$8 sps:$4 sm:$0xff]   ;;  %v2020_v20 = vld [vmem:[%s2754_s0 + $0x18] ss:$36 sps:$4 sm:$0xff]  }
  0x4d   :  { %1340 = vmatprep.subr.bf16.mxu1 %v1926_v21  ;;  %1167 = vmatprep.mubr.bf16.mxu0 %v1969_v23  ;;  %v2023_v21 = vld [vmem:[%s2753_s1 + $0x470] ss:$8 sps:$4 sm:$0xff]   ;;  %v2029_v23 = vld [vmem:[%s2754_s0 + $0x5c] ss:$36 sps:$4 sm:$0xff]  }
  0x4e   :  { %1240 = vmatprep.mubr.bf16.mxu1 %v1978_v30  ;;  %v2040_v30 = vld [vmem:[%s2753_s1 + $0x444] ss:$8 sps:$4 sm:$0xff]  }
  0x4f   :  { %1268 = vmatpush1.bf16.msra.mxu0 %v1921_v22  ;;  %v2028_v22 = vld [vmem:[%s2753_s1 + $0x464] ss:$8 sps:$4 sm:$0xff]  }
  0x50   :  { %1341 = vmatpush1.bf16.msra.mxu1 %v1924_v24  ;;  %1269 = vmatprep.subr.bf16.mxu0 %v1929_v25  ;;  %v2031_v24 = vld [vmem:[%s2754_s0 + $0x64] ss:$36 sps:$4 sm:$0xff]  }
  0x51   :  { %1342 = vmatprep.subr.bf16.mxu1 %v1932_v26  ;;  %v2026_v25 = vld [vmem:[%s2753_s1 + $0x460] ss:$8 sps:$4 sm:$0xff]   ;;  %v2037_v26 = vld [vmem:[%s2753_s1 + $0x454] ss:$8 sps:$4 sm:$0xff]  }
  0x52   :  { %1168 = vmatmul.mubr.bf16.gmra.mxu0 %v1977_v29  ;;  %v2035_v29 = vld [vmem:[%s2753_s1 + $0x450] ss:$8 sps:$4 sm:$0xff]  }
  0x53   :  { %1241 = vmatmul.mubr.bf16.gmra.mxu1 %v1980_v31  ;;  %1270 = vmatpush1.bf16.msra.mxu0 %v1927_v27  ;;  %v2033_v27 = vld [vmem:[%s2754_s0 + $0x58] ss:$36 sps:$4 sm:$0xff]   ;;  %v2041_v31 = vld [vmem:[%s2754_s0 + $0xa4] ss:$36 sps:$4 sm:$0xff]  }
  0x54   :  { %1343 = vmatpush1.bf16.msra.mxu1 %v1930_v28  ;;  %1271 = vmatprep.subr.bf16.mxu0 %v1935_v32  ;;  %v2034_v28 = vld [vmem:[%s2754_s0 + $0x60] ss:$36 sps:$4 sm:$0xff]   ;;  %v2043_v32 = vld [vmem:[%s2754_s0 + $0xac] ss:$36 sps:$4 sm:$0xff]  }
  0x55   :  { %1344 = vmatprep.subr.bf16.mxu1 %v1938_v33  ;;  %1177 = vmatprep.mubr.bf16.mxu0 %v1987_v35  ;;  %v2038_v33 = vld [vmem:[%s2753_s1 + $0x440] ss:$8 sps:$4 sm:$0xff]  }
  0x56   :  { %1250 = vmatprep.mubr.bf16.mxu1 %v1996_v42  ;;  %v2045_v35 = vld [vmem:[%s2754_s0 + $0xa0] ss:$36 sps:$4 sm:$0xff]   ;;  %v2061_v42 = vld [vmem:[%s2753_s1 + $0x414] ss:$8 sps:$4 sm:$0xff]  }
  0x57   :  { %1272 = vmatpush1.bf16.msra.mxu0 %v1933_v34  ;;  %v2049_v34 = vld [vmem:[%s2753_s1 + $0x434] ss:$8 sps:$4 sm:$0xff]  }
  0x58   :  { %1345 = vmatpush1.bf16.msra.mxu1 %v1936_v36  ;;  %1273 = vmatprep.subr.bf16.mxu0 %v1941_v37  ;;  %v2046_v36 = vld [vmem:[%s2754_s0 + $0xa8] ss:$36 sps:$4 sm:$0xff]   ;;  %v2047_v37 = vld [vmem:[%s2753_s1 + $0x430] ss:$8 sps:$4 sm:$0xff]  }
  0x59   :  { %1346 = vmatprep.subr.bf16.mxu1 %v1944_v38  ;;  %v2052_v38 = vld [vmem:[%s2753_s1 + $0x424] ss:$8 sps:$4 sm:$0xff]  }
  0x5a   :  { %1178 = vmatmul.mubr.bf16.gmra.mxu0 %v1995_v41  ;;  %v2050_v41 = vld [vmem:[%s2753_s1 + $0x420] ss:$8 sps:$4 sm:$0xff]  }
  0x5b   :  { %1251 = vmatmul.mubr.bf16.gmra.mxu1 %v1998_v43  ;;  %1274 = vmatpush1.bf16.msra.mxu0 %v1939_v39  ;;  %v2053_v39 = vld [vmem:[%s2754_s0 + $0xec] ss:$36 sps:$4 sm:$0xff]  }
  0x5c   :  { %1347 = vmatpush1.bf16.msra.mxu1 %v1942_v40  ;;  %1275 = vmatprep.subr.bf16.mxu0 %v1947_v44  ;;  %v2055_v40 = vld [vmem:[%s2754_s0 + $0xf4] ss:$36 sps:$4 sm:$0xff]   ;;  %v2057_v43 = vld [vmem:[%s2754_s0 + $0xe8] ss:$36 sps:$4 sm:$0xff]  }
  0x5d   :  { %1348 = vmatprep.subr.bf16.mxu1 %v1950_v45  ;;  %1293 = vmatprep.mubr.bf16.mxu0 %v2019_v54  ;;  %v2058_v44 = vld [vmem:[%s2754_s0 + $0xf0] ss:$36 sps:$4 sm:$0xff]  }
  0x5e   :  { %1366 = vmatprep.mubr.bf16.mxu1 %v2022_v55  ;;  %v2059_v45 = vld [vmem:[%s2753_s1 + $0x410] ss:$8 sps:$4 sm:$0xff]  }
  0x5f   :  { %1276 = vmatpush1.bf16.msra.mxu0 %v1945_v46  ;;  %v2064_v46 = vld [vmem:[%s2753_s1 + $0x404] ss:$8 sps:$4 sm:$0xff]  }
  0x60   :  { %1349 = vmatpush1.bf16.msra.mxu1 %v1948_v47  ;;  %1277 = vmatprep.subr.bf16.mxu0 %v1955_v48  ;;  %v2062_v47 = vld [vmem:[%s2753_s1 + $0x400] ss:$8 sps:$4 sm:$0xff]   ;;  %v2069_v48 = vmov 0  }
  0x61   :  { %1350 = vmatprep.subr.bf16.mxu1 %v1958_v49  ;;  %v2065_v49 = vld [vmem:[%s2754_s0 + $0x20] ss:$36 sps:$4 sm:$0xff]  }
  0x63   :  { %1278 = vmatpush2.bf16.msra.mxu0 %v1953_v50  ;;  %v2066_v50 = vld [vmem:[%s2754_s0 + $0xb0] ss:$36 sps:$4 sm:$0xff]  }
  0x64   :  { %1351 = vmatpush2.bf16.msra.mxu1 %v1956_v51  ;;  %1279 = vmatprep.subr.bf16.mxu0 %v1965_v52  ;;  %v2067_v51 = vld [vmem:[%s2754_s0 + $0x68] ss:$36 sps:$4 sm:$0xff]   ;;  %v2068_v52 = vld [vmem:[%s2754_s0 + $0xf8] ss:$36 sps:$4 sm:$0xff]  }
  0x65   :  { %1352 = vmatprep.subr.bf16.mxu1 %v1968_v53 }
  0x67   :  { %1280 = vmatpush2.bf16.msra.mxu0 %v1963_v56 }
  0x68   :  { %1353 = vmatpush2.bf16.msra.mxu1 %v1966_v57  ;;  %1281 = vmatprep.subr.bf16.mxu0 %v1973_v58 }
  0x69   :  { %1354 = vmatprep.subr.bf16.mxu1 %v1976_v59 }
  0x6b   :  { %1282 = vmatpush2.bf16.msra.mxu0 %v1971_v60 }
  0x6c   :  { %1355 = vmatpush2.bf16.msra.mxu1 %v1974_v61  ;;  %1283 = vmatprep.subr.bf16.mxu0 %v1983_v62 }
  0x6d   :  { %1356 = vmatprep.subr.bf16.mxu1 %v1986_v63 }
  0x6f   :  { %1284 = vmatpush2.bf16.msra.mxu0 %v1981_v0 }
  0x70   :  { %1357 = vmatpush2.bf16.msra.mxu1 %v1984_v1  ;;  %1285 = vmatprep.subr.bf16.mxu0 %v1991_v2 }
  0x71   :  { %1358 = vmatprep.subr.bf16.mxu1 %v1994_v3 }
  0x73   :  { %1286 = vmatpush2.bf16.msra.mxu0 %v1989_v4 }
  0x74   :  { %1359 = vmatpush2.bf16.msra.mxu1 %v1992_v5  ;;  %1287 = vmatprep.subr.bf16.mxu0 %v2001_v6 }
  0x75   :  { %1360 = vmatprep.subr.bf16.mxu1 %v2004_v7 }
  0x77   :  { %1288 = vmatpush2.bf16.msra.mxu0 %v1999_v8 }
  0x78   :  { %1361 = vmatpush2.bf16.msra.mxu1 %v2002_v9  ;;  %1289 = vmatprep.subr.bf16.mxu0 %v2007_v10 }
  0x79   :  { %1362 = vmatprep.subr.bf16.mxu1 %v2010_v11 }
  0x7b   :  { %1290 = vmatpush2.bf16.msra.mxu0 %v2005_v12 }
  0x7c   :  { %1363 = vmatpush2.bf16.msra.mxu1 %v2008_v13  ;;  %1291 = vmatprep.subr.bf16.mxu0 %v2013_v14 }
  0x7d   :  { %1364 = vmatprep.subr.bf16.mxu1 %v2016_v15 }
  0x7f   :  { %1292 = vmatpush2.bf16.msra.mxu0 %v2011_v16 }
  0x80   :  { %1365 = vmatpush2.bf16.msra.mxu1 %v2014_v17  ;;  %1407 = vmatprep.subr.bf16.mxu0 %v2025_v18 }
  0x81   :  { %1784 = vmatprep.subr.bf16.mxu1 %v2025_v18 }
  0x82   :  { %1294 = vmatmul.mubr.bf16.vlgmr.msra.gmra.mxu0 %v2017_v19 }
  0x83   :  { %1367 = vmatmul.mubr.bf16.vlgmr.msra.gmra.mxu1 %v2020_v20  ;;  %1408 = vmatpush1.bf16.msra.mxu0 %v2023_v21 }
  0x84   :  { %1792 = vmatpush1.bf16.msra.mxu1 %v2023_v21  ;;  %1409 = vmatprep.subr.bf16.mxu0 %v2028_v22 }
  0x85   :  { %1785 = vmatprep.subr.bf16.mxu1 %v2028_v22  ;;  %1303 = vmatprep.mubr.bf16.mxu0 %v2029_v23  ;;  %v201_v23 = vlaneseq }
  0x86   :  { %1376 = vmatprep.mubr.bf16.mxu1 %v2031_v24 }
  0x87   :  { %1410 = vmatpush1.bf16.msra.mxu0 %v2026_v25 }
  0x88   :  { %1793 = vmatpush1.bf16.msra.mxu1 %v2026_v25  ;;  %1411 = vmatprep.subr.bf16.mxu0 %v2037_v26 }
  0x89   :  { %1786 = vmatprep.subr.bf16.mxu1 %v2037_v26 }
  0x8a   :  { %1304 = vmatmul.mubr.bf16.gmra.mxu0 %v2033_v27 }
  0x8b   :  { %1377 = vmatmul.mubr.bf16.gmra.mxu1 %v2034_v28  ;;  %1412 = vmatpush1.bf16.msra.mxu0 %v2035_v29  ;;  %v202_v28 = vshrl.u32 %v201_v23, 7 }
  0x8c   :  { %1794 = vmatpush1.bf16.msra.mxu1 %v2035_v29  ;;  %1413 = vmatprep.subr.bf16.mxu0 %v2040_v30 }
  0x8d   :  { %1787 = vmatprep.subr.bf16.mxu1 %v2040_v30  ;;  %1313 = vmatprep.mubr.bf16.mxu0 %v2041_v31 }
  0x8e   :  { %1386 = vmatprep.mubr.bf16.mxu1 %v2043_v32 }
  0x8f   :  { %1414 = vmatpush1.bf16.msra.mxu0 %v2038_v33 }
  0x90   :  { %1795 = vmatpush1.bf16.msra.mxu1 %v2038_v33  ;;  %1415 = vmatprep.subr.bf16.mxu0 %v2049_v34  ;;  %v203_v33 = vsub.s32 0, %v202_v28 }
  0x91   :  { %1788 = vmatprep.subr.bf16.mxu1 %v2049_v34  ;;  %v199_v34 = vld [vmem:[%s2755_s2] sm:$0x3] }
  0x92   :  { %1314 = vmatmul.mubr.bf16.gmra.mxu0 %v2045_v35 }
  0x93   :  { %1387 = vmatmul.mubr.bf16.gmra.mxu1 %v2046_v36  ;;  %1416 = vmatpush1.bf16.msra.mxu0 %v2047_v37 }
  0x94   :  { %1796 = vmatpush1.bf16.msra.mxu1 %v2047_v37  ;;  %1417 = vmatprep.subr.bf16.mxu0 %v2052_v38  ;;  %v207_v37 = vsub.s32 1, %v202_v28 }
  0x95   :  { %1789 = vmatprep.subr.bf16.mxu1 %v2052_v38  ;;  %1323 = vmatprep.mubr.bf16.mxu0 %v2053_v39 }
  0x96   :  { %1396 = vmatprep.mubr.bf16.mxu1 %v2055_v40  ;;  %v204_v40 = vrot.slane %v199_v34, %v203_v33 }
  0x97   :  { %1418 = vmatpush1.bf16.msra.mxu0 %v2050_v41 }
  0x98   :  { %1797 = vmatpush1.bf16.msra.mxu1 %v2050_v41  ;;  %1419 = vmatprep.subr.bf16.mxu0 %v2061_v42 }
  0x99   :  { %1790 = vmatprep.subr.bf16.mxu1 %v2061_v42 }
  0x9a   :  { %1324 = vmatmul.mubr.bf16.gmra.mxu0 %v2057_v43  ;;  %v208_v43 = vrot.slane %v199_v34, %v207_v37 }
  0x9b   :  { %1397 = vmatmul.mubr.bf16.gmra.mxu1 %v2058_v44  ;;  %1420 = vmatpush1.bf16.msra.mxu0 %v2059_v45 }
  0x9c   :  { %1798 = vmatpush1.bf16.msra.mxu1 %v2059_v45  ;;  %1421 = vmatprep.subr.bf16.mxu0 %v2064_v46 }
  0x9d   :  { %1791 = vmatprep.subr.bf16.mxu1 %v2064_v46  ;;  %1439 = vmatprep.mubr.bf16.mxu0 %v2069_v48 }
  0x9e   :  { %1459 = vmatprep.mubr.bf16.mxu1 %v2069_v48 }
  0x9f   :  { %1422 = vmatpush1.bf16.msra.mxu0 %v2062_v47 }
  0xa0   :  { %1799 = vmatpush1.bf16.msra.mxu1 %v2062_v47 }
  0xa2   :  { %1440 = vmatmul.mubr.bf16.vlgmr.msra.gmra.mxu0 %v2065_v49 }
  0xa3   :  { %1460 = vmatmul.mubr.bf16.vlgmr.msra.gmra.mxu1 %v2066_v50  ;;  %1449 = vmatprep.mubr.bf16.mxu0 %v2069_v48 }
  0xa4   :  { %1469 = vmatprep.mubr.bf16.mxu1 %v2069_v48 }
  0xaa   :  { %1450 = vmatmul.mubr.bf16.gmra.mxu0 %v2067_v51 }
  0xab   :  { %1470 = vmatmul.mubr.bf16.gmra.mxu1 %v2068_v52 }
 0x102   :  { %v1149_v53 = vpop.f32.mrf.mxu0 }
 0x103   :  { %v2630_v54 = vpop.f32.mrf.mxu1  ;;  %v1150_v46 = vadd.f32 %v1149_v53, %v204_v40 }
 0x104   :  { %v1151_v55 = vpop.f32.mrf.mxu0 }
 0x105   :  { %v2632_v56 = vpop.f32.mrf.mxu1  ;;  %v1152_v49 = vadd.f32 %v1151_v55, %v208_v43  ;;  %v1223_v33 = vadd.f32 %v2630_v54, %v1150_v46 }
 0x106   :  { %v1153_v57 = vpop.f32.mrf.mxu0 }
 0x107   :  { %v2634_v58 = vpop.f32.mrf.mxu1  ;;  %v1154_v50 = vadd.f32 %v1153_v57, %v204_v40 }
 0x108   :  { %v1155_v59 = vpop.f32.mrf.mxu0 }
 0x109   :  { %v2636_v60 = vpop.f32.mrf.mxu1  ;;  %v1156_v51 = vadd.f32 %v1155_v59, %v208_v43  ;;  %v1227_v55 = vadd.f32 %v2634_v58, %v1154_v50 }
 0x10a   :  { %v1159_v61 = vpop.f32.mrf.mxu0 }
 0x10b   :  { %v2638_v62 = vpop.f32.mrf.mxu1  ;;  %v1160_v52 = vadd.f32 %v1159_v61, %v204_v40  ;;  %v1229_v61 = vadd.f32 %v2636_v60, %v1156_v51 }
 0x10c   :  { %v1161_v63 = vpop.f32.mrf.mxu0 }
 0x10d   :  { %v2640_v0 = vpop.f32.mrf.mxu1  ;;  %v1162_v23 = vadd.f32 %v1161_v63, %v208_v43  ;;  %v1233_v63 = vadd.f32 %v2638_v62, %v1160_v52 }
 0x10e   :  { %v1163_v1 = vpop.f32.mrf.mxu0 }
 0x10f   :  { %v2642_v2 = vpop.f32.mrf.mxu1  ;;  %v1164_v28 = vadd.f32 %v1163_v1, %v204_v40  ;;  %v1235_v1 = vadd.f32 %v2640_v0, %v1162_v23 }
 0x110   :  { %v1165_v3 = vpop.f32.mrf.mxu0 }
 0x111   :  { %v2644_v4 = vpop.f32.mrf.mxu1  ;;  %v1237_v54 = vadd.f32 %v2642_v2, %v1164_v28 }
 0x112   :  { %v1169_v5 = vpop.f32.mrf.mxu0 }
 0x113   :  { %v2646_v6 = vpop.f32.mrf.mxu1 }
 0x114   :  { %v1171_v7 = vpop.f32.mrf.mxu0 }
 0x115   :  { %v2648_v8 = vpop.f32.mrf.mxu1  ;;  %v1172_v34 = vadd.f32 %v1171_v7, %v208_v43 }
 0x116   :  { %v1173_v9 = vpop.f32.mrf.mxu0 }
 0x117   :  { %v2650_v10 = vpop.f32.mrf.mxu1  ;;  %v1174_v37 = vadd.f32 %v1173_v9, %v204_v40  ;;  %v1245_v58 = vadd.f32 %v2648_v8, %v1172_v34 }
 0x118   :  { %v1175_v11 = vpop.f32.mrf.mxu0 }
 0x119   :  { %v2652_v12 = vpop.f32.mrf.mxu1 }
 0x11a   :  { %v1179_v13 = vpop.f32.mrf.mxu0 }
 0x11b   :  { %v2654_v14 = vpop.f32.mrf.mxu1  ;;  %v1180_v57 = vadd.f32 %v1179_v13, %v204_v40  ;;  %v1247_v13 = vadd.f32 %v2650_v10, %v1174_v37 }
 0x11c   :  { %v1181_v15 = vpop.f32.mrf.mxu0 }
 0x11d   :  { %v2656_v16 = vpop.f32.mrf.mxu1  ;;  %v1182_v59 = vadd.f32 %v1181_v15, %v208_v43  ;;  %v1253_v0 = vadd.f32 %v2654_v14, %v1180_v57 }
 0x11e   :  { %v1183_v17 = vpop.f32.mrf.mxu0 }
 0x11f   :  { %v2658_v18 = vpop.f32.mrf.mxu1  ;;  %v1184_v9 = vadd.f32 %v1183_v17, %v204_v40  ;;  %v1255_v2 = vadd.f32 %v2656_v16, %v1182_v59 }
 0x120   :  { %v1185_v19 = vpop.f32.mrf.mxu0 }
 0x121   :  { %v2660_v20 = vpop.f32.mrf.mxu1  ;;  %v1257_v10 = vadd.f32 %v2658_v18, %v1184_v9 }
 0x142   :  { %v1295_v21 = vpop.f32.mrf.mxu0 }
 0x143   :  { %v2662_v22 = vpop.f32.mrf.mxu1  ;;  %v1296_v46 = vadd.f32 %v1295_v21, %v1223_v33 }
 0x144   :  { %v2664_v24 = vpop.f32.mrf.mxu0 }
 0x145   :  { %v2666_v25 = vpop.f32.mrf.mxu1 }
 0x146   :  { %v2668_v26 = vpop.f32.mrf.mxu0 }
 0x147   :  { %v2670_v27 = vpop.f32.mrf.mxu1  ;;  %v1300_v17 = vadd.f32 %v2668_v26, %v1227_v55 }
 0x148   :  { %2757 = vst [vmem:[#allocation2_spill] sm:$0xff] %v2670_v27  ;;  %v1301_v29 = vpop.f32.mrf.mxu0 }
 0x149   :  { %v2672_v30 = vpop.f32.mrf.mxu1 }
 0x14a   :  { %2758 = vst [vmem:[#allocation3_spill] sm:$0xff] %v2672_v30  ;;  %v1305_v31 = vpop.f32.mrf.mxu0  ;;  %v1176_v30 = vadd.f32 %v1175_v11, %v208_v43  ;;  %v1186_v11 = vadd.f32 %v1185_v19, %v208_v43  ;;  %v1302_v19 = vadd.f32 %v1301_v29, %v1229_v61 }
 0x14b   :  { %v2674_v32 = vpop.f32.mrf.mxu1  ;;  %v1306_v21 = vadd.f32 %v1305_v31, %v1233_v63 }
 0x14c   :  { %2759 = vst [vmem:[#allocation4_spill] sm:$0xff] %v2674_v32  ;;  %v1307_v35 = vpop.f32.mrf.mxu0  ;;  %v1249_v60 = vadd.f32 %v2652_v12, %v1176_v30  ;;  %v1259_v12 = vadd.f32 %v2660_v20, %v1186_v11  ;;  %v1369_v30 = vadd.f32 %v2662_v22, %v1296_v46 }
 0x14d   :  { %v2679_v36 = vpop.f32.mrf.mxu1 }
 0x14e   :  { %2760 = vst [vmem:[#allocation5_spill] sm:$0xff] %v2679_v36  ;;  %v1309_v38 = vpop.f32.mrf.mxu0 }
 0x14f   :  { %v2681_v39 = vpop.f32.mrf.mxu1 }
 0x150   :  { %2761 = vst [vmem:[#allocation6_spill] sm:$0xff] %v2681_v39  ;;  %v1311_v41 = vpop.f32.mrf.mxu0  ;;  %v1170_v39 = vadd.f32 %v1169_v5, %v204_v40  ;;  %v1310_v40 = vadd.f32 %v1309_v38, %v1237_v54 }
 0x151   :  { %v2683_v42 = vpop.f32.mrf.mxu1  ;;  %v2765_v18 = vld [vmem:[#allocation3_spill] sm:$0xff] }
 0x152   :  { %2762 = vst [vmem:[#allocation7_spill] sm:$0xff] %v2683_v42  ;;  %v1315_v44 = vpop.f32.mrf.mxu0  ;;  %v1166_v42 = vadd.f32 %v1165_v3, %v208_v43  ;;  %v1243_v7 = vadd.f32 %v2646_v6, %v1170_v39  ;;  %v1375_v51 = vadd.f32 %v2765_v18, %v1302_v19 }
 0x153   :  { %v1388_v45 = vpop.f32.mrf.mxu1  ;;  %v2766_v20 = vld [vmem:[#allocation4_spill] sm:$0xff] }
 0x154   :  { %v1317_v47 = vpop.f32.mrf.mxu0  ;;  %v1316_v6 = vadd.f32 %v1315_v44, %v1243_v7  ;;  %v1379_v52 = vadd.f32 %v2766_v20, %v1306_v21 }
 0x155   :  { %v2685_v48 = vpop.f32.mrf.mxu1  ;;  %v2767_v22 = vld [vmem:[#allocation5_spill] sm:$0xff] }
 0x156   :  { %2763 = vst [vmem:[#allocation8_spill] sm:$0xff] %v2685_v48  ;;  %v1319_v36 = vpop.f32.mrf.mxu0  ;;  %v1225_v48 = vadd.f32 %v2632_v56, %v1152_v49  ;;  %v1239_v56 = vadd.f32 %v2644_v4, %v1166_v42  ;;  %v1308_v4 = vadd.f32 %v1307_v35, %v1235_v1  ;;  %v1318_v42 = vadd.f32 %v1317_v47, %v1245_v58 }
 0x157   :  { %v2687_v32 = vpop.f32.mrf.mxu1  ;;  %v1320_v16 = vadd.f32 %v1319_v36, %v1247_v13  ;;  %v1389_v29 = vadd.f32 %v1388_v45, %v1316_v6  ;;  %v2768_v36 = vld [vmem:[#allocation6_spill] sm:$0xff] }
 0x158   :  { %v1321_v53 = vpop.f32.mrf.mxu0  ;;  %v1298_v49 = vadd.f32 %v2664_v24, %v1225_v48  ;;  %v1312_v14 = vadd.f32 %v1311_v41, %v1239_v56  ;;  %v2764_v48 = vld [vmem:[#allocation2_spill] sm:$0xff]  ;;  %v1381_v38 = vadd.f32 %v2767_v22, %v1308_v4  ;;  %v2716_v23 = vadd.f32 %v2768_v36, %v1310_v40 }
 0x159   :  { %v1394_v27 = vpop.f32.mrf.mxu1  ;;  %v1322_v43 = vadd.f32 %v1321_v53, %v1249_v60  ;;  %v1373_v50 = vadd.f32 %v2764_v48, %v1300_v17  ;;  %v1393_v55 = vadd.f32 %v2687_v32, %v1320_v16 }
 0x15a   :  { %v1325_v3 = vpop.f32.mrf.mxu0  ;;  %v1371_v26 = vadd.f32 %v2666_v25, %v1298_v49  ;;  %v2769_v25 = vld [vmem:[#allocation7_spill] sm:$0xff] }
 0x15b   :  { %v1398_v5 = vpop.f32.mrf.mxu1  ;;  %v1326_v31 = vadd.f32 %v1325_v3, %v1253_v0  ;;  %v2719_v45 = vadd.f32 %v2769_v25, %v1312_v14  ;;  %v1395_v57 = vadd.f32 %v1394_v27, %v1322_v43 }
 0x15c   :  { %v1327_v62 = vpop.f32.mrf.mxu0 }
 0x15d   :  { %v1400_v15 = vpop.f32.mrf.mxu1  ;;  %v1328_v35 = vadd.f32 %v1327_v62, %v1255_v2  ;;  %v2770_v37 = vld [vmem:[#allocation8_spill] sm:$0xff]  ;;  %v1399_v63 = vadd.f32 %v1398_v5, %v1326_v31 }
 0x15e   :  { %v1329_v39 = vpop.f32.mrf.mxu0  ;;  %v1391_v53 = vadd.f32 %v2770_v37, %v1318_v42 }
 0x15f   :  { %v1402_v8 = vpop.f32.mrf.mxu1  ;;  %v1330_v28 = vadd.f32 %v1329_v39, %v1257_v10  ;;  %v1401_v1 = vadd.f32 %v1400_v15, %v1328_v35 }
 0x160   :  { %v1331_v24 = vpop.f32.mrf.mxu0 }
 0x161   :  { %v2708_v44 = vpop.f32.mrf.mxu1  ;;  %v1403_v56 = vadd.f32 %v1402_v8, %v1330_v28  ;;  %v1332_v58 = vadd.f32 %v1331_v24, %v1259_v12 }
 0x162   :  { %v1441_v41 = vpop.f32.mrf.mxu0 }
 0x163   :  { %v1461_v47 = vpop.f32.mrf.mxu1  ;;  %v1442_v33 = vadd.f32 %v1441_v41, %v1369_v30 }
 0x164   :  { %v1462_v34 = vadd.f32 %v1461_v47, %v1389_v29  ;;  %v1443_v59 = vpop.f32.mrf.mxu0 }
 0x165   :  { %v1463_v61 = vpop.f32.mrf.mxu1  ;;  %v1496_v54 = vmul.f32 0.01, %v1442_v33  ;;  %vm1480_vm0 = vcmp.gt.f32.partialorder %v1442_v33, 0.0  ;;  %v1444_v7 = vadd.f32 %v1443_v59, %v1371_v26 }
 0x166   :  { %v1504_v3 = vmul.f32 0.01, %v1462_v34  ;;  %vm1488_vm1 = vcmp.gt.f32.partialorder %v1462_v34, 0.0  ;;  %v1464_v9 = vadd.f32 %v1463_v61, %v1391_v53  ;;  %v1445_v11 = vpop.f32.mrf.mxu0 }
 0x167   :  { %v1465_v46 = vpop.f32.mrf.mxu1  ;;  %v1446_v13 = vadd.f32 %v1445_v11, %v1373_v50  ;;  %vm1481_vm2 = vcmp.gt.f32.partialorder %v1444_v7, 0.0  ;;  %v1497_v62 = vmul.f32 0.01, %v1444_v7  ;;  %v1512_v5 = vsel %vm1480_vm0, %v1442_v33, %v1496_v54 }
 0x168   :  { %v1466_v60 = vadd.f32 %v1465_v46, %v1393_v55  ;;  %vm1489_vm3 = vcmp.gt.f32.partialorder %v1464_v9, 0.0  ;;  %v1505_v27 = vmul.f32 0.01, %v1464_v9  ;;  %v1447_v32 = vpop.f32.mrf.mxu0  ;;  %v1520_v15 = vsel %vm1488_vm1, %v1462_v34, %v1504_v3 }
 0x169   :  { %v1467_v0 = vpop.f32.mrf.mxu1  ;;  %v1498_v2 = vmul.f32 0.01, %v1446_v13  ;;  %v1513_v6 = vsel %vm1481_vm2, %v1444_v7, %v1497_v62  ;;  %v1448_v19 = vadd.f32 %v1447_v32, %v1375_v51  ;;  %vm1482_vm4 = vcmp.gt.f32.partialorder %v1446_v13, 0.0 }
 0x16a   :  { %v1506_v49 = vmul.f32 0.01, %v1466_v60  ;;  %v1521_v17 = vsel %vm1489_vm3, %v1464_v9, %v1505_v27  ;;  %v1468_v21 = vadd.f32 %v1467_v0, %v1395_v57  ;;  %v1451_v4 = vpop.f32.mrf.mxu0  ;;  %v1776_v8 = vpack.c.bf16 %v1513_v6, %v1512_v5 }
 0x16b   :  { %v1471_v39 = vpop.f32.mrf.mxu1  ;;  %v1780_v10 = vpack.c.bf16 %v1521_v17, %v1520_v15  ;;  %vm1490_vm5 = vcmp.gt.f32.partialorder %v1466_v60, 0.0  ;;  %vm1483_vm6 = vcmp.gt.f32.partialorder %v1448_v19, 0.0  ;;  %v1499_v12 = vmul.f32 0.01, %v1448_v19 }
 0x16c   :  { %vm1491_vm7 = vcmp.gt.f32.partialorder %v1468_v21, 0.0  ;;  %v1507_v30 = vmul.f32 0.01, %v1468_v21  ;;  %v1453_v40 = vpop.f32.mrf.mxu0  ;;  %1576 = vst [vmem:[%s2756_s3] sm:$0xff] %v1776_v8  ;;  %v1452_v42 = vadd.f32 %v1451_v4, %v1379_v52  ;;  %v1472_v16 = vadd.f32 %v1471_v39, %v1399_v63 }
 0x16d   :  { %v1473_v14 = vpop.f32.mrf.mxu1  ;;  %1580 = vst [vmem:[%s2756_s3 + $0x20] sm:$0xff] %v1780_v10  ;;  %v1454_v43 = vadd.f32 %v1453_v40, %v1381_v38  ;;  %v1514_v26 = vsel %vm1482_vm4, %v1446_v13, %v1498_v2  ;;  %v1522_v29 = vsel %vm1490_vm5, %v1466_v60, %v1506_v49  ;;  %v1515_v31 = vsel %vm1483_vm6, %v1448_v19, %v1499_v12 }
 0x16e   :  { %v1474_v24 = vadd.f32 %v1473_v14, %v1401_v1  ;;  %v1523_v35 = vsel %vm1491_vm7, %v1468_v21, %v1507_v30  ;;  %v1455_v48 = vpop.f32.mrf.mxu0  ;;  %v1777_v18 = vpack.c.bf16 %v1515_v31, %v1514_v26  ;;  %vm1484_vm8 = vcmp.gt.f32.partialorder %v1452_v42, 0.0 }
 0x16f   :  { %v1475_v50 = vpop.f32.mrf.mxu1  ;;  %v1781_v51 = vpack.c.bf16 %v1523_v35, %v1522_v29  ;;  %v1500_v20 = vmul.f32 0.01, %v1452_v42  ;;  %vm1492_vm9 = vcmp.gt.f32.partialorder %v1472_v16, 0.0  ;;  %v1508_v22 = vmul.f32 0.01, %v1472_v16 }
 0x170   :  { %vm1485_vm10 = vcmp.gt.f32.partialorder %v1454_v43, 0.0  ;;  %v1501_v41 = vmul.f32 0.01, %v1454_v43  ;;  %v1457_v47 = vpop.f32.mrf.mxu0  ;;  %v1405_v52 = vadd.f32 %v2708_v44, %v1332_v58  ;;  %1577 = vst [vmem:[%s2756_s3 + $0x8] sm:$0xff] %v1777_v18  ;;  %vm1493_vm11 = vcmp.gt.f32.partialorder %v1474_v24, 0.0 }
 0x171   :  { %1581 = vst [vmem:[%s2756_s3 + $0x28] sm:$0xff] %v1781_v51  ;;  %v1509_v38 = vmul.f32 0.01, %v1474_v24  ;;  %v1456_v36 = vadd.f32 %v1455_v48, %v2716_v23  ;;  %v1516_v28 = vsel %vm1484_vm8, %v1452_v42, %v1500_v20  ;;  %v1476_v34 = vadd.f32 %v1475_v50, %v1403_v56  ;;  %v1477_v37 = vpop.f32.mrf.mxu1 }
 0x172   :  { %v1517_v33 = vsel %vm1485_vm10, %v1454_v43, %v1501_v41  ;;  %v1458_v25 = vadd.f32 %v1457_v47, %v2719_v45  ;;  %v1524_v44 = vsel %vm1492_vm9, %v1472_v16, %v1508_v22  ;;  %v1478_v63 = vadd.f32 %v1477_v37, %v1405_v52 }
 0x173   :  { %v1778_v53 = vpack.c.bf16 %v1517_v33, %v1516_v28  ;;  %v1525_v55 = vsel %vm1493_vm11, %v1474_v24, %v1509_v38  ;;  %v1502_v57 = vmul.f32 0.01, %v1456_v36  ;;  %vm1486_vm12 = vcmp.gt.f32.partialorder %v1456_v36, 0.0 }
 0x174   :  { %v1782_v59 = vpack.c.bf16 %v1525_v55, %v1524_v44  ;;  %vm1487_vm13 = vcmp.gt.f32.partialorder %v1458_v25, 0.0  ;;  %v1510_v61 = vmul.f32 0.01, %v1476_v34  ;;  %v1503_v23 = vmul.f32 0.01, %v1458_v25 }
 0x175   :  { %1578 = vst [vmem:[%s2756_s3 + $0x10] sm:$0xff] %v1778_v53  ;;  %vm1494_vm14 = vcmp.gt.f32.partialorder %v1476_v34, 0.0  ;;  %v1518_v45 = vsel %vm1486_vm12, %v1456_v36, %v1502_v57  ;;  %vm1495_vm15 = vcmp.gt.f32.partialorder %v1478_v63, 0.0  ;;  %v1511_v54 = vmul.f32 0.01, %v1478_v63 }
 0x176   :  { %1582 = vst [vmem:[%s2756_s3 + $0x30] sm:$0xff] %v1782_v59  ;;  %v1519_v1 = vsel %vm1487_vm13, %v1458_v25, %v1503_v23  ;;  %v1526_v7 = vsel %vm1494_vm14, %v1476_v34, %v1510_v61 }
 0x177   :  { %v1779_v3 = vpack.c.bf16 %v1519_v1, %v1518_v45  ;;  %v1527_v9 = vsel %vm1495_vm15, %v1478_v63, %v1511_v54 }
 0x178   :  { %v1783_v11 = vpack.c.bf16 %v1527_v9, %v1526_v7 }
 0x179   :  { %1579 = vst [vmem:[%s2756_s3 + $0x18] sm:$0xff] %v1779_v3 }
 0x17a   :  { %1583 = vst [vmem:[%s2756_s3 + $0x38] sm:$0xff] %v1783_v11 }

// kernel: jepa_forward.11
= control target key start
LH: loop header
LB: loop body
LE: loop exit
PB: predicated region body
PF: predicated region fallthrough
CT: control target
= control target key end

     0   :  { %s3027_s30 = smov 0   ;;  %s3775_s0 = inlined_call_operand.vmem [shape: f32[16,128], index: 0, kind: input, shape index: {}]   ;;  %s3776_s1 = inlined_call_operand.vmem [shape: f32[3,16,128], index: 1, kind: input, shape index: {}]   ;;  %s3777_s2 = inlined_call_operand.vmem [shape: bf16[128,512], index: 2, kind: input, shape index: {}]   ;;  %s3778_s3 = inlined_call_operand.vmem [shape: bf16[128,512], index: 3, kind: input, shape index: {}]   ;;  %s3779_s4 = inlined_call_operand.vmem [shape: f32[1,512], index: 4, kind: input, shape index: {}]   ;;  %s3780_s5 = inlined_call_operand.vmem [shape: bf16[512,512], index: 5, kind: input, shape index: {}]   ;;  %s3781_s6 = inlined_call_operand.vmem [shape: f32[1,512], index: 6, kind: input, shape index: {}]   ;;  %s3782_s7 = inlined_call_operand.vmem [shape: bf16[512,128], index: 7, kind: input, shape index: {}]   ;;  %s3783_s8 = inlined_call_operand.vmem [shape: f32[1,128], index: 8, kind: input, shape index: {}]   ;;  %s3784_s9 = inlined_call_operand.vmem [shape: f32[3,16,128], index: 9, kind: output, shape index: {}]  }
   0x1 LB: > { %s2356_s10 = sadd.s32 4294967295, %s2974_s30   ;;  %p2360_p0 = scmp.ge.s32.totalorder %s2974_s30, 1  ;;  %s2974_s30 = sphi %s3027_s30, %s19_s30  }
   0x2   : > { %p287_p1 = scmp.lt.s32.totalorder %s2974_s30, 4 }
   0x4   : > { %p288_p2 = pnand %p2360_p0, %p287_p1 }
   0x5   : > { %p323_p3 = scmp.lt.s32.totalorder (!%p288_p2), %s2356_s10, 2  ;;  %p2365_p4 = scmp.ne.s32.totalorder (!%p288_p2), %s2356_s10, 0 }
   0x6   : > { %291 = sbr.rel (%p288_p2) target bundleno = 771 (0x303), region = 56 }
   0xb   : > { %s324_s11 = scalar_select %p323_p3, %s2356_s10, 2 }
   0xc   : > { %337 = sbr.rel (%p2365_p4) target bundleno = 19 (0x13), region = 60 }
   0xd   : > { %s2593_s12 = sshll.u32 %s324_s11, 4 }
   0xe   : > { %s3038_s15 = scalar_lea.vmem %s3776_s1, %s2593_s12  ;;  %s3043_s18 = scalar_lea.vmem %s3784_s9, %s2593_s12 }
  0x11   : > { %v338_v0 = vld [vmem:[%s3775_s0] sm:$0xff]  ;;  %v339_v1 = vld [vmem:[%s3775_s0 + $0x8] sm:$0xff] }
  0x12   : > { %340 = vst [vmem:[#allocation2] sm:$0xff] %v338_v0  ;;  %341 = vst [vmem:[#allocation2 + $0x8] sm:$0xff] %v339_v1 }
  0x13 PF: > { %v2648_v2 = vld [vmem:[%s3778_s3 + $0xe4] ss:$16 sps:$4 sm:$0xff]   ;;  %v2650_v3 = vld [vmem:[%s3778_s3 + $0xec] ss:$16 sps:$4 sm:$0xff]   ;;  %v2976_v4 = vmov 0  }
  0x14   : > { %604 = vmatprep.mubr.bf16.mxu0 %v2976_v4  ;;  %647 = vmatprep.mubr.bf16.mxu1 %v2976_v4  ;;  %v2652_v5 = vld [vmem:[%s3778_s3 + $0xe0] ss:$16 sps:$4 sm:$0xff]   ;;  %v2653_v6 = vld [vmem:[%s3778_s3 + $0xe8] ss:$16 sps:$4 sm:$0xff]   ;;  %v2654_v7 = vld [vmem:[%s3778_s3 + $0xc4] ss:$16 sps:$4 sm:$0xff]  }
  0x15   : > { %572 = vmatprep.subr.bf16.mxu0 %v2648_v2  ;;  %615 = vmatprep.subr.bf16.mxu1 %v2650_v3  ;;  %v2656_v8 = vld [vmem:[%s3778_s3 + $0xcc] ss:$16 sps:$4 sm:$0xff]   ;;  %v2658_v9 = vld [vmem:[%s3778_s3 + $0xc0] ss:$16 sps:$4 sm:$0xff]   ;;  %v2659_v10 = vld [vmem:[%s3778_s3 + $0xc8] ss:$16 sps:$4 sm:$0xff]  }
  0x16   : > { %573 = vmatpush1.bf16.msra.mxu0 %v2652_v5  ;;  %616 = vmatpush1.bf16.msra.mxu1 %v2653_v6  ;;  %v2660_v11 = vld [vmem:[%s3778_s3 + $0xa4] ss:$16 sps:$4 sm:$0xff]   ;;  %v2662_v12 = vld [vmem:[%s3778_s3 + $0xac] ss:$16 sps:$4 sm:$0xff]   ;;  %v2664_v13 = vld [vmem:[%s3778_s3 + $0xa0] ss:$16 sps:$4 sm:$0xff]  }
  0x17   : > { %574 = vmatprep.subr.bf16.mxu0 %v2654_v7  ;;  %617 = vmatprep.subr.bf16.mxu1 %v2656_v8  ;;  %v2665_v14 = vld [vmem:[%s3778_s3 + $0xa8] ss:$16 sps:$4 sm:$0xff]   ;;  %v2666_v15 = vld [vmem:[%s3778_s3 + $0x84] ss:$16 sps:$4 sm:$0xff]   ;;  %v2668_v16 = vld [vmem:[%s3778_s3 + $0x8c] ss:$16 sps:$4 sm:$0xff]  }
  0x18   : > { %v2670_v17 = vld [vmem:[%s3778_s3 + $0x80] ss:$16 sps:$4 sm:$0xff]   ;;  %v2671_v18 = vld [vmem:[%s3778_s3 + $0x88] ss:$16 sps:$4 sm:$0xff]   ;;  %v2672_v19 = vld [vmem:[%s3778_s3 + $0x64] ss:$16 sps:$4 sm:$0xff]  }
  0x19   : > { %v2674_v20 = vld [vmem:[%s3778_s3 + $0x6c] ss:$16 sps:$4 sm:$0xff]   ;;  %v2676_v21 = vld [vmem:[%s3778_s3 + $0x60] ss:$16 sps:$4 sm:$0xff]   ;;  %v2677_v22 = vld [vmem:[%s3778_s3 + $0x68] ss:$16 sps:$4 sm:$0xff]  }
  0x1a   : > { %575 = vmatpush1.bf16.msra.mxu0 %v2658_v9  ;;  %618 = vmatpush1.bf16.msra.mxu1 %v2659_v10  ;;  %v2678_v23 = vld [vmem:[%s3778_s3 + $0x44] ss:$16 sps:$4 sm:$0xff]   ;;  %v2680_v24 = vld [vmem:[%s3778_s3 + $0x4c] ss:$16 sps:$4 sm:$0xff]   ;;  %v2682_v25 = vld [vmem:[%s3778_s3 + $0x40] ss:$16 sps:$4 sm:$0xff]  }
  0x1b   : > { %576 = vmatprep.subr.bf16.mxu0 %v2660_v11  ;;  %619 = vmatprep.subr.bf16.mxu1 %v2662_v12  ;;  %v2683_v26 = vld [vmem:[%s3778_s3 + $0x48] ss:$16 sps:$4 sm:$0xff]   ;;  %v2684_v27 = vld [vmem:[%s3778_s3 + $0x24] ss:$16 sps:$4 sm:$0xff]   ;;  %v2686_v28 = vld [vmem:[%s3778_s3 + $0x2c] ss:$16 sps:$4 sm:$0xff]  }
  0x1c   : > { %v2688_v29 = vld [vmem:[%s3778_s3 + $0x20] ss:$16 sps:$4 sm:$0xff]   ;;  %v2689_v30 = vld [vmem:[%s3778_s3 + $0x28] ss:$16 sps:$4 sm:$0xff]   ;;  %v2690_v31 = vld [vmem:[%s3778_s3 + $0x4] ss:$16 sps:$4 sm:$0xff]  }
  0x1d   : > { %v2692_v32 = vld [vmem:[%s3778_s3 + $0xc] ss:$16 sps:$4 sm:$0xff]   ;;  %v2694_v33 = vld [vmem:[%s3778_s3] ss:$16 sps:$4 sm:$0xff]   ;;  %v2695_v34 = vld [vmem:[%s3778_s3 + $0x8] ss:$16 sps:$4 sm:$0xff]  }
  0x1e   : > { %577 = vmatpush1.bf16.msra.mxu0 %v2664_v13  ;;  %620 = vmatpush1.bf16.msra.mxu1 %v2665_v14  ;;  %v345_v35 = vld [vmem:[%s3038_s15] sm:$0xff]  ;;  %v346_v36 = vld [vmem:[%s3038_s15 + $0x8] sm:$0xff] }
  0x1f   : > { %578 = vmatprep.subr.bf16.mxu0 %v2666_v15  ;;  %621 = vmatprep.subr.bf16.mxu1 %v2668_v16  ;;  %v2698_v37 = vld [vmem:[%s3777_s2 + $0xe4] ss:$16 sps:$4 sm:$0xff]   ;;  %v2701_v38 = vld [vmem:[%s3777_s2 + $0xec] ss:$16 sps:$4 sm:$0xff]   ;;  %v347_v39 = vpack.c.bf16 %v346_v36, %v345_v35  ;;  %v2696_v40 = vld [vmem:[%s3777_s2 + $0xe0] ss:$16 sps:$4 sm:$0xff]  }
  0x20   : > { %v2699_v41 = vld [vmem:[%s3777_s2 + $0xe8] ss:$16 sps:$4 sm:$0xff]   ;;  %v2704_v42 = vld [vmem:[%s3777_s2 + $0xc4] ss:$16 sps:$4 sm:$0xff]   ;;  %v2707_v43 = vld [vmem:[%s3777_s2 + $0xcc] ss:$16 sps:$4 sm:$0xff]  }
  0x21   : > { %v2702_v44 = vld [vmem:[%s3777_s2 + $0xc0] ss:$16 sps:$4 sm:$0xff]   ;;  %v2705_v45 = vld [vmem:[%s3777_s2 + $0xc8] ss:$16 sps:$4 sm:$0xff]   ;;  %v2710_v46 = vld [vmem:[%s3777_s2 + $0xa4] ss:$16 sps:$4 sm:$0xff]  }
  0x22   : > { %579 = vmatpush1.bf16.msra.mxu0 %v2670_v17  ;;  %622 = vmatpush1.bf16.msra.mxu1 %v2671_v18  ;;  %v2713_v47 = vld [vmem:[%s3777_s2 + $0xac] ss:$16 sps:$4 sm:$0xff]   ;;  %v2708_v48 = vld [vmem:[%s3777_s2 + $0xa0] ss:$16 sps:$4 sm:$0xff]   ;;  %v2711_v49 = vld [vmem:[%s3777_s2 + $0xa8] ss:$16 sps:$4 sm:$0xff]  }
  0x23   : > { %580 = vmatprep.subr.bf16.mxu0 %v2672_v19  ;;  %623 = vmatprep.subr.bf16.mxu1 %v2674_v20  ;;  %v2716_v50 = vld [vmem:[%s3777_s2 + $0x84] ss:$16 sps:$4 sm:$0xff]   ;;  %v2719_v51 = vld [vmem:[%s3777_s2 + $0x8c] ss:$16 sps:$4 sm:$0xff]   ;;  %v2714_v52 = vld [vmem:[%s3777_s2 + $0x80] ss:$16 sps:$4 sm:$0xff]  }
  0x24   : > { %v2717_v53 = vld [vmem:[%s3777_s2 + $0x88] ss:$16 sps:$4 sm:$0xff]   ;;  %v2722_v54 = vld [vmem:[%s3777_s2 + $0x64] ss:$16 sps:$4 sm:$0xff]   ;;  %v2725_v55 = vld [vmem:[%s3777_s2 + $0x6c] ss:$16 sps:$4 sm:$0xff]  }
  0x25   : > { %v2720_v56 = vld [vmem:[%s3777_s2 + $0x60] ss:$16 sps:$4 sm:$0xff]   ;;  %v2723_v57 = vld [vmem:[%s3777_s2 + $0x68] ss:$16 sps:$4 sm:$0xff]   ;;  %v2728_v58 = vld [vmem:[%s3777_s2 + $0x44] ss:$16 sps:$4 sm:$0xff]  }
  0x26   : > { %581 = vmatpush1.bf16.msra.mxu0 %v2676_v21  ;;  %624 = vmatpush1.bf16.msra.mxu1 %v2677_v22  ;;  %v2731_v59 = vld [vmem:[%s3777_s2 + $0x4c] ss:$16 sps:$4 sm:$0xff]   ;;  %v2726_v60 = vld [vmem:[%s3777_s2 + $0x40] ss:$16 sps:$4 sm:$0xff]   ;;  %v2729_v61 = vld [vmem:[%s3777_s2 + $0x48] ss:$16 sps:$4 sm:$0xff]  }
  0x27   : > { %582 = vmatprep.subr.bf16.mxu0 %v2678_v23  ;;  %625 = vmatprep.subr.bf16.mxu1 %v2680_v24  ;;  %v2734_v62 = vld [vmem:[%s3777_s2 + $0x24] ss:$16 sps:$4 sm:$0xff]   ;;  %v2737_v63 = vld [vmem:[%s3777_s2 + $0x2c] ss:$16 sps:$4 sm:$0xff]   ;;  %v2732_v0 = vld [vmem:[%s3777_s2 + $0x20] ss:$16 sps:$4 sm:$0xff]  }
  0x28   : > { %v2735_v1 = vld [vmem:[%s3777_s2 + $0x28] ss:$16 sps:$4 sm:$0xff]   ;;  %v2740_v2 = vld [vmem:[%s3777_s2 + $0x4] ss:$16 sps:$4 sm:$0xff]   ;;  %v2743_v3 = vld [vmem:[%s3777_s2 + $0xc] ss:$16 sps:$4 sm:$0xff]  }
  0x29   : > { %v2741_v5 = vld [vmem:[%s3777_s2 + $0x8] ss:$16 sps:$4 sm:$0xff]   ;;  %v342_v6 = vld [vmem:[#allocation2] sm:$0xff] }
  0x2a   : > { %583 = vmatpush1.bf16.msra.mxu0 %v2682_v25  ;;  %626 = vmatpush1.bf16.msra.mxu1 %v2683_v26  ;;  %v343_v7 = vld [vmem:[#allocation2 + $0x8] sm:$0xff]  ;;  %v2746_v8 = vld [vmem:[%s3780_s5 + $0xe4] ss:$16 sps:$4 sm:$0xff]   ;;  %v2744_v10 = vld [vmem:[%s3780_s5 + $0xe0] ss:$16 sps:$4 sm:$0xff]  }
  0x2b   : > { %584 = vmatprep.subr.bf16.mxu0 %v2684_v27  ;;  %627 = vmatprep.subr.bf16.mxu1 %v2686_v28  ;;  %v2749_v9 = vld [vmem:[%s3780_s5 + $0x2e4] ss:$16 sps:$4 sm:$0xff]   ;;  %v2747_v11 = vld [vmem:[%s3780_s5 + $0x2e0] ss:$16 sps:$4 sm:$0xff]   ;;  %v344_v12 = vpack.c.bf16 %v343_v7, %v342_v6 }
  0x2c   : > { %v2752_v13 = vld [vmem:[%s3780_s5 + $0xc4] ss:$16 sps:$4 sm:$0xff]   ;;  %v2750_v15 = vld [vmem:[%s3780_s5 + $0xc0] ss:$16 sps:$4 sm:$0xff]  }
  0x2d   : > { %v2755_v14 = vld [vmem:[%s3780_s5 + $0x2c4] ss:$16 sps:$4 sm:$0xff]   ;;  %v2753_v16 = vld [vmem:[%s3780_s5 + $0x2c0] ss:$16 sps:$4 sm:$0xff]  }
  0x2e   : > { %585 = vmatpush1.bf16.msra.mxu0 %v2688_v29  ;;  %628 = vmatpush1.bf16.msra.mxu1 %v2689_v30  ;;  %v2758_v17 = vld [vmem:[%s3780_s5 + $0xa4] ss:$16 sps:$4 sm:$0xff]   ;;  %v2756_v19 = vld [vmem:[%s3780_s5 + $0xa0] ss:$16 sps:$4 sm:$0xff]  }
  0x2f   : > { %586 = vmatprep.subr.bf16.mxu0 %v2690_v31  ;;  %629 = vmatprep.subr.bf16.mxu1 %v2692_v32  ;;  %v2761_v18 = vld [vmem:[%s3780_s5 + $0x2a4] ss:$16 sps:$4 sm:$0xff]   ;;  %v2759_v20 = vld [vmem:[%s3780_s5 + $0x2a0] ss:$16 sps:$4 sm:$0xff]  }
  0x30   : > { %v2764_v21 = vld [vmem:[%s3780_s5 + $0x84] ss:$16 sps:$4 sm:$0xff]   ;;  %v2762_v23 = vld [vmem:[%s3780_s5 + $0x80] ss:$16 sps:$4 sm:$0xff]  }
  0x31   : > { %v2767_v22 = vld [vmem:[%s3780_s5 + $0x284] ss:$16 sps:$4 sm:$0xff]   ;;  %v2765_v24 = vld [vmem:[%s3780_s5 + $0x280] ss:$16 sps:$4 sm:$0xff]  }
  0x32   : > { %587 = vmatpush1.bf16.msra.mxu0 %v2694_v33  ;;  %630 = vmatpush1.bf16.msra.mxu1 %v2695_v34  ;;  %v2770_v25 = vld [vmem:[%s3780_s5 + $0x64] ss:$16 sps:$4 sm:$0xff]   ;;  %v2768_v27 = vld [vmem:[%s3780_s5 + $0x60] ss:$16 sps:$4 sm:$0xff]  }
  0x33   : > { %818 = vmatprep.subr.bf16.mxu0 %v2698_v37  ;;  %861 = vmatprep.subr.bf16.mxu1 %v2701_v38  ;;  %v2773_v26 = vld [vmem:[%s3780_s5 + $0x264] ss:$16 sps:$4 sm:$0xff]   ;;  %v2771_v28 = vld [vmem:[%s3780_s5 + $0x260] ss:$16 sps:$4 sm:$0xff]  }
  0x34   : > { %v2776_v29 = vld [vmem:[%s3780_s5 + $0x44] ss:$16 sps:$4 sm:$0xff]   ;;  %v2774_v31 = vld [vmem:[%s3780_s5 + $0x40] ss:$16 sps:$4 sm:$0xff]  }
  0x35   : > { %605 = vmatmul.mubr.bf16.vlgmr.msra.gmra.mxu0 %v347_v39  ;;  %648 = vmatmul.mubr.bf16.vlgmr.msra.gmra.mxu1 %v347_v39  ;;  %v2779_v30 = vld [vmem:[%s3780_s5 + $0x244] ss:$16 sps:$4 sm:$0xff]   ;;  %v2777_v32 = vld [vmem:[%s3780_s5 + $0x240] ss:$16 sps:$4 sm:$0xff]  }
  0x36   : > { %819 = vmatpush1.bf16.msra.mxu0 %v2696_v40  ;;  %862 = vmatpush1.bf16.msra.mxu1 %v2699_v41  ;;  %v2780_v33 = vld [vmem:[%s3780_s5 + $0x20] ss:$16 sps:$4 sm:$0xff]   ;;  %v2782_v34 = vld [vmem:[%s3780_s5 + $0x24] ss:$16 sps:$4 sm:$0xff]  }
  0x37   : > { %820 = vmatprep.subr.bf16.mxu0 %v2704_v42  ;;  %863 = vmatprep.subr.bf16.mxu1 %v2707_v43  ;;  %v2783_v35 = vld [vmem:[%s3780_s5 + $0x220] ss:$16 sps:$4 sm:$0xff]   ;;  %v2785_v36 = vld [vmem:[%s3780_s5 + $0x224] ss:$16 sps:$4 sm:$0xff]  }
  0x38   : > { %850 = vmatprep.mubr.bf16.mxu0 %v2976_v4  ;;  %893 = vmatprep.mubr.bf16.mxu1 %v2976_v4  ;;  %v2738_v4 = vld [vmem:[%s3777_s2] ss:$16 sps:$4 sm:$0xff]   ;;  %v2788_v37 = vld [vmem:[%s3780_s5 + $0x4] ss:$16 sps:$4 sm:$0xff]  }
  0x39   : > { %v2791_v38 = vld [vmem:[%s3780_s5 + $0x204] ss:$16 sps:$4 sm:$0xff]   ;;  %v2786_v39 = vld [vmem:[%s3780_s5] ss:$16 sps:$4 sm:$0xff]  }
  0x3a   : > { %821 = vmatpush1.bf16.msra.mxu0 %v2702_v44  ;;  %864 = vmatpush1.bf16.msra.mxu1 %v2705_v45  ;;  %v2789_v40 = vld [vmem:[%s3780_s5 + $0x200] ss:$16 sps:$4 sm:$0xff]   ;;  %v2794_v41 = vld [vmem:[%s3780_s5 + $0x1e4] ss:$16 sps:$4 sm:$0xff]  }
  0x3b   : > { %822 = vmatprep.subr.bf16.mxu0 %v2710_v46  ;;  %865 = vmatprep.subr.bf16.mxu1 %v2713_v47  ;;  %v2797_v42 = vld [vmem:[%s3780_s5 + $0x3e4] ss:$16 sps:$4 sm:$0xff]   ;;  %v2792_v43 = vld [vmem:[%s3780_s5 + $0x1e0] ss:$16 sps:$4 sm:$0xff]  }
  0x3c   : > { %v2795_v44 = vld [vmem:[%s3780_s5 + $0x3e0] ss:$16 sps:$4 sm:$0xff]   ;;  %v2800_v45 = vld [vmem:[%s3780_s5 + $0x1c4] ss:$16 sps:$4 sm:$0xff]  }
  0x3d   : > { %v2803_v46 = vld [vmem:[%s3780_s5 + $0x3c4] ss:$16 sps:$4 sm:$0xff]   ;;  %v2798_v47 = vld [vmem:[%s3780_s5 + $0x1c0] ss:$16 sps:$4 sm:$0xff]  }
  0x3e   : > { %823 = vmatpush1.bf16.msra.mxu0 %v2708_v48  ;;  %866 = vmatpush1.bf16.msra.mxu1 %v2711_v49  ;;  %v2801_v48 = vld [vmem:[%s3780_s5 + $0x3c0] ss:$16 sps:$4 sm:$0xff]   ;;  %v2806_v49 = vld [vmem:[%s3780_s5 + $0x1a4] ss:$16 sps:$4 sm:$0xff]  }
  0x3f   : > { %824 = vmatprep.subr.bf16.mxu0 %v2716_v50  ;;  %867 = vmatprep.subr.bf16.mxu1 %v2719_v51  ;;  %v2809_v50 = vld [vmem:[%s3780_s5 + $0x3a4] ss:$16 sps:$4 sm:$0xff]   ;;  %v2804_v51 = vld [vmem:[%s3780_s5 + $0x1a0] ss:$16 sps:$4 sm:$0xff]  }
  0x40   : > { %v2839_v6 = vld [vmem:[%s3780_s5 + $0x304] ss:$16 sps:$4 sm:$0xff]   ;;  %v2834_v7 = vld [vmem:[%s3780_s5 + $0x100] ss:$16 sps:$4 sm:$0xff]  }
  0x42   : > { %825 = vmatpush1.bf16.msra.mxu0 %v2714_v52  ;;  %868 = vmatpush1.bf16.msra.mxu1 %v2717_v53  ;;  %v2807_v52 = vld [vmem:[%s3780_s5 + $0x3a0] ss:$16 sps:$4 sm:$0xff]   ;;  %v2812_v53 = vld [vmem:[%s3780_s5 + $0x184] ss:$16 sps:$4 sm:$0xff]  }
  0x43   : > { %826 = vmatprep.subr.bf16.mxu0 %v2722_v54  ;;  %869 = vmatprep.subr.bf16.mxu1 %v2725_v55  ;;  %v2815_v54 = vld [vmem:[%s3780_s5 + $0x384] ss:$16 sps:$4 sm:$0xff]   ;;  %v2810_v55 = vld [vmem:[%s3780_s5 + $0x180] ss:$16 sps:$4 sm:$0xff]  }
  0x46   : > { %827 = vmatpush1.bf16.msra.mxu0 %v2720_v56  ;;  %870 = vmatpush1.bf16.msra.mxu1 %v2723_v57  ;;  %v2813_v56 = vld [vmem:[%s3780_s5 + $0x380] ss:$16 sps:$4 sm:$0xff]   ;;  %v2818_v57 = vld [vmem:[%s3780_s5 + $0x164] ss:$16 sps:$4 sm:$0xff]  }
  0x47   : > { %828 = vmatprep.subr.bf16.mxu0 %v2728_v58  ;;  %871 = vmatprep.subr.bf16.mxu1 %v2731_v59  ;;  %v2821_v58 = vld [vmem:[%s3780_s5 + $0x364] ss:$16 sps:$4 sm:$0xff]   ;;  %v2816_v59 = vld [vmem:[%s3780_s5 + $0x160] ss:$16 sps:$4 sm:$0xff]  }
  0x4a   : > { %829 = vmatpush1.bf16.msra.mxu0 %v2726_v60  ;;  %872 = vmatpush1.bf16.msra.mxu1 %v2729_v61  ;;  %v2819_v60 = vld [vmem:[%s3780_s5 + $0x360] ss:$16 sps:$4 sm:$0xff]   ;;  %v2824_v61 = vld [vmem:[%s3780_s5 + $0x144] ss:$16 sps:$4 sm:$0xff]  }
  0x4b   : > { %830 = vmatprep.subr.bf16.mxu0 %v2734_v62  ;;  %873 = vmatprep.subr.bf16.mxu1 %v2737_v63  ;;  %v2827_v62 = vld [vmem:[%s3780_s5 + $0x344] ss:$16 sps:$4 sm:$0xff]   ;;  %v2822_v63 = vld [vmem:[%s3780_s5 + $0x140] ss:$16 sps:$4 sm:$0xff]  }
  0x4e   : > { %831 = vmatpush1.bf16.msra.mxu0 %v2732_v0  ;;  %874 = vmatpush1.bf16.msra.mxu1 %v2735_v1  ;;  %v2825_v0 = vld [vmem:[%s3780_s5 + $0x340] ss:$16 sps:$4 sm:$0xff]   ;;  %v2830_v1 = vld [vmem:[%s3780_s5 + $0x124] ss:$16 sps:$4 sm:$0xff]  }
  0x4f   : > { %832 = vmatprep.subr.bf16.mxu0 %v2740_v2  ;;  %875 = vmatprep.subr.bf16.mxu1 %v2743_v3  ;;  %v2833_v2 = vld [vmem:[%s3780_s5 + $0x324] ss:$16 sps:$4 sm:$0xff]   ;;  %v2828_v3 = vld [vmem:[%s3780_s5 + $0x120] ss:$16 sps:$4 sm:$0xff]  }
  0x52   : > { %833 = vmatpush1.bf16.msra.mxu0 %v2738_v4  ;;  %876 = vmatpush1.bf16.msra.mxu1 %v2741_v5  ;;  %v2831_v4 = vld [vmem:[%s3780_s5 + $0x320] ss:$16 sps:$4 sm:$0xff]   ;;  %v2836_v5 = vld [vmem:[%s3780_s5 + $0x104] ss:$16 sps:$4 sm:$0xff]  }
  0x53   : > { %1752 = vmatprep.subr.bf16.mxu0 %v2746_v8  ;;  %1795 = vmatprep.subr.bf16.mxu1 %v2749_v9  ;;  %v2837_v8 = vld [vmem:[%s3780_s5 + $0x300] ss:$16 sps:$4 sm:$0xff]   ;;  %v2842_v9 = vld [vmem:[%s3780_s5 + $0xec] ss:$16 sps:$4 sm:$0xff]  }
  0x55   : > { %851 = vmatmul.mubr.bf16.vlgmr.msra.gmra.mxu0 %v344_v12  ;;  %894 = vmatmul.mubr.bf16.vlgmr.msra.gmra.mxu1 %v344_v12 }
  0x56   : > { %1753 = vmatpush1.bf16.msra.mxu0 %v2744_v10  ;;  %1796 = vmatpush1.bf16.msra.mxu1 %v2747_v11  ;;  %v2845_v10 = vld [vmem:[%s3780_s5 + $0x2ec] ss:$16 sps:$4 sm:$0xff]  }
  0x57   : > { %1754 = vmatprep.subr.bf16.mxu0 %v2752_v13  ;;  %1797 = vmatprep.subr.bf16.mxu1 %v2755_v14  ;;  %v906_v13 = vlaneseq }
  0x5a   : > { %1755 = vmatpush1.bf16.msra.mxu0 %v2750_v15  ;;  %1798 = vmatpush1.bf16.msra.mxu1 %v2753_v16  ;;  %v3447_v16 = vshrl.u32 %v906_v13, 7  ;;  %v2851_v13 = vld [vmem:[%s3780_s5 + $0x2cc] ss:$16 sps:$4 sm:$0xff]  }
  0x5b   : > { %1756 = vmatprep.subr.bf16.mxu0 %v2758_v17  ;;  %1799 = vmatprep.subr.bf16.mxu1 %v2761_v18 }
  0x5e   : > { %1757 = vmatpush1.bf16.msra.mxu0 %v2756_v19  ;;  %1800 = vmatpush1.bf16.msra.mxu1 %v2759_v20  ;;  %v908_v19 = vsub.s32 0, %v3447_v16  ;;  %v916_v20 = vsub.s32 2, %v3447_v16 }
  0x5f   : > { %1758 = vmatprep.subr.bf16.mxu0 %v2764_v21  ;;  %1801 = vmatprep.subr.bf16.mxu1 %v2767_v22  ;;  %v904_v21 = vld [vmem:[%s3779_s4] sm:$0xf] }
  0x62   : > { %1759 = vmatpush1.bf16.msra.mxu0 %v2762_v23  ;;  %1802 = vmatpush1.bf16.msra.mxu1 %v2765_v24  ;;  %v912_v24 = vsub.s32 1, %v3447_v16 }
  0x63   : > { %1760 = vmatprep.subr.bf16.mxu0 %v2770_v25  ;;  %1803 = vmatprep.subr.bf16.mxu1 %v2773_v26  ;;  %v920_v25 = vsub.s32 3, %v3447_v16 }
  0x66   : > { %1761 = vmatpush1.bf16.msra.mxu0 %v2768_v27  ;;  %1804 = vmatpush1.bf16.msra.mxu1 %v2771_v28  ;;  %v909_v27 = vrot.slane %v904_v21, %v908_v19 }
  0x67   : > { %1762 = vmatprep.subr.bf16.mxu0 %v2776_v29  ;;  %1805 = vmatprep.subr.bf16.mxu1 %v2779_v30  ;;  %v917_v29 = vrot.slane %v904_v21, %v916_v20 }
  0x6a   : > { %1763 = vmatpush1.bf16.msra.mxu0 %v2774_v31  ;;  %1806 = vmatpush1.bf16.msra.mxu1 %v2777_v32 }
  0x6b   : > { %1764 = vmatprep.subr.bf16.mxu0 %v2782_v34  ;;  %1807 = vmatprep.subr.bf16.mxu1 %v2785_v36 }
  0x6e   : > { %1765 = vmatpush1.bf16.msra.mxu0 %v2780_v33  ;;  %1808 = vmatpush1.bf16.msra.mxu1 %v2783_v35  ;;  %v913_v33 = vrot.slane %v904_v21, %v912_v24  ;;  %v921_v35 = vrot.slane %v904_v21, %v920_v25  ;;  %v2852_v21 = vld [vmem:[%s3780_s5 + $0xa8] ss:$16 sps:$4 sm:$0xff]  }
  0x6f   : > { %1766 = vmatprep.subr.bf16.mxu0 %v2788_v37  ;;  %1809 = vmatprep.subr.bf16.mxu1 %v2791_v38 }
  0x72   : > { %1767 = vmatpush1.bf16.msra.mxu0 %v2786_v39  ;;  %1810 = vmatpush1.bf16.msra.mxu1 %v2789_v40 }
  0x73   : > { %1768 = vmatprep.subr.bf16.mxu0 %v2794_v41  ;;  %1811 = vmatprep.subr.bf16.mxu1 %v2797_v42 }
  0x76   : > { %1769 = vmatpush2.bf16.msra.mxu0 %v2792_v43  ;;  %1812 = vmatpush2.bf16.msra.mxu1 %v2795_v44 }
  0x77   : > { %1770 = vmatprep.subr.bf16.mxu0 %v2800_v45  ;;  %1813 = vmatprep.subr.bf16.mxu1 %v2803_v46 }
  0x7a   : > { %1771 = vmatpush2.bf16.msra.mxu0 %v2798_v47  ;;  %1814 = vmatpush2.bf16.msra.mxu1 %v2801_v48 }
  0x7b   : > { %1772 = vmatprep.subr.bf16.mxu0 %v2806_v49  ;;  %1815 = vmatprep.subr.bf16.mxu1 %v2809_v50 }
  0x7e   : > { %1773 = vmatpush2.bf16.msra.mxu0 %v2804_v51  ;;  %1816 = vmatpush2.bf16.msra.mxu1 %v2807_v52 }
  0x7f   : > { %1774 = vmatprep.subr.bf16.mxu0 %v2812_v53  ;;  %1817 = vmatprep.subr.bf16.mxu1 %v2815_v54 }
  0x82   : > { %1775 = vmatpush2.bf16.msra.mxu0 %v2810_v55  ;;  %1818 = vmatpush2.bf16.msra.mxu1 %v2813_v56 }
  0x83   : > { %1776 = vmatprep.subr.bf16.mxu0 %v2818_v57  ;;  %1819 = vmatprep.subr.bf16.mxu1 %v2821_v58 }
  0x86   : > { %1777 = vmatpush2.bf16.msra.mxu0 %v2816_v59  ;;  %1820 = vmatpush2.bf16.msra.mxu1 %v2819_v60 }
  0x87   : > { %1778 = vmatprep.subr.bf16.mxu0 %v2824_v61  ;;  %1821 = vmatprep.subr.bf16.mxu1 %v2827_v62 }
  0x8a   : > { %1779 = vmatpush2.bf16.msra.mxu0 %v2822_v63  ;;  %1822 = vmatpush2.bf16.msra.mxu1 %v2825_v0 }
  0x8b   : > { %1780 = vmatprep.subr.bf16.mxu0 %v2830_v1  ;;  %1823 = vmatprep.subr.bf16.mxu1 %v2833_v2 }
  0x8e   : > { %1781 = vmatpush2.bf16.msra.mxu0 %v2828_v3  ;;  %1824 = vmatpush2.bf16.msra.mxu1 %v2831_v4 }
  0x8f   : > { %1782 = vmatprep.subr.bf16.mxu0 %v2836_v5  ;;  %1825 = vmatprep.subr.bf16.mxu1 %v2839_v6 }
  0x92   : > { %1783 = vmatpush2.bf16.msra.mxu0 %v2834_v7  ;;  %1826 = vmatpush2.bf16.msra.mxu1 %v2837_v8  ;;  %v2840_v8 = vld [vmem:[%s3780_s5 + $0xe8] ss:$16 sps:$4 sm:$0xff]  }
  0x93   : > { %1838 = vmatprep.subr.bf16.mxu0 %v2842_v9  ;;  %1881 = vmatprep.subr.bf16.mxu1 %v2845_v10  ;;  %v2843_v9 = vld [vmem:[%s3780_s5 + $0x2e8] ss:$16 sps:$4 sm:$0xff]  }
  0xf5   : > { %v606_v11 = vpop.f32.mrf.mxu0  ;;  %v649_v12 = vpop.f32.mrf.mxu1 }
  0xf7   : > { %v608_v14 = vpop.f32.mrf.mxu0  ;;  %v651_v15 = vpop.f32.mrf.mxu1 }
  0xf9   : > { %v610_v17 = vpop.f32.mrf.mxu0  ;;  %v653_v18 = vpop.f32.mrf.mxu1 }
  0xfb   : > { %v612_v22 = vpop.f32.mrf.mxu0  ;;  %v655_v23 = vpop.f32.mrf.mxu1 }
 0x115   : > { %v852_v26 = vpop.f32.mrf.mxu0  ;;  %v895_v28 = vpop.f32.mrf.mxu1 }
 0x116   : > { %v853_v30 = vadd.f32 %v852_v26, %v606_v11  ;;  %v896_v31 = vadd.f32 %v895_v28, %v649_v12  ;;  %v2848_v12 = vld [vmem:[%s3780_s5 + $0xcc] ss:$16 sps:$4 sm:$0xff]   ;;  %v2861_v28 = vld [vmem:[%s3780_s5 + $0x288] ss:$16 sps:$4 sm:$0xff]  }
 0x117   : > { %v854_v32 = vpop.f32.mrf.mxu0  ;;  %v897_v34 = vpop.f32.mrf.mxu1  ;;  %v2863_v26 = vld [vmem:[%s3780_s5 + $0x28c] ss:$16 sps:$4 sm:$0xff]  }
 0x118   : > { %v855_v36 = vadd.f32 %v854_v32, %v608_v14  ;;  %v898_v37 = vadd.f32 %v897_v34, %v651_v15  ;;  %v926_v38 = vadd.f32 %v909_v27, %v853_v30  ;;  %v928_v39 = vadd.f32 %v917_v29, %v896_v31  ;;  %v2846_v14 = vld [vmem:[%s3780_s5 + $0xc8] ss:$16 sps:$4 sm:$0xff]   ;;  %v2869_v30 = vld [vmem:[%s3780_s5 + $0x26c] ss:$16 sps:$4 sm:$0xff]  }
 0x119   : > { %v856_v40 = vpop.f32.mrf.mxu0  ;;  %v899_v41 = vpop.f32.mrf.mxu1  ;;  %v2849_v15 = vld [vmem:[%s3780_s5 + $0x2c8] ss:$16 sps:$4 sm:$0xff]   ;;  %v2875_v34 = vld [vmem:[%s3780_s5 + $0x24c] ss:$16 sps:$4 sm:$0xff]  }
 0x11a   : > { %v927_v42 = vadd.f32 %v913_v33, %v855_v36  ;;  %v929_v43 = vadd.f32 %v921_v35, %v898_v37  ;;  %v857_v44 = vadd.f32 %v856_v40, %v610_v17  ;;  %v900_v45 = vadd.f32 %v899_v41, %v653_v18  ;;  %v2854_v17 = vld [vmem:[%s3780_s5 + $0xac] ss:$16 sps:$4 sm:$0xff]   ;;  %v2864_v31 = vld [vmem:[%s3780_s5 + $0x68] ss:$16 sps:$4 sm:$0xff]  }
 0x11b   : > { %v858_v46 = vpop.f32.mrf.mxu0  ;;  %v901_v47 = vpop.f32.mrf.mxu1  ;;  %vm934_vm0 = vcmp.gt.f32.partialorder %v926_v38, 0.0  ;;  %v942_v50 = vmul.f32 0.01, %v926_v38  ;;  %vm936_vm1 = vcmp.gt.f32.partialorder %v928_v39, 0.0  ;;  %v944_v51 = vmul.f32 0.01, %v928_v39 }
 0x11c   : > { %v859_v48 = vadd.f32 %v858_v46, %v612_v22  ;;  %v902_v49 = vadd.f32 %v901_v47, %v655_v23  ;;  %v930_v52 = vadd.f32 %v909_v27, %v857_v44  ;;  %v932_v53 = vadd.f32 %v917_v29, %v900_v45  ;;  %v2857_v18 = vld [vmem:[%s3780_s5 + $0x2ac] ss:$16 sps:$4 sm:$0xff]   ;;  %v2855_v22 = vld [vmem:[%s3780_s5 + $0x2a8] ss:$16 sps:$4 sm:$0xff]  }
 0x11d   : > { %vm935_vm2 = vcmp.gt.f32.partialorder %v927_v42, 0.0  ;;  %v943_v56 = vmul.f32 0.01, %v927_v42  ;;  %vm937_vm3 = vcmp.gt.f32.partialorder %v929_v43, 0.0  ;;  %v945_v57 = vmul.f32 0.01, %v929_v43 }
 0x11e   : > { %v931_v54 = vadd.f32 %v913_v33, %v859_v48  ;;  %v933_v55 = vadd.f32 %v921_v35, %v902_v49  ;;  %vm938_vm4 = vcmp.gt.f32.partialorder %v930_v52, 0.0  ;;  %v946_v58 = vmul.f32 0.01, %v930_v52  ;;  %v2860_v23 = vld [vmem:[%s3780_s5 + $0x8c] ss:$16 sps:$4 sm:$0xff]  }
 0x11f   : > { %vm940_vm5 = vcmp.gt.f32.partialorder %v932_v53, 0.0  ;;  %v948_v59 = vmul.f32 0.01, %v932_v53  ;;  %v951_v0 = vsel %vm935_vm2, %v927_v42, %v943_v56  ;;  %v953_v2 = vsel %vm937_vm3, %v929_v43, %v945_v57  ;;  %v2858_v27 = vld [vmem:[%s3780_s5 + $0x88] ss:$16 sps:$4 sm:$0xff]  }
 0x120   : > { %vm939_vm6 = vcmp.gt.f32.partialorder %v931_v54, 0.0  ;;  %v947_v60 = vmul.f32 0.01, %v931_v54  ;;  %vm941_vm7 = vcmp.gt.f32.partialorder %v933_v55, 0.0  ;;  %v949_v61 = vmul.f32 0.01, %v933_v55 }
 0x121   : > { %v954_v62 = vsel %vm938_vm4, %v930_v52, %v946_v58  ;;  %v956_v63 = vsel %vm940_vm5, %v932_v53, %v948_v59  ;;  %v950_v4 = vsel %vm934_vm0, %v926_v38, %v942_v50  ;;  %v952_v5 = vsel %vm936_vm1, %v928_v39, %v944_v51  ;;  %v2866_v29 = vld [vmem:[%s3780_s5 + $0x6c] ss:$16 sps:$4 sm:$0xff]   ;;  %v2867_v32 = vld [vmem:[%s3780_s5 + $0x268] ss:$16 sps:$4 sm:$0xff]  }
 0x122   : > { %v955_v1 = vsel %vm939_vm6, %v931_v54, %v947_v60  ;;  %v957_v3 = vsel %vm941_vm7, %v933_v55, %v949_v61  ;;  %v3472_v10 = vpack.c.bf16 %v954_v62, %v950_v4  ;;  %v3474_v11 = vpack.c.bf16 %v956_v63, %v952_v5  ;;  %v2872_v33 = vld [vmem:[%s3780_s5 + $0x4c] ss:$16 sps:$4 sm:$0xff]   ;;  %v2870_v35 = vld [vmem:[%s3780_s5 + $0x48] ss:$16 sps:$4 sm:$0xff]  }
 0x123   : > { %v959_v6 = vpack.c.bf16 %v955_v1, %v951_v0  ;;  %v961_v7 = vpack.c.bf16 %v957_v3, %v953_v2  ;;  %v2873_v36 = vld [vmem:[%s3780_s5 + $0x248] ss:$16 sps:$4 sm:$0xff]   ;;  %v2878_v37 = vld [vmem:[%s3780_s5 + $0x2c] ss:$16 sps:$4 sm:$0xff]  }
 0x124   : > { %v2881_v38 = vld [vmem:[%s3780_s5 + $0x22c] ss:$16 sps:$4 sm:$0xff]   ;;  %v2876_v39 = vld [vmem:[%s3780_s5 + $0x28] ss:$16 sps:$4 sm:$0xff]  }
 0x125   : > { %1784 = vmatprep.mubr.bf16.mxu0 %v959_v6  ;;  %1827 = vmatprep.mubr.bf16.mxu1 %v961_v7  ;;  %v2879_v40 = vld [vmem:[%s3780_s5 + $0x228] ss:$16 sps:$4 sm:$0xff]   ;;  %v2884_v41 = vld [vmem:[%s3780_s5 + $0xc] ss:$16 sps:$4 sm:$0xff]  }
 0x126   : > { %1785 = vmatmul.mubr.bf16.vlgmr.msra.gmra.mxu0 %v3472_v10  ;;  %1828 = vmatmul.mubr.bf16.vlgmr.msra.gmra.mxu1 %v3474_v11  ;;  %v2887_v42 = vld [vmem:[%s3780_s5 + $0x20c] ss:$16 sps:$4 sm:$0xff]   ;;  %v2882_v43 = vld [vmem:[%s3780_s5 + $0x8] ss:$16 sps:$4 sm:$0xff]  }
 0x127   : > { %1839 = vmatpush1.bf16.msra.mxu0 %v2840_v8  ;;  %1882 = vmatpush1.bf16.msra.mxu1 %v2843_v9  ;;  %v2885_v44 = vld [vmem:[%s3780_s5 + $0x208] ss:$16 sps:$4 sm:$0xff]   ;;  %v2890_v45 = vld [vmem:[%s3780_s5 + $0x1ec] ss:$16 sps:$4 sm:$0xff]  }
 0x128   : > { %1870 = vmatprep.mubr.bf16.mxu0 %v959_v6  ;;  %1913 = vmatprep.mubr.bf16.mxu1 %v961_v7  ;;  %v2893_v46 = vld [vmem:[%s3780_s5 + $0x3ec] ss:$16 sps:$4 sm:$0xff]   ;;  %v2888_v47 = vld [vmem:[%s3780_s5 + $0x1e8] ss:$16 sps:$4 sm:$0xff]  }
 0x129   : > { %1840 = vmatprep.subr.bf16.mxu0 %v2848_v12  ;;  %1883 = vmatprep.subr.bf16.mxu1 %v2851_v13  ;;  %v2891_v48 = vld [vmem:[%s3780_s5 + $0x3e8] ss:$16 sps:$4 sm:$0xff]   ;;  %v2896_v49 = vld [vmem:[%s3780_s5 + $0x1cc] ss:$16 sps:$4 sm:$0xff]  }
 0x12a   : > { %v2899_v50 = vld [vmem:[%s3780_s5 + $0x3cc] ss:$16 sps:$4 sm:$0xff]   ;;  %v2894_v51 = vld [vmem:[%s3780_s5 + $0x1c8] ss:$16 sps:$4 sm:$0xff]  }
 0x12b   : > { %1841 = vmatpush1.bf16.msra.mxu0 %v2846_v14  ;;  %1884 = vmatpush1.bf16.msra.mxu1 %v2849_v15  ;;  %v2897_v52 = vld [vmem:[%s3780_s5 + $0x3c8] ss:$16 sps:$4 sm:$0xff]   ;;  %v2902_v53 = vld [vmem:[%s3780_s5 + $0x1ac] ss:$16 sps:$4 sm:$0xff]  }
 0x12c   : > { %1842 = vmatprep.subr.bf16.mxu0 %v2854_v17  ;;  %1885 = vmatprep.subr.bf16.mxu1 %v2857_v18  ;;  %v2905_v54 = vld [vmem:[%s3780_s5 + $0x3ac] ss:$16 sps:$4 sm:$0xff]   ;;  %v2900_v55 = vld [vmem:[%s3780_s5 + $0x1a8] ss:$16 sps:$4 sm:$0xff]   ;;  %v2938_v18 = vld [vmem:[%s3782_s7 + $0x70] sm:$0xff]  }
 0x12d   : > { %v2903_v56 = vld [vmem:[%s3780_s5 + $0x3a8] ss:$16 sps:$4 sm:$0xff]   ;;  %v2908_v57 = vld [vmem:[%s3780_s5 + $0x18c] ss:$16 sps:$4 sm:$0xff]  }
 0x12e   : > { %v2911_v58 = vld [vmem:[%s3780_s5 + $0x38c] ss:$16 sps:$4 sm:$0xff]   ;;  %v2906_v59 = vld [vmem:[%s3780_s5 + $0x188] ss:$16 sps:$4 sm:$0xff]  }
 0x12f   : > { %1843 = vmatpush1.bf16.msra.mxu0 %v2852_v21  ;;  %1886 = vmatpush1.bf16.msra.mxu1 %v2855_v22  ;;  %v2909_v60 = vld [vmem:[%s3780_s5 + $0x388] ss:$16 sps:$4 sm:$0xff]   ;;  %v2914_v61 = vld [vmem:[%s3780_s5 + $0x16c] ss:$16 sps:$4 sm:$0xff]   ;;  %v2939_v21 = vld [vmem:[%s3782_s7 + $0x30] sm:$0xff]  }
 0x130   : > { %1844 = vmatprep.subr.bf16.mxu0 %v2860_v23  ;;  %1887 = vmatprep.subr.bf16.mxu1 %v2863_v26  ;;  %v2917_v62 = vld [vmem:[%s3780_s5 + $0x36c] ss:$16 sps:$4 sm:$0xff]   ;;  %v2912_v63 = vld [vmem:[%s3780_s5 + $0x168] ss:$16 sps:$4 sm:$0xff]  }
 0x131   : > { %v2915_v0 = vld [vmem:[%s3780_s5 + $0x368] ss:$16 sps:$4 sm:$0xff]   ;;  %v2920_v1 = vld [vmem:[%s3780_s5 + $0x14c] ss:$16 sps:$4 sm:$0xff]  }
 0x132   : > { %v2923_v2 = vld [vmem:[%s3780_s5 + $0x34c] ss:$16 sps:$4 sm:$0xff]   ;;  %v2918_v3 = vld [vmem:[%s3780_s5 + $0x148] ss:$16 sps:$4 sm:$0xff]  }
 0x133   : > { %1845 = vmatpush1.bf16.msra.mxu0 %v2858_v27  ;;  %1888 = vmatpush1.bf16.msra.mxu1 %v2861_v28  ;;  %v2921_v4 = vld [vmem:[%s3780_s5 + $0x348] ss:$16 sps:$4 sm:$0xff]   ;;  %v2926_v5 = vld [vmem:[%s3780_s5 + $0x12c] ss:$16 sps:$4 sm:$0xff]   ;;  %v2946_v28 = vld [vmem:[%s3782_s7 + $0x50] sm:$0xff]  }
 0x134   : > { %1846 = vmatprep.subr.bf16.mxu0 %v2866_v29  ;;  %1889 = vmatprep.subr.bf16.mxu1 %v2869_v30  ;;  %v2929_v6 = vld [vmem:[%s3780_s5 + $0x32c] ss:$16 sps:$4 sm:$0xff]   ;;  %v2924_v7 = vld [vmem:[%s3780_s5 + $0x128] ss:$16 sps:$4 sm:$0xff]   ;;  %v2947_v29 = vld [vmem:[%s3782_s7 + $0x10] sm:$0xff]  }
 0x135   : > { %v2927_v8 = vld [vmem:[%s3780_s5 + $0x328] ss:$16 sps:$4 sm:$0xff]   ;;  %v2932_v9 = vld [vmem:[%s3780_s5 + $0x10c] ss:$16 sps:$4 sm:$0xff]  }
 0x136   : > { %v2935_v12 = vld [vmem:[%s3780_s5 + $0x30c] ss:$16 sps:$4 sm:$0xff]   ;;  %v2930_v13 = vld [vmem:[%s3780_s5 + $0x108] ss:$16 sps:$4 sm:$0xff]  }
 0x137   : > { %1847 = vmatpush1.bf16.msra.mxu0 %v2864_v31  ;;  %1890 = vmatpush1.bf16.msra.mxu1 %v2867_v32  ;;  %v2933_v14 = vld [vmem:[%s3780_s5 + $0x308] ss:$16 sps:$4 sm:$0xff]  }
 0x138   : > { %1848 = vmatprep.subr.bf16.mxu0 %v2872_v33  ;;  %1891 = vmatprep.subr.bf16.mxu1 %v2875_v34  ;;  %v2936_v15 = vld [vmem:[%s3782_s7 + $0x78] sm:$0xff]   ;;  %v2940_v22 = vld [vmem:[%s3782_s7 + $0x68] sm:$0xff]   ;;  %v2954_v33 = vld [vmem:[%s3782_s7 + $0xf0] sm:$0xff]  }
 0x139   : > { %v2937_v17 = vld [vmem:[%s3782_s7 + $0x38] sm:$0xff]   ;;  %v2941_v23 = vld [vmem:[%s3782_s7 + $0x28] sm:$0xff]  }
 0x13a   : > { %v2944_v26 = vld [vmem:[%s3782_s7 + $0x58] sm:$0xff]   ;;  %v2948_v30 = vld [vmem:[%s3782_s7 + $0x48] sm:$0xff]  }
 0x13b   : > { %1849 = vmatpush1.bf16.msra.mxu0 %v2870_v35  ;;  %1892 = vmatpush1.bf16.msra.mxu1 %v2873_v36  ;;  %v2945_v27 = vld [vmem:[%s3782_s7 + $0x18] sm:$0xff]   ;;  %v2949_v34 = vld [vmem:[%s3782_s7 + $0x8] sm:$0xff]   ;;  %v2955_v35 = vld [vmem:[%s3782_s7 + $0xb0] sm:$0xff]  }
 0x13c   : > { %1850 = vmatprep.subr.bf16.mxu0 %v2878_v37  ;;  %1893 = vmatprep.subr.bf16.mxu1 %v2881_v38  ;;  %v2952_v31 = vld [vmem:[%s3782_s7 + $0xf8] sm:$0xff]   ;;  %v2950_v36 = vld [vmem:[%s3782_s7 + $0x40] sm:$0xff]   ;;  %v2956_v37 = vld [vmem:[%s3782_s7 + $0xe8] sm:$0xff]  }
 0x13d   : > { %v2953_v32 = vld [vmem:[%s3782_s7 + $0xb8] sm:$0xff]   ;;  %v2951_v38 = vld [vmem:[%s3782_s7] sm:$0xff]  }
 0x13f   : > { %1851 = vmatpush1.bf16.msra.mxu0 %v2876_v39  ;;  %1894 = vmatpush1.bf16.msra.mxu1 %v2879_v40  ;;  %v2957_v39 = vld [vmem:[%s3782_s7 + $0xa8] sm:$0xff]   ;;  %v2958_v40 = vld [vmem:[%s3782_s7 + $0xe0] sm:$0xff]  }
 0x140   : > { %1852 = vmatprep.subr.bf16.mxu0 %v2884_v41  ;;  %1895 = vmatprep.subr.bf16.mxu1 %v2887_v42  ;;  %v2959_v41 = vld [vmem:[%s3782_s7 + $0xa0] sm:$0xff]   ;;  %v2960_v42 = vld [vmem:[%s3782_s7 + $0xd8] sm:$0xff]  }
 0x143   : > { %1853 = vmatpush1.bf16.msra.mxu0 %v2882_v43  ;;  %1896 = vmatpush1.bf16.msra.mxu1 %v2885_v44  ;;  %v2961_v43 = vld [vmem:[%s3782_s7 + $0x98] sm:$0xff]   ;;  %v2962_v44 = vld [vmem:[%s3782_s7 + $0xd0] sm:$0xff]  }
 0x144   : > { %1854 = vmatprep.subr.bf16.mxu0 %v2890_v45  ;;  %1897 = vmatprep.subr.bf16.mxu1 %v2893_v46  ;;  %v2963_v45 = vld [vmem:[%s3782_s7 + $0x90] sm:$0xff]   ;;  %v2964_v46 = vld [vmem:[%s3782_s7 + $0xc8] sm:$0xff]  }
 0x147   : > { %1855 = vmatpush2.bf16.msra.mxu0 %v2888_v47  ;;  %1898 = vmatpush2.bf16.msra.mxu1 %v2891_v48  ;;  %v2965_v47 = vld [vmem:[%s3782_s7 + $0x88] sm:$0xff]   ;;  %v2966_v48 = vld [vmem:[%s3782_s7 + $0xc0] sm:$0xff]  }
 0x148   : > { %1856 = vmatprep.subr.bf16.mxu0 %v2896_v49  ;;  %1899 = vmatprep.subr.bf16.mxu1 %v2899_v50  ;;  %v2967_v49 = vld [vmem:[%s3782_s7 + $0x80] sm:$0xff]  }
 0x149   : > { %v1090_v50 = vld [vmem:[%s3781_s6] sm:$0xf] }
 0x14b   : > { %1857 = vmatpush2.bf16.msra.mxu0 %v2894_v51  ;;  %1900 = vmatpush2.bf16.msra.mxu1 %v2897_v52  ;;  %v1095_v51 = vrot.slane %v1090_v50, %v908_v19  ;;  %v1099_v52 = vrot.slane %v1090_v50, %v912_v24 }
 0x14c   : > { %1858 = vmatprep.subr.bf16.mxu0 %v2902_v53  ;;  %1901 = vmatprep.subr.bf16.mxu1 %v2905_v54 }
 0x14f   : > { %1859 = vmatpush2.bf16.msra.mxu0 %v2900_v55  ;;  %1902 = vmatpush2.bf16.msra.mxu1 %v2903_v56 }
 0x150   : > { %1860 = vmatprep.subr.bf16.mxu0 %v2908_v57  ;;  %1903 = vmatprep.subr.bf16.mxu1 %v2911_v58 }
 0x153   : > { %1861 = vmatpush2.bf16.msra.mxu0 %v2906_v59  ;;  %1904 = vmatpush2.bf16.msra.mxu1 %v2909_v60 }
 0x154   : > { %1862 = vmatprep.subr.bf16.mxu0 %v2914_v61  ;;  %1905 = vmatprep.subr.bf16.mxu1 %v2917_v62 }
 0x157   : > { %1863 = vmatpush2.bf16.msra.mxu0 %v2912_v63  ;;  %1906 = vmatpush2.bf16.msra.mxu1 %v2915_v0 }
 0x158   : > { %1864 = vmatprep.subr.bf16.mxu0 %v2920_v1  ;;  %1907 = vmatprep.subr.bf16.mxu1 %v2923_v2 }
 0x15b   : > { %1865 = vmatpush2.bf16.msra.mxu0 %v2918_v3  ;;  %1908 = vmatpush2.bf16.msra.mxu1 %v2921_v4 }
 0x15c   : > { %1866 = vmatprep.subr.bf16.mxu0 %v2926_v5  ;;  %1909 = vmatprep.subr.bf16.mxu1 %v2929_v6 }
 0x15f   : > { %1867 = vmatpush2.bf16.msra.mxu0 %v2924_v7  ;;  %1910 = vmatpush2.bf16.msra.mxu1 %v2927_v8 }
 0x160   : > { %1868 = vmatprep.subr.bf16.mxu0 %v2932_v9  ;;  %1911 = vmatprep.subr.bf16.mxu1 %v2935_v12 }
 0x163   : > { %1869 = vmatpush2.bf16.msra.mxu0 %v2930_v13  ;;  %1912 = vmatpush2.bf16.msra.mxu1 %v2933_v14 }
 0x164   : > { %2595 = vmatprep.subr.bf16.mxu0 %v2936_v15  ;;  %2617 = vmatprep.subr.bf16.mxu1 %v2952_v31  ;;  %v1103_v15 = vrot.slane %v1090_v50, %v916_v20 }
 0x166   : > { %1871 = vmatmul.mubr.bf16.vlgmr.msra.gmra.mxu0 %v3472_v10  ;;  %1914 = vmatmul.mubr.bf16.vlgmr.msra.gmra.mxu1 %v3474_v11  ;;  %v2942_v10 = vld [vmem:[%s3782_s7 + $0x60] sm:$0xff]  }
 0x167   : > { %2596 = vmatpush3.bf16.msra.mxu0 %v2937_v17  ;;  %v2943_v11 = vld [vmem:[%s3782_s7 + $0x20] sm:$0xff]   ;;  %2618 = vmatpush3.bf16.msra.mxu1 %v2953_v32  ;;  %v1107_v17 = vrot.slane %v1090_v50, %v920_v25 }
 0x168   : > { %2597 = vmatprep.subr.bf16.mxu0 %v2938_v18  ;;  %2619 = vmatprep.subr.bf16.mxu1 %v2954_v33 }
 0x16b   : > { %2598 = vmatpush3.bf16.msra.mxu0 %v2939_v21  ;;  %2620 = vmatpush3.bf16.msra.mxu1 %v2955_v35 }
 0x16c   : > { %2599 = vmatprep.subr.bf16.mxu0 %v2940_v22  ;;  %2621 = vmatprep.subr.bf16.mxu1 %v2956_v37 }
 0x16f   : > { %2600 = vmatpush3.bf16.msra.mxu0 %v2941_v23  ;;  %2622 = vmatpush3.bf16.msra.mxu1 %v2957_v39 }
 0x170   : > { %2601 = vmatprep.subr.bf16.mxu0 %v2942_v10  ;;  %2623 = vmatprep.subr.bf16.mxu1 %v2958_v40 }
 0x173   : > { %2602 = vmatpush3.bf16.msra.mxu0 %v2943_v11  ;;  %2624 = vmatpush3.bf16.msra.mxu1 %v2959_v41 }
 0x174   : > { %2603 = vmatprep.subr.bf16.mxu0 %v2944_v26  ;;  %2625 = vmatprep.subr.bf16.mxu1 %v2960_v42 }
 0x177   : > { %2604 = vmatpush3.bf16.msra.mxu0 %v2945_v27  ;;  %2626 = vmatpush3.bf16.msra.mxu1 %v2961_v43 }
 0x178   : > { %2605 = vmatprep.subr.bf16.mxu0 %v2946_v28  ;;  %2627 = vmatprep.subr.bf16.mxu1 %v2962_v44 }
 0x17b   : > { %2606 = vmatpush3.bf16.msra.mxu0 %v2947_v29  ;;  %2628 = vmatpush3.bf16.msra.mxu1 %v2963_v45 }
 0x17c   : > { %2607 = vmatprep.subr.bf16.mxu0 %v2948_v30  ;;  %2629 = vmatprep.subr.bf16.mxu1 %v2964_v46 }
 0x17f   : > { %2608 = vmatpush3.bf16.msra.mxu0 %v2949_v34  ;;  %2630 = vmatpush3.bf16.msra.mxu1 %v2965_v47  ;;  %v2558_v47 = vld [vmem:[%s3783_s8] ss:$0 sm:$0xff] }
 0x180   : > { %2609 = vmatprep.subr.bf16.mxu0 %v2950_v36  ;;  %2631 = vmatprep.subr.bf16.mxu1 %v2966_v48 }
 0x183   : > { %2610 = vmatpush3.bf16.msra.mxu0 %v2951_v38  ;;  %2632 = vmatpush3.bf16.msra.mxu1 %v2967_v49 }
 0x1e6   : > { %v1786_v53 = vpop.f32.mrf.mxu0  ;;  %v1829_v54 = vpop.f32.mrf.mxu1 }
 0x1e7   : > { %v1787_v57 = vadd.f32 %v1786_v53, %v1095_v51 }
 0x1e8   : > { %v1788_v55 = vpop.f32.mrf.mxu0  ;;  %v1831_v56 = vpop.f32.mrf.mxu1 }
 0x1e9   : > { %v1789_v58 = vadd.f32 %v1788_v55, %v1099_v52  ;;  %v1830_v0 = vadd.f32 %v1829_v54, %v1787_v57 }
 0x1ea   : > { %v1790_v59 = vpop.f32.mrf.mxu0  ;;  %v1833_v61 = vpop.f32.mrf.mxu1 }
 0x1eb   : > { %v1791_v60 = vadd.f32 %v1790_v59, %v1095_v51  ;;  %v1832_v62 = vadd.f32 %v1831_v56, %v1789_v58  ;;  %v1932_v24 = vmul.f32 0.01, %v1830_v0  ;;  %vm1924_vm10 = vcmp.gt.f32.partialorder %v1830_v0, 0.0 }
 0x1ec   : > { %v1792_v63 = vpop.f32.mrf.mxu0  ;;  %v1835_v4 = vpop.f32.mrf.mxu1 }
 0x1ed   : > { %v1834_v1 = vadd.f32 %v1833_v61, %v1791_v60  ;;  %v1793_v2 = vadd.f32 %v1792_v63, %v1099_v52  ;;  %v1933_v19 = vmul.f32 0.01, %v1832_v62  ;;  %vm1925_vm9 = vcmp.gt.f32.partialorder %v1832_v62, 0.0 }
 0x1ee   : > { %v1940_v12 = vsel %vm1924_vm10, %v1830_v0, %v1932_v24 }
 0x1ef   : > { %v1936_v3 = vmul.f32 0.01, %v1834_v1  ;;  %vm1928_vm8 = vcmp.gt.f32.partialorder %v1834_v1, 0.0  ;;  %v1836_v5 = vadd.f32 %v1835_v4, %v1793_v2  ;;  %v1941_v8 = vsel %vm1925_vm9, %v1832_v62, %v1933_v19 }
 0x1f1   : > { %vm1929_vm11 = vcmp.gt.f32.partialorder %v1836_v5, 0.0  ;;  %v1937_v6 = vmul.f32 0.01, %v1836_v5  ;;  %v1944_v7 = vsel %vm1928_vm8, %v1834_v1, %v1936_v3 }
 0x1f2   : > { %v1948_v14 = vpack.c.bf16 %v1944_v7, %v1940_v12 }
 0x1f3   : > { %v1945_v9 = vsel %vm1929_vm11, %v1836_v5, %v1937_v6 }
 0x1f4   : > { %v1949_v13 = vpack.c.bf16 %v1945_v9, %v1941_v8 }
 0x1f6   : > { %2247 = vmatprep.mubr.bf16.mxu0 %v1949_v13 }
 0x1f7   : > { %2248 = vmatmul.mubr.bf16.vlgmr.msra.gmra.mxu0 %v1948_v14 }
 0x226   : > { %v1872_v18 = vpop.f32.mrf.mxu0  ;;  %v1915_v21 = vpop.f32.mrf.mxu1 }
 0x227   : > { %v1873_v10 = vadd.f32 %v1872_v18, %v1103_v15 }
 0x228   : > { %v1874_v22 = vpop.f32.mrf.mxu0  ;;  %v1917_v23 = vpop.f32.mrf.mxu1 }
 0x229   : > { %v1875_v11 = vadd.f32 %v1874_v22, %v1107_v17  ;;  %v1916_v31 = vadd.f32 %v1915_v21, %v1873_v10 }
 0x22a   : > { %v1876_v26 = vpop.f32.mrf.mxu0  ;;  %v1919_v28 = vpop.f32.mrf.mxu1 }
 0x22b   : > { %v1877_v27 = vadd.f32 %v1876_v26, %v1103_v15  ;;  %v1918_v29 = vadd.f32 %v1917_v23, %v1875_v11  ;;  %v1934_v25 = vmul.f32 0.01, %v1916_v31  ;;  %vm1926_vm14 = vcmp.gt.f32.partialorder %v1916_v31, 0.0 }
 0x22c   : > { %v1878_v30 = vpop.f32.mrf.mxu0  ;;  %v1921_v35 = vpop.f32.mrf.mxu1 }
 0x22d   : > { %v1920_v32 = vadd.f32 %v1919_v28, %v1877_v27  ;;  %v1879_v33 = vadd.f32 %v1878_v30, %v1107_v17  ;;  %v1935_v20 = vmul.f32 0.01, %v1918_v29  ;;  %vm1927_vm13 = vcmp.gt.f32.partialorder %v1918_v29, 0.0 }
 0x22e   : > { %v1942_v40 = vsel %vm1926_vm14, %v1916_v31, %v1934_v25 }
 0x22f   : > { %v1938_v34 = vmul.f32 0.01, %v1920_v32  ;;  %vm1930_vm12 = vcmp.gt.f32.partialorder %v1920_v32, 0.0  ;;  %v1922_v16 = vadd.f32 %v1921_v35, %v1879_v33  ;;  %v1943_v38 = vsel %vm1927_vm13, %v1918_v29, %v1935_v20 }
 0x231   : > { %vm1931_vm15 = vcmp.gt.f32.partialorder %v1922_v16, 0.0  ;;  %v1939_v36 = vmul.f32 0.01, %v1922_v16  ;;  %v1946_v37 = vsel %vm1930_vm12, %v1920_v32, %v1938_v34 }
 0x232   : > { %v1950_v42 = vpack.c.bf16 %v1946_v37, %v1942_v40 }
 0x233   : > { %v1947_v39 = vsel %vm1931_vm15, %v1922_v16, %v1939_v36 }
 0x234   : > { %v1951_v41 = vpack.c.bf16 %v1947_v39, %v1943_v38 }
 0x236   : > { %2288 = vmatprep.mubr.bf16.mxu1 %v1951_v41 }
 0x237   : > { %2289 = vmatmul.mubr.bf16.vlgmr.msra.gmra.mxu1 %v1950_v42 }
 0x2b7   : > { %v2611_v43 = vpop.f32.mrf.mxu0 }
 0x2b9   : > { %v2612_v44 = vpop.f32.mrf.mxu0 }
 0x2ba   : > { %v2613_v46 = vadd.f32 %v2612_v44, %v2611_v43 }
 0x2bb   : > { %v2614_v45 = vpop.f32.mrf.mxu0 }
 0x2bc   : > { %v2250_v51 = vadd.f32 %v2613_v46, %v2558_v47 }
 0x2bd   : > { %v2615_v48 = vpop.f32.mrf.mxu0 }
 0x2be   : > { %v2616_v52 = vadd.f32 %v2615_v48, %v2614_v45 }
 0x2c0   : > { %v2253_v57 = vadd.f32 %v2616_v52, %v2558_v47 }
 0x2f7   : > { %v2633_v49 = vpop.f32.mrf.mxu1 }
 0x2f9   : > { %v2634_v50 = vpop.f32.mrf.mxu1 }
 0x2fa   : > { %v2635_v53 = vadd.f32 %v2634_v50, %v2633_v49 }
 0x2fb   : > { %v2636_v54 = vpop.f32.mrf.mxu1 }
 0x2fc   : > { %v2291_v55 = vadd.f32 %v2635_v53, %v2250_v51 }
 0x2fd   : > { %v2637_v56 = vpop.f32.mrf.mxu1 }
 0x2fe   : > { %2297 = vst [vmem:[#allocation2] sm:$0xff] %v2291_v55  ;;  %2299 = vst [vmem:[%s3043_s18] sm:$0xff] %v2291_v55  ;;  %v2638_v58 = vadd.f32 %v2637_v56, %v2636_v54 }
 0x300   : > { %v2294_v59 = vadd.f32 %v2638_v58, %v2253_v57 }
 0x302   : > { %2298 = vst [vmem:[#allocation2 + $0x8] sm:$0xff] %v2294_v59  ;;  %2300 = vst [vmem:[%s3043_s18 + $0x8] sm:$0xff] %v2294_v59 }
 0x303 PF: > { %s19_s30 = sadd.s32 1, %s2974_s30  }
 0x304   : > { %p16_p5 = scmp.ge.s32.totalorder %s19_s30, 5  }
 0x306   :  { %18 = sbr.rel (!%p16_p5) target bundleno = 1 (0x1), region = 90 }

// kernel: jepa_forward.10
= control target key start
LH: loop header
LB: loop body
LE: loop exit
PB: predicated region body
PF: predicated region fallthrough
CT: control target
= control target key end

     0   :  { %s7561_s1 = inlined_call_operand.vmem [shape: bf16[6400,128], index: 1, kind: input, shape index: {}]   ;;  %s7562_s0 = inlined_call_operand.vmem [shape: bf16[16,6400], index: 0, kind: input, shape index: {}]   ;;  %s7563_s2 = inlined_call_operand.vmem [shape: f32[1,128], index: 2, kind: input, shape index: {}]   ;;  %s7564_s3 = inlined_call_operand.vmem [shape: f32[16,128], index: 3, kind: output, shape index: {}]  }
   0x1   :  { %v5554_v0 = vld [vmem:[%s7561_s1 + $0x78] sm:$0xff]   ;;  %v5558_v4 = vld [vmem:[%s7561_s1 + $0x70] sm:$0xff]   ;;  %v5562_v8 = vld [vmem:[%s7561_s1 + $0x68] sm:$0xff]  }
   0x2   :  { %v5555_v1 = vld [vmem:[%s7561_s1 + $0x38] sm:$0xff]   ;;  %5004 = vmatprep.subr.bf16.mxu0 %v5554_v0  ;;  %v5559_v5 = vld [vmem:[%s7561_s1 + $0x30] sm:$0xff]   ;;  %v5563_v9 = vld [vmem:[%s7561_s1 + $0x28] sm:$0xff]  }
   0x3   :  { %v5556_v2 = vld [vmem:[%s7561_s1 + $0xf8] sm:$0xff]   ;;  %5005 = vmatpush3.bf16.msra.mxu0 %v5555_v1  ;;  %v5560_v6 = vld [vmem:[%s7561_s1 + $0xf0] sm:$0xff]   ;;  %v5564_v10 = vld [vmem:[%s7561_s1 + $0xe8] sm:$0xff]  }
   0x4   :  { %v5557_v3 = vld [vmem:[%s7561_s1 + $0xb8] sm:$0xff]   ;;  %5026 = vmatprep.subr.bf16.mxu1 %v5556_v2  ;;  %5006 = vmatprep.subr.bf16.mxu0 %v5558_v4  ;;  %v5561_v7 = vld [vmem:[%s7561_s1 + $0xb0] sm:$0xff]   ;;  %v5565_v11 = vld [vmem:[%s7561_s1 + $0xa8] sm:$0xff]  }
   0x5   :  { %5027 = vmatpush3.bf16.msra.mxu1 %v5557_v3  ;;  %v5566_v12 = vld [vmem:[%s7561_s1 + $0x60] sm:$0xff]   ;;  %v5570_v16 = vld [vmem:[%s7561_s1 + $0x58] sm:$0xff]   ;;  %v5574_v20 = vld [vmem:[%s7561_s1 + $0x50] sm:$0xff]  }
   0x6   :  { %5028 = vmatprep.subr.bf16.mxu1 %v5560_v6  ;;  %v5567_v13 = vld [vmem:[%s7561_s1 + $0x20] sm:$0xff]   ;;  %v5571_v17 = vld [vmem:[%s7561_s1 + $0x18] sm:$0xff]   ;;  %v5575_v21 = vld [vmem:[%s7561_s1 + $0x10] sm:$0xff]  }
   0x7   :  { %5007 = vmatpush3.bf16.msra.mxu0 %v5559_v5  ;;  %v5568_v14 = vld [vmem:[%s7561_s1 + $0xe0] sm:$0xff]   ;;  %v5572_v18 = vld [vmem:[%s7561_s1 + $0xd8] sm:$0xff]   ;;  %v5576_v22 = vld [vmem:[%s7561_s1 + $0xd0] sm:$0xff]  }
   0x8   :  { %5008 = vmatprep.subr.bf16.mxu0 %v5562_v8  ;;  %v5569_v15 = vld [vmem:[%s7561_s1 + $0xa0] sm:$0xff]   ;;  %v5573_v19 = vld [vmem:[%s7561_s1 + $0x98] sm:$0xff]   ;;  %v5577_v23 = vld [vmem:[%s7561_s1 + $0x90] sm:$0xff]  }
   0x9   :  { %5029 = vmatpush3.bf16.msra.mxu1 %v5561_v7  ;;  %v5578_v24 = vld [vmem:[%s7561_s1 + $0x48] sm:$0xff]   ;;  %v5582_v28 = vld [vmem:[%s7561_s1 + $0x40] sm:$0xff]   ;;  %v5589_v34 = vld [vmem:[%s7561_s1 + $0x178] sm:$0xff]  }
   0xa   :  { %5030 = vmatprep.subr.bf16.mxu1 %v5564_v10  ;;  %v5579_v25 = vld [vmem:[%s7561_s1 + $0x8] sm:$0xff]   ;;  %v5583_v29 = vld [vmem:[%s7561_s1] sm:$0xff]   ;;  %v5593_v37 = vld [vmem:[%s7561_s1 + $0x138] sm:$0xff]  }
   0xb   :  { %5009 = vmatpush3.bf16.msra.mxu0 %v5563_v9  ;;  %v5580_v26 = vld [vmem:[%s7561_s1 + $0xc8] sm:$0xff]   ;;  %v5584_v30 = vld [vmem:[%s7561_s1 + $0xc0] sm:$0xff]   ;;  %v5594_v38 = vld [vmem:[%s7561_s1 + $0x1f8] sm:$0xff]  }
   0xc   :  { %5010 = vmatprep.subr.bf16.mxu0 %v5566_v12  ;;  %v5581_v27 = vld [vmem:[%s7561_s1 + $0x88] sm:$0xff]   ;;  %v5588_v33 = vld [vmem:[%s7561_s1 + $0x80] sm:$0xff]   ;;  %v5595_v39 = vld [vmem:[%s7561_s1 + $0x1b8] sm:$0xff]  }
   0xd   :  { %5031 = vmatpush3.bf16.msra.mxu1 %v5565_v11  ;;  %v5585_v31 = vld [vmem:[%s7562_s0] ss:$200 sps:$4 sm:$0xff]   ;;  %v5587_v32 = vld [vmem:[%s7562_s0 + $0x4] ss:$200 sps:$4 sm:$0xff]   ;;  %v5596_v40 = vld [vmem:[%s7561_s1 + $0x170] sm:$0xff]  }
   0xe   :  { %5032 = vmatprep.subr.bf16.mxu1 %v5568_v14  ;;  %3554 = vmatprep.mubr.bf16.mxu0 %v5587_v32  ;;  %v5590_v35 = vld [vmem:[%s7562_s0 + $0x8] ss:$200 sps:$4 sm:$0xff]   ;;  %v5592_v36 = vld [vmem:[%s7562_s0 + $0xc] ss:$200 sps:$4 sm:$0xff]   ;;  %v5604_v48 = vld [vmem:[%s7561_s1 + $0x160] sm:$0xff]  }
   0xf   :  { %5011 = vmatpush3.bf16.msra.mxu0 %v5567_v13  ;;  %3595 = vmatprep.mubr.bf16.mxu1 %v5592_v36  ;;  %v5597_v41 = vld [vmem:[%s7561_s1 + $0x130] sm:$0xff]   ;;  %v5600_v44 = vld [vmem:[%s7561_s1 + $0x168] sm:$0xff]   ;;  %v5605_v49 = vld [vmem:[%s7561_s1 + $0x120] sm:$0xff]  }
  0x10   :  { %5012 = vmatprep.subr.bf16.mxu0 %v5570_v16  ;;  %v5598_v42 = vld [vmem:[%s7561_s1 + $0x1f0] sm:$0xff]   ;;  %v5601_v45 = vld [vmem:[%s7561_s1 + $0x128] sm:$0xff]   ;;  %v5606_v50 = vld [vmem:[%s7561_s1 + $0x1e0] sm:$0xff]  }
  0x11   :  { %5033 = vmatpush3.bf16.msra.mxu1 %v5569_v15  ;;  %v5599_v43 = vld [vmem:[%s7561_s1 + $0x1b0] sm:$0xff]   ;;  %v5602_v46 = vld [vmem:[%s7561_s1 + $0x1e8] sm:$0xff]   ;;  %v5607_v51 = vld [vmem:[%s7561_s1 + $0x1a0] sm:$0xff]  }
  0x12   :  { %5034 = vmatprep.subr.bf16.mxu1 %v5572_v18  ;;  %v5603_v47 = vld [vmem:[%s7561_s1 + $0x1a8] sm:$0xff]   ;;  %v5608_v52 = vld [vmem:[%s7561_s1 + $0x158] sm:$0xff]   ;;  %v5612_v56 = vld [vmem:[%s7561_s1 + $0x150] sm:$0xff]  }
  0x13   :  { %5013 = vmatpush3.bf16.msra.mxu0 %v5571_v17  ;;  %v5609_v53 = vld [vmem:[%s7561_s1 + $0x118] sm:$0xff]   ;;  %v5613_v57 = vld [vmem:[%s7561_s1 + $0x110] sm:$0xff]   ;;  %v5616_v60 = vld [vmem:[%s7561_s1 + $0x148] sm:$0xff]  }
  0x14   :  { %5014 = vmatprep.subr.bf16.mxu0 %v5574_v20  ;;  %v5610_v54 = vld [vmem:[%s7561_s1 + $0x1d8] sm:$0xff]   ;;  %v5614_v58 = vld [vmem:[%s7561_s1 + $0x1d0] sm:$0xff]   ;;  %v5617_v61 = vld [vmem:[%s7561_s1 + $0x108] sm:$0xff]  }
  0x15   :  { %5035 = vmatpush3.bf16.msra.mxu1 %v5573_v19  ;;  %v5611_v55 = vld [vmem:[%s7561_s1 + $0x198] sm:$0xff]   ;;  %v5615_v59 = vld [vmem:[%s7561_s1 + $0x190] sm:$0xff]   ;;  %v5618_v62 = vld [vmem:[%s7561_s1 + $0x1c8] sm:$0xff]  }
  0x16   :  { %5036 = vmatprep.subr.bf16.mxu1 %v5576_v22  ;;  %v5619_v63 = vld [vmem:[%s7561_s1 + $0x188] sm:$0xff]   ;;  %v5620_v0 = vld [vmem:[%s7561_s1 + $0x140] sm:$0xff]   ;;  %v5623_v3 = vld [vmem:[%s7562_s0 + $0x10] ss:$200 sps:$4 sm:$0xff]  }
  0x17   :  { %5015 = vmatpush3.bf16.msra.mxu0 %v5575_v21  ;;  %v5621_v1 = vld [vmem:[%s7561_s1 + $0x100] sm:$0xff]   ;;  %v5625_v4 = vld [vmem:[%s7562_s0 + $0x14] ss:$200 sps:$4 sm:$0xff]   ;;  %v5638_v16 = vld [vmem:[%s7561_s1 + $0x268] sm:$0xff]  }
  0x18   :  { %5016 = vmatprep.subr.bf16.mxu0 %v5578_v24  ;;  %v5622_v2 = vld [vmem:[%s7561_s1 + $0x1c0] sm:$0xff]   ;;  %v5627_v6 = vld [vmem:[%s7561_s1 + $0x278] sm:$0xff]   ;;  %v5634_v12 = vld [vmem:[%s7561_s1 + $0x270] sm:$0xff]  }
  0x19   :  { %5037 = vmatpush3.bf16.msra.mxu1 %v5577_v23  ;;  %v5626_v5 = vld [vmem:[%s7561_s1 + $0x180] sm:$0xff]   ;;  %v5631_v9 = vld [vmem:[%s7561_s1 + $0x238] sm:$0xff]   ;;  %v5635_v13 = vld [vmem:[%s7561_s1 + $0x230] sm:$0xff]  }
  0x1a   :  { %5038 = vmatprep.subr.bf16.mxu1 %v5580_v26  ;;  %v5628_v7 = vld [vmem:[%s7562_s0 + $0x18] ss:$200 sps:$4 sm:$0xff]   ;;  %v5630_v8 = vld [vmem:[%s7562_s0 + $0x1c] ss:$200 sps:$4 sm:$0xff]   ;;  %v5636_v14 = vld [vmem:[%s7561_s1 + $0x2f0] sm:$0xff]  }
  0x1b   :  { %5017 = vmatpush3.bf16.msra.mxu0 %v5579_v25  ;;  %v5632_v10 = vld [vmem:[%s7561_s1 + $0x2f8] sm:$0xff]   ;;  %v5637_v15 = vld [vmem:[%s7561_s1 + $0x2b0] sm:$0xff]   ;;  %v5639_v17 = vld [vmem:[%s7561_s1 + $0x228] sm:$0xff]  }
  0x1c   :  { %5018 = vmatprep.subr.bf16.mxu0 %v5582_v28  ;;  %v5633_v11 = vld [vmem:[%s7561_s1 + $0x2b8] sm:$0xff]   ;;  %v5640_v18 = vld [vmem:[%s7561_s1 + $0x2e8] sm:$0xff]   ;;  %v5642_v20 = vld [vmem:[%s7561_s1 + $0x260] sm:$0xff]  }
  0x1d   :  { %5039 = vmatpush3.bf16.msra.mxu1 %v5581_v27  ;;  %v5641_v19 = vld [vmem:[%s7561_s1 + $0x2a8] sm:$0xff]   ;;  %v5643_v21 = vld [vmem:[%s7561_s1 + $0x220] sm:$0xff]   ;;  %v5646_v24 = vld [vmem:[%s7561_s1 + $0x258] sm:$0xff]  }
  0x1e   :  { %5040 = vmatprep.subr.bf16.mxu1 %v5584_v30  ;;  %v5644_v22 = vld [vmem:[%s7561_s1 + $0x2e0] sm:$0xff]   ;;  %v5647_v25 = vld [vmem:[%s7561_s1 + $0x218] sm:$0xff]   ;;  %v5650_v28 = vld [vmem:[%s7561_s1 + $0x250] sm:$0xff]  }
  0x1f   :  { %5019 = vmatpush3.bf16.msra.mxu0 %v5583_v29  ;;  %v5645_v23 = vld [vmem:[%s7561_s1 + $0x2a0] sm:$0xff]   ;;  %v5648_v26 = vld [vmem:[%s7561_s1 + $0x2d8] sm:$0xff]   ;;  %v5651_v29 = vld [vmem:[%s7561_s1 + $0x210] sm:$0xff]  }
  0x20   :  { %5048 = vmatprep.subr.bf16.mxu0 %v5589_v34  ;;  %v5649_v27 = vld [vmem:[%s7561_s1 + $0x298] sm:$0xff]   ;;  %v5652_v30 = vld [vmem:[%s7561_s1 + $0x2d0] sm:$0xff]   ;;  %v5654_v32 = vld [vmem:[%s7561_s1 + $0x248] sm:$0xff]  }
  0x21   :  { %5041 = vmatpush3.bf16.msra.mxu1 %v5588_v33  ;;  %v5655_v33 = vld [vmem:[%s7561_s1 + $0x208] sm:$0xff]   ;;  %v5658_v36 = vld [vmem:[%s7561_s1 + $0x240] sm:$0xff]  }
  0x22   :  { %3555 = vmatmul.mubr.bf16.vlgmr.msra.gmra.mxu0 %v5585_v31  ;;  %5070 = vmatprep.subr.bf16.mxu1 %v5594_v38  ;;  %v5653_v31 = vld [vmem:[%s7561_s1 + $0x290] sm:$0xff]   ;;  %v5656_v34 = vld [vmem:[%s7561_s1 + $0x2c8] sm:$0xff]   ;;  %v5660_v38 = vld [vmem:[%s7561_s1 + $0x2c0] sm:$0xff]  }
  0x23   :  { %5049 = vmatpush3.bf16.msra.mxu0 %v5593_v37  ;;  %3636 = vmatprep.mubr.bf16.mxu0 %v5625_v4  ;;  %v5659_v37 = vld [vmem:[%s7561_s1 + $0x200] sm:$0xff]   ;;  %v5692_v4 = vld [vmem:[%s7561_s1 + $0x348] sm:$0xff]  }
  0x24   :  { %3596 = vmatmul.mubr.bf16.vlgmr.msra.gmra.mxu1 %v5590_v35  ;;  %5050 = vmatprep.subr.bf16.mxu0 %v5596_v40  ;;  %v5657_v35 = vld [vmem:[%s7561_s1 + $0x288] sm:$0xff]  }
  0x25   :  { %5071 = vmatpush3.bf16.msra.mxu1 %v5595_v39  ;;  %3677 = vmatprep.mubr.bf16.mxu1 %v5630_v8  ;;  %v5661_v39 = vld [vmem:[%s7562_s0 + $0x20] ss:$200 sps:$4 sm:$0xff]   ;;  %v5663_v40 = vld [vmem:[%s7562_s0 + $0x24] ss:$200 sps:$4 sm:$0xff]  }
  0x26   :  { %5072 = vmatprep.subr.bf16.mxu1 %v5598_v42  ;;  %v5665_v42 = vld [vmem:[%s7561_s1 + $0x378] sm:$0xff]   ;;  %v5696_v8 = vld [vmem:[%s7561_s1 + $0x340] sm:$0xff]  }
  0x27   :  { %5051 = vmatpush3.bf16.msra.mxu0 %v5597_v41  ;;  %v5664_v41 = vld [vmem:[%s7561_s1 + $0x280] sm:$0xff]  }
  0x28   :  { %5052 = vmatprep.subr.bf16.mxu0 %v5600_v44  ;;  %v5668_v44 = vld [vmem:[%s7562_s0 + $0x2c] ss:$200 sps:$4 sm:$0xff]  }
  0x29   :  { %5073 = vmatpush3.bf16.msra.mxu1 %v5599_v43  ;;  %v5666_v43 = vld [vmem:[%s7562_s0 + $0x28] ss:$200 sps:$4 sm:$0xff]  }
  0x2a   :  { %5074 = vmatprep.subr.bf16.mxu1 %v5602_v46  ;;  %v5670_v46 = vld [vmem:[%s7561_s1 + $0x3f8] sm:$0xff]  }
  0x2b   :  { %5053 = vmatpush3.bf16.msra.mxu0 %v5601_v45  ;;  %v5669_v45 = vld [vmem:[%s7561_s1 + $0x338] sm:$0xff]  }
  0x2c   :  { %5054 = vmatprep.subr.bf16.mxu0 %v5604_v48  ;;  %v5672_v48 = vld [vmem:[%s7561_s1 + $0x370] sm:$0xff]  }
  0x2d   :  { %5075 = vmatpush3.bf16.msra.mxu1 %v5603_v47  ;;  %v5671_v47 = vld [vmem:[%s7561_s1 + $0x3b8] sm:$0xff]  }
  0x2e   :  { %5076 = vmatprep.subr.bf16.mxu1 %v5606_v50  ;;  %v5674_v50 = vld [vmem:[%s7561_s1 + $0x3f0] sm:$0xff]  }
  0x2f   :  { %5055 = vmatpush3.bf16.msra.mxu0 %v5605_v49  ;;  %v5673_v49 = vld [vmem:[%s7561_s1 + $0x330] sm:$0xff]  }
  0x30   :  { %5056 = vmatprep.subr.bf16.mxu0 %v5608_v52  ;;  %v5676_v52 = vld [vmem:[%s7561_s1 + $0x368] sm:$0xff]  }
  0x31   :  { %5077 = vmatpush3.bf16.msra.mxu1 %v5607_v51  ;;  %v5675_v51 = vld [vmem:[%s7561_s1 + $0x3b0] sm:$0xff]  }
  0x32   :  { %5078 = vmatprep.subr.bf16.mxu1 %v5610_v54  ;;  %v5678_v54 = vld [vmem:[%s7561_s1 + $0x3e8] sm:$0xff]  }
  0x33   :  { %5057 = vmatpush3.bf16.msra.mxu0 %v5609_v53  ;;  %v5677_v53 = vld [vmem:[%s7561_s1 + $0x328] sm:$0xff]  }
  0x34   :  { %5058 = vmatprep.subr.bf16.mxu0 %v5612_v56  ;;  %v5680_v56 = vld [vmem:[%s7561_s1 + $0x360] sm:$0xff]  }
  0x35   :  { %5079 = vmatpush3.bf16.msra.mxu1 %v5611_v55  ;;  %v5679_v55 = vld [vmem:[%s7561_s1 + $0x3a8] sm:$0xff]  }
  0x36   :  { %5080 = vmatprep.subr.bf16.mxu1 %v5614_v58  ;;  %v5682_v58 = vld [vmem:[%s7561_s1 + $0x3e0] sm:$0xff]  }
  0x37   :  { %5059 = vmatpush3.bf16.msra.mxu0 %v5613_v57  ;;  %v5681_v57 = vld [vmem:[%s7561_s1 + $0x320] sm:$0xff]  }
  0x38   :  { %5060 = vmatprep.subr.bf16.mxu0 %v5616_v60  ;;  %v5684_v60 = vld [vmem:[%s7561_s1 + $0x358] sm:$0xff]  }
  0x39   :  { %5081 = vmatpush3.bf16.msra.mxu1 %v5615_v59  ;;  %v5683_v59 = vld [vmem:[%s7561_s1 + $0x3a0] sm:$0xff]  }
  0x3a   :  { %5082 = vmatprep.subr.bf16.mxu1 %v5618_v62  ;;  %v5686_v62 = vld [vmem:[%s7561_s1 + $0x3d8] sm:$0xff]  }
  0x3b   :  { %5061 = vmatpush3.bf16.msra.mxu0 %v5617_v61  ;;  %v5685_v61 = vld [vmem:[%s7561_s1 + $0x318] sm:$0xff]  }
  0x3c   :  { %5062 = vmatprep.subr.bf16.mxu0 %v5620_v0  ;;  %v5688_v0 = vld [vmem:[%s7561_s1 + $0x350] sm:$0xff]  }
  0x3d   :  { %5083 = vmatpush3.bf16.msra.mxu1 %v5619_v63  ;;  %v5687_v63 = vld [vmem:[%s7561_s1 + $0x398] sm:$0xff]  }
  0x3e   :  { %5084 = vmatprep.subr.bf16.mxu1 %v5622_v2  ;;  %v5690_v2 = vld [vmem:[%s7561_s1 + $0x3d0] sm:$0xff]  }
  0x3f   :  { %5063 = vmatpush3.bf16.msra.mxu0 %v5621_v1  ;;  %v5689_v1 = vld [vmem:[%s7561_s1 + $0x310] sm:$0xff]  }
  0x40   :  { %5092 = vmatprep.subr.bf16.mxu0 %v5627_v6  ;;  %v5694_v6 = vld [vmem:[%s7561_s1 + $0x3c8] sm:$0xff]  }
  0x41   :  { %5085 = vmatpush3.bf16.msra.mxu1 %v5626_v5  ;;  %v5693_v5 = vld [vmem:[%s7561_s1 + $0x308] sm:$0xff]  }
  0x42   :  { %3637 = vmatmul.mubr.bf16.vlgmr.msra.gmra.mxu0 %v5623_v3  ;;  %5114 = vmatprep.subr.bf16.mxu1 %v5632_v10  ;;  %v5691_v3 = vld [vmem:[%s7561_s1 + $0x390] sm:$0xff]   ;;  %v5698_v10 = vld [vmem:[%s7561_s1 + $0x3c0] sm:$0xff]  }
  0x43   :  { %5093 = vmatpush3.bf16.msra.mxu0 %v5631_v9  ;;  %3718 = vmatprep.mubr.bf16.mxu0 %v5663_v40  ;;  %v5697_v9 = vld [vmem:[%s7561_s1 + $0x300] sm:$0xff]   ;;  %v5730_v40 = vld [vmem:[%s7561_s1 + $0x448] sm:$0xff]  }
  0x44   :  { %3678 = vmatmul.mubr.bf16.vlgmr.msra.gmra.mxu1 %v5628_v7  ;;  %5094 = vmatprep.subr.bf16.mxu0 %v5634_v12  ;;  %v5695_v7 = vld [vmem:[%s7561_s1 + $0x388] sm:$0xff]   ;;  %v5701_v12 = vld [vmem:[%s7562_s0 + $0x34] ss:$200 sps:$4 sm:$0xff]  }
  0x45   :  { %5115 = vmatpush3.bf16.msra.mxu1 %v5633_v11  ;;  %3759 = vmatprep.mubr.bf16.mxu1 %v5668_v44  ;;  %v5699_v11 = vld [vmem:[%s7562_s0 + $0x30] ss:$200 sps:$4 sm:$0xff]   ;;  %v5734_v44 = vld [vmem:[%s7561_s1 + $0x440] sm:$0xff]  }
  0x46   :  { %5116 = vmatprep.subr.bf16.mxu1 %v5636_v14  ;;  %v5703_v14 = vld [vmem:[%s7561_s1 + $0x478] sm:$0xff]  }
  0x47   :  { %5095 = vmatpush3.bf16.msra.mxu0 %v5635_v13  ;;  %v5702_v13 = vld [vmem:[%s7561_s1 + $0x380] sm:$0xff]  }
  0x48   :  { %5096 = vmatprep.subr.bf16.mxu0 %v5638_v16  ;;  %v5706_v16 = vld [vmem:[%s7562_s0 + $0x3c] ss:$200 sps:$4 sm:$0xff]  }
  0x49   :  { %5117 = vmatpush3.bf16.msra.mxu1 %v5637_v15  ;;  %v5704_v15 = vld [vmem:[%s7562_s0 + $0x38] ss:$200 sps:$4 sm:$0xff]  }
  0x4a   :  { %5118 = vmatprep.subr.bf16.mxu1 %v5640_v18  ;;  %v5708_v18 = vld [vmem:[%s7561_s1 + $0x4f8] sm:$0xff]  }
  0x4b   :  { %5097 = vmatpush3.bf16.msra.mxu0 %v5639_v17  ;;  %v5707_v17 = vld [vmem:[%s7561_s1 + $0x438] sm:$0xff]  }
  0x4c   :  { %5098 = vmatprep.subr.bf16.mxu0 %v5642_v20  ;;  %v5710_v20 = vld [vmem:[%s7561_s1 + $0x470] sm:$0xff]  }
  0x4d   :  { %5119 = vmatpush3.bf16.msra.mxu1 %v5641_v19  ;;  %v5709_v19 = vld [vmem:[%s7561_s1 + $0x4b8] sm:$0xff]  }
  0x4e   :  { %5120 = vmatprep.subr.bf16.mxu1 %v5644_v22  ;;  %v5712_v22 = vld [vmem:[%s7561_s1 + $0x4f0] sm:$0xff]  }
  0x4f   :  { %5099 = vmatpush3.bf16.msra.mxu0 %v5643_v21  ;;  %v5711_v21 = vld [vmem:[%s7561_s1 + $0x430] sm:$0xff]  }
  0x50   :  { %5100 = vmatprep.subr.bf16.mxu0 %v5646_v24  ;;  %v5714_v24 = vld [vmem:[%s7561_s1 + $0x468] sm:$0xff]  }
  0x51   :  { %5121 = vmatpush3.bf16.msra.mxu1 %v5645_v23  ;;  %v5713_v23 = vld [vmem:[%s7561_s1 + $0x4b0] sm:$0xff]  }
  0x52   :  { %5122 = vmatprep.subr.bf16.mxu1 %v5648_v26  ;;  %v5716_v26 = vld [vmem:[%s7561_s1 + $0x4e8] sm:$0xff]  }
  0x53   :  { %5101 = vmatpush3.bf16.msra.mxu0 %v5647_v25  ;;  %v5715_v25 = vld [vmem:[%s7561_s1 + $0x428] sm:$0xff]  }
  0x54   :  { %5102 = vmatprep.subr.bf16.mxu0 %v5650_v28  ;;  %v5718_v28 = vld [vmem:[%s7561_s1 + $0x460] sm:$0xff]  }
  0x55   :  { %5123 = vmatpush3.bf16.msra.mxu1 %v5649_v27  ;;  %v5717_v27 = vld [vmem:[%s7561_s1 + $0x4a8] sm:$0xff]  }
  0x56   :  { %5124 = vmatprep.subr.bf16.mxu1 %v5652_v30  ;;  %v5720_v30 = vld [vmem:[%s7561_s1 + $0x4e0] sm:$0xff]  }
  0x57   :  { %5103 = vmatpush3.bf16.msra.mxu0 %v5651_v29  ;;  %v5719_v29 = vld [vmem:[%s7561_s1 + $0x420] sm:$0xff]  }
  0x58   :  { %5104 = vmatprep.subr.bf16.mxu0 %v5654_v32  ;;  %v5722_v32 = vld [vmem:[%s7561_s1 + $0x458] sm:$0xff]  }
  0x59   :  { %5125 = vmatpush3.bf16.msra.mxu1 %v5653_v31  ;;  %v5721_v31 = vld [vmem:[%s7561_s1 + $0x4a0] sm:$0xff]  }
  0x5a   :  { %5126 = vmatprep.subr.bf16.mxu1 %v5656_v34  ;;  %v5724_v34 = vld [vmem:[%s7561_s1 + $0x4d8] sm:$0xff]  }
  0x5b   :  { %5105 = vmatpush3.bf16.msra.mxu0 %v5655_v33  ;;  %v5723_v33 = vld [vmem:[%s7561_s1 + $0x418] sm:$0xff]  }
  0x5c   :  { %5106 = vmatprep.subr.bf16.mxu0 %v5658_v36  ;;  %v5726_v36 = vld [vmem:[%s7561_s1 + $0x450] sm:$0xff]  }
  0x5d   :  { %5127 = vmatpush3.bf16.msra.mxu1 %v5657_v35  ;;  %v5725_v35 = vld [vmem:[%s7561_s1 + $0x498] sm:$0xff]  }
  0x5e   :  { %5128 = vmatprep.subr.bf16.mxu1 %v5660_v38  ;;  %v5728_v38 = vld [vmem:[%s7561_s1 + $0x4d0] sm:$0xff]  }
  0x5f   :  { %5107 = vmatpush3.bf16.msra.mxu0 %v5659_v37  ;;  %v5727_v37 = vld [vmem:[%s7561_s1 + $0x410] sm:$0xff]  }
  0x60   :  { %5136 = vmatprep.subr.bf16.mxu0 %v5665_v42  ;;  %v5732_v42 = vld [vmem:[%s7561_s1 + $0x4c8] sm:$0xff]  }
  0x61   :  { %5129 = vmatpush3.bf16.msra.mxu1 %v5664_v41  ;;  %v5731_v41 = vld [vmem:[%s7561_s1 + $0x408] sm:$0xff]  }
  0x62   :  { %3719 = vmatmul.mubr.bf16.vlgmr.msra.gmra.mxu0 %v5661_v39  ;;  %5158 = vmatprep.subr.bf16.mxu1 %v5670_v46  ;;  %v5729_v39 = vld [vmem:[%s7561_s1 + $0x490] sm:$0xff]   ;;  %v5736_v46 = vld [vmem:[%s7561_s1 + $0x4c0] sm:$0xff]  }
  0x63   :  { %5137 = vmatpush3.bf16.msra.mxu0 %v5669_v45  ;;  %3800 = vmatprep.mubr.bf16.mxu0 %v5701_v12  ;;  %v5735_v45 = vld [vmem:[%s7561_s1 + $0x400] sm:$0xff]   ;;  %v5768_v12 = vld [vmem:[%s7561_s1 + $0x548] sm:$0xff]  }
  0x64   :  { %3760 = vmatmul.mubr.bf16.vlgmr.msra.gmra.mxu1 %v5666_v43  ;;  %5138 = vmatprep.subr.bf16.mxu0 %v5672_v48  ;;  %v5733_v43 = vld [vmem:[%s7561_s1 + $0x488] sm:$0xff]  }
  0x65   :  { %5159 = vmatpush3.bf16.msra.mxu1 %v5671_v47  ;;  %3841 = vmatprep.mubr.bf16.mxu1 %v5706_v16  ;;  %v5737_v47 = vld [vmem:[%s7562_s0 + $0x40] ss:$200 sps:$4 sm:$0xff]   ;;  %v5739_v48 = vld [vmem:[%s7562_s0 + $0x44] ss:$200 sps:$4 sm:$0xff]  }
  0x66   :  { %5160 = vmatprep.subr.bf16.mxu1 %v5674_v50  ;;  %v5741_v50 = vld [vmem:[%s7561_s1 + $0x578] sm:$0xff]   ;;  %v5772_v16 = vld [vmem:[%s7561_s1 + $0x540] sm:$0xff]  }
  0x67   :  { %5139 = vmatpush3.bf16.msra.mxu0 %v5673_v49  ;;  %v5740_v49 = vld [vmem:[%s7561_s1 + $0x480] sm:$0xff]  }
  0x68   :  { %5140 = vmatprep.subr.bf16.mxu0 %v5676_v52  ;;  %v5744_v52 = vld [vmem:[%s7562_s0 + $0x4c] ss:$200 sps:$4 sm:$0xff]  }
  0x69   :  { %5161 = vmatpush3.bf16.msra.mxu1 %v5675_v51  ;;  %v5742_v51 = vld [vmem:[%s7562_s0 + $0x48] ss:$200 sps:$4 sm:$0xff]  }
  0x6a   :  { %5162 = vmatprep.subr.bf16.mxu1 %v5678_v54  ;;  %v5746_v54 = vld [vmem:[%s7561_s1 + $0x5f8] sm:$0xff]  }
  0x6b   :  { %5141 = vmatpush3.bf16.msra.mxu0 %v5677_v53  ;;  %v5745_v53 = vld [vmem:[%s7561_s1 + $0x538] sm:$0xff]  }
  0x6c   :  { %5142 = vmatprep.subr.bf16.mxu0 %v5680_v56  ;;  %v5748_v56 = vld [vmem:[%s7561_s1 + $0x570] sm:$0xff]  }
  0x6d   :  { %5163 = vmatpush3.bf16.msra.mxu1 %v5679_v55  ;;  %v5747_v55 = vld [vmem:[%s7561_s1 + $0x5b8] sm:$0xff]  }
  0x6e   :  { %5164 = vmatprep.subr.bf16.mxu1 %v5682_v58  ;;  %v5750_v58 = vld [vmem:[%s7561_s1 + $0x5f0] sm:$0xff]  }
  0x6f   :  { %5143 = vmatpush3.bf16.msra.mxu0 %v5681_v57  ;;  %v5749_v57 = vld [vmem:[%s7561_s1 + $0x530] sm:$0xff]  }
  0x70   :  { %5144 = vmatprep.subr.bf16.mxu0 %v5684_v60  ;;  %v5752_v60 = vld [vmem:[%s7561_s1 + $0x568] sm:$0xff]  }
  0x71   :  { %5165 = vmatpush3.bf16.msra.mxu1 %v5683_v59  ;;  %v5751_v59 = vld [vmem:[%s7561_s1 + $0x5b0] sm:$0xff]  }
  0x72   :  { %5166 = vmatprep.subr.bf16.mxu1 %v5686_v62  ;;  %v5754_v62 = vld [vmem:[%s7561_s1 + $0x5e8] sm:$0xff]  }
  0x73   :  { %5145 = vmatpush3.bf16.msra.mxu0 %v5685_v61  ;;  %v5753_v61 = vld [vmem:[%s7561_s1 + $0x528] sm:$0xff]  }
  0x74   :  { %5146 = vmatprep.subr.bf16.mxu0 %v5688_v0  ;;  %v5756_v0 = vld [vmem:[%s7561_s1 + $0x560] sm:$0xff]  }
  0x75   :  { %5167 = vmatpush3.bf16.msra.mxu1 %v5687_v63  ;;  %v5755_v63 = vld [vmem:[%s7561_s1 + $0x5a8] sm:$0xff]  }
  0x76   :  { %5168 = vmatprep.subr.bf16.mxu1 %v5690_v2  ;;  %v5758_v2 = vld [vmem:[%s7561_s1 + $0x5e0] sm:$0xff]  }
  0x77   :  { %5147 = vmatpush3.bf16.msra.mxu0 %v5689_v1  ;;  %v5757_v1 = vld [vmem:[%s7561_s1 + $0x520] sm:$0xff]  }
  0x78   :  { %5148 = vmatprep.subr.bf16.mxu0 %v5692_v4  ;;  %v5760_v4 = vld [vmem:[%s7561_s1 + $0x558] sm:$0xff]  }
  0x79   :  { %5169 = vmatpush3.bf16.msra.mxu1 %v5691_v3  ;;  %v5759_v3 = vld [vmem:[%s7561_s1 + $0x5a0] sm:$0xff]  }
  0x7a   :  { %5170 = vmatprep.subr.bf16.mxu1 %v5694_v6  ;;  %v5762_v6 = vld [vmem:[%s7561_s1 + $0x5d8] sm:$0xff]  }
  0x7b   :  { %5149 = vmatpush3.bf16.msra.mxu0 %v5693_v5  ;;  %v5761_v5 = vld [vmem:[%s7561_s1 + $0x518] sm:$0xff]  }
  0x7c   :  { %5150 = vmatprep.subr.bf16.mxu0 %v5696_v8  ;;  %v5764_v8 = vld [vmem:[%s7561_s1 + $0x550] sm:$0xff]  }
  0x7d   :  { %5171 = vmatpush3.bf16.msra.mxu1 %v5695_v7  ;;  %v5763_v7 = vld [vmem:[%s7561_s1 + $0x598] sm:$0xff]  }
  0x7e   :  { %5172 = vmatprep.subr.bf16.mxu1 %v5698_v10  ;;  %v5766_v10 = vld [vmem:[%s7561_s1 + $0x5d0] sm:$0xff]  }
  0x7f   :  { %5151 = vmatpush3.bf16.msra.mxu0 %v5697_v9  ;;  %v5765_v9 = vld [vmem:[%s7561_s1 + $0x510] sm:$0xff]  }
  0x80   :  { %5180 = vmatprep.subr.bf16.mxu0 %v5703_v14  ;;  %v5770_v14 = vld [vmem:[%s7561_s1 + $0x5c8] sm:$0xff]  }
  0x81   :  { %5173 = vmatpush3.bf16.msra.mxu1 %v5702_v13  ;;  %v5769_v13 = vld [vmem:[%s7561_s1 + $0x508] sm:$0xff]  }
  0x82   :  { %3801 = vmatmul.mubr.bf16.vlgmr.msra.gmra.mxu0 %v5699_v11  ;;  %5202 = vmatprep.subr.bf16.mxu1 %v5708_v18  ;;  %v5767_v11 = vld [vmem:[%s7561_s1 + $0x590] sm:$0xff]   ;;  %v5774_v18 = vld [vmem:[%s7561_s1 + $0x5c0] sm:$0xff]  }
  0x83   :  { %5181 = vmatpush3.bf16.msra.mxu0 %v5707_v17  ;;  %3882 = vmatprep.mubr.bf16.mxu0 %v5739_v48  ;;  %v5773_v17 = vld [vmem:[%s7561_s1 + $0x500] sm:$0xff]   ;;  %v5806_v48 = vld [vmem:[%s7561_s1 + $0x648] sm:$0xff]  }
  0x84   :  { %3842 = vmatmul.mubr.bf16.vlgmr.msra.gmra.mxu1 %v5704_v15  ;;  %5182 = vmatprep.subr.bf16.mxu0 %v5710_v20  ;;  %v5771_v15 = vld [vmem:[%s7561_s1 + $0x588] sm:$0xff]   ;;  %v5777_v20 = vld [vmem:[%s7562_s0 + $0x54] ss:$200 sps:$4 sm:$0xff]  }
  0x85   :  { %5203 = vmatpush3.bf16.msra.mxu1 %v5709_v19  ;;  %3923 = vmatprep.mubr.bf16.mxu1 %v5744_v52  ;;  %v5775_v19 = vld [vmem:[%s7562_s0 + $0x50] ss:$200 sps:$4 sm:$0xff]   ;;  %v5810_v52 = vld [vmem:[%s7561_s1 + $0x640] sm:$0xff]  }
  0x86   :  { %5204 = vmatprep.subr.bf16.mxu1 %v5712_v22  ;;  %v5779_v22 = vld [vmem:[%s7561_s1 + $0x678] sm:$0xff]  }
  0x87   :  { %5183 = vmatpush3.bf16.msra.mxu0 %v5711_v21  ;;  %v5778_v21 = vld [vmem:[%s7561_s1 + $0x580] sm:$0xff]  }
  0x88   :  { %5184 = vmatprep.subr.bf16.mxu0 %v5714_v24  ;;  %v5782_v24 = vld [vmem:[%s7562_s0 + $0x5c] ss:$200 sps:$4 sm:$0xff]  }
  0x89   :  { %5205 = vmatpush3.bf16.msra.mxu1 %v5713_v23  ;;  %v5780_v23 = vld [vmem:[%s7562_s0 + $0x58] ss:$200 sps:$4 sm:$0xff]  }
  0x8a   :  { %5206 = vmatprep.subr.bf16.mxu1 %v5716_v26  ;;  %v5784_v26 = vld [vmem:[%s7561_s1 + $0x6f8] sm:$0xff]  }
  0x8b   :  { %5185 = vmatpush3.bf16.msra.mxu0 %v5715_v25  ;;  %v5783_v25 = vld [vmem:[%s7561_s1 + $0x638] sm:$0xff]  }
  0x8c   :  { %5186 = vmatprep.subr.bf16.mxu0 %v5718_v28  ;;  %v5786_v28 = vld [vmem:[%s7561_s1 + $0x670] sm:$0xff]  }
  0x8d   :  { %5207 = vmatpush3.bf16.msra.mxu1 %v5717_v27  ;;  %v5785_v27 = vld [vmem:[%s7561_s1 + $0x6b8] sm:$0xff]  }
  0x8e   :  { %5208 = vmatprep.subr.bf16.mxu1 %v5720_v30  ;;  %v5788_v30 = vld [vmem:[%s7561_s1 + $0x6f0] sm:$0xff]  }
  0x8f   :  { %5187 = vmatpush3.bf16.msra.mxu0 %v5719_v29  ;;  %v5787_v29 = vld [vmem:[%s7561_s1 + $0x630] sm:$0xff]  }
  0x90   :  { %5188 = vmatprep.subr.bf16.mxu0 %v5722_v32  ;;  %v5790_v32 = vld [vmem:[%s7561_s1 + $0x668] sm:$0xff]  }
  0x91   :  { %5209 = vmatpush3.bf16.msra.mxu1 %v5721_v31  ;;  %v5789_v31 = vld [vmem:[%s7561_s1 + $0x6b0] sm:$0xff]  }
  0x92   :  { %5210 = vmatprep.subr.bf16.mxu1 %v5724_v34  ;;  %v5792_v34 = vld [vmem:[%s7561_s1 + $0x6e8] sm:$0xff]  }
  0x93   :  { %5189 = vmatpush3.bf16.msra.mxu0 %v5723_v33  ;;  %v5791_v33 = vld [vmem:[%s7561_s1 + $0x628] sm:$0xff]  }
  0x94   :  { %5190 = vmatprep.subr.bf16.mxu0 %v5726_v36  ;;  %v5794_v36 = vld [vmem:[%s7561_s1 + $0x660] sm:$0xff]  }
  0x95   :  { %5211 = vmatpush3.bf16.msra.mxu1 %v5725_v35  ;;  %v5793_v35 = vld [vmem:[%s7561_s1 + $0x6a8] sm:$0xff]  }
  0x96   :  { %5212 = vmatprep.subr.bf16.mxu1 %v5728_v38  ;;  %v5796_v38 = vld [vmem:[%s7561_s1 + $0x6e0] sm:$0xff]  }
  0x97   :  { %5191 = vmatpush3.bf16.msra.mxu0 %v5727_v37  ;;  %v5795_v37 = vld [vmem:[%s7561_s1 + $0x620] sm:$0xff]  }
  0x98   :  { %5192 = vmatprep.subr.bf16.mxu0 %v5730_v40  ;;  %v5798_v40 = vld [vmem:[%s7561_s1 + $0x658] sm:$0xff]  }
  0x99   :  { %5213 = vmatpush3.bf16.msra.mxu1 %v5729_v39  ;;  %v5797_v39 = vld [vmem:[%s7561_s1 + $0x6a0] sm:$0xff]  }
  0x9a   :  { %5214 = vmatprep.subr.bf16.mxu1 %v5732_v42  ;;  %v5800_v42 = vld [vmem:[%s7561_s1 + $0x6d8] sm:$0xff]  }
  0x9b   :  { %5193 = vmatpush3.bf16.msra.mxu0 %v5731_v41  ;;  %v5799_v41 = vld [vmem:[%s7561_s1 + $0x618] sm:$0xff]  }
  0x9c   :  { %5194 = vmatprep.subr.bf16.mxu0 %v5734_v44  ;;  %v5802_v44 = vld [vmem:[%s7561_s1 + $0x650] sm:$0xff]  }
  0x9d   :  { %5215 = vmatpush3.bf16.msra.mxu1 %v5733_v43  ;;  %v5801_v43 = vld [vmem:[%s7561_s1 + $0x698] sm:$0xff]  }
  0x9e   :  { %5216 = vmatprep.subr.bf16.mxu1 %v5736_v46  ;;  %v5804_v46 = vld [vmem:[%s7561_s1 + $0x6d0] sm:$0xff]  }
  0x9f   :  { %5195 = vmatpush3.bf16.msra.mxu0 %v5735_v45  ;;  %v5803_v45 = vld [vmem:[%s7561_s1 + $0x610] sm:$0xff]  }
  0xa0   :  { %5224 = vmatprep.subr.bf16.mxu0 %v5741_v50  ;;  %v5808_v50 = vld [vmem:[%s7561_s1 + $0x6c8] sm:$0xff]  }
  0xa1   :  { %5217 = vmatpush3.bf16.msra.mxu1 %v5740_v49  ;;  %v5807_v49 = vld [vmem:[%s7561_s1 + $0x608] sm:$0xff]  }
  0xa2   :  { %3883 = vmatmul.mubr.bf16.vlgmr.msra.gmra.mxu0 %v5737_v47  ;;  %5246 = vmatprep.subr.bf16.mxu1 %v5746_v54  ;;  %v5805_v47 = vld [vmem:[%s7561_s1 + $0x690] sm:$0xff]   ;;  %v5812_v54 = vld [vmem:[%s7561_s1 + $0x6c0] sm:$0xff]  }
  0xa3   :  { %5225 = vmatpush3.bf16.msra.mxu0 %v5745_v53  ;;  %3964 = vmatprep.mubr.bf16.mxu0 %v5777_v20  ;;  %v5811_v53 = vld [vmem:[%s7561_s1 + $0x600] sm:$0xff]   ;;  %v5844_v20 = vld [vmem:[%s7561_s1 + $0x748] sm:$0xff]  }
  0xa4   :  { %3924 = vmatmul.mubr.bf16.vlgmr.msra.gmra.mxu1 %v5742_v51  ;;  %5226 = vmatprep.subr.bf16.mxu0 %v5748_v56  ;;  %v5809_v51 = vld [vmem:[%s7561_s1 + $0x688] sm:$0xff]  }
  0xa5   :  { %5247 = vmatpush3.bf16.msra.mxu1 %v5747_v55  ;;  %4005 = vmatprep.mubr.bf16.mxu1 %v5782_v24  ;;  %v5813_v55 = vld [vmem:[%s7562_s0 + $0x60] ss:$200 sps:$4 sm:$0xff]   ;;  %v5815_v56 = vld [vmem:[%s7562_s0 + $0x64] ss:$200 sps:$4 sm:$0xff]  }
  0xa6   :  { %5248 = vmatprep.subr.bf16.mxu1 %v5750_v58  ;;  %v5817_v58 = vld [vmem:[%s7561_s1 + $0x778] sm:$0xff]   ;;  %v5848_v24 = vld [vmem:[%s7561_s1 + $0x740] sm:$0xff]  }
  0xa7   :  { %5227 = vmatpush3.bf16.msra.mxu0 %v5749_v57  ;;  %v5816_v57 = vld [vmem:[%s7561_s1 + $0x680] sm:$0xff]  }
  0xa8   :  { %5228 = vmatprep.subr.bf16.mxu0 %v5752_v60  ;;  %v5820_v60 = vld [vmem:[%s7562_s0 + $0x6c] ss:$200 sps:$4 sm:$0xff]  }
  0xa9   :  { %5249 = vmatpush3.bf16.msra.mxu1 %v5751_v59  ;;  %v5818_v59 = vld [vmem:[%s7562_s0 + $0x68] ss:$200 sps:$4 sm:$0xff]  }
  0xaa   :  { %5250 = vmatprep.subr.bf16.mxu1 %v5754_v62  ;;  %v5822_v62 = vld [vmem:[%s7561_s1 + $0x7f8] sm:$0xff]  }
  0xab   :  { %5229 = vmatpush3.bf16.msra.mxu0 %v5753_v61  ;;  %v5821_v61 = vld [vmem:[%s7561_s1 + $0x738] sm:$0xff]  }
  0xac   :  { %5230 = vmatprep.subr.bf16.mxu0 %v5756_v0  ;;  %v5824_v0 = vld [vmem:[%s7561_s1 + $0x770] sm:$0xff]  }
  0xad   :  { %5251 = vmatpush3.bf16.msra.mxu1 %v5755_v63  ;;  %v5823_v63 = vld [vmem:[%s7561_s1 + $0x7b8] sm:$0xff]  }
  0xae   :  { %5252 = vmatprep.subr.bf16.mxu1 %v5758_v2  ;;  %v5826_v2 = vld [vmem:[%s7561_s1 + $0x7f0] sm:$0xff]  }
  0xaf   :  { %5231 = vmatpush3.bf16.msra.mxu0 %v5757_v1  ;;  %v5825_v1 = vld [vmem:[%s7561_s1 + $0x730] sm:$0xff]  }
  0xb0   :  { %5232 = vmatprep.subr.bf16.mxu0 %v5760_v4  ;;  %v5828_v4 = vld [vmem:[%s7561_s1 + $0x768] sm:$0xff]  }
  0xb1   :  { %5253 = vmatpush3.bf16.msra.mxu1 %v5759_v3  ;;  %v5827_v3 = vld [vmem:[%s7561_s1 + $0x7b0] sm:$0xff]  }
  0xb2   :  { %5254 = vmatprep.subr.bf16.mxu1 %v5762_v6  ;;  %v5830_v6 = vld [vmem:[%s7561_s1 + $0x7e8] sm:$0xff]  }
  0xb3   :  { %5233 = vmatpush3.bf16.msra.mxu0 %v5761_v5  ;;  %v5829_v5 = vld [vmem:[%s7561_s1 + $0x728] sm:$0xff]  }
  0xb4   :  { %5234 = vmatprep.subr.bf16.mxu0 %v5764_v8  ;;  %v5832_v8 = vld [vmem:[%s7561_s1 + $0x760] sm:$0xff]  }
  0xb5   :  { %5255 = vmatpush3.bf16.msra.mxu1 %v5763_v7  ;;  %v5831_v7 = vld [vmem:[%s7561_s1 + $0x7a8] sm:$0xff]  }
  0xb6   :  { %5256 = vmatprep.subr.bf16.mxu1 %v5766_v10  ;;  %v5834_v10 = vld [vmem:[%s7561_s1 + $0x7e0] sm:$0xff]  }
  0xb7   :  { %5235 = vmatpush3.bf16.msra.mxu0 %v5765_v9  ;;  %v5833_v9 = vld [vmem:[%s7561_s1 + $0x720] sm:$0xff]  }
  0xb8   :  { %5236 = vmatprep.subr.bf16.mxu0 %v5768_v12  ;;  %v5836_v12 = vld [vmem:[%s7561_s1 + $0x758] sm:$0xff]  }
  0xb9   :  { %5257 = vmatpush3.bf16.msra.mxu1 %v5767_v11  ;;  %v5835_v11 = vld [vmem:[%s7561_s1 + $0x7a0] sm:$0xff]  }
  0xba   :  { %5258 = vmatprep.subr.bf16.mxu1 %v5770_v14  ;;  %v5838_v14 = vld [vmem:[%s7561_s1 + $0x7d8] sm:$0xff]  }
  0xbb   :  { %5237 = vmatpush3.bf16.msra.mxu0 %v5769_v13  ;;  %v5837_v13 = vld [vmem:[%s7561_s1 + $0x718] sm:$0xff]  }
  0xbc   :  { %5238 = vmatprep.subr.bf16.mxu0 %v5772_v16  ;;  %v5840_v16 = vld [vmem:[%s7561_s1 + $0x750] sm:$0xff]  }
  0xbd   :  { %5259 = vmatpush3.bf16.msra.mxu1 %v5771_v15  ;;  %v5839_v15 = vld [vmem:[%s7561_s1 + $0x798] sm:$0xff]  }
  0xbe   :  { %5260 = vmatprep.subr.bf16.mxu1 %v5774_v18  ;;  %v5842_v18 = vld [vmem:[%s7561_s1 + $0x7d0] sm:$0xff]  }
  0xbf   :  { %5239 = vmatpush3.bf16.msra.mxu0 %v5773_v17  ;;  %v5841_v17 = vld [vmem:[%s7561_s1 + $0x710] sm:$0xff]  }
  0xc0   :  { %5268 = vmatprep.subr.bf16.mxu0 %v5779_v22  ;;  %v5846_v22 = vld [vmem:[%s7561_s1 + $0x7c8] sm:$0xff]  }
  0xc1   :  { %5261 = vmatpush3.bf16.msra.mxu1 %v5778_v21  ;;  %v5845_v21 = vld [vmem:[%s7561_s1 + $0x708] sm:$0xff]  }
  0xc2   :  { %3965 = vmatmul.mubr.bf16.vlgmr.msra.gmra.mxu0 %v5775_v19  ;;  %5290 = vmatprep.subr.bf16.mxu1 %v5784_v26  ;;  %v5843_v19 = vld [vmem:[%s7561_s1 + $0x790] sm:$0xff]   ;;  %v5850_v26 = vld [vmem:[%s7561_s1 + $0x7c0] sm:$0xff]  }
  0xc3   :  { %5269 = vmatpush3.bf16.msra.mxu0 %v5783_v25  ;;  %4046 = vmatprep.mubr.bf16.mxu0 %v5815_v56  ;;  %v5849_v25 = vld [vmem:[%s7561_s1 + $0x700] sm:$0xff]   ;;  %v5882_v56 = vld [vmem:[%s7561_s1 + $0x848] sm:$0xff]  }
  0xc4   :  { %4006 = vmatmul.mubr.bf16.vlgmr.msra.gmra.mxu1 %v5780_v23  ;;  %5270 = vmatprep.subr.bf16.mxu0 %v5786_v28  ;;  %v5847_v23 = vld [vmem:[%s7561_s1 + $0x788] sm:$0xff]   ;;  %v5853_v28 = vld [vmem:[%s7562_s0 + $0x74] ss:$200 sps:$4 sm:$0xff]  }
  0xc5   :  { %5291 = vmatpush3.bf16.msra.mxu1 %v5785_v27  ;;  %4087 = vmatprep.mubr.bf16.mxu1 %v5820_v60  ;;  %v5851_v27 = vld [vmem:[%s7562_s0 + $0x70] ss:$200 sps:$4 sm:$0xff]   ;;  %v5886_v60 = vld [vmem:[%s7561_s1 + $0x840] sm:$0xff]  }
  0xc6   :  { %5292 = vmatprep.subr.bf16.mxu1 %v5788_v30  ;;  %v5855_v30 = vld [vmem:[%s7561_s1 + $0x878] sm:$0xff]  }
  0xc7   :  { %5271 = vmatpush3.bf16.msra.mxu0 %v5787_v29  ;;  %v5854_v29 = vld [vmem:[%s7561_s1 + $0x780] sm:$0xff]  }
  0xc8   :  { %5272 = vmatprep.subr.bf16.mxu0 %v5790_v32  ;;  %v5858_v32 = vld [vmem:[%s7562_s0 + $0x7c] ss:$200 sps:$4 sm:$0xff]  }
  0xc9   :  { %5293 = vmatpush3.bf16.msra.mxu1 %v5789_v31  ;;  %v5856_v31 = vld [vmem:[%s7562_s0 + $0x78] ss:$200 sps:$4 sm:$0xff]  }
  0xca   :  { %5294 = vmatprep.subr.bf16.mxu1 %v5792_v34  ;;  %v5860_v34 = vld [vmem:[%s7561_s1 + $0x8f8] sm:$0xff]  }
  0xcb   :  { %5273 = vmatpush3.bf16.msra.mxu0 %v5791_v33  ;;  %v5859_v33 = vld [vmem:[%s7561_s1 + $0x838] sm:$0xff]  }
  0xcc   :  { %5274 = vmatprep.subr.bf16.mxu0 %v5794_v36  ;;  %v5862_v36 = vld [vmem:[%s7561_s1 + $0x870] sm:$0xff]  }
  0xcd   :  { %5295 = vmatpush3.bf16.msra.mxu1 %v5793_v35  ;;  %v5861_v35 = vld [vmem:[%s7561_s1 + $0x8b8] sm:$0xff]  }
  0xce   :  { %5296 = vmatprep.subr.bf16.mxu1 %v5796_v38  ;;  %v5864_v38 = vld [vmem:[%s7561_s1 + $0x8f0] sm:$0xff]  }
  0xcf   :  { %5275 = vmatpush3.bf16.msra.mxu0 %v5795_v37  ;;  %v5863_v37 = vld [vmem:[%s7561_s1 + $0x830] sm:$0xff]  }
  0xd0   :  { %5276 = vmatprep.subr.bf16.mxu0 %v5798_v40  ;;  %v5866_v40 = vld [vmem:[%s7561_s1 + $0x868] sm:$0xff]  }
  0xd1   :  { %5297 = vmatpush3.bf16.msra.mxu1 %v5797_v39  ;;  %v5865_v39 = vld [vmem:[%s7561_s1 + $0x8b0] sm:$0xff]  }
  0xd2   :  { %5298 = vmatprep.subr.bf16.mxu1 %v5800_v42  ;;  %v5868_v42 = vld [vmem:[%s7561_s1 + $0x8e8] sm:$0xff]  }
  0xd3   :  { %5277 = vmatpush3.bf16.msra.mxu0 %v5799_v41  ;;  %v5867_v41 = vld [vmem:[%s7561_s1 + $0x828] sm:$0xff]  }
  0xd4   :  { %5278 = vmatprep.subr.bf16.mxu0 %v5802_v44  ;;  %v5870_v44 = vld [vmem:[%s7561_s1 + $0x860] sm:$0xff]  }
  0xd5   :  { %5299 = vmatpush3.bf16.msra.mxu1 %v5801_v43  ;;  %v5869_v43 = vld [vmem:[%s7561_s1 + $0x8a8] sm:$0xff]  }
  0xd6   :  { %5300 = vmatprep.subr.bf16.mxu1 %v5804_v46  ;;  %v5872_v46 = vld [vmem:[%s7561_s1 + $0x8e0] sm:$0xff]  }
  0xd7   :  { %5279 = vmatpush3.bf16.msra.mxu0 %v5803_v45  ;;  %v5871_v45 = vld [vmem:[%s7561_s1 + $0x820] sm:$0xff]  }
  0xd8   :  { %5280 = vmatprep.subr.bf16.mxu0 %v5806_v48  ;;  %v5874_v48 = vld [vmem:[%s7561_s1 + $0x858] sm:$0xff]  }
  0xd9   :  { %5301 = vmatpush3.bf16.msra.mxu1 %v5805_v47  ;;  %v5873_v47 = vld [vmem:[%s7561_s1 + $0x8a0] sm:$0xff]  }
  0xda   :  { %5302 = vmatprep.subr.bf16.mxu1 %v5808_v50  ;;  %v5876_v50 = vld [vmem:[%s7561_s1 + $0x8d8] sm:$0xff]  }
  0xdb   :  { %5281 = vmatpush3.bf16.msra.mxu0 %v5807_v49  ;;  %v5875_v49 = vld [vmem:[%s7561_s1 + $0x818] sm:$0xff]  }
  0xdc   :  { %5282 = vmatprep.subr.bf16.mxu0 %v5810_v52  ;;  %v5878_v52 = vld [vmem:[%s7561_s1 + $0x850] sm:$0xff]  }
  0xdd   :  { %5303 = vmatpush3.bf16.msra.mxu1 %v5809_v51  ;;  %v5877_v51 = vld [vmem:[%s7561_s1 + $0x898] sm:$0xff]  }
  0xde   :  { %5304 = vmatprep.subr.bf16.mxu1 %v5812_v54  ;;  %v5880_v54 = vld [vmem:[%s7561_s1 + $0x8d0] sm:$0xff]  }
  0xdf   :  { %5283 = vmatpush3.bf16.msra.mxu0 %v5811_v53  ;;  %v5879_v53 = vld [vmem:[%s7561_s1 + $0x810] sm:$0xff]  }
  0xe0   :  { %5312 = vmatprep.subr.bf16.mxu0 %v5817_v58  ;;  %v5884_v58 = vld [vmem:[%s7561_s1 + $0x8c8] sm:$0xff]  }
  0xe1   :  { %5305 = vmatpush3.bf16.msra.mxu1 %v5816_v57  ;;  %v5883_v57 = vld [vmem:[%s7561_s1 + $0x808] sm:$0xff]  }
  0xe2   :  { %4047 = vmatmul.mubr.bf16.vlgmr.msra.gmra.mxu0 %v5813_v55  ;;  %5334 = vmatprep.subr.bf16.mxu1 %v5822_v62  ;;  %v5881_v55 = vld [vmem:[%s7561_s1 + $0x890] sm:$0xff]   ;;  %v5888_v62 = vld [vmem:[%s7561_s1 + $0x8c0] sm:$0xff]  }
  0xe3   :  { %5313 = vmatpush3.bf16.msra.mxu0 %v5821_v61  ;;  %4128 = vmatprep.mubr.bf16.mxu0 %v5853_v28  ;;  %v5887_v61 = vld [vmem:[%s7561_s1 + $0x800] sm:$0xff]   ;;  %v5920_v28 = vld [vmem:[%s7561_s1 + $0x948] sm:$0xff]  }
  0xe4   :  { %4088 = vmatmul.mubr.bf16.vlgmr.msra.gmra.mxu1 %v5818_v59  ;;  %5314 = vmatprep.subr.bf16.mxu0 %v5824_v0  ;;  %v5885_v59 = vld [vmem:[%s7561_s1 + $0x888] sm:$0xff]  }
  0xe5   :  { %5335 = vmatpush3.bf16.msra.mxu1 %v5823_v63  ;;  %4169 = vmatprep.mubr.bf16.mxu1 %v5858_v32  ;;  %v5889_v63 = vld [vmem:[%s7562_s0 + $0x80] ss:$200 sps:$4 sm:$0xff]   ;;  %v5891_v0 = vld [vmem:[%s7562_s0 + $0x84] ss:$200 sps:$4 sm:$0xff]  }
  0xe6   :  { %5336 = vmatprep.subr.bf16.mxu1 %v5826_v2  ;;  %v5893_v2 = vld [vmem:[%s7561_s1 + $0x978] sm:$0xff]   ;;  %v5924_v32 = vld [vmem:[%s7561_s1 + $0x940] sm:$0xff]  }
  0xe7   :  { %5315 = vmatpush3.bf16.msra.mxu0 %v5825_v1  ;;  %v5892_v1 = vld [vmem:[%s7561_s1 + $0x880] sm:$0xff]  }
  0xe8   :  { %5316 = vmatprep.subr.bf16.mxu0 %v5828_v4  ;;  %v5896_v4 = vld [vmem:[%s7562_s0 + $0x8c] ss:$200 sps:$4 sm:$0xff]  }
  0xe9   :  { %5337 = vmatpush3.bf16.msra.mxu1 %v5827_v3  ;;  %v5894_v3 = vld [vmem:[%s7562_s0 + $0x88] ss:$200 sps:$4 sm:$0xff]  }
  0xea   :  { %5338 = vmatprep.subr.bf16.mxu1 %v5830_v6  ;;  %v5898_v6 = vld [vmem:[%s7561_s1 + $0x9f8] sm:$0xff]  }
  0xeb   :  { %5317 = vmatpush3.bf16.msra.mxu0 %v5829_v5  ;;  %v5897_v5 = vld [vmem:[%s7561_s1 + $0x938] sm:$0xff]  }
  0xec   :  { %5318 = vmatprep.subr.bf16.mxu0 %v5832_v8  ;;  %v5900_v8 = vld [vmem:[%s7561_s1 + $0x970] sm:$0xff]  }
  0xed   :  { %5339 = vmatpush3.bf16.msra.mxu1 %v5831_v7  ;;  %v5899_v7 = vld [vmem:[%s7561_s1 + $0x9b8] sm:$0xff]  }
  0xee   :  { %5340 = vmatprep.subr.bf16.mxu1 %v5834_v10  ;;  %v5902_v10 = vld [vmem:[%s7561_s1 + $0x9f0] sm:$0xff]  }
  0xef   :  { %5319 = vmatpush3.bf16.msra.mxu0 %v5833_v9  ;;  %v5901_v9 = vld [vmem:[%s7561_s1 + $0x930] sm:$0xff]  }
  0xf0   :  { %5320 = vmatprep.subr.bf16.mxu0 %v5836_v12  ;;  %v5904_v12 = vld [vmem:[%s7561_s1 + $0x968] sm:$0xff]  }
  0xf1   :  { %5341 = vmatpush3.bf16.msra.mxu1 %v5835_v11  ;;  %v5903_v11 = vld [vmem:[%s7561_s1 + $0x9b0] sm:$0xff]  }
  0xf2   :  { %5342 = vmatprep.subr.bf16.mxu1 %v5838_v14  ;;  %v5906_v14 = vld [vmem:[%s7561_s1 + $0x9e8] sm:$0xff]  }
  0xf3   :  { %5321 = vmatpush3.bf16.msra.mxu0 %v5837_v13  ;;  %v5905_v13 = vld [vmem:[%s7561_s1 + $0x928] sm:$0xff]  }
  0xf4   :  { %5322 = vmatprep.subr.bf16.mxu0 %v5840_v16  ;;  %v5908_v16 = vld [vmem:[%s7561_s1 + $0x960] sm:$0xff]  }
  0xf5   :  { %5343 = vmatpush3.bf16.msra.mxu1 %v5839_v15  ;;  %v5907_v15 = vld [vmem:[%s7561_s1 + $0x9a8] sm:$0xff]  }
  0xf6   :  { %5344 = vmatprep.subr.bf16.mxu1 %v5842_v18  ;;  %v5910_v18 = vld [vmem:[%s7561_s1 + $0x9e0] sm:$0xff]  }
  0xf7   :  { %5323 = vmatpush3.bf16.msra.mxu0 %v5841_v17  ;;  %v5909_v17 = vld [vmem:[%s7561_s1 + $0x920] sm:$0xff]  }
  0xf8   :  { %5324 = vmatprep.subr.bf16.mxu0 %v5844_v20  ;;  %v5912_v20 = vld [vmem:[%s7561_s1 + $0x958] sm:$0xff]  }
  0xf9   :  { %5345 = vmatpush3.bf16.msra.mxu1 %v5843_v19  ;;  %v5911_v19 = vld [vmem:[%s7561_s1 + $0x9a0] sm:$0xff]  }
  0xfa   :  { %5346 = vmatprep.subr.bf16.mxu1 %v5846_v22  ;;  %v5914_v22 = vld [vmem:[%s7561_s1 + $0x9d8] sm:$0xff]  }
  0xfb   :  { %5325 = vmatpush3.bf16.msra.mxu0 %v5845_v21  ;;  %v5913_v21 = vld [vmem:[%s7561_s1 + $0x918] sm:$0xff]  }
  0xfc   :  { %5326 = vmatprep.subr.bf16.mxu0 %v5848_v24  ;;  %v5916_v24 = vld [vmem:[%s7561_s1 + $0x950] sm:$0xff]  }
  0xfd   :  { %5347 = vmatpush3.bf16.msra.mxu1 %v5847_v23  ;;  %v5915_v23 = vld [vmem:[%s7561_s1 + $0x998] sm:$0xff]  }
  0xfe   :  { %5348 = vmatprep.subr.bf16.mxu1 %v5850_v26  ;;  %v5918_v26 = vld [vmem:[%s7561_s1 + $0x9d0] sm:$0xff]  }
  0xff   :  { %5327 = vmatpush3.bf16.msra.mxu0 %v5849_v25  ;;  %v5917_v25 = vld [vmem:[%s7561_s1 + $0x910] sm:$0xff]  }
 0x100   :  { %5356 = vmatprep.subr.bf16.mxu0 %v5855_v30  ;;  %v5922_v30 = vld [vmem:[%s7561_s1 + $0x9c8] sm:$0xff]  }
 0x101   :  { %5349 = vmatpush3.bf16.msra.mxu1 %v5854_v29  ;;  %v5921_v29 = vld [vmem:[%s7561_s1 + $0x908] sm:$0xff]  }
 0x102   :  { %4129 = vmatmul.mubr.bf16.vlgmr.msra.gmra.mxu0 %v5851_v27  ;;  %5378 = vmatprep.subr.bf16.mxu1 %v5860_v34  ;;  %v5919_v27 = vld [vmem:[%s7561_s1 + $0x990] sm:$0xff]   ;;  %v5926_v34 = vld [vmem:[%s7561_s1 + $0x9c0] sm:$0xff]  }
 0x103   :  { %5357 = vmatpush3.bf16.msra.mxu0 %v5859_v33  ;;  %4210 = vmatprep.mubr.bf16.mxu0 %v5891_v0  ;;  %v5925_v33 = vld [vmem:[%s7561_s1 + $0x900] sm:$0xff]   ;;  %v5958_v0 = vld [vmem:[%s7561_s1 + $0xa48] sm:$0xff]  }
 0x104   :  { %4170 = vmatmul.mubr.bf16.vlgmr.msra.gmra.mxu1 %v5856_v31  ;;  %5358 = vmatprep.subr.bf16.mxu0 %v5862_v36  ;;  %v5923_v31 = vld [vmem:[%s7561_s1 + $0x988] sm:$0xff]   ;;  %v5929_v36 = vld [vmem:[%s7562_s0 + $0x94] ss:$200 sps:$4 sm:$0xff]  }
 0x105   :  { %5379 = vmatpush3.bf16.msra.mxu1 %v5861_v35  ;;  %4251 = vmatprep.mubr.bf16.mxu1 %v5896_v4  ;;  %v5927_v35 = vld [vmem:[%s7562_s0 + $0x90] ss:$200 sps:$4 sm:$0xff]   ;;  %v5962_v4 = vld [vmem:[%s7561_s1 + $0xa40] sm:$0xff]  }
 0x106   :  { %5380 = vmatprep.subr.bf16.mxu1 %v5864_v38  ;;  %v5931_v38 = vld [vmem:[%s7561_s1 + $0xa78] sm:$0xff]  }
 0x107   :  { %5359 = vmatpush3.bf16.msra.mxu0 %v5863_v37  ;;  %v5930_v37 = vld [vmem:[%s7561_s1 + $0x980] sm:$0xff]  }
 0x108   :  { %5360 = vmatprep.subr.bf16.mxu0 %v5866_v40  ;;  %v5934_v40 = vld [vmem:[%s7562_s0 + $0x9c] ss:$200 sps:$4 sm:$0xff]  }
 0x109   :  { %5381 = vmatpush3.bf16.msra.mxu1 %v5865_v39  ;;  %v5932_v39 = vld [vmem:[%s7562_s0 + $0x98] ss:$200 sps:$4 sm:$0xff]  }
 0x10a   :  { %5382 = vmatprep.subr.bf16.mxu1 %v5868_v42  ;;  %v5936_v42 = vld [vmem:[%s7561_s1 + $0xaf8] sm:$0xff]  }
 0x10b   :  { %5361 = vmatpush3.bf16.msra.mxu0 %v5867_v41  ;;  %v5935_v41 = vld [vmem:[%s7561_s1 + $0xa38] sm:$0xff]  }
 0x10c   :  { %5362 = vmatprep.subr.bf16.mxu0 %v5870_v44  ;;  %v5938_v44 = vld [vmem:[%s7561_s1 + $0xa70] sm:$0xff]  }
 0x10d   :  { %5383 = vmatpush3.bf16.msra.mxu1 %v5869_v43  ;;  %v5937_v43 = vld [vmem:[%s7561_s1 + $0xab8] sm:$0xff]  }
 0x10e   :  { %5384 = vmatprep.subr.bf16.mxu1 %v5872_v46  ;;  %v5940_v46 = vld [vmem:[%s7561_s1 + $0xaf0] sm:$0xff]  }
 0x10f   :  { %5363 = vmatpush3.bf16.msra.mxu0 %v5871_v45  ;;  %v5939_v45 = vld [vmem:[%s7561_s1 + $0xa30] sm:$0xff]  }
 0x110   :  { %5364 = vmatprep.subr.bf16.mxu0 %v5874_v48  ;;  %v5942_v48 = vld [vmem:[%s7561_s1 + $0xa68] sm:$0xff]  }
 0x111   :  { %5385 = vmatpush3.bf16.msra.mxu1 %v5873_v47  ;;  %v5941_v47 = vld [vmem:[%s7561_s1 + $0xab0] sm:$0xff]  }
 0x112   :  { %5386 = vmatprep.subr.bf16.mxu1 %v5876_v50  ;;  %v5944_v50 = vld [vmem:[%s7561_s1 + $0xae8] sm:$0xff]  }
 0x113   :  { %5365 = vmatpush3.bf16.msra.mxu0 %v5875_v49  ;;  %v5943_v49 = vld [vmem:[%s7561_s1 + $0xa28] sm:$0xff]  }
 0x114   :  { %5366 = vmatprep.subr.bf16.mxu0 %v5878_v52  ;;  %v5946_v52 = vld [vmem:[%s7561_s1 + $0xa60] sm:$0xff]  }
 0x115   :  { %5387 = vmatpush3.bf16.msra.mxu1 %v5877_v51  ;;  %v5945_v51 = vld [vmem:[%s7561_s1 + $0xaa8] sm:$0xff]  }
 0x116   :  { %5388 = vmatprep.subr.bf16.mxu1 %v5880_v54  ;;  %v5948_v54 = vld [vmem:[%s7561_s1 + $0xae0] sm:$0xff]  }
 0x117   :  { %5367 = vmatpush3.bf16.msra.mxu0 %v5879_v53  ;;  %v5947_v53 = vld [vmem:[%s7561_s1 + $0xa20] sm:$0xff]  }
 0x118   :  { %5368 = vmatprep.subr.bf16.mxu0 %v5882_v56  ;;  %v5950_v56 = vld [vmem:[%s7561_s1 + $0xa58] sm:$0xff]  }
 0x119   :  { %5389 = vmatpush3.bf16.msra.mxu1 %v5881_v55  ;;  %v5949_v55 = vld [vmem:[%s7561_s1 + $0xaa0] sm:$0xff]  }
 0x11a   :  { %5390 = vmatprep.subr.bf16.mxu1 %v5884_v58  ;;  %v5952_v58 = vld [vmem:[%s7561_s1 + $0xad8] sm:$0xff]  }
 0x11b   :  { %5369 = vmatpush3.bf16.msra.mxu0 %v5883_v57  ;;  %v5951_v57 = vld [vmem:[%s7561_s1 + $0xa18] sm:$0xff]  }
 0x11c   :  { %5370 = vmatprep.subr.bf16.mxu0 %v5886_v60  ;;  %v5954_v60 = vld [vmem:[%s7561_s1 + $0xa50] sm:$0xff]  }
 0x11d   :  { %5391 = vmatpush3.bf16.msra.mxu1 %v5885_v59  ;;  %v5953_v59 = vld [vmem:[%s7561_s1 + $0xa98] sm:$0xff]  }
 0x11e   :  { %5392 = vmatprep.subr.bf16.mxu1 %v5888_v62  ;;  %v5956_v62 = vld [vmem:[%s7561_s1 + $0xad0] sm:$0xff]  }
 0x11f   :  { %5371 = vmatpush3.bf16.msra.mxu0 %v5887_v61  ;;  %v5955_v61 = vld [vmem:[%s7561_s1 + $0xa10] sm:$0xff]  }
 0x120   :  { %5400 = vmatprep.subr.bf16.mxu0 %v5893_v2  ;;  %v5960_v2 = vld [vmem:[%s7561_s1 + $0xac8] sm:$0xff]  }
 0x121   :  { %5393 = vmatpush3.bf16.msra.mxu1 %v5892_v1  ;;  %v5959_v1 = vld [vmem:[%s7561_s1 + $0xa08] sm:$0xff]  }
 0x122   :  { %4211 = vmatmul.mubr.bf16.vlgmr.msra.gmra.mxu0 %v5889_v63  ;;  %5422 = vmatprep.subr.bf16.mxu1 %v5898_v6  ;;  %v5957_v63 = vld [vmem:[%s7561_s1 + $0xa90] sm:$0xff]   ;;  %v5964_v6 = vld [vmem:[%s7561_s1 + $0xac0] sm:$0xff]  }
 0x123   :  { %5401 = vmatpush3.bf16.msra.mxu0 %v5897_v5  ;;  %4292 = vmatprep.mubr.bf16.mxu0 %v5929_v36  ;;  %v5963_v5 = vld [vmem:[%s7561_s1 + $0xa00] sm:$0xff]   ;;  %v5996_v36 = vld [vmem:[%s7561_s1 + $0xb48] sm:$0xff]  }
 0x124   :  { %4252 = vmatmul.mubr.bf16.vlgmr.msra.gmra.mxu1 %v5894_v3  ;;  %5402 = vmatprep.subr.bf16.mxu0 %v5900_v8  ;;  %v5961_v3 = vld [vmem:[%s7561_s1 + $0xa88] sm:$0xff]  }
 0x125   :  { %5423 = vmatpush3.bf16.msra.mxu1 %v5899_v7  ;;  %4333 = vmatprep.mubr.bf16.mxu1 %v5934_v40  ;;  %v5965_v7 = vld [vmem:[%s7562_s0 + $0xa0] ss:$200 sps:$4 sm:$0xff]   ;;  %v5967_v8 = vld [vmem:[%s7562_s0 + $0xa4] ss:$200 sps:$4 sm:$0xff]  }
 0x126   :  { %5424 = vmatprep.subr.bf16.mxu1 %v5902_v10  ;;  %v5969_v10 = vld [vmem:[%s7561_s1 + $0xb78] sm:$0xff]   ;;  %v6000_v40 = vld [vmem:[%s7561_s1 + $0xb40] sm:$0xff]  }
 0x127   :  { %5403 = vmatpush3.bf16.msra.mxu0 %v5901_v9  ;;  %v5968_v9 = vld [vmem:[%s7561_s1 + $0xa80] sm:$0xff]  }
 0x128   :  { %5404 = vmatprep.subr.bf16.mxu0 %v5904_v12  ;;  %v5972_v12 = vld [vmem:[%s7562_s0 + $0xac] ss:$200 sps:$4 sm:$0xff]  }
 0x129   :  { %5425 = vmatpush3.bf16.msra.mxu1 %v5903_v11  ;;  %v5970_v11 = vld [vmem:[%s7562_s0 + $0xa8] ss:$200 sps:$4 sm:$0xff]  }
 0x12a   :  { %5426 = vmatprep.subr.bf16.mxu1 %v5906_v14  ;;  %v5974_v14 = vld [vmem:[%s7561_s1 + $0xbf8] sm:$0xff]  }
 0x12b   :  { %5405 = vmatpush3.bf16.msra.mxu0 %v5905_v13  ;;  %v5973_v13 = vld [vmem:[%s7561_s1 + $0xb38] sm:$0xff]  }
 0x12c   :  { %5406 = vmatprep.subr.bf16.mxu0 %v5908_v16  ;;  %v5976_v16 = vld [vmem:[%s7561_s1 + $0xb70] sm:$0xff]  }
 0x12d   :  { %5427 = vmatpush3.bf16.msra.mxu1 %v5907_v15  ;;  %v5975_v15 = vld [vmem:[%s7561_s1 + $0xbb8] sm:$0xff]  }
 0x12e   :  { %5428 = vmatprep.subr.bf16.mxu1 %v5910_v18  ;;  %v5978_v18 = vld [vmem:[%s7561_s1 + $0xbf0] sm:$0xff]  }
 0x12f   :  { %5407 = vmatpush3.bf16.msra.mxu0 %v5909_v17  ;;  %v5977_v17 = vld [vmem:[%s7561_s1 + $0xb30] sm:$0xff]  }
 0x130   :  { %5408 = vmatprep.subr.bf16.mxu0 %v5912_v20  ;;  %v5980_v20 = vld [vmem:[%s7561_s1 + $0xb68] sm:$0xff]  }
 0x131   :  { %5429 = vmatpush3.bf16.msra.mxu1 %v5911_v19  ;;  %v5979_v19 = vld [vmem:[%s7561_s1 + $0xbb0] sm:$0xff]  }
 0x132   :  { %5430 = vmatprep.subr.bf16.mxu1 %v5914_v22  ;;  %v5982_v22 = vld [vmem:[%s7561_s1 + $0xbe8] sm:$0xff]  }
 0x133   :  { %5409 = vmatpush3.bf16.msra.mxu0 %v5913_v21  ;;  %v5981_v21 = vld [vmem:[%s7561_s1 + $0xb28] sm:$0xff]  }
 0x134   :  { %5410 = vmatprep.subr.bf16.mxu0 %v5916_v24  ;;  %v5984_v24 = vld [vmem:[%s7561_s1 + $0xb60] sm:$0xff]  }
 0x135   :  { %5431 = vmatpush3.bf16.msra.mxu1 %v5915_v23  ;;  %v5983_v23 = vld [vmem:[%s7561_s1 + $0xba8] sm:$0xff]  }
 0x136   :  { %5432 = vmatprep.subr.bf16.mxu1 %v5918_v26  ;;  %v5986_v26 = vld [vmem:[%s7561_s1 + $0xbe0] sm:$0xff]  }
 0x137   :  { %5411 = vmatpush3.bf16.msra.mxu0 %v5917_v25  ;;  %v5985_v25 = vld [vmem:[%s7561_s1 + $0xb20] sm:$0xff]  }
 0x138   :  { %5412 = vmatprep.subr.bf16.mxu0 %v5920_v28  ;;  %v5988_v28 = vld [vmem:[%s7561_s1 + $0xb58] sm:$0xff]  }
 0x139   :  { %5433 = vmatpush3.bf16.msra.mxu1 %v5919_v27  ;;  %v5987_v27 = vld [vmem:[%s7561_s1 + $0xba0] sm:$0xff]  }
 0x13a   :  { %5434 = vmatprep.subr.bf16.mxu1 %v5922_v30  ;;  %v5990_v30 = vld [vmem:[%s7561_s1 + $0xbd8] sm:$0xff]  }
 0x13b   :  { %5413 = vmatpush3.bf16.msra.mxu0 %v5921_v29  ;;  %v5989_v29 = vld [vmem:[%s7561_s1 + $0xb18] sm:$0xff]  }
 0x13c   :  { %5414 = vmatprep.subr.bf16.mxu0 %v5924_v32  ;;  %v5992_v32 = vld [vmem:[%s7561_s1 + $0xb50] sm:$0xff]  }
 0x13d   :  { %5435 = vmatpush3.bf16.msra.mxu1 %v5923_v31  ;;  %v5991_v31 = vld [vmem:[%s7561_s1 + $0xb98] sm:$0xff]  }
 0x13e   :  { %5436 = vmatprep.subr.bf16.mxu1 %v5926_v34  ;;  %v5994_v34 = vld [vmem:[%s7561_s1 + $0xbd0] sm:$0xff]  }
 0x13f   :  { %5415 = vmatpush3.bf16.msra.mxu0 %v5925_v33  ;;  %v5993_v33 = vld [vmem:[%s7561_s1 + $0xb10] sm:$0xff]  }
 0x140   :  { %5444 = vmatprep.subr.bf16.mxu0 %v5931_v38  ;;  %v5998_v38 = vld [vmem:[%s7561_s1 + $0xbc8] sm:$0xff]  }
 0x141   :  { %5437 = vmatpush3.bf16.msra.mxu1 %v5930_v37  ;;  %v5997_v37 = vld [vmem:[%s7561_s1 + $0xb08] sm:$0xff]  }
 0x142   :  { %4293 = vmatmul.mubr.bf16.vlgmr.msra.gmra.mxu0 %v5927_v35  ;;  %5466 = vmatprep.subr.bf16.mxu1 %v5936_v42  ;;  %v5995_v35 = vld [vmem:[%s7561_s1 + $0xb90] sm:$0xff]   ;;  %v6002_v42 = vld [vmem:[%s7561_s1 + $0xbc0] sm:$0xff]  }
 0x143   :  { %5445 = vmatpush3.bf16.msra.mxu0 %v5935_v41  ;;  %4374 = vmatprep.mubr.bf16.mxu0 %v5967_v8  ;;  %v6001_v41 = vld [vmem:[%s7561_s1 + $0xb00] sm:$0xff]  }
 0x144   :  { %4334 = vmatmul.mubr.bf16.vlgmr.msra.gmra.mxu1 %v5932_v39  ;;  %5446 = vmatprep.subr.bf16.mxu0 %v5938_v44  ;;  %v5999_v39 = vld [vmem:[%s7561_s1 + $0xb88] sm:$0xff]   ;;  %v6005_v44 = vld [vmem:[%s7562_s0 + $0xb4] ss:$200 sps:$4 sm:$0xff]  }
 0x145   :  { %5467 = vmatpush3.bf16.msra.mxu1 %v5937_v43  ;;  %4415 = vmatprep.mubr.bf16.mxu1 %v5972_v12  ;;  %v6003_v43 = vld [vmem:[%s7562_s0 + $0xb0] ss:$200 sps:$4 sm:$0xff]  }
 0x146   :  { %5468 = vmatprep.subr.bf16.mxu1 %v5940_v46  ;;  %v6007_v46 = vld [vmem:[%s7561_s1 + $0xc78] sm:$0xff]  }
 0x147   :  { %5447 = vmatpush3.bf16.msra.mxu0 %v5939_v45  ;;  %v6006_v45 = vld [vmem:[%s7561_s1 + $0xb80] sm:$0xff]  }
 0x148   :  { %5448 = vmatprep.subr.bf16.mxu0 %v5942_v48  ;;  %v6010_v48 = vld [vmem:[%s7562_s0 + $0xbc] ss:$200 sps:$4 sm:$0xff]  }
 0x149   :  { %5469 = vmatpush3.bf16.msra.mxu1 %v5941_v47  ;;  %v6008_v47 = vld [vmem:[%s7562_s0 + $0xb8] ss:$200 sps:$4 sm:$0xff]  }
 0x14a   :  { %5470 = vmatprep.subr.bf16.mxu1 %v5944_v50  ;;  %v6012_v50 = vld [vmem:[%s7561_s1 + $0xc70] sm:$0xff]  }
 0x14b   :  { %5449 = vmatpush3.bf16.msra.mxu0 %v5943_v49  ;;  %v6011_v49 = vld [vmem:[%s7561_s1 + $0xc38] sm:$0xff]  }
 0x14c   :  { %5450 = vmatprep.subr.bf16.mxu0 %v5946_v52  ;;  %v6014_v52 = vld [vmem:[%s7561_s1 + $0xc68] sm:$0xff]  }
 0x14d   :  { %5471 = vmatpush3.bf16.msra.mxu1 %v5945_v51  ;;  %v6013_v51 = vld [vmem:[%s7561_s1 + $0xc30] sm:$0xff]  }
 0x14e   :  { %5472 = vmatprep.subr.bf16.mxu1 %v5948_v54  ;;  %v6016_v54 = vld [vmem:[%s7561_s1 + $0xc60] sm:$0xff]  }
 0x14f   :  { %5451 = vmatpush3.bf16.msra.mxu0 %v5947_v53  ;;  %v6015_v53 = vld [vmem:[%s7561_s1 + $0xc28] sm:$0xff]  }
 0x150   :  { %5452 = vmatprep.subr.bf16.mxu0 %v5950_v56  ;;  %v6018_v56 = vld [vmem:[%s7561_s1 + $0xc58] sm:$0xff]  }
 0x151   :  { %5473 = vmatpush3.bf16.msra.mxu1 %v5949_v55  ;;  %v6017_v55 = vld [vmem:[%s7561_s1 + $0xc20] sm:$0xff]  }
 0x152   :  { %5474 = vmatprep.subr.bf16.mxu1 %v5952_v58  ;;  %v6020_v58 = vld [vmem:[%s7561_s1 + $0xc50] sm:$0xff]  }
 0x153   :  { %5453 = vmatpush3.bf16.msra.mxu0 %v5951_v57  ;;  %v6019_v57 = vld [vmem:[%s7561_s1 + $0xc18] sm:$0xff]  }
 0x154   :  { %5454 = vmatprep.subr.bf16.mxu0 %v5954_v60  ;;  %v6021_v60 = vld [vmem:[%s7561_s1 + $0xc10] sm:$0xff]  }
 0x155   :  { %5475 = vmatpush3.bf16.msra.mxu1 %v5953_v59  ;;  %v6028_v59 = vld [vmem:[%s7562_s0 + $0xc4] ss:$200 sps:$4 sm:$0xff]  }
 0x156   :  { %5476 = vmatprep.subr.bf16.mxu1 %v5956_v62  ;;  %v6023_v62 = vld [vmem:[%s7561_s1 + $0xc08] sm:$0xff]  }
 0x157   :  { %5455 = vmatpush3.bf16.msra.mxu0 %v5955_v61  ;;  %v6022_v61 = vld [vmem:[%s7561_s1 + $0xc48] sm:$0xff]  }
 0x158   :  { %5456 = vmatprep.subr.bf16.mxu0 %v5958_v0  ;;  %v6025_v0 = vld [vmem:[%s7561_s1 + $0xc00] sm:$0xff]  }
 0x159   :  { %5477 = vmatpush3.bf16.msra.mxu1 %v5957_v63  ;;  %v6024_v63 = vld [vmem:[%s7561_s1 + $0xc40] sm:$0xff]  }
 0x15a   :  { %5478 = vmatprep.subr.bf16.mxu1 %v5960_v2  ;;  %v5020_v2 = vpop.f32.mrf.mxu0 }
 0x15b   :  { %5457 = vmatpush3.bf16.msra.mxu0 %v5959_v1  ;;  %v6026_v1 = vld [vmem:[%s7562_s0 + $0xc0] ss:$200 sps:$4 sm:$0xff]  }
 0x15c   :  { %5458 = vmatprep.subr.bf16.mxu0 %v5962_v4  ;;  %v5042_v4 = vpop.f32.mrf.mxu1 }
 0x15d   :  { %5479 = vmatpush3.bf16.msra.mxu1 %v5961_v3  ;;  %v5021_v3 = vpop.f32.mrf.mxu0 }
 0x15e   :  { %5480 = vmatprep.subr.bf16.mxu1 %v5964_v6  ;;  %v5043_v6 = vpop.f32.mrf.mxu1 }
 0x15f   :  { %5459 = vmatpush3.bf16.msra.mxu0 %v5963_v5  ;;  %v5023_v5 = vpop.f32.mrf.mxu0 }
 0x160   :  { %5488 = vmatprep.subr.bf16.mxu0 %v5969_v10  ;;  %v7399_v8 = vpop.f32.mrf.mxu1 }
 0x161   :  { %5481 = vmatpush3.bf16.msra.mxu1 %v5968_v9 }
 0x162   :  { %4375 = vmatmul.mubr.bf16.vlgmr.msra.gmra.mxu0 %v5965_v7  ;;  %5510 = vmatprep.subr.bf16.mxu1 %v5974_v14  ;;  %v5024_v7 = vpop.f32.mrf.mxu0  ;;  %v5046_v10 = vpop.f32.mrf.mxu1 }
 0x163   :  { %5489 = vmatpush3.bf16.msra.mxu0 %v5973_v13  ;;  %4456 = vmatprep.mubr.bf16.mxu0 %v6005_v44 }
 0x164   :  { %4416 = vmatmul.mubr.bf16.vlgmr.msra.gmra.mxu1 %v5970_v11  ;;  %5490 = vmatprep.subr.bf16.mxu0 %v5976_v16  ;;  %v5064_v9 = vpop.f32.mrf.mxu0  ;;  %v5086_v12 = vpop.f32.mrf.mxu1 }
 0x165   :  { %5511 = vmatpush3.bf16.msra.mxu1 %v5975_v15  ;;  %4497 = vmatprep.mubr.bf16.mxu1 %v6010_v48 }
 0x166   :  { %5512 = vmatprep.subr.bf16.mxu1 %v5978_v18  ;;  %v5065_v11 = vpop.f32.mrf.mxu0  ;;  %v5087_v14 = vpop.f32.mrf.mxu1 }
 0x167   :  { %5491 = vmatpush3.bf16.msra.mxu0 %v5977_v17 }
 0x168   :  { %5492 = vmatprep.subr.bf16.mxu0 %v5980_v20  ;;  %v5067_v13 = vpop.f32.mrf.mxu0  ;;  %v7401_v16 = vpop.f32.mrf.mxu1 }
 0x169   :  { %5513 = vmatpush3.bf16.msra.mxu1 %v5979_v19 }
 0x16a   :  { %5514 = vmatprep.subr.bf16.mxu1 %v5982_v22  ;;  %v5068_v15 = vpop.f32.mrf.mxu0  ;;  %v7403_v18 = vpop.f32.mrf.mxu1 }
 0x16b   :  { %5493 = vmatpush3.bf16.msra.mxu0 %v5981_v21 }
 0x16c   :  { %5494 = vmatprep.subr.bf16.mxu0 %v5984_v24  ;;  %v5108_v17 = vpop.f32.mrf.mxu0  ;;  %v7405_v20 = vpop.f32.mrf.mxu1 }
 0x16d   :  { %5515 = vmatpush3.bf16.msra.mxu1 %v5983_v23 }
 0x16e   :  { %5516 = vmatprep.subr.bf16.mxu1 %v5986_v26  ;;  %v5109_v19 = vpop.f32.mrf.mxu0  ;;  %v7409_v22 = vpop.f32.mrf.mxu1 }
 0x16f   :  { %5495 = vmatpush3.bf16.msra.mxu0 %v5985_v25 }
 0x170   :  { %5496 = vmatprep.subr.bf16.mxu0 %v5988_v28  ;;  %v7407_v21 = vpop.f32.mrf.mxu0  ;;  %v7413_v24 = vpop.f32.mrf.mxu1 }
 0x171   :  { %5517 = vmatpush3.bf16.msra.mxu1 %v5987_v27 }
 0x172   :  { %5518 = vmatprep.subr.bf16.mxu1 %v5990_v30  ;;  %v7411_v23 = vpop.f32.mrf.mxu0  ;;  %v7417_v26 = vpop.f32.mrf.mxu1 }
 0x173   :  { %5497 = vmatpush3.bf16.msra.mxu0 %v5989_v29 }
 0x174   :  { %5498 = vmatprep.subr.bf16.mxu0 %v5992_v32  ;;  %v7415_v25 = vpop.f32.mrf.mxu0  ;;  %v7421_v28 = vpop.f32.mrf.mxu1 }
 0x175   :  { %5519 = vmatpush3.bf16.msra.mxu1 %v5991_v31 }
 0x176   :  { %5520 = vmatprep.subr.bf16.mxu1 %v5994_v34  ;;  %v7419_v27 = vpop.f32.mrf.mxu0  ;;  %v7425_v30 = vpop.f32.mrf.mxu1 }
 0x177   :  { %5499 = vmatpush3.bf16.msra.mxu0 %v5993_v33 }
 0x178   :  { %5500 = vmatprep.subr.bf16.mxu0 %v5996_v36  ;;  %v7423_v29 = vpop.f32.mrf.mxu0  ;;  %v7429_v32 = vpop.f32.mrf.mxu1 }
 0x179   :  { %5521 = vmatpush3.bf16.msra.mxu1 %v5995_v35 }
 0x17a   :  { %5522 = vmatprep.subr.bf16.mxu1 %v5998_v38  ;;  %v7427_v31 = vpop.f32.mrf.mxu0  ;;  %v7433_v34 = vpop.f32.mrf.mxu1 }
 0x17b   :  { %5501 = vmatpush3.bf16.msra.mxu0 %v5997_v37 }
 0x17c   :  { %5502 = vmatprep.subr.bf16.mxu0 %v6000_v40  ;;  %v7431_v33 = vpop.f32.mrf.mxu0  ;;  %v7437_v36 = vpop.f32.mrf.mxu1 }
 0x17d   :  { %5523 = vmatpush3.bf16.msra.mxu1 %v5999_v39 }
 0x17e   :  { %5524 = vmatprep.subr.bf16.mxu1 %v6002_v42  ;;  %v7435_v35 = vpop.f32.mrf.mxu0  ;;  %v7441_v38 = vpop.f32.mrf.mxu1 }
 0x17f   :  { %5503 = vmatpush3.bf16.msra.mxu0 %v6001_v41 }
 0x180   :  { %5532 = vmatprep.subr.bf16.mxu0 %v6007_v46  ;;  %v7439_v37 = vpop.f32.mrf.mxu0  ;;  %v7445_v40 = vpop.f32.mrf.mxu1 }
 0x181   :  { %5525 = vmatpush3.bf16.msra.mxu1 %v6006_v45 }
 0x182   :  { %4457 = vmatmul.mubr.bf16.vlgmr.msra.gmra.mxu0 %v6003_v43  ;;  %v7443_v39 = vpop.f32.mrf.mxu0  ;;  %v7449_v42 = vpop.f32.mrf.mxu1 }
 0x183   :  { %5533 = vmatpush3.bf16.msra.mxu0 %v6011_v49  ;;  %4538 = vmatprep.mubr.bf16.mxu0 %v6028_v59  ;;  %v4553_v59 = vld [vmem:[%s7563_s2] ss:$0 sm:$0xff] }
 0x184   :  { %4498 = vmatmul.mubr.bf16.vlgmr.msra.gmra.mxu1 %v6008_v47  ;;  %5534 = vmatprep.subr.bf16.mxu0 %v6012_v50  ;;  %v7447_v41 = vpop.f32.mrf.mxu0  ;;  %v7453_v44 = vpop.f32.mrf.mxu1 }
 0x186   :  { %v7451_v43 = vpop.f32.mrf.mxu0  ;;  %v7457_v46 = vpop.f32.mrf.mxu1 }
 0x187   :  { %5535 = vmatpush3.bf16.msra.mxu0 %v6013_v51 }
 0x188   :  { %5536 = vmatprep.subr.bf16.mxu0 %v6014_v52  ;;  %v7455_v45 = vpop.f32.mrf.mxu0  ;;  %v7461_v48 = vpop.f32.mrf.mxu1 }
 0x18a   :  { %v7459_v47 = vpop.f32.mrf.mxu0  ;;  %v7465_v50 = vpop.f32.mrf.mxu1 }
 0x18b   :  { %5537 = vmatpush3.bf16.msra.mxu0 %v6015_v53  ;;  %7565 = vst [vmem:[#allocation2_spill] sm:$0xff] %v7465_v50  ;;  %v5069_v50 = vadd.f32 %v5068_v15, %v5067_v13  ;;  %v5154_v15 = vadd.f32 %v7419_v27, %v7415_v25 }
 0x18c   :  { %5538 = vmatprep.subr.bf16.mxu0 %v6016_v54 }
 0x18f   :  { %5539 = vmatpush3.bf16.msra.mxu0 %v6017_v55 }
 0x190   :  { %5540 = vmatprep.subr.bf16.mxu0 %v6018_v56 }
 0x193   :  { %5541 = vmatpush3.bf16.msra.mxu0 %v6019_v57 }
 0x194   :  { %5542 = vmatprep.subr.bf16.mxu0 %v6020_v58  ;;  %v5022_v58 = vadd.f32 %v5021_v3, %v5020_v2  ;;  %v5047_v3 = vadd.f32 %v5046_v10, %v7399_v8  ;;  %v5132_v8 = vadd.f32 %v7409_v22, %v7405_v20  ;;  %v5113_v10 = vadd.f32 %v7411_v23, %v7407_v21 }
 0x195   :  { %v5176_v20 = vadd.f32 %v7425_v30, %v7421_v28  ;;  %v5157_v21 = vadd.f32 %v7427_v31, %v7423_v29  ;;  %v5198_v23 = vadd.f32 %v7435_v35, %v7431_v33  ;;  %v5201_v28 = vadd.f32 %v7443_v39, %v7439_v37 }
 0x196   :  { %v5242_v31 = vadd.f32 %v7451_v43, %v7447_v41 }
 0x197   :  { %5543 = vmatpush3.bf16.msra.mxu0 %v6021_v60 }
 0x198   :  { %5544 = vmatprep.subr.bf16.mxu0 %v6022_v61 }
 0x19b   :  { %5545 = vmatpush3.bf16.msra.mxu0 %v6023_v62 }
 0x19c   :  { %5546 = vmatprep.subr.bf16.mxu0 %v6024_v63  ;;  %v3557_v63 = vadd.f32 %v5022_v58, %v4553_v59  ;;  %v5110_v58 = vadd.f32 %v5109_v19, %v5108_v17 }
 0x19f   :  { %5547 = vmatpush3.bf16.msra.mxu0 %v6025_v0  ;;  %v5044_v0 = vadd.f32 %v5043_v6, %v5042_v4 }
 0x1a2   :  { %4539 = vmatmul.mubr.bf16.vlgmr.msra.gmra.mxu0 %v6026_v1  ;;  %v7463_v49 = vpop.f32.mrf.mxu0  ;;  %v5025_v1 = vadd.f32 %v5024_v7, %v5023_v5  ;;  %v5091_v7 = vadd.f32 %v7403_v18, %v7401_v16  ;;  %v5135_v16 = vadd.f32 %v7417_v26, %v7413_v24  ;;  %v5179_v24 = vadd.f32 %v7433_v34, %v7429_v32 }
 0x1a3   :  { %v5223_v32 = vadd.f32 %v7449_v42, %v7445_v40 }
 0x1a4   :  { %v7467_v51 = vpop.f32.mrf.mxu0  ;;  %v7469_v52 = vpop.f32.mrf.mxu1  ;;  %v3560_v2 = vadd.f32 %v5025_v1, %v4553_v59  ;;  %v5220_v59 = vadd.f32 %v7441_v38, %v7437_v36  ;;  %v5245_v36 = vadd.f32 %v7459_v47, %v7455_v45 }
 0x1a5   :  { %7566 = vst [vmem:[#allocation3_spill] sm:$0xff] %v7469_v52  ;;  %v5088_v52 = vadd.f32 %v5087_v14, %v5086_v12  ;;  %v5286_v41 = vadd.f32 %v7467_v51, %v7463_v49 }
 0x1a6   :  { %v7471_v53 = vpop.f32.mrf.mxu0  ;;  %v7473_v54 = vpop.f32.mrf.mxu1 }
 0x1a7   :  { %7567 = vst [vmem:[#allocation4_spill] sm:$0xff] %v7471_v53  ;;  %7568 = vst [vmem:[#allocation5_spill] sm:$0xff] %v7473_v54  ;;  %v5066_v53 = vadd.f32 %v5065_v11, %v5064_v9 }
 0x1a8   :  { %v7475_v55 = vpop.f32.mrf.mxu0  ;;  %v7477_v56 = vpop.f32.mrf.mxu1 }
 0x1a9   :  { %7569 = vst [vmem:[#allocation6_spill] sm:$0xff] %v7475_v55  ;;  %7570 = vst [vmem:[#allocation7_spill] sm:$0xff] %v7477_v56 }
 0x1aa   :  { %v7484_v60 = vpop.f32.mrf.mxu1 }
 0x1ab   :  { %7572 = vst [vmem:[#allocation9_spill] sm:$0xff] %v7484_v60 }
 0x1c2   :  { %v7479_v57 = vpop.f32.mrf.mxu0 }
 0x1c3   :  { %7571 = vst [vmem:[#allocation8_spill] sm:$0xff] %v7479_v57  ;;  %v3598_v57 = vadd.f32 %v5044_v0, %v3557_v63  ;;  %v5264_v0 = vadd.f32 %v7457_v46, %v7453_v44  ;;  %v7578_v46 = vld [vmem:[#allocation4_spill] sm:$0xff] }
 0x1c4   :  { %v7486_v61 = vpop.f32.mrf.mxu0  ;;  %v7488_v62 = vpop.f32.mrf.mxu1 }
 0x1c5   :  { %7573 = vst [vmem:[#allocation10_spill] sm:$0xff] %v7486_v61  ;;  %7574 = vst [vmem:[#allocation11_spill] sm:$0xff] %v7488_v62  ;;  %v3639_v54 = vadd.f32 %v5066_v53, %v3598_v57  ;;  %v3601_v62 = vadd.f32 %v5047_v3, %v3560_v2  ;;  %v7575_v2 = vld [vmem:[#allocation2_spill] sm:$0xff] }
 0x1c6   :  { %v7490_v55 = vpop.f32.mrf.mxu0  ;;  %v7492_v56 = vpop.f32.mrf.mxu1  ;;  %v5267_v3 = vadd.f32 %v7575_v2, %v7461_v48 }
 0x1c7   :  { %v3680_v5 = vadd.f32 %v5088_v52, %v3639_v54  ;;  %v3642_v6 = vadd.f32 %v5069_v50, %v3601_v62 }
 0x1c8   :  { %v7495_v60 = vpop.f32.mrf.mxu0  ;;  %v7497_v61 = vpop.f32.mrf.mxu1 }
 0x1c9   :  { %v3721_v11 = vadd.f32 %v5110_v58, %v3680_v5  ;;  %v3683_v14 = vadd.f32 %v5091_v7, %v3642_v6  ;;  %v7576_v5 = vld [vmem:[#allocation3_spill] sm:$0xff]  ;;  %v7577_v6 = vld [vmem:[#allocation5_spill] sm:$0xff]  ;;  %v7579_v7 = vld [vmem:[#allocation6_spill] sm:$0xff] }
 0x1ca   :  { %v7503_v9 = vpop.f32.mrf.mxu1  ;;  %v5308_v44 = vadd.f32 %v7577_v6, %v7576_v5  ;;  %v5289_v45 = vadd.f32 %v7579_v7, %v7578_v46 }
 0x1cb   :  { %v3762_v17 = vadd.f32 %v5132_v8, %v3721_v11  ;;  %v3724_v19 = vadd.f32 %v5113_v10, %v3683_v14  ;;  %v7580_v8 = vld [vmem:[#allocation8_spill] sm:$0xff] }
 0x1cc   :  { %v7581_v10 = vld [vmem:[#allocation10_spill] sm:$0xff] }
 0x1cd   :  { %v3803_v52 = vadd.f32 %v5154_v15, %v3762_v17  ;;  %v3765_v22 = vadd.f32 %v5135_v16, %v3724_v19  ;;  %v5330_v14 = vadd.f32 %v7581_v10, %v7580_v8  ;;  %v7582_v17 = vld [vmem:[#allocation7_spill] sm:$0xff]  ;;  %v7583_v19 = vld [vmem:[#allocation9_spill] sm:$0xff] }
 0x1ce   :  { %v5311_v48 = vadd.f32 %v7583_v19, %v7582_v17 }
 0x1cf   :  { %v3844_v27 = vadd.f32 %v5176_v20, %v3803_v52  ;;  %v3806_v54 = vadd.f32 %v5157_v21, %v3765_v22  ;;  %v7584_v21 = vld [vmem:[#allocation11_spill] sm:$0xff] }
 0x1d0   :  { %v5352_v22 = vadd.f32 %v7492_v56, %v7584_v21 }
 0x1d1   :  { %v3885_v57 = vadd.f32 %v5198_v23, %v3844_v27  ;;  %v3847_v30 = vadd.f32 %v5179_v24, %v3806_v54  ;;  %v5333_v23 = vadd.f32 %v7495_v60, %v7490_v55 }
 0x1d3   :  { %v3926_v62 = vadd.f32 %v5220_v59, %v3885_v57  ;;  %v3888_v63 = vadd.f32 %v5201_v28, %v3847_v30  ;;  %v5355_v30 = vadd.f32 %v7503_v9, %v7497_v61 }
 0x1d5   :  { %v3967_v34 = vadd.f32 %v5242_v31, %v3926_v62  ;;  %v3929_v39 = vadd.f32 %v5223_v32, %v3888_v63 }
 0x1d7   :  { %v4008_v43 = vadd.f32 %v5264_v0, %v3967_v34  ;;  %v3970_v1 = vadd.f32 %v5245_v36, %v3929_v39 }
 0x1d9   :  { %v4049_v42 = vadd.f32 %v5286_v41, %v4008_v43  ;;  %v4011_v11 = vadd.f32 %v5267_v3, %v3970_v1 }
 0x1db   :  { %v4090_v51 = vadd.f32 %v5308_v44, %v4049_v42  ;;  %v4052_v15 = vadd.f32 %v5289_v45, %v4011_v11 }
 0x1dd   :  { %v4131_v20 = vadd.f32 %v5330_v14, %v4090_v51  ;;  %v4093_v27 = vadd.f32 %v5311_v48, %v4052_v15 }
 0x1df   :  { %v4172_v59 = vadd.f32 %v5352_v22, %v4131_v20  ;;  %v4134_v28 = vadd.f32 %v5333_v23, %v4093_v27 }
 0x1e1   :  { %v4175_v56 = vadd.f32 %v5355_v30, %v4134_v28 }
 0x1e2   :  { %v7499_v4 = vpop.f32.mrf.mxu0 }
 0x1e4   :  { %v5373_v12 = vpop.f32.mrf.mxu0  ;;  %v7509_v13 = vpop.f32.mrf.mxu1 }
 0x1e5   :  { %v5374_v54 = vadd.f32 %v5373_v12, %v7499_v4 }
 0x1e6   :  { %v5375_v18 = vpop.f32.mrf.mxu0  ;;  %v5395_v50 = vpop.f32.mrf.mxu1 }
 0x1e7   :  { %v4213_v31 = vadd.f32 %v5374_v54, %v4172_v59  ;;  %v5396_v62 = vadd.f32 %v5395_v50, %v7509_v13 }
 0x1e8   :  { %v5376_v53 = vpop.f32.mrf.mxu0  ;;  %v5397_v25 = vpop.f32.mrf.mxu1 }
 0x1e9   :  { %v5377_v63 = vadd.f32 %v5376_v53, %v5375_v18  ;;  %v4254_v55 = vadd.f32 %v5396_v62, %v4213_v31 }
 0x1ea   :  { %v5398_v29 = vpop.f32.mrf.mxu1 }
 0x1eb   :  { %v4216_v60 = vadd.f32 %v5377_v63, %v4175_v56  ;;  %v5399_v39 = vadd.f32 %v5398_v29, %v5397_v25 }
 0x1ed   :  { %v4257_v3 = vadd.f32 %v5399_v39, %v4216_v60 }
 0x202   :  { %v5416_v26 = vpop.f32.mrf.mxu0 }
 0x204   :  { %v5417_v33 = vpop.f32.mrf.mxu0  ;;  %v5438_v35 = vpop.f32.mrf.mxu1 }
 0x205   :  { %v5418_v0 = vadd.f32 %v5417_v33, %v5416_v26 }
 0x206   :  { %v5419_v37 = vpop.f32.mrf.mxu0  ;;  %v5439_v38 = vpop.f32.mrf.mxu1 }
 0x207   :  { %v4295_v12 = vadd.f32 %v5418_v0, %v4254_v55  ;;  %v5440_v41 = vadd.f32 %v5439_v38, %v5438_v35 }
 0x208   :  { %v5420_v58 = vpop.f32.mrf.mxu0  ;;  %v5441_v40 = vpop.f32.mrf.mxu1 }
 0x209   :  { %v5421_v43 = vadd.f32 %v5420_v58, %v5419_v37  ;;  %v4336_v9 = vadd.f32 %v5440_v41, %v4295_v12 }
 0x20a   :  { %v5442_v49 = vpop.f32.mrf.mxu1 }
 0x20b   :  { %v4298_v42 = vadd.f32 %v5421_v43, %v4257_v3  ;;  %v5443_v13 = vadd.f32 %v5442_v49, %v5441_v40 }
 0x20d   :  { %v4339_v33 = vadd.f32 %v5443_v13, %v4298_v42 }
 0x222   :  { %v5460_v47 = vpop.f32.mrf.mxu0 }
 0x224   :  { %v5461_v16 = vpop.f32.mrf.mxu0  ;;  %v5482_v52 = vpop.f32.mrf.mxu1 }
 0x225   :  { %v5462_v61 = vadd.f32 %v5461_v16, %v5460_v47 }
 0x226   :  { %v5463_v24 = vpop.f32.mrf.mxu0  ;;  %v5483_v57 = vpop.f32.mrf.mxu1 }
 0x227   :  { %v4377_v53 = vadd.f32 %v5462_v61, %v4336_v9  ;;  %v5484_v5 = vadd.f32 %v5483_v57, %v5482_v52 }
 0x228   :  { %v5464_v32 = vpop.f32.mrf.mxu0  ;;  %v5485_v34 = vpop.f32.mrf.mxu1 }
 0x229   :  { %v5465_v26 = vadd.f32 %v5464_v32, %v5463_v24  ;;  %v4418_v29 = vadd.f32 %v5484_v5, %v4377_v53 }
 0x22a   :  { %v5486_v4 = vpop.f32.mrf.mxu1 }
 0x22b   :  { %v4380_v46 = vadd.f32 %v5465_v26, %v4339_v33  ;;  %v5487_v35 = vadd.f32 %v5486_v4, %v5485_v34 }
 0x22d   :  { %v4421_v47 = vadd.f32 %v5487_v35, %v4380_v46 }
 0x242   :  { %v5504_v36 = vpop.f32.mrf.mxu0 }
 0x244   :  { %v5505_v1 = vpop.f32.mrf.mxu0  ;;  %v5526_v2 = vpop.f32.mrf.mxu1 }
 0x245   :  { %v5506_v6 = vadd.f32 %v5505_v1, %v5504_v36 }
 0x246   :  { %v5507_v18 = vpop.f32.mrf.mxu0  ;;  %v5527_v50 = vpop.f32.mrf.mxu1 }
 0x247   :  { %v4459_v37 = vadd.f32 %v5506_v6, %v4418_v29  ;;  %v5528_v38 = vadd.f32 %v5527_v50, %v5526_v2 }
 0x248   :  { %v5508_v44 = vpop.f32.mrf.mxu0  ;;  %v5529_v25 = vpop.f32.mrf.mxu1 }
 0x249   :  { %v5509_v58 = vadd.f32 %v5508_v44, %v5507_v18  ;;  %v4500_v40 = vadd.f32 %v5528_v38, %v4459_v37 }
 0x24a   :  { %v5530_v7 = vpop.f32.mrf.mxu1 }
 0x24b   :  { %v4462_v8 = vadd.f32 %v5509_v58, %v4421_v47  ;;  %v5531_v10 = vadd.f32 %v5530_v7, %v5529_v25 }
 0x24d   :  { %v4503_v17 = vadd.f32 %v5531_v10, %v4462_v8 }
 0x262   :  { %v5548_v45 = vpop.f32.mrf.mxu0 }
 0x264   :  { %v5549_v11 = vpop.f32.mrf.mxu0 }
 0x265   :  { %v5550_v14 = vadd.f32 %v5549_v11, %v5548_v45 }
 0x266   :  { %v5551_v49 = vpop.f32.mrf.mxu0 }
 0x267   :  { %v4541_v51 = vadd.f32 %v5550_v14, %v4500_v40 }
 0x268   :  { %v5552_v15 = vpop.f32.mrf.mxu0 }
 0x269   :  { %4547 = vst [vmem:[%s7564_s3] sm:$0xff] %v4541_v51  ;;  %v5553_v19 = vadd.f32 %v5552_v15, %v5551_v49 }
 0x26b   :  { %v4544_v48 = vadd.f32 %v5553_v19, %v4503_v17 }
 0x26d   :  { %4548 = vst [vmem:[%s7564_s3 + $0x8] sm:$0xff] %v4544_v48 }

</bundles_post_ra>
